<compile_context>
chip_gen: v7x
topology: tpu7x:2x2x1
jax: 0.10.0
libtpu: 0.0.40
codegen_flags: <defaults>
</compile_context>

<pallas_src>
import functools

import jax
import jax.numpy as jnp
from jax.experimental import pallas as pl
from jax.experimental.pallas import tpu as pltpu


def critic_kernel(state_ref, action_ref, w_s1_ref, awb_ref, w_c1s_ref,
                  w_c1a_ref, w_c2_ref, w_o_ref, b_o_ref, out_ref, *,
                  micro_batch):
    """One grid step == G = rows_per_step // micro_batch independent micro-batches."""
    eps = jnp.float32(1e-5)
    m = state_ref.shape[0]            # rows per grid step
    b = micro_batch                   # rows per BatchNorm group
    g = m // b                        # groups per grid step

    def bn_relu(x):
        # Training-mode BatchNorm1d per micro-batch group + ReLU (all f32).
        # Feature dim stays on the lane axis; the axis=1 reduce is a sublane
        # reduce (XLU), hidden under the MXU work.
        f = x.shape[-1]
        xg = x.reshape(g, b, f)
        mu = jnp.mean(xg, axis=1, keepdims=True)
        var = jnp.mean(jnp.square(xg - mu), axis=1, keepdims=True)
        y = jnp.maximum((xg - mu) * jax.lax.rsqrt(var + eps), 0.0)
        return y.reshape(m, f)

    # --- state branch: relu(bn(state @ W_s1)); pre-BN bias elided (BN no-op).
    state_bf = state_ref[...].astype(jnp.bfloat16)
    s = bn_relu(jnp.dot(state_bf, w_s1_ref[...],
                        preferred_element_type=jnp.float32))

    # --- action branch: relu(action @ W_a + b_a).  K=1 is degenerate on the
    #     MXU -> VPU broadcast multiply instead.  awb = [w_a_row; b_a_row].
    awb = awb_ref[...]                                        # (2, 32) f32
    a = jnp.maximum(action_ref[...] * awb[0:1, :] + awb[1:2, :], 0.0)

    # --- combined_fc1(cat([s, a], 1)) == s @ W_s_part + a @ W_a_part
    #     (weight passed pre-split; pre-BN bias elided).
    c1 = (jnp.dot(s.astype(jnp.bfloat16), w_c1s_ref[...],
                  preferred_element_type=jnp.float32)
          + jnp.dot(a.astype(jnp.bfloat16), w_c1a_ref[...],
                    preferred_element_type=jnp.float32))
    x = bn_relu(c1)

    # --- combined_fc2 + bn + relu (pre-BN bias elided).
    x = bn_relu(jnp.dot(x.astype(jnp.bfloat16), w_c2_ref[...],
                        preferred_element_type=jnp.float32))

    # --- output_fc: N=1 -> VPU multiply + lane reduce + SMEM scalar bias.
    #     Store lane-dense as a (1, m) block.
    q = jnp.sum(x * w_o_ref[...], axis=-1) + b_o_ref[0, 0]    # (m,) f32
    out_ref[...] = q.reshape(1, m)


def critic_forward(state, action, params, micro_batch=8, rows_per_step=256):
    """state: (NB, state_dim), action: (NB, 1) -> q: (NB, 1).

    Each consecutive chunk of `micro_batch` rows is one independent batch (its
    own BatchNorm statistics), i.e. one PyTorch forward call.  `rows_per_step`
    micro-batch rows are processed per grid step for MXU occupancy.
    """
    nb, state_dim = state.shape
    action_dim = action.shape[1]
    assert micro_batch >= 2, "training-mode BatchNorm needs >= 2 rows per group"
    assert nb % micro_batch == 0, "NB must be a multiple of micro_batch"

    rows_per_step = min(rows_per_step, nb)
    assert rows_per_step % micro_batch == 0
    assert nb % rows_per_step == 0
    assert rows_per_step % 128 == 0 or rows_per_step == nb, (
        "lane-dense output block needs rows_per_step % 128 == 0 (or one step)")
    n_steps = nb // rows_per_step
    m = rows_per_step

    kernel = functools.partial(critic_kernel, micro_batch=micro_batch)

    in_specs = [
        pl.BlockSpec((m, state_dim), lambda i: (i, 0)),        # state rows
        pl.BlockSpec((m, action_dim), lambda i: (i, 0)),       # action rows
        pl.BlockSpec(params["w_s1"].shape, lambda i: (0, 0)),  # resident weights
        pl.BlockSpec(params["awb"].shape, lambda i: (0, 0)),
        pl.BlockSpec(params["w_c1s"].shape, lambda i: (0, 0)),
        pl.BlockSpec(params["w_c1a"].shape, lambda i: (0, 0)),
        pl.BlockSpec(params["w_c2"].shape, lambda i: (0, 0)),
        pl.BlockSpec(params["w_o"].shape, lambda i: (0, 0)),
        pl.BlockSpec(memory_space=pltpu.MemorySpace.SMEM),     # b_o scalar
    ]
    # Lane-dense output: (1, NB) array, (1, m) block per step.
    out_specs = pl.BlockSpec((1, m), lambda i: (0, i))

    out = pl.pallas_call(
        kernel,
        out_shape=jax.ShapeDtypeStruct((1, nb), jnp.float32),
        grid=(n_steps,),
        in_specs=in_specs,
        out_specs=out_specs,
        compiler_params=pltpu.CompilerParams(
            dimension_semantics=("parallel",)),
    )(state, action, params["w_s1"], params["awb"], params["w_c1s"],
      params["w_c1a"], params["w_c2"], params["w_o"], params["b_o"])

    return out.reshape(nb, 1)


def xavier_uniform(key, out_f, in_f):
    bound = (6.0 / (in_f + out_f)) ** 0.5
    return jax.random.uniform(key, (out_f, in_f), jnp.float32, -bound, bound)


def init_params(key, state_dim=128, action_dim=1,
                hidden_dims=(400, 432, 300, 300)):
    h0, _, h2, h3 = hidden_dims
    ks = jax.random.split(key, 5)
    bias_val = 0.01

    w_s1 = xavier_uniform(ks[0], h0, state_dim)          # (400, 128) state_fc1
    w_a = xavier_uniform(ks[1], 32, action_dim)          # (32, 1)    action_fc
    w_c1 = xavier_uniform(ks[2], h2, h0 + 32)            # (300, 432) combined_fc1
    w_c2 = xavier_uniform(ks[3], h3, h2)                 # (300, 300) combined_fc2
    w_o = xavier_uniform(ks[4], 1, h3)                   # (1, 300)   output_fc

    # action_fc weight row (action_dim == 1) + its bias packed into one buffer.
    awb = jnp.stack([w_a[:, 0], jnp.full((32,), bias_val, jnp.float32)], axis=0)
    w_c1_t = w_c1.T                                      # (432, 300)

    return {
        "w_s1": w_s1.T.astype(jnp.bfloat16),             # (128, 400) bf16
        "awb": awb.astype(jnp.float32),                  # (2, 32)    f32
        "w_c1s": w_c1_t[:h0].astype(jnp.bfloat16),       # (400, 300) bf16
        "w_c1a": w_c1_t[h0:].astype(jnp.bfloat16),       # (32, 300)  bf16
        "w_c2": w_c2.T.astype(jnp.bfloat16),             # (300, 300) bf16
        "w_o": w_o.astype(jnp.float32),                  # (1, 300)   f32 (VPU epilogue)
        "b_o": jnp.full((1, 1), bias_val, jnp.float32),  # SMEM scalar
        # state_fc1 / combined_fc1 / combined_fc2 biases omitted:
        # bn(x + b) == bn(x) for training-mode BN with gamma=1, beta=0.
    }


def reference_forward(state, action, params, micro_batch=8, eps=1e-5):
    """Pure-JAX reference with the kernel's numerical contract (bf16 MXU
    operands, f32 accumulation, per-micro-batch training-mode BN).  Matches the
    f32 PyTorch forward up to bf16 matmul rounding (~1e-2)."""
    def bn_relu(x):
        mu = jnp.mean(x, axis=0, keepdims=True)
        var = jnp.mean(jnp.square(x - mu), axis=0, keepdims=True)
        return jnp.maximum((x - mu) * jax.lax.rsqrt(var + eps), 0.0)

    def mm(x, w):
        return jnp.dot(x.astype(jnp.bfloat16), w,
                       preferred_element_type=jnp.float32)

    w_a = params["awb"][0:1, :]
    b_a = params["awb"][1:2, :]
    w_o = params["w_o"]
    b_o = params["b_o"][0, 0]

    outs = []
    for i in range(0, state.shape[0], micro_batch):
        st = state[i:i + micro_batch]
        ac = action[i:i + micro_batch]
        s = bn_relu(mm(st, params["w_s1"]))
        a = jnp.maximum(ac * w_a + b_a, 0.0)
        x = bn_relu(mm(s, params["w_c1s"]) + mm(a, params["w_c1a"]))
        x = bn_relu(mm(x, params["w_c2"]))
        outs.append(jnp.sum(x * w_o, axis=-1, keepdims=True) + b_o)
    return jnp.concatenate(outs, axis=0)


if __name__ == "__main__":
    key = jax.random.PRNGKey(0)
    k_param, k_state, k_action = jax.random.split(key, 3)

    STATE_DIM, ACTION_DIM = 128, 1
    MICRO_B = 8             # rows per BatchNorm group (one PyTorch forward call)
    ROWS_PER_STEP = 128     # MXU-friendly super-step (multiple of 128 lanes)
    N_STEPS = 2             # keep >= 2 parallel steps (v7x has 2 TensorCores)
    NB = ROWS_PER_STEP * N_STEPS

    params = init_params(k_param, state_dim=STATE_DIM, action_dim=ACTION_DIM)
    state = jax.random.normal(k_state, (NB, STATE_DIM), jnp.float32)
    action = jax.random.normal(k_action, (NB, ACTION_DIM), jnp.float32)

    q = critic_forward(state, action, params, micro_batch=MICRO_B,
                       rows_per_step=ROWS_PER_STEP)
    q = jax.block_until_ready(q)

    q_ref = reference_forward(state, action, params, micro_batch=MICRO_B)
    assert q.shape == (NB, 1)
    assert jnp.allclose(q, q_ref, atol=2e-3, rtol=2e-3)

    print("KERNEL_OK")
</pallas_src>

<mosaic_0001>
module attributes {stable_mosaic.version = 11 : i64} {
  func.func @critic_kernel(%arg0: i32, %arg1: memref<128x128xf32, #tpu.memory_space<vmem>>, %arg2: memref<128x1xf32, #tpu.memory_space<vmem>>, %arg3: memref<128x400xbf16, #tpu.memory_space<vmem>>, %arg4: memref<2x32xf32, #tpu.memory_space<vmem>>, %arg5: memref<400x300xbf16, #tpu.memory_space<vmem>>, %arg6: memref<32x300xbf16, #tpu.memory_space<vmem>>, %arg7: memref<300x300xbf16, #tpu.memory_space<vmem>>, %arg8: memref<1x300xf32, #tpu.memory_space<vmem>>, %arg9: memref<1x1xf32, #tpu.memory_space<smem>>, %arg10: memref<1x128xf32, #tpu.memory_space<vmem>>) attributes {dimension_semantics = [#tpu.dimension_semantics<parallel>], iteration_bounds = array<i64: 2>, scalar_prefetch = 0 : i64, scratch_operands = 0 : i64, tpu.core_type = #tpu.core_type<tc>, window_params = [{transform_indices = @transform_0, window_bounds = array<i64: 128, 128>}, {transform_indices = @transform_1, window_bounds = array<i64: 128, 1>}, {pipeline_mode = #tpu.pipeline_mode<synchronous>, transform_indices = @transform_2, window_bounds = array<i64: 128, 400>}, {pipeline_mode = #tpu.pipeline_mode<synchronous>, transform_indices = @transform_3, window_bounds = array<i64: 2, 32>}, {pipeline_mode = #tpu.pipeline_mode<synchronous>, transform_indices = @transform_4, window_bounds = array<i64: 400, 300>}, {pipeline_mode = #tpu.pipeline_mode<synchronous>, transform_indices = @transform_5, window_bounds = array<i64: 32, 300>}, {pipeline_mode = #tpu.pipeline_mode<synchronous>, transform_indices = @transform_6, window_bounds = array<i64: 300, 300>}, {pipeline_mode = #tpu.pipeline_mode<synchronous>, transform_indices = @transform_7, window_bounds = array<i64: 1, 300>}, {transform_indices = @transform_8, window_bounds = array<i64: 1, 1>}, {transform_indices = @transform_9, window_bounds = array<i64: 1, 128>}]} {
    %c0 = arith.constant 0 : index
    %c0_0 = arith.constant 0 : index
    %0 = vector.load %arg1[%c0, %c0_0] : memref<128x128xf32, #tpu.memory_space<vmem>>, vector<128x128xf32>
    %1 = arith.truncf %0 : vector<128x128xf32> to vector<128x128xbf16>
    %c0_1 = arith.constant 0 : index
    %c0_2 = arith.constant 0 : index
    %2 = vector.load %arg3[%c0_1, %c0_2] : memref<128x400xbf16, #tpu.memory_space<vmem>>, vector<128x400xbf16>
    %cst = arith.constant dense<0.000000e+00> : vector<128x400xf32>
    %3 = tpu.matmul %1, %2, %cst {dimension_numbers = #tpu.dot_dimension_numbers<[1], [0], [0], [1], [0, 0, 1, 1], [], []>} : vector<128x128xbf16>, vector<128x400xbf16>, vector<128x400xf32> -> vector<128x400xf32>
    %4 = vector.shape_cast %3 : vector<128x400xf32> to vector<16x8x400xf32>
    %cst_3 = arith.constant dense<0.000000e+00> : vector<16x400xf32>
    %5 = vector.multi_reduction <add>, %4, %cst_3 [1] : vector<16x8x400xf32> to vector<16x400xf32>
    %6 = vector.shape_cast %5 : vector<16x400xf32> to vector<16x1x400xf32>
    %cst_4 = arith.constant 8.000000e+00 : f32
    %7 = vector.broadcast %cst_4 : f32 to vector<16x1x400xf32>
    %8 = arith.divf %6, %7 : vector<16x1x400xf32>
    %9 = vector.broadcast %8 : vector<16x1x400xf32> to vector<16x8x400xf32>
    %10 = arith.subf %4, %9 : vector<16x8x400xf32>
    %11 = arith.mulf %10, %10 : vector<16x8x400xf32>
    %cst_5 = arith.constant dense<0.000000e+00> : vector<16x400xf32>
    %12 = vector.multi_reduction <add>, %11, %cst_5 [1] : vector<16x8x400xf32> to vector<16x400xf32>
    %13 = vector.shape_cast %12 : vector<16x400xf32> to vector<16x1x400xf32>
    %cst_6 = arith.constant 8.000000e+00 : f32
    %14 = vector.broadcast %cst_6 : f32 to vector<16x1x400xf32>
    %15 = arith.divf %13, %14 : vector<16x1x400xf32>
    %16 = vector.broadcast %8 : vector<16x1x400xf32> to vector<16x8x400xf32>
    %17 = arith.subf %4, %16 : vector<16x8x400xf32>
    %cst_7 = arith.constant 9.99999974E-6 : f32
    %18 = vector.broadcast %cst_7 : f32 to vector<16x1x400xf32>
    %19 = arith.addf %15, %18 : vector<16x1x400xf32>
    %20 = math.rsqrt %19 : vector<16x1x400xf32>
    %21 = vector.broadcast %20 : vector<16x1x400xf32> to vector<16x8x400xf32>
    %22 = arith.mulf %17, %21 : vector<16x8x400xf32>
    %cst_8 = arith.constant 0.000000e+00 : f32
    %23 = vector.broadcast %cst_8 : f32 to vector<16x8x400xf32>
    %24 = arith.maximumf %22, %23 : vector<16x8x400xf32>
    %25 = vector.shape_cast %24 : vector<16x8x400xf32> to vector<128x400xf32>
    %c0_9 = arith.constant 0 : index
    %c0_10 = arith.constant 0 : index
    %26 = vector.load %arg4[%c0_9, %c0_10] : memref<2x32xf32, #tpu.memory_space<vmem>>, vector<2x32xf32>
    %c0_11 = arith.constant 0 : index
    %c0_12 = arith.constant 0 : index
    %27 = vector.load %arg2[%c0_11, %c0_12] : memref<128x1xf32, #tpu.memory_space<vmem>>, vector<128x1xf32>
    %28 = vector.extract_strided_slice %26 {offsets = [0, 0], sizes = [1, 32], strides = [1, 1]} : vector<2x32xf32> to vector<1x32xf32>
    %29 = vector.broadcast %27 : vector<128x1xf32> to vector<128x32xf32>
    %30 = vector.broadcast %28 : vector<1x32xf32> to vector<128x32xf32>
    %31 = arith.mulf %29, %30 : vector<128x32xf32>
    %32 = vector.extract_strided_slice %26 {offsets = [1, 0], sizes = [1, 32], strides = [1, 1]} : vector<2x32xf32> to vector<1x32xf32>
    %33 = vector.broadcast %32 : vector<1x32xf32> to vector<128x32xf32>
    %34 = arith.addf %31, %33 : vector<128x32xf32>
    %cst_13 = arith.constant 0.000000e+00 : f32
    %35 = vector.broadcast %cst_13 : f32 to vector<128x32xf32>
    %36 = arith.maximumf %34, %35 : vector<128x32xf32>
    %37 = arith.truncf %25 : vector<128x400xf32> to vector<128x400xbf16>
    %c0_14 = arith.constant 0 : index
    %c0_15 = arith.constant 0 : index
    %38 = vector.load %arg5[%c0_14, %c0_15] : memref<400x300xbf16, #tpu.memory_space<vmem>>, vector<400x300xbf16>
    %cst_16 = arith.constant dense<0.000000e+00> : vector<128x300xf32>
    %39 = tpu.matmul %37, %38, %cst_16 {dimension_numbers = #tpu.dot_dimension_numbers<[1], [0], [0], [1], [0, 0, 1, 1], [], []>} : vector<128x400xbf16>, vector<400x300xbf16>, vector<128x300xf32> -> vector<128x300xf32>
    %40 = arith.truncf %36 : vector<128x32xf32> to vector<128x32xbf16>
    %c0_17 = arith.constant 0 : index
    %c0_18 = arith.constant 0 : index
    %41 = vector.load %arg6[%c0_17, %c0_18] : memref<32x300xbf16, #tpu.memory_space<vmem>>, vector<32x300xbf16>
    %cst_19 = arith.constant dense<0.000000e+00> : vector<128x300xf32>
    %42 = tpu.matmul %40, %41, %cst_19 {dimension_numbers = #tpu.dot_dimension_numbers<[1], [0], [0], [1], [0, 0, 1, 1], [], []>} : vector<128x32xbf16>, vector<32x300xbf16>, vector<128x300xf32> -> vector<128x300xf32>
    %43 = arith.addf %39, %42 : vector<128x300xf32>
    %44 = vector.shape_cast %43 : vector<128x300xf32> to vector<16x8x300xf32>
    %cst_20 = arith.constant dense<0.000000e+00> : vector<16x300xf32>
    %45 = vector.multi_reduction <add>, %44, %cst_20 [1] : vector<16x8x300xf32> to vector<16x300xf32>
    %46 = vector.shape_cast %45 : vector<16x300xf32> to vector<16x1x300xf32>
    %cst_21 = arith.constant 8.000000e+00 : f32
    %47 = vector.broadcast %cst_21 : f32 to vector<16x1x300xf32>
    %48 = arith.divf %46, %47 : vector<16x1x300xf32>
    %49 = vector.broadcast %48 : vector<16x1x300xf32> to vector<16x8x300xf32>
    %50 = arith.subf %44, %49 : vector<16x8x300xf32>
    %51 = arith.mulf %50, %50 : vector<16x8x300xf32>
    %cst_22 = arith.constant dense<0.000000e+00> : vector<16x300xf32>
    %52 = vector.multi_reduction <add>, %51, %cst_22 [1] : vector<16x8x300xf32> to vector<16x300xf32>
    %53 = vector.shape_cast %52 : vector<16x300xf32> to vector<16x1x300xf32>
    %cst_23 = arith.constant 8.000000e+00 : f32
    %54 = vector.broadcast %cst_23 : f32 to vector<16x1x300xf32>
    %55 = arith.divf %53, %54 : vector<16x1x300xf32>
    %56 = vector.broadcast %48 : vector<16x1x300xf32> to vector<16x8x300xf32>
    %57 = arith.subf %44, %56 : vector<16x8x300xf32>
    %cst_24 = arith.constant 9.99999974E-6 : f32
    %58 = vector.broadcast %cst_24 : f32 to vector<16x1x300xf32>
    %59 = arith.addf %55, %58 : vector<16x1x300xf32>
    %60 = math.rsqrt %59 : vector<16x1x300xf32>
    %61 = vector.broadcast %60 : vector<16x1x300xf32> to vector<16x8x300xf32>
    %62 = arith.mulf %57, %61 : vector<16x8x300xf32>
    %cst_25 = arith.constant 0.000000e+00 : f32
    %63 = vector.broadcast %cst_25 : f32 to vector<16x8x300xf32>
    %64 = arith.maximumf %62, %63 : vector<16x8x300xf32>
    %65 = vector.shape_cast %64 : vector<16x8x300xf32> to vector<128x300xf32>
    %66 = arith.truncf %65 : vector<128x300xf32> to vector<128x300xbf16>
    %c0_26 = arith.constant 0 : index
    %c0_27 = arith.constant 0 : index
    %67 = vector.load %arg7[%c0_26, %c0_27] : memref<300x300xbf16, #tpu.memory_space<vmem>>, vector<300x300xbf16>
    %cst_28 = arith.constant dense<0.000000e+00> : vector<128x300xf32>
    %68 = tpu.matmul %66, %67, %cst_28 {dimension_numbers = #tpu.dot_dimension_numbers<[1], [0], [0], [1], [0, 0, 1, 1], [], []>} : vector<128x300xbf16>, vector<300x300xbf16>, vector<128x300xf32> -> vector<128x300xf32>
    %69 = vector.shape_cast %68 : vector<128x300xf32> to vector<16x8x300xf32>
    %cst_29 = arith.constant dense<0.000000e+00> : vector<16x300xf32>
    %70 = vector.multi_reduction <add>, %69, %cst_29 [1] : vector<16x8x300xf32> to vector<16x300xf32>
    %71 = vector.shape_cast %70 : vector<16x300xf32> to vector<16x1x300xf32>
    %cst_30 = arith.constant 8.000000e+00 : f32
    %72 = vector.broadcast %cst_30 : f32 to vector<16x1x300xf32>
    %73 = arith.divf %71, %72 : vector<16x1x300xf32>
    %74 = vector.broadcast %73 : vector<16x1x300xf32> to vector<16x8x300xf32>
    %75 = arith.subf %69, %74 : vector<16x8x300xf32>
    %76 = arith.mulf %75, %75 : vector<16x8x300xf32>
    %cst_31 = arith.constant dense<0.000000e+00> : vector<16x300xf32>
    %77 = vector.multi_reduction <add>, %76, %cst_31 [1] : vector<16x8x300xf32> to vector<16x300xf32>
    %78 = vector.shape_cast %77 : vector<16x300xf32> to vector<16x1x300xf32>
    %cst_32 = arith.constant 8.000000e+00 : f32
    %79 = vector.broadcast %cst_32 : f32 to vector<16x1x300xf32>
    %80 = arith.divf %78, %79 : vector<16x1x300xf32>
    %81 = vector.broadcast %73 : vector<16x1x300xf32> to vector<16x8x300xf32>
    %82 = arith.subf %69, %81 : vector<16x8x300xf32>
    %cst_33 = arith.constant 9.99999974E-6 : f32
    %83 = vector.broadcast %cst_33 : f32 to vector<16x1x300xf32>
    %84 = arith.addf %80, %83 : vector<16x1x300xf32>
    %85 = math.rsqrt %84 : vector<16x1x300xf32>
    %86 = vector.broadcast %85 : vector<16x1x300xf32> to vector<16x8x300xf32>
    %87 = arith.mulf %82, %86 : vector<16x8x300xf32>
    %cst_34 = arith.constant 0.000000e+00 : f32
    %88 = vector.broadcast %cst_34 : f32 to vector<16x8x300xf32>
    %89 = arith.maximumf %87, %88 : vector<16x8x300xf32>
    %90 = vector.shape_cast %89 : vector<16x8x300xf32> to vector<128x300xf32>
    %c0_35 = arith.constant 0 : index
    %c0_36 = arith.constant 0 : index
    %91 = vector.load %arg8[%c0_35, %c0_36] : memref<1x300xf32, #tpu.memory_space<vmem>>, vector<1x300xf32>
    %92 = vector.broadcast %91 : vector<1x300xf32> to vector<128x300xf32>
    %93 = arith.mulf %90, %92 : vector<128x300xf32>
    %cst_37 = arith.constant dense<0.000000e+00> : vector<128xf32>
    %94 = vector.multi_reduction <add>, %93, %cst_37 [1] : vector<128x300xf32> to vector<128xf32>
    %c0_38 = arith.constant 0 : index
    %c0_39 = arith.constant 0 : index
    %95 = memref.load %arg9[%c0_38, %c0_39] : memref<1x1xf32, #tpu.memory_space<smem>>
    %96 = vector.broadcast %95 : f32 to vector<128xf32>
    %97 = arith.addf %94, %96 : vector<128xf32>
    %98 = vector.shape_cast %97 : vector<128xf32> to vector<1x128xf32>
    %c0_40 = arith.constant 0 : index
    %c0_41 = arith.constant 0 : index
    %99 = vector.load %arg10[%c0_40, %c0_41] : memref<1x128xf32, #tpu.memory_space<vmem>>, vector<1x128xf32>
    tpu.vector_store %arg10[%c0_40, %c0_41], %98 {strides = array<i32>} : memref<1x128xf32, #tpu.memory_space<vmem>>, vector<1x128xf32>,
    return
  }
  func.func @transform_0(%arg0: i32) -> (i32, i32) {
    %c0_i32 = arith.constant 0 : i32
    %c0_i32_0 = arith.constant 0 : i32
    return %arg0, %c0_i32 : i32, i32
  }
  func.func @transform_1(%arg0: i32) -> (i32, i32) {
    %c0_i32 = arith.constant 0 : i32
    %c0_i32_0 = arith.constant 0 : i32
    return %arg0, %c0_i32 : i32, i32
  }
  func.func @transform_2(%arg0: i32) -> (i32, i32) {
    %c0_i32 = arith.constant 0 : i32
    %c0_i32_0 = arith.constant 0 : i32
    %c0_i32_1 = arith.constant 0 : i32
    return %c0_i32, %c0_i32_0 : i32, i32
  }
  func.func @transform_3(%arg0: i32) -> (i32, i32) {
    %c0_i32 = arith.constant 0 : i32
    %c0_i32_0 = arith.constant 0 : i32
    %c0_i32_1 = arith.constant 0 : i32
    return %c0_i32, %c0_i32_0 : i32, i32
  }
  func.func @transform_4(%arg0: i32) -> (i32, i32) {
    %c0_i32 = arith.constant 0 : i32
    %c0_i32_0 = arith.constant 0 : i32
    %c0_i32_1 = arith.constant 0 : i32
    return %c0_i32, %c0_i32_0 : i32, i32
  }
  func.func @transform_5(%arg0: i32) -> (i32, i32) {
    %c0_i32 = arith.constant 0 : i32
    %c0_i32_0 = arith.constant 0 : i32
    %c0_i32_1 = arith.constant 0 : i32
    return %c0_i32, %c0_i32_0 : i32, i32
  }
  func.func @transform_6(%arg0: i32) -> (i32, i32) {
    %c0_i32 = arith.constant 0 : i32
    %c0_i32_0 = arith.constant 0 : i32
    %c0_i32_1 = arith.constant 0 : i32
    return %c0_i32, %c0_i32_0 : i32, i32
  }
  func.func @transform_7(%arg0: i32) -> (i32, i32) {
    %c0_i32 = arith.constant 0 : i32
    %c0_i32_0 = arith.constant 0 : i32
    %c0_i32_1 = arith.constant 0 : i32
    return %c0_i32, %c0_i32_0 : i32, i32
  }
  func.func @transform_8(%arg0: i32) -> (i32, i32) {
    %c0_i32 = arith.constant 0 : i32
    %c0_i32_0 = arith.constant 0 : i32
    %c0_i32_1 = arith.constant 0 : i32
    return %c0_i32, %c0_i32_0 : i32, i32
  }
  func.func @transform_9(%arg0: i32) -> (i32, i32) {
    %c0_i32 = arith.constant 0 : i32
    %c0_i32_0 = arith.constant 0 : i32
    return %c0_i32, %arg0 : i32, i32
  }
}

</mosaic_0001>

<bundles_post_ra>
// kernel: tpu_custom_call.1
= control target key start
LH: loop header
LB: loop body
LE: loop exit
PB: predicated region body
PF: predicated region fallthrough
CT: control target
= control target key end

     0   :  { %s11408_s0 = inlined_call_operand.hbm [shape: f32[256,128], index: 0, kind: input, shape index: {}]   ;;  %s11409_s1 = inlined_call_operand.vmem [shape: f32[256,1], index: 1, kind: input, shape index: {}]   ;;  %s11410_s2 = inlined_call_operand.vmem [shape: bf16[128,400], index: 2, kind: input, shape index: {}]   ;;  %s11411_s3 = inlined_call_operand.vmem [shape: f32[2,32], index: 3, kind: input, shape index: {}]   ;;  %s11412_s4 = inlined_call_operand.vmem [shape: bf16[400,300], index: 4, kind: input, shape index: {}]   ;;  %s11413_s5 = inlined_call_operand.vmem [shape: bf16[32,300], index: 5, kind: input, shape index: {}]   ;;  %s11414_s6 = inlined_call_operand.hbm [shape: bf16[300,300], index: 6, kind: input, shape index: {}]   ;;  %s11415_s7 = inlined_call_operand.vmem [shape: f32[1,300], index: 7, kind: input, shape index: {}]   ;;  %s11416_s8 = inlined_call_operand.<no memory space> [shape: f32[1,1], index: 8, kind: input, shape index: {}]   ;;  %s11417_s9 = inlined_call_operand.hbm [shape: f32[1,256], index: 9, kind: output, shape index: {}]  }
   0x1   :  { %14 = sst [smem:[#allocation2]] %s11416_s8 }
   0x2   :  { %15 = vsyncpa [#allocation4], 0 }
   0x3   :  { %17 = vsyncpa [#allocation4 + $0x1], 0 }
   0x4   :  { %18 = vsyncpa [#allocation7], 0 }
   0x5   :  { %19 = vsyncpa [#allocation5], 0 }
   0x6   :  { %21 = vsyncpa [#allocation5 + $0x1], 0  ;;  %s8122_s11 = smov 0   ;;  %s8124_s12 = smov 0  }
   0x7   :  { %s8126_s13 = smov 0   ;;  %s8128_s14 = smov 0  }
   0x8 LB: > { %s8143_s8 = sadd.s32 4294967295, %s8059_s14   ;;  %s6791_s15 = sadd.s32 4294967294, %s8059_s14   ;;  %s8059_s14 = sphi %s8128_s14, %s11724_s14   ;;  %s8055_s13 = sphi %s8126_s13, %s11727_s13   ;;  %s8051_s12 = sphi %s8124_s12, %s11726_s12   ;;  %s8047_s11 = sphi %s8122_s11, %s11725_s11  }
   0x9   : > { %p47_p0 = scmp.ne.s32.totalorder %s8051_s12, %s8047_s11  ;;  %p11418_p1 = scmp.eq.s32.totalorder %s8143_s8, 0 }
   0xa   : > { %p250_p3 = scmp.eq.s32.totalorder %s6791_s15, 1  ;;  %p6792_p5 = scmp.ge.s32.totalorder %s8059_s14, 1 }
   0xb   : > { %p8152_p4 = por %p11418_p1, %p47_p0  ;;  %p257_p7 = scmp.lt.s32.totalorder %s8059_s14, 3 }
   0xc   : > { %p8157_p6 = por %p250_p3, %p47_p0  ;;  %s8061_s19 = smov [#allocation6]  }
   0xd   : > { %s11471_s16 = scalar_select %p8152_p4, 1, 0 }
   0xe   : > { %s11472_s17 = scalar_select %p8157_p6, 1, 0 }
   0xf   : > { %p8162_p8 = pnand %p6792_p5, %p257_p7  ;;  %s281_s20 = sshll.u32 %s8061_s19, 4  ;;  %s8166_s20 = int_to_ptr.vmem [resolvable:$true] %s281_s20 }
  0x10   : > { %s8178_s22 = sadd.s32 1, %s8059_s14   ;;  %s34_s23 = sadd.s32 1, %s8055_s13 }
  0x11   : > { %s11473_s18 = scalar_select %p8162_p8, 1, 0 }
  0x12   : > { %p7322_p9 = pneg %p8162_p8  ;;  %11475 = sst [smem:[#allocation12_spill]] %s8178_s22 }
  0x13   : > { %s31_s24 = ssub.s32 %s8059_s14, %s8178_s22  ;;  %s7931_s27 = scalar_lea.hbm %s11414_s6, 7296 }
  0x14   : > { %p8173_p11 = pnand %p7322_p9, %p11418_p1  ;;  %p7932_p12 = scmp.ne.s32.totalorder %s11414_s6, %s7931_s27 }
  0x15   : > { %p7938_p5 = scmp.lt.u32.totalorder %s7931_s27, %s11414_s6 }
  0x16   : > { %p7933_p13 = pneg %p8173_p11 }
  0x18   : > { %p7934_p0 = pnand %p7933_p13, %p7932_p12 }
  0x1a   : > { %p7935_p3 = pneg %p7934_p0 }
  0x1c   : > { %p7940_p7 = pnand %p7938_p5, %p7935_p3 }
  0x1e   : > { %7943 = shalt.err (!%p7940_p7)
}
  0x1f   : > { %s7944_s15 = scalar_lea.vmem %s8166_s20, 7296  ;;  %p7952_p2 = scmp.lt.s32.totalorder %s8166_s20, %s8166_s20 }
  0x20   : > { %p7945_p9 = scmp.ne.s32.totalorder %s8166_s20, %s7944_s15  ;;  %p7953_p6 = scmp.lt.s32.totalorder %s7944_s15, %s7944_s15 }
  0x22   : > { %p7947_p10 = pnand %p7945_p9, %p7933_p13  ;;  %p7954_p4 = por %p7953_p6, %p7952_p2 }
  0x24   : > { %p7948_p1 = pneg %p7947_p10 }
  0x26   : > { %p7955_p8 = pnand %p7954_p4, %p7948_p1 }
  0x28   : > { %7958 = shalt.err (!%p7955_p8)
}
  0x29   : > { %s8062_s19 = smov 192   ;;  %s8063_s25 = smov 12  }
  0x2a   : > { %7325 = dma.hbm_to_vmem [thread:$0]  (!%p8173_p11), %s11414_s6, 7296, %s8166_s20, [#allocation7], %s8062_s19, %s8062_s19, %s8063_s25  }
  0x2b   : > { %p32_p2 = scmp.eq.s32.totalorder %s31_s24, 0  ;;  %p41_p1 = scmp.ne.s32.totalorder %s8055_s13, %s8051_s12 }
  0x2c   : > { %p42_p4 = scmp.eq.s32.totalorder %s8059_s14, 0  ;;  %p7335_p6 = scmp.lt.s32.totalorder %s8059_s14, 2 }
  0x2d   : > { %s8209_s28 = scalar_select %p32_p2, %s8055_s13, %s34_s23  }
  0x2e   : > { %p43_p8 = por %p42_p4, %p41_p1  ;;  %p11476_p10 = scmp.eq.s32.totalorder %s8143_s8, 1 }
  0x2f   : > { %s301_s30 = sand.u32 1, %s8055_s13   ;;  %s7025_s10 = sshll.u32 %s8059_s14, 11 }
  0x30   : > { %p8213_p12 = por %p11476_p10, %p41_p1  ;;  %s6795_s15 = sshll.u32 %s301_s30, 7 }
  0x31   : > { %s8222_s26 = scalar_lea.hbm %s11408_s0, %s7025_s10  ;;  %s305_s20 = scalar_lea.vmem [#allocation3], %s6795_s15 }
  0x32   : > { %s312_s23 = sshll.u32 %s305_s20, 4  ;;  %p8224_p11 = pnand %p7335_p6, %p43_p8  ;;  %s8228_s23 = int_to_ptr.vmem [resolvable:$true] %s312_s23 }
  0x33   : > { %s8230_s19 = scalar_lea.sflag [#allocation4], %s301_s30  ;;  %s7959_s25 = scalar_lea.hbm %s8222_s26, 2048 }
  0x34   : > { %p7960_p13 = scmp.ne.s32.totalorder %s8222_s26, %s7959_s25  ;;  %p7961_p0 = pneg %p8224_p11 }
  0x35   : > { %s7964_s10 = scalar_lea.hbm %s11408_s0, 4096  ;;  %p7965_p7 = scmp.lt.u32.totalorder %s8222_s26, %s11408_s0 }
  0x36   : > { %p7962_p3 = pnand %p7961_p0, %p7960_p13  ;;  %p7966_p9 = scmp.lt.u32.totalorder %s7964_s10, %s7959_s25 }
  0x37   : > { %p7968_p1 = scmp.lt.u32.totalorder %s7959_s25, %s8222_s26 }
  0x38   : > { %p7963_p5 = pneg %p7962_p3  ;;  %p7967_p2 = por %p7966_p9, %p7965_p7 }
  0x3a   : > { %p7969_p4 = por %p7968_p1, %p7967_p2 }
  0x3c   : > { %p7970_p6 = pnand %p7969_p4, %p7963_p5 }
  0x3e   : > { %7973 = shalt.err (!%p7970_p6)
}
  0x3f   : > { %s7974_s30 = scalar_lea.vmem %s8228_s23, 2048  ;;  %s8064_s20 = smov [#allocation3]  }
  0x40   : > { %p7975_p8 = scmp.ne.s32.totalorder %s8228_s23, %s7974_s30  ;;  %s7979_s22 = sshll.u32 %s8064_s20, 4  ;;  %s7980_s22 = int_to_ptr.vmem [resolvable:$false] %s7979_s22 }
  0x41   : > { %s7981_s27 = scalar_lea.vmem %s7980_s22, 4096  ;;  %p7982_p3 = scmp.lt.s32.totalorder %s8228_s23, %s7980_s22 }
  0x42   : > { %p7977_p10 = pnand %p7975_p8, %p7961_p0  ;;  %p7983_p7 = scmp.lt.s32.totalorder %s7981_s27, %s7974_s30 }
  0x44   : > { %p7978_p13 = pneg %p7977_p10  ;;  %p7984_p9 = por %p7983_p7, %p7982_p3 }
  0x46   : > { %p7985_p2 = pnand %p7984_p9, %p7978_p13 }
  0x48   : > { %7988 = shalt.err (!%p7985_p2)
}
  0x49   : > { %s8065_s25 = smov 128   ;;  %s8066_s10 = smov 8  }
  0x4a   : > { %7329 = dma.hbm_to_vmem [thread:$0]  (!%p8224_p11), %s8222_s26, 2048, %s8228_s23, %s8230_s19, %s8065_s25, %s8065_s25, %s8066_s10  }
  0x4b   : > { %p11479_p0 = scmp.ne.s32.totalorder %s11473_s18, 0 }
  0x4d   : > { %333 = sbr.rel (%p11479_p0) target bundleno = 1861 (0x745), region = 56 }
  0x54   : > { %s8261_s15 = sand.u32 1, %s8051_s12   ;;  %p11480_p5 = scmp.ne.s32.totalorder %s11471_s16, 0 }
  0x55   : > { %s6799_s21 = sshll.u32 %s8261_s15, 7  ;;  %s336_s30 = scalar_lea.sflag [#allocation4], %s8261_s15 }
  0x56   : > { %s8265_s20 = scalar_lea.vmem [#allocation3], %s6799_s21 }
  0x57   : > { %8034 = dma.done.wait (%p11480_p5), %s336_s30, 2048  }
  0x58   : > { %8036 = vsyncadd (%p11480_p5), %s336_s30, 4294965248  ;;  %p11481_p11 = scmp.eq.s32.totalorder %s8143_s8, 0 }
  0x5a   : > { %8038 = dma.done.wait (%p11481_p11), [#allocation7], 7296   ;;  %p11482_p1 = pmov %p11481_p11 }
  0x5b   : > { %v11426_v0 = vmov 0   ;;  %v7378_v1 = vld [vmem:[%s11410_s2 + $0x4] ss:$16 sps:$4 sm:$0xff]   ;;  %v7380_v2 = vld [vmem:[%s11410_s2] ss:$16 sps:$4 sm:$0xff]   ;;  %s8289_s22 = sshll.u32 %s8143_s8, 4 }
  0x5c   : > { %8040 = vsyncadd (%p11482_p1), [#allocation7], 4294960000  ;;  %638 = vmatprep.mubr.bf16.mxu0 %v11426_v0  ;;  %7376 = vset.pattern.permute.xlu0 %v11426_v0  ;;  %v7381_v3 = vld [vmem:[%s11410_s2 + $0x24] ss:$16 sps:$4 sm:$0xff]   ;;  %v7383_v4 = vld [vmem:[%s11410_s2 + $0x20] ss:$16 sps:$4 sm:$0xff]   ;;  %s11364_s24 = scalar_lea.hbm %s11417_s9, %s8289_s22 }
  0x5d   : > { %7377 = vset.pattern.permute.xlu1 %v11426_v0  ;;  %751 = vmatprep.mubr.bf16.mxu1 %v11426_v0  ;;  %v7384_v5 = vld [vmem:[%s11410_s2 + $0x44] ss:$16 sps:$4 sm:$0xff]   ;;  %p384_p4 = scmp.lt.s32.totalorder %s8289_s22, 31  ;;  %v7390_v6 = vld [vmem:[%s11410_s2 + $0xc] ss:$16 sps:$4 sm:$0xff]   ;;  %vm2479_vm0 = vcmask 261120  }
  0x5e   : > { %606 = vmatprep.subr.bf16.mxu0 %v7378_v1  ;;  %v7392_v7 = vld [vmem:[%s11410_s2 + $0x8] ss:$16 sps:$4 sm:$0xff]   ;;  %v7386_v8 = vld [vmem:[%s11410_s2 + $0x40] ss:$16 sps:$4 sm:$0xff]   ;;  %v7387_v9 = vld [vmem:[%s11410_s2 + $0x64] ss:$16 sps:$4 sm:$0xff]   ;;  %719 = vmatprep.subr.bf16.mxu1 %v7390_v6 }
  0x5f   : > { %607 = vmatpush1.bf16.msra.mxu0 %v7380_v2  ;;  %v7396_v10 = vld [vmem:[%s11410_s2 + $0x2c] ss:$16 sps:$4 sm:$0xff]   ;;  %720 = vmatpush1.bf16.msra.mxu1 %v7392_v7  ;;  %v7398_v11 = vld [vmem:[%s11410_s2 + $0x28] ss:$16 sps:$4 sm:$0xff]   ;;  %s385_s30 = scalar_select %p384_p4, %s8289_s22, 31  ;;  %v390_v35 = vld [vmem:[%s8265_s20] sm:$0xff] }
  0x60   : > { %608 = vmatprep.subr.bf16.mxu0 %v7381_v3  ;;  %721 = vmatprep.subr.bf16.mxu1 %v7396_v10  ;;  %v7389_v12 = vld [vmem:[%s11410_s2 + $0x60] ss:$16 sps:$4 sm:$0xff]   ;;  %v7402_v13 = vld [vmem:[%s11410_s2 + $0x4c] ss:$16 sps:$4 sm:$0xff]   ;;  %v7393_v14 = vld [vmem:[%s11410_s2 + $0x84] ss:$16 sps:$4 sm:$0xff]  }
  0x61   : > { %v7404_v15 = vld [vmem:[%s11410_s2 + $0x48] ss:$16 sps:$4 sm:$0xff]   ;;  %s6802_s25 = sshll.u32 %s385_s30, 3  ;;  %v7408_v16 = vld [vmem:[%s11410_s2 + $0x6c] ss:$16 sps:$4 sm:$0xff]   ;;  %v392_v44 = vld [vmem:[%s8265_s20 + $0x10] sm:$0xff] }
  0x62   : > { %v7395_v17 = vld [vmem:[%s11410_s2 + $0x80] ss:$16 sps:$4 sm:$0xff]   ;;  %v7399_v18 = vld [vmem:[%s11410_s2 + $0xa4] ss:$16 sps:$4 sm:$0xff]   ;;  %s8341_s19 = scalar_lea.vmem %s11409_s1, %s6802_s25  ;;  %v7410_v19 = vld [vmem:[%s11410_s2 + $0x68] ss:$16 sps:$4 sm:$0xff]  }
  0x63   : > { %609 = vmatpush1.bf16.msra.mxu0 %v7383_v4  ;;  %722 = vmatpush1.bf16.msra.mxu1 %v7398_v11  ;;  %v7414_v20 = vld [vmem:[%s11410_s2 + $0x8c] ss:$16 sps:$4 sm:$0xff]   ;;  %v7401_v21 = vld [vmem:[%s11410_s2 + $0xa0] ss:$16 sps:$4 sm:$0xff]   ;;  %v7405_v23 = vld [vmem:[%s11410_s2 + $0xc4] ss:$16 sps:$4 sm:$0xff]  }
  0x64   : > { %610 = vmatprep.subr.bf16.mxu0 %v7384_v5  ;;  %723 = vmatprep.subr.bf16.mxu1 %v7402_v13  ;;  %v2147_v22 = vld [vmem:[%s8341_s19] sm:$0xff]  ;;  %v7416_v24 = vld [vmem:[%s11410_s2 + $0x88] ss:$16 sps:$4 sm:$0xff]   ;;  %v7417_v26 = vld [vmem:[%s11410_s2 + $0xac] ss:$16 sps:$4 sm:$0xff]   ;;  %vm850_vm1 = vcmask 130048  }
  0x65   : > { %2165 = vperm.xlu0 %7376, %v2147_v22   ;;  %v2148_v25 = vld [vmem:[%s8341_s19 + $0x8] sm:$0xff]  ;;  %v7407_v27 = vld [vmem:[%s11410_s2 + $0xc0] ss:$16 sps:$4 sm:$0xff]   ;;  %v7411_v29 = vld [vmem:[%s11410_s2 + $0xe4] ss:$16 sps:$4 sm:$0xff]   ;;  %vm3570_vm2 = vcmask 359424  }
  0x66   : > { %v2149_v28 = vld [vmem:[%s8341_s19 + $0x10] sm:$0xff]  ;;  %v7419_v30 = vld [vmem:[%s11410_s2 + $0xa8] ss:$16 sps:$4 sm:$0xff]   ;;  %v2151_v31 = vld [vmem:[%s8341_s19 + $0x20] sm:$0xff]  ;;  %vm4976_vm3 = vcmask 1045504   ;;  %s6543_s25 = sld [smem:[#allocation2]] }
  0x67   : > { %611 = vmatpush1.bf16.msra.mxu0 %v7386_v8  ;;  %724 = vmatpush1.bf16.msra.mxu1 %v7404_v15  ;;  %v7420_v32 = vld [vmem:[%s11410_s2 + $0xcc] ss:$16 sps:$4 sm:$0xff]   ;;  %v7413_v34 = vld [vmem:[%s11410_s2 + $0xe0] ss:$16 sps:$4 sm:$0xff]   ;;  %v7422_v37 = vld [vmem:[%s11410_s2 + $0xc8] ss:$16 sps:$4 sm:$0xff]  }
  0x68   : > { %612 = vmatprep.subr.bf16.mxu0 %v7387_v9  ;;  %725 = vmatprep.subr.bf16.mxu1 %v7408_v16  ;;  %v2150_v33 = vld [vmem:[%s8341_s19 + $0x18] sm:$0xff]  ;;  %v391_v36 = vld [vmem:[%s8265_s20 + $0x8] sm:$0xff]  ;;  %v2153_v38 = vld [vmem:[%s8341_s19 + $0x30] sm:$0xff]  ;;  %vm6588_vm4 = vcmask 130112   ;;  %vm6595_vm5 = vcmask 195712   ;;  %vm6602_vm6 = vcmask 261312  }
  0x69   : > { %2170 = vperm.xlu0 %7376, %v2148_v25   ;;  %2175 = vperm.xlu1 %7377, %v2149_v28   ;;  %v406_v39 = vpack.c.bf16 %v391_v36, %v390_v35  ;;  %v7423_v40 = vld [vmem:[%s11410_s2 + $0xec] ss:$16 sps:$4 sm:$0xff]   ;;  %v7425_v42 = vld [vmem:[%s11410_s2 + $0xe8] ss:$16 sps:$4 sm:$0xff]   ;;  %v2155_v43 = vld [vmem:[%s8341_s19 + $0x40] sm:$0xff]  ;;  %vm6609_vm7 = vcmask 326912  }
  0x6a   : > { %v2152_v41 = vld [vmem:[%s8341_s19 + $0x28] sm:$0xff]  ;;  %v393_v45 = vld [vmem:[%s8265_s20 + $0x18] sm:$0xff]  ;;  %v7428_v47 = vld [vmem:[%s11413_s5 + $0x4] ss:$12 sps:$4 sm:$0xff]   ;;  %vm6616_vm8 = vcmask 392512   ;;  %vm6623_vm9 = vcmask 458112  }
  0x6b   : > { %613 = vmatpush1.bf16.msra.mxu0 %v7389_v12  ;;  %726 = vmatpush1.bf16.msra.mxu1 %v7410_v19  ;;  %v7426_v46 = vld [vmem:[%s11413_s5] ss:$12 sps:$4 sm:$0xff]   ;;  %v2154_v48 = vld [vmem:[%s8341_s19 + $0x38] sm:$0xff]  ;;  %v2157_v49 = vld [vmem:[%s8341_s19 + $0x50] sm:$0xff]  ;;  %v407_v53 = vpack.c.bf16 %v393_v45, %v392_v44  ;;  %vm6630_vm10 = vcmask 523712   ;;  %vm6637_vm11 = vcmask 589312  }
  0x6c   : > { %614 = vmatprep.subr.bf16.mxu0 %v7393_v14  ;;  %727 = vmatprep.subr.bf16.mxu1 %v7414_v20  ;;  %v7431_v50 = vld [vmem:[%s11413_s5 + $0x1c] ss:$12 sps:$4 sm:$0xff]   ;;  %v7429_v52 = vld [vmem:[%s11413_s5 + $0x18] ss:$12 sps:$4 sm:$0xff]   ;;  %v2161_v58 = vld [vmem:[%s8341_s19 + $0x70] sm:$0xff]  ;;  %vm6644_vm12 = vcmask 654912  }
  0x6d   : > { %2185 = vperm.xlu0 %7376, %v2151_v31   ;;  %2180 = vperm.xlu1 %7377, %v2150_v33   ;;  %v2156_v51 = vld [vmem:[%s8341_s19 + $0x48] sm:$0xff]  ;;  %v2159_v54 = vld [vmem:[%s8341_s19 + $0x60] sm:$0xff]  ;;  %v2158_v55 = vld [vmem:[%s8341_s19 + $0x58] sm:$0xff]  ;;  %vm6651_vm13 = vcmask 720512   ;;  %vm6658_vm14 = vcmask 786112   ;;  %vm6665_vm15 = vcmask 851712  }
  0x6e   : > { %v394_v56 = vld [vmem:[%s8265_s20 + $0x20] sm:$0xff]  ;;  %v395_v57 = vld [vmem:[%s8265_s20 + $0x28] sm:$0xff]  ;;  %v2162_v61 = vld [vmem:[%s8341_s19 + $0x78] sm:$0xff]  ;;  %s381_s8 = scalar_lea.vmem [#allocation8], %s8261_s15  ;;  %s6691_s30 = scalar_lea.sflag [#allocation5], %s8261_s15 }
  0x6f   : > { %615 = vmatpush1.bf16.msra.mxu0 %v7395_v17  ;;  %728 = vmatpush1.bf16.msra.mxu1 %v7416_v24  ;;  %v2160_v59 = vld [vmem:[%s8341_s19 + $0x68] sm:$0xff]  ;;  %v408_v60 = vpack.c.bf16 %v395_v57, %v394_v56  ;;  %v396_v63 = vld [vmem:[%s8265_s20 + $0x30] sm:$0xff]  ;;  %v397_v1 = vld [vmem:[%s8265_s20 + $0x38] sm:$0xff]  ;;  %v11423_v17 = vlaneseq  ;;  %s8068_s10 = smov [#allocation8]  }
  0x70   : > { %616 = vmatprep.subr.bf16.mxu0 %v7399_v18  ;;  %729 = vmatprep.subr.bf16.mxu1 %v7417_v26  ;;  %v7432_v62 = vld [vmem:[%s11413_s5 + $0x8] ss:$12 sps:$4 sm:$0xff]   ;;  %v409_v2 = vpack.c.bf16 %v397_v1, %v396_v63  ;;  %v7433_v3 = vld [vmem:[%s11413_s5 + $0x20] ss:$12 sps:$4 sm:$0xff]   ;;  %v401_v8 = vld [vmem:[%s8265_s20 + $0x58] sm:$0xff]  ;;  %s7993_s21 = sshll.u32 %s8068_s10, 4  ;;  %s7994_s21 = int_to_ptr.vmem [resolvable:$false] %s7993_s21 }
  0x71   : > { %2195 = vperm.xlu0 %7376, %v2153_v38   ;;  %2190 = vperm.xlu1 %7377, %v2152_v41   ;;  %v398_v4 = vld [vmem:[%s8265_s20 + $0x40] sm:$0xff]  ;;  %v399_v5 = vld [vmem:[%s8265_s20 + $0x48] sm:$0xff]  ;;  %v400_v7 = vld [vmem:[%s8265_s20 + $0x50] sm:$0xff]  ;;  %v8454_v18 = vshrl.u32 %v11423_v17, 7  ;;  %s7995_s18 = scalar_lea.vmem %s7994_s21, 32 }
  0x72   : > { %v410_v6 = vpack.c.bf16 %v399_v5, %v398_v4  ;;  %v411_v9 = vpack.c.bf16 %v401_v8, %v400_v7  ;;  %v402_v10 = vld [vmem:[%s8265_s20 + $0x60] sm:$0xff]  ;;  %v403_v11 = vld [vmem:[%s8265_s20 + $0x68] sm:$0xff]  ;;  %v404_v13 = vld [vmem:[%s8265_s20 + $0x70] sm:$0xff] }
  0x73   : > { %617 = vmatpush1.bf16.msra.mxu0 %v7401_v21  ;;  %730 = vmatpush1.bf16.msra.mxu1 %v7419_v30  ;;  %v412_v12 = vpack.c.bf16 %v403_v11, %v402_v10  ;;  %v405_v14 = vld [vmem:[%s8265_s20 + $0x78] sm:$0xff]  ;;  %v7436_v16 = vld [vmem:[%s11412_s4 + $0x4] ss:$12 sps:$4 sm:$0xff]   ;;  %11483 = vst [vmem:[#allocation13_spill] sm:$0xff] %v8454_v18  ;;  %v11425_v19 = vsub.s32 0, %v8454_v18  ;;  %v11424_v21 = vsub.s32 1, %v8454_v18 }
  0x74   : > { %618 = vmatprep.subr.bf16.mxu0 %v7405_v23  ;;  %731 = vmatprep.subr.bf16.mxu1 %v7420_v32  ;;  %v413_v15 = vpack.c.bf16 %v405_v14, %v404_v13  ;;  %v2146_v20 = vld [vmem:[%s11411_s3] sm:$0x3]  ;;  %v7439_v41 = vld [vmem:[%s11412_s4 + $0x1c] ss:$12 sps:$4 sm:$0xff]   ;;  %v7445_v4 = vld [vmem:[%s11412_s4 + $0x4c] ss:$12 sps:$4 sm:$0xff]  }
  0x75   : > { %2205 = vperm.xlu0 %7376, %v2155_v43   ;;  %2200 = vperm.xlu1 %7377, %v2154_v48   ;;  %v8463_v22 = vrot.slane %v2146_v20, %v11425_v19  ;;  %v8467_v23 = vrot.slane %v2146_v20, %v11424_v21  ;;  %s6703_s20 = sshll.u32 %s381_s8, 4  ;;  %s11366_s20 = int_to_ptr.vmem [resolvable:$true] %s6703_s20 }
  0x76   : > { %s7989_s27 = scalar_lea.vmem %s11366_s20, 16  ;;  %p7996_p13 = scmp.lt.s32.totalorder %s11366_s20, %s7994_s21 }
  0x77   : > { %619 = vmatpush1.bf16.msra.mxu0 %v7407_v27  ;;  %732 = vmatpush1.bf16.msra.mxu1 %v7422_v37  ;;  %p7990_p6 = scmp.ne.s32.totalorder %s11366_s20, %s7989_s27  ;;  %p7997_p3 = scmp.lt.s32.totalorder %s7995_s18, %s7989_s27 }
  0x78   : > { %620 = vmatprep.subr.bf16.mxu0 %v7411_v29  ;;  %733 = vmatprep.subr.bf16.mxu1 %v7423_v40 }
  0x79   : > { %2215 = vperm.xlu0 %7376, %v2157_v49   ;;  %2210 = vperm.xlu1 %7377, %v2156_v51   ;;  %v7442_v51 = vld [vmem:[%s11412_s4 + $0x34] ss:$12 sps:$4 sm:$0xff]   ;;  %p7991_p8 = pnand %p7990_p6, %p8213_p12  ;;  %p7998_p7 = por %p7997_p3, %p7996_p13 }
  0x7b   : > { %621 = vmatpush1.bf16.msra.mxu0 %v7413_v34  ;;  %734 = vmatpush1.bf16.msra.mxu1 %v7425_v42  ;;  %p7992_p10 = pneg %p7991_p8 }
  0x7c   : > { %2504 = vmatprep.subr.bf16.mxu0 %v7428_v47  ;;  %7175 = vmatprep.subr.bf16.mxu1 %v7432_v62 }
  0x7d   : > { %2225 = vperm.xlu0 %7376, %v2159_v54   ;;  %2220 = vperm.xlu1 %7377, %v2158_v55   ;;  %p7999_p9 = pnand %p7998_p7, %p7992_p10 }
  0x7e   : > { %639 = vmatmul.mubr.bf16.vlgmr.msra.gmra.mrb[0].mxu0 %v406_v39  ;;  %752 = vmatmul.mubr.bf16.vlgmr.msra.gmra.mrb[0].mxu1 %v406_v39  ;;  %v7434_v39 = vld [vmem:[%s11412_s4] ss:$12 sps:$4 sm:$0xff]  }
  0x7f   : > { %648 = vmatprep.mubr.bf16.mxu0 %v11426_v0  ;;  %2505 = vmatpush1.bf16.msra.mxu0 %v7426_v46 }
  0x80   : > { %2506 = vmatprep.subr.bf16.mxu0 %v7431_v50  ;;  %761 = vmatprep.mubr.bf16.mxu1 %v11426_v0  ;;  %v7437_v50 = vld [vmem:[%s11412_s4 + $0x18] ss:$12 sps:$4 sm:$0xff]  }
  0x81   : > { %2235 = vperm.xlu0 %7376, %v2161_v58   ;;  %2230 = vperm.xlu1 %7377, %v2160_v59  }
  0x82   : > { %7176 = vmatpush3.bf16.msra.mxu1 %v7432_v62 }
  0x83   : > { %2507 = vmatpush1.bf16.msra.mxu0 %v7429_v52  ;;  %7177 = vmatprep.subr.bf16.mxu1 %v7433_v3 }
  0x84   : > { %3138 = vmatprep.subr.bf16.mxu0 %v7436_v16 }
  0x85   : > { %2240 = vperm.xlu1 %7377, %v2162_v61   ;;  %v7440_v61 = vld [vmem:[%s11412_s4 + $0x30] ss:$12 sps:$4 sm:$0xff]  }
  0x86   : > { %649 = vmatmul.mubr.bf16.gmra.mrb[4].mxu0 %v407_v53  ;;  %762 = vmatmul.mubr.bf16.gmra.mrb[4].mxu1 %v407_v53 }
  0x87   : > { %658 = vmatprep.mubr.bf16.mxu0 %v11426_v0  ;;  %771 = vmatprep.mubr.bf16.mxu1 %v11426_v0 }
  0x88   : > { %7178 = vmatpush3.bf16.msra.mxu1 %v7433_v3 }
  0x8e   : > { %659 = vmatmul.mubr.bf16.gmra.mrb[8].mxu0 %v408_v60  ;;  %772 = vmatmul.mubr.bf16.gmra.mrb[8].mxu1 %v408_v60 }
  0x8f   : > { %668 = vmatprep.mubr.bf16.mxu0 %v11426_v0  ;;  %781 = vmatprep.mubr.bf16.mxu1 %v11426_v0 }
  0x96   : > { %669 = vmatmul.mubr.bf16.gmra.mrb[12].mxu0 %v409_v2  ;;  %782 = vmatmul.mubr.bf16.gmra.mrb[12].mxu1 %v409_v2 }
  0x97   : > { %678 = vmatprep.mubr.bf16.mxu0 %v11426_v0  ;;  %791 = vmatprep.mubr.bf16.mxu1 %v11426_v0 }
  0x9e   : > { %679 = vmatmul.mubr.bf16.gmra.mrb[16].mxu0 %v410_v6  ;;  %792 = vmatmul.mubr.bf16.gmra.mrb[16].mxu1 %v410_v6 }
  0x9f   : > { %688 = vmatprep.mubr.bf16.mxu0 %v11426_v0  ;;  %801 = vmatprep.mubr.bf16.mxu1 %v11426_v0 }
  0xa6   : > { %689 = vmatmul.mubr.bf16.gmra.mrb[20].mxu0 %v411_v9  ;;  %802 = vmatmul.mubr.bf16.gmra.mrb[20].mxu1 %v411_v9  ;;  %v7443_v9 = vld [vmem:[%s11412_s4 + $0x48] ss:$12 sps:$4 sm:$0xff]  }
  0xa7   : > { %698 = vmatprep.mubr.bf16.mxu0 %v11426_v0  ;;  %811 = vmatprep.mubr.bf16.mxu1 %v11426_v0 }
  0xae   : > { %699 = vmatmul.mubr.bf16.gmra.mrb[24].mxu0 %v412_v12  ;;  %812 = vmatmul.mubr.bf16.gmra.mrb[24].mxu1 %v412_v12 }
  0xaf   : > { %708 = vmatprep.mubr.bf16.mxu0 %v11426_v0  ;;  %821 = vmatprep.mubr.bf16.mxu1 %v11426_v0 }
  0xb6   : > { %709 = vmatmul.mubr.bf16.gmra.mrb[28].mxu0 %v413_v15  ;;  %822 = vmatmul.mubr.bf16.gmra.mrb[28].mxu1 %v413_v15  ;;  %v7448_v15 = vld [vmem:[%s11412_s4 + $0x64] ss:$12 sps:$4 sm:$0xff]  }
  0xb7   : > { %2536 = vmatprep.mubr.bf16.mxu0 %v11426_v0 }
  0xe4   : > { %v2166_v24 = vpop.permute.xlu0 %2165 }
  0xe5   : > { %v2247_v25 = vmul.f32 %v8463_v22, %v2166_v24 }
  0xe7   : > { %v2267_v26 = vadd.f32 %v8467_v23, %v2247_v25 }
  0xe8   : > { %v2171_v27 = vpop.permute.xlu0 %2170  ;;  %v2176_v29 = vpop.permute.xlu1 %2175 }
  0xe9   : > { %v2248_v28 = vmul.f32 %v8463_v22, %v2171_v27  ;;  %v2249_v30 = vmul.f32 %v8463_v22, %v2176_v29  ;;  %v2283_v31 = vmax.f32 %v2267_v26, 0.0  ;;  %v7446_v26 = vld [vmem:[%s11412_s4 + $0x60] ss:$12 sps:$4 sm:$0xff]  }
  0xeb   : > { %v2268_v32 = vadd.f32 %v8467_v23, %v2248_v28  ;;  %v2269_v33 = vadd.f32 %v8467_v23, %v2249_v30 }
  0xec   : > { %v2186_v34 = vpop.permute.xlu0 %2185  ;;  %v2181_v36 = vpop.permute.xlu1 %2180 }
  0xed   : > { %v2284_v35 = vmax.f32 %v2268_v32, 0.0  ;;  %v2251_v37 = vmul.f32 %v8463_v22, %v2186_v34  ;;  %v2250_v38 = vmul.f32 %v8463_v22, %v2181_v36  ;;  %v2285_v42 = vmax.f32 %v2269_v33, 0.0  ;;  %v7451_v32 = vld [vmem:[%s11412_s4 + $0x7c] ss:$12 sps:$4 sm:$0xff]  }
  0xef   : > { %v2431_v40 = vpack.c.bf16 %v2284_v35, %v2283_v31  ;;  %v2270_v43 = vadd.f32 %v8467_v23, %v2250_v38  ;;  %v2271_v44 = vadd.f32 %v8467_v23, %v2251_v37  ;;  %v7449_v37 = vld [vmem:[%s11412_s4 + $0x78] ss:$12 sps:$4 sm:$0xff]  }
  0xf0   : > { %v2196_v45 = vpop.permute.xlu0 %2195  ;;  %v2191_v46 = vpop.permute.xlu1 %2190 }
  0xf1   : > { %6841 = vmatmul.mubr.msk.bf16.vlgmr.msra.gmra.mrb[32].mxu0 %vm2479_vm0, %v2431_v40  ;;  %v2253_v47 = vmul.f32 %v8463_v22, %v2196_v45  ;;  %7179 = vmatprep.mubr.msk.bf16.mxu1 %vm2479_vm0, %v2431_v40  ;;  %v2286_v48 = vmax.f32 %v2270_v43, 0.0  ;;  %v2252_v49 = vmul.f32 %v8463_v22, %v2191_v46  ;;  %v2287_v54 = vmax.f32 %v2271_v44, 0.0  ;;  %v7452_v46 = vld [vmem:[%s11412_s4 + $0x90] ss:$12 sps:$4 sm:$0xff]  }
  0xf2   : > { %2546 = vmatprep.mubr.bf16.mxu0 %v11426_v0  ;;  %3139 = vmatpush1.bf16.msra.mxu0 %v7434_v39 }
  0xf3   : > { %3140 = vmatprep.subr.bf16.mxu0 %v7439_v41  ;;  %v2432_v52 = vpack.c.bf16 %v2286_v48, %v2285_v42  ;;  %v2272_v53 = vadd.f32 %v8467_v23, %v2252_v49  ;;  %v2273_v55 = vadd.f32 %v8467_v23, %v2253_v47  ;;  %v7454_v42 = vld [vmem:[%s11412_s4 + $0x94] ss:$12 sps:$4 sm:$0xff]  }
  0xf4   : > { %v2206_v56 = vpop.permute.xlu0 %2205  ;;  %v2201_v57 = vpop.permute.xlu1 %2200 }
  0xf5   : > { %v2255_v58 = vmul.f32 %v8463_v22, %v2206_v56  ;;  %v2288_v59 = vmax.f32 %v2272_v53, 0.0  ;;  %v2254_v60 = vmul.f32 %v8463_v22, %v2201_v57  ;;  %7180 = vmatmul.mubr.msk.bf16.vlgmr.msra.gmra.mrb[32].mxu1 %vm2479_vm0, %v2432_v52  ;;  %v2289_v1 = vmax.f32 %v2273_v55, 0.0  ;;  %v7458_v53 = vld [vmem:[%s11412_s4 + $0xc0] ss:$12 sps:$4 sm:$0xff]   ;;  %v7462_v55 = vld [vmem:[%s11412_s4 + $0x8] ss:$12 sps:$4 sm:$0xff]  }
  0xf6   : > { %3141 = vmatpush1.bf16.msra.mxu0 %v7437_v50  ;;  %v7457_v50 = vld [vmem:[%s11412_s4 + $0xac] ss:$12 sps:$4 sm:$0xff]   ;;  %v7465_v56 = vld [vmem:[%s11412_s4 + $0xdc] ss:$12 sps:$4 sm:$0xff]  }
  0xf7   : > { %3142 = vmatprep.subr.bf16.mxu0 %v7442_v51  ;;  %v2433_v62 = vpack.c.bf16 %v2288_v59, %v2287_v54  ;;  %v2274_v63 = vadd.f32 %v8467_v23, %v2254_v60  ;;  %v2275_v2 = vadd.f32 %v8467_v23, %v2255_v58  ;;  %v7455_v51 = vld [vmem:[%s11412_s4 + $0xa8] ss:$12 sps:$4 sm:$0xff]   ;;  %v7466_v57 = vld [vmem:[%s11412_s4 + $0xe0] ss:$12 sps:$4 sm:$0xff]   ;;  %v7463_v58 = vld [vmem:[%s11412_s4 + $0xd8] ss:$12 sps:$4 sm:$0xff]  }
  0xf8   : > { %v2216_v3 = vpop.permute.xlu0 %2215  ;;  %v2211_v5 = vpop.permute.xlu1 %2210  ;;  %v7461_v54 = vld [vmem:[%s11412_s4 + $0xc8] ss:$12 sps:$4 sm:$0xff]   ;;  %v7467_v59 = vld [vmem:[%s11412_s4 + $0x20] ss:$12 sps:$4 sm:$0xff]  }
  0xf9   : > { %6842 = vmatmul.mubr.msk.bf16.gmra.mrb[36].mxu0 %vm2479_vm0, %v2432_v52  ;;  %v2257_v6 = vmul.f32 %v8463_v22, %v2216_v3  ;;  %v2290_v7 = vmax.f32 %v2274_v63, 0.0  ;;  %v2256_v8 = vmul.f32 %v8463_v22, %v2211_v5  ;;  %7183 = vmatprep.mubr.msk.bf16.mxu1 %vm2479_vm0, %v2433_v62  ;;  %v2291_v12 = vmax.f32 %v2275_v2, 0.0  ;;  %v7470_v60 = vld [vmem:[%s11412_s4 + $0xf4] ss:$12 sps:$4 sm:$0xff]   ;;  %v7472_v5 = vld [vmem:[%s11412_s4 + $0x38] ss:$12 sps:$4 sm:$0xff]  }
  0xfa   : > { %2556 = vmatprep.mubr.bf16.mxu0 %v11426_v0  ;;  %3143 = vmatpush1.bf16.msra.mxu0 %v7440_v61  ;;  %v7468_v61 = vld [vmem:[%s11412_s4 + $0xf0] ss:$12 sps:$4 sm:$0xff]  }
  0xfb   : > { %v2434_v10 = vpack.c.bf16 %v2290_v7, %v2289_v1  ;;  %v2276_v11 = vadd.f32 %v8467_v23, %v2256_v8  ;;  %v2277_v13 = vadd.f32 %v8467_v23, %v2257_v6  ;;  %3144 = vmatprep.subr.bf16.mxu0 %v7445_v4  ;;  %7036 = vmatprep.subr.bf16.mxu1 %v7461_v54 }
  0xfc   : > { %v2226_v14 = vpop.permute.xlu0 %2225  ;;  %v2221_v16 = vpop.permute.xlu1 %2220  ;;  %7037 = vmatpush3.bf16.msra.mxu1 %v7462_v55 }
  0xfd   : > { %v2259_v20 = vmul.f32 %v8463_v22, %v2226_v14  ;;  %v2292_v24 = vmax.f32 %v2276_v11, 0.0  ;;  %v2258_v25 = vmul.f32 %v8463_v22, %v2221_v16  ;;  %7184 = vmatmul.mubr.msk.bf16.gmra.mrb[36].mxu1 %vm2479_vm0, %v2434_v10  ;;  %v2293_v29 = vmax.f32 %v2277_v13, 0.0  ;;  %7038 = vmatprep.subr.bf16.mxu1 %v7466_v57 }
  0xfe   : > { %3145 = vmatpush1.bf16.msra.mxu0 %v7443_v9 }
  0xff   : > { %v2435_v27 = vpack.c.bf16 %v2292_v24, %v2291_v12  ;;  %v2278_v28 = vadd.f32 %v8467_v23, %v2258_v25  ;;  %v2279_v30 = vadd.f32 %v8467_v23, %v2259_v20  ;;  %3146 = vmatprep.subr.bf16.mxu0 %v7448_v15 }
 0x100   : > { %v2236_v31 = vpop.permute.xlu0 %2235  ;;  %v2231_v33 = vpop.permute.xlu1 %2230  ;;  %7039 = vmatpush3.bf16.msra.mxu1 %v7467_v59 }
 0x101   : > { %6843 = vmatmul.mubr.msk.bf16.gmra.mrb[40].mxu0 %vm2479_vm0, %v2433_v62  ;;  %v2261_v34 = vmul.f32 %v8463_v22, %v2236_v31  ;;  %v2294_v35 = vmax.f32 %v2278_v28, 0.0  ;;  %v2260_v36 = vmul.f32 %v8463_v22, %v2231_v33  ;;  %7187 = vmatprep.mubr.msk.bf16.mxu1 %vm2479_vm0, %v2435_v27  ;;  %v2295_v40 = vmax.f32 %v2279_v30, 0.0  ;;  %v7471_v62 = vld [vmem:[%s11412_s4 + $0xf8] ss:$12 sps:$4 sm:$0xff]  }
 0x102   : > { %2566 = vmatprep.mubr.bf16.mxu0 %v11426_v0  ;;  %3147 = vmatpush1.bf16.msra.mxu0 %v7446_v26 }
 0x103   : > { %v2436_v38 = vpack.c.bf16 %v2294_v35, %v2293_v29  ;;  %v2280_v39 = vadd.f32 %v8467_v23, %v2260_v36  ;;  %v2281_v41 = vadd.f32 %v8467_v23, %v2261_v34  ;;  %3148 = vmatprep.subr.bf16.mxu0 %v7451_v32  ;;  %7040 = vmatprep.subr.bf16.mxu1 %v7471_v62 }
 0x104   : > { %v2241_v43 = vpop.permute.xlu1 %2240  ;;  %7041 = vmatpush3.bf16.msra.mxu1 %v7472_v5 }
 0x105   : > { %v2296_v44 = vmax.f32 %v2280_v39, 0.0  ;;  %v2262_v45 = vmul.f32 %v8463_v22, %v2241_v43  ;;  %7188 = vmatmul.mubr.msk.bf16.gmra.mrb[40].mxu1 %vm2479_vm0, %v2436_v38  ;;  %v2297_v49 = vmax.f32 %v2281_v41, 0.0 }
 0x106   : > { %3149 = vmatpush1.bf16.msra.mxu0 %v7449_v37 }
 0x107   : > { %v2437_v47 = vpack.c.bf16 %v2296_v44, %v2295_v40  ;;  %v2282_v48 = vadd.f32 %v8467_v23, %v2262_v45  ;;  %3150 = vmatprep.subr.bf16.mxu0 %v7454_v42  ;;  %v7460_v23 = vld [vmem:[%s11412_s4 + $0xc4] ss:$12 sps:$4 sm:$0xff]  }
 0x109   : > { %6844 = vmatmul.mubr.msk.bf16.gmra.mrb[44].mxu0 %vm2479_vm0, %v2434_v10  ;;  %v2298_v22 = vmax.f32 %v2282_v48, 0.0  ;;  %7191 = vmatprep.mubr.msk.bf16.mxu1 %vm2479_vm0, %v2437_v47 }
 0x10a   : > { %2576 = vmatprep.mubr.bf16.mxu0 %v11426_v0  ;;  %3151 = vmatpush1.bf16.msra.mxu0 %v7452_v46 }
 0x10b   : > { %v2438_v52 = vpack.c.bf16 %v2298_v22, %v2297_v49  ;;  %3152 = vmatprep.subr.bf16.mxu0 %v7457_v50 }
 0x10d   : > { %7192 = vmatmul.mubr.msk.bf16.gmra.mrb[44].mxu1 %vm2479_vm0, %v2438_v52 }
 0x10e   : > { %3153 = vmatpush1.bf16.msra.mxu0 %v7455_v51  ;;  %v7473_v51 = vld [vmem:[%s11412_s4 + $0x108] ss:$12 sps:$4 sm:$0xff]  }
 0x10f   : > { %3154 = vmatprep.subr.bf16.mxu0 %v7460_v23 }
 0x111   : > { %6845 = vmatmul.mubr.msk.bf16.gmra.mrb[48].mxu0 %vm2479_vm0, %v2435_v27 }
 0x112   : > { %2586 = vmatprep.mubr.bf16.mxu0 %v11426_v0  ;;  %3155 = vmatpush1.bf16.msra.mxu0 %v7458_v53 }
 0x113   : > { %3156 = vmatprep.subr.bf16.mxu0 %v7465_v56  ;;  %v7477_v56 = vld [vmem:[%s11412_s4 + $0x50] ss:$12 sps:$4 sm:$0xff]  }
 0x116   : > { %3157 = vmatpush1.bf16.msra.mxu0 %v7463_v58 }
 0x117   : > { %3158 = vmatprep.subr.bf16.mxu0 %v7470_v60 }
 0x119   : > { %6846 = vmatmul.mubr.msk.bf16.gmra.mrb[52].mxu0 %vm2479_vm0, %v2436_v38 }
 0x11a   : > { %2596 = vmatprep.mubr.bf16.mxu0 %v11426_v0  ;;  %3159 = vmatpush1.bf16.msra.mxu0 %v7468_v61 }
 0x121   : > { %6847 = vmatmul.mubr.msk.bf16.gmra.mrb[56].mxu0 %vm2479_vm0, %v2437_v47  ;;  %v7475_v47 = vld [vmem:[%s11412_s4 + $0x10c] ss:$12 sps:$4 sm:$0xff]  }
 0x122   : > { %2606 = vmatprep.mubr.bf16.mxu0 %v11426_v0  ;;  %3160 = vmatprep.subr.bf16.mxu0 %v7475_v47 }
 0x123   : > { %3161 = vmatpush1.bf16.msra.mxu0 %v7473_v51 }
 0x129   : > { %6848 = vmatmul.mubr.msk.bf16.gmra.mrb[60].mxu0 %vm2479_vm0, %v2438_v52  ;;  %v7476_v52 = vld [vmem:[%s11412_s4 + $0x110] ss:$12 sps:$4 sm:$0xff]   ;;  %vm6672_vm0 = vcmask 917312  }
 0x12a   : > { %7042 = vmatprep.subr.bf16.mxu1 %v7476_v52 }
 0x12b   : > { %7043 = vmatpush3.bf16.msra.mxu1 %v7477_v56 }
 0x151   : > { %v8602_v63 = vpop.f32.mrb[0].mxu0  ;;  %v8621_v15 = vpop.f32.mrb[0].mxu1 }
 0x152   : > { %v832_v1 = vrot.slane %v8602_v63, 4  ;;  %v8605_v2 = vpop.f32.mrb[1].mxu0  ;;  %v844_v24 = vrot.slane %v8621_v15, 4  ;;  %v8624_v25 = vpop.f32.mrb[1].mxu1 }
 0x153   : > { %v838_v3 = vrot.slane %v8605_v2, 4  ;;  %v8608_v4 = vpop.f32.mrb[2].mxu0  ;;  %v8630_v29 = vsel %vm850_vm1, %v8624_v25, 0.0  ;;  %v8632_v30 = vpop.f32.mrb[2].mxu1 }
 0x154   : > { %v833_v6 = vadd.f32 %v832_v1, %v8602_v63  ;;  %v858_v7 = vrot.slane %v8608_v4, 4  ;;  %v8615_v8 = vpop.f32.mrb[3].mxu0  ;;  %v8638_v35 = vadd.f32 %v844_v24, %v8621_v15  ;;  %v8640_v36 = vpop.f32.mrb[3].mxu1  ;;  %v852_v41 = vrot.slane %v8630_v29, 4 }
 0x155   : > { %v839_v9 = vadd.f32 %v838_v3, %v8605_v2  ;;  %v864_v10 = vrot.slane %v8615_v8, 4 }
 0x156   : > { %v834_v11 = vrot.slane %v833_v6, 2  ;;  %v859_v12 = vadd.f32 %v858_v7, %v8608_v4 }
 0x157   : > { %v840_v13 = vrot.slane %v839_v9, 2  ;;  %v865_v14 = vadd.f32 %v864_v10, %v8615_v8 }
 0x158   : > { %v835_v16 = vadd.f32 %v834_v11, %v833_v6  ;;  %v860_v20 = vrot.slane %v859_v12, 2 }
 0x159   : > { %v841_v26 = vadd.f32 %v840_v13, %v839_v9  ;;  %v866_v27 = vrot.slane %v865_v14, 2  ;;  %v8626_v28 = vpop.f32.mrb[4].mxu0  ;;  %v8666_v61 = vpop.f32.mrb[4].mxu1 }
 0x15a   : > { %v836_v31 = vrot.slane %v835_v16, 1  ;;  %v861_v32 = vadd.f32 %v860_v20, %v859_v12  ;;  %v883_v33 = vrot.slane %v8626_v28, 4  ;;  %v8635_v34 = vpop.f32.mrb[5].mxu0  ;;  %v8671_v6 = vpop.f32.mrb[5].mxu1 }
 0x15b   : > { %v842_v37 = vrot.slane %v841_v26, 1  ;;  %v867_v38 = vadd.f32 %v866_v27, %v865_v14  ;;  %v889_v39 = vrot.slane %v8635_v34, 4  ;;  %v8643_v40 = vpop.f32.mrb[6].mxu0  ;;  %v8678_v13 = vpop.f32.mrb[6].mxu1 }
 0x15c   : > { %v837_v42 = vadd.f32 %v836_v31, %v835_v16  ;;  %v862_v43 = vrot.slane %v861_v32, 1  ;;  %v884_v44 = vadd.f32 %v883_v33, %v8626_v28  ;;  %v908_v45 = vrot.slane %v8643_v40, 4  ;;  %v8648_v46 = vpop.f32.mrb[7].mxu0 }
 0x15d   : > { %v843_v48 = vadd.f32 %v842_v37, %v841_v26  ;;  %v868_v49 = vrot.slane %v867_v38, 1  ;;  %v890_v50 = vadd.f32 %v889_v39, %v8635_v34  ;;  %v914_v22 = vrot.slane %v8648_v46, 4  ;;  %v8687_v26 = vpop.f32.mrb[7].mxu1 }
 0x15e   : > { %v1234_v23 = vmul.f32 0.125, %v837_v42  ;;  %v863_v53 = vadd.f32 %v862_v43, %v861_v32  ;;  %v885_v54 = vrot.slane %v884_v44, 2  ;;  %v909_v55 = vadd.f32 %v908_v45, %v8643_v40 }
 0x15f   : > { %v1235_v57 = vmul.f32 0.125, %v843_v48  ;;  %v869_v58 = vadd.f32 %v868_v49, %v867_v38  ;;  %v891_v59 = vrot.slane %v890_v50, 2  ;;  %v915_v60 = vadd.f32 %v914_v22, %v8648_v46  ;;  %v7480_v22 = vld [vmem:[%s11412_s4 + $0x124] ss:$12 sps:$4 sm:$0xff]  }
 0x160   : > { %v8669_v62 = vsub.f32 %v8602_v63, %v1234_v23  ;;  %v1238_v1 = vmul.f32 0.125, %v863_v53  ;;  %v886_v3 = vadd.f32 %v885_v54, %v884_v44  ;;  %v910_v5 = vrot.slane %v909_v55, 2  ;;  %3162 = vmatprep.subr.bf16.mxu0 %v7480_v22 }
 0x161   : > { %v8674_v7 = vsub.f32 %v8605_v2, %v1235_v57  ;;  %v1239_v9 = vmul.f32 0.125, %v869_v58  ;;  %v892_v10 = vadd.f32 %v891_v59, %v890_v50  ;;  %v916_v11 = vrot.slane %v915_v60, 2  ;;  %v8676_v12 = vpop.f32.mrb[8].mxu0  ;;  %v8705_v54 = vpop.f32.mrb[8].mxu1 }
 0x162   : > { %v1362_v63 = vmul.f32 %v8669_v62, %v8669_v62  ;;  %v8683_v14 = vsub.f32 %v8608_v4, %v1238_v1  ;;  %v887_v16 = vrot.slane %v886_v3, 1  ;;  %v911_v20 = vadd.f32 %v910_v5, %v909_v55  ;;  %v8685_v24 = vpop.f32.mrb[9].mxu0  ;;  %v7478_v55 = vld [vmem:[%s11412_s4 + $0x120] ss:$12 sps:$4 sm:$0xff]  }
 0x163   : > { %v1363_v2 = vmul.f32 %v8674_v7, %v8674_v7  ;;  %v8692_v27 = vsub.f32 %v8615_v8, %v1239_v9  ;;  %v893_v31 = vrot.slane %v892_v10, 1  ;;  %v917_v32 = vadd.f32 %v916_v11, %v915_v60  ;;  %v8694_v33 = vpop.f32.mrb[10].mxu0  ;;  %v8713_v60 = vpop.f32.mrb[9].mxu1  ;;  %3163 = vmatpush1.bf16.msra.mxu0 %v7478_v55 }
 0x164   : > { %v1426_v37 = vrot.slane %v1362_v63, 4  ;;  %v1366_v4 = vmul.f32 %v8683_v14, %v8683_v14  ;;  %v888_v38 = vadd.f32 %v887_v16, %v886_v3  ;;  %v912_v39 = vrot.slane %v911_v20, 1  ;;  %v8698_v42 = vpop.f32.mrb[11].mxu0  ;;  %v8720_v11 = vpop.f32.mrb[10].mxu1 }
 0x165   : > { %v1432_v43 = vrot.slane %v1363_v2, 4  ;;  %v1367_v44 = vmul.f32 %v8692_v27, %v8692_v27  ;;  %v894_v45 = vadd.f32 %v893_v31, %v892_v10  ;;  %v918_v47 = vrot.slane %v917_v32, 1  ;;  %v8729_v31 = vpop.f32.mrb[11].mxu1 }
 0x166   : > { %v1427_v8 = vadd.f32 %v1426_v37, %v1362_v63  ;;  %v1451_v48 = vrot.slane %v1366_v4, 4  ;;  %v1242_v49 = vmul.f32 0.125, %v888_v38  ;;  %v913_v50 = vadd.f32 %v912_v39, %v911_v20 }
 0x167   : > { %v1433_v51 = vadd.f32 %v1432_v43, %v1363_v2  ;;  %v1457_v52 = vrot.slane %v1367_v44, 4  ;;  %v1243_v23 = vmul.f32 0.125, %v894_v45  ;;  %v919_v53 = vadd.f32 %v918_v47, %v917_v32 }
 0x168   : > { %v1428_v56 = vrot.slane %v1427_v8, 2  ;;  %v1452_v57 = vadd.f32 %v1451_v48, %v1366_v4  ;;  %v8711_v58 = vsub.f32 %v8626_v28, %v1242_v49  ;;  %v1246_v59 = vmul.f32 0.125, %v913_v50 }
 0x169   : > { %v1434_v1 = vrot.slane %v1433_v51, 2  ;;  %v1458_v3 = vadd.f32 %v1457_v52, %v1367_v44  ;;  %v8716_v5 = vsub.f32 %v8635_v34, %v1243_v23  ;;  %v1247_v9 = vmul.f32 0.125, %v919_v53  ;;  %v8718_v10 = vpop.f32.mrb[12].mxu0  ;;  %v7481_v52 = vld [vmem:[%s11412_s4 + $0x128] ss:$12 sps:$4 sm:$0xff]  }
 0x16a   : > { %v1429_v63 = vadd.f32 %v1428_v56, %v1427_v8  ;;  %v1453_v16 = vrot.slane %v1452_v57, 2  ;;  %v1370_v28 = vmul.f32 %v8711_v58, %v8711_v58  ;;  %v8725_v20 = vsub.f32 %v8643_v40, %v1246_v59  ;;  %v8727_v2 = vpop.f32.mrb[13].mxu0  ;;  %7044 = vmatprep.subr.bf16.mxu1 %v7481_v52 }
 0x16b   : > { %v1435_v34 = vadd.f32 %v1434_v1, %v1433_v51  ;;  %v1459_v32 = vrot.slane %v1458_v3, 2  ;;  %v1371_v37 = vmul.f32 %v8716_v5, %v8716_v5  ;;  %v8734_v4 = vsub.f32 %v8648_v46, %v1247_v9  ;;  %v8736_v38 = vpop.f32.mrb[14].mxu0 }
 0x16c   : > { %v1430_v39 = vrot.slane %v1429_v63, 1  ;;  %v1454_v43 = vadd.f32 %v1453_v16, %v1452_v57  ;;  %v1476_v44 = vrot.slane %v1370_v28, 4  ;;  %v1374_v40 = vmul.f32 %v8725_v20, %v8725_v20  ;;  %v8740_v45 = vpop.f32.mrb[15].mxu0  ;;  %v8747_v57 = vpop.f32.mrb[12].mxu1 }
 0x16d   : > { %v1436_v47 = vrot.slane %v1435_v34, 1  ;;  %v1460_v8 = vadd.f32 %v1459_v32, %v1458_v3  ;;  %v1482_v48 = vrot.slane %v1371_v37, 4  ;;  %v1375_v49 = vmul.f32 %v8734_v4, %v8734_v4  ;;  %v8749_v16 = vpop.f32.mrb[13].mxu1 }
 0x16e   : > { %v1431_v50 = vadd.f32 %v1430_v39, %v1429_v63  ;;  %v1455_v22 = vrot.slane %v1454_v43, 1  ;;  %v1477_v46 = vadd.f32 %v1476_v44, %v1370_v28  ;;  %v1501_v51 = vrot.slane %v1374_v40, 4  ;;  %v8753_v17 = vpop.f32.mrb[14].mxu1 }
 0x16f   : > { %v1437_v23 = vadd.f32 %v1436_v47, %v1435_v34  ;;  %v1461_v53 = vrot.slane %v1460_v8, 1  ;;  %v1483_v55 = vadd.f32 %v1482_v48, %v1371_v37  ;;  %v1507_v56 = vrot.slane %v1375_v49, 4 }
 0x170   : > { %v1826_v59 = vmul.f32 0.125, %v1431_v50  ;;  %v1456_v1 = vadd.f32 %v1455_v22, %v1454_v43  ;;  %v1478_v3 = vrot.slane %v1477_v46, 2  ;;  %v1502_v9 = vadd.f32 %v1501_v51, %v1374_v40 }
 0x171   : > { %v1827_v63 = vmul.f32 0.125, %v1437_v23  ;;  %v1462_v28 = vadd.f32 %v1461_v53, %v1460_v8  ;;  %v1484_v32 = vrot.slane %v1483_v55, 2  ;;  %v1508_v39 = vadd.f32 %v1507_v56, %v1375_v49  ;;  %v8751_v44 = vpop.f32.mrb[16].mxu0 }
 0x172   : > { %v1890_v34 = vadd.f32 1e-05, %v1826_v59  ;;  %v1830_v37 = vmul.f32 0.125, %v1456_v1  ;;  %v1479_v47 = vadd.f32 %v1478_v3, %v1477_v46  ;;  %v1503_v48 = vrot.slane %v1502_v9, 2  ;;  %v8755_v21 = vpop.f32.mrb[17].mxu0  ;;  %v8761_v46 = vpop.f32.mrb[15].mxu1 }
 0x173   : > { %v1891_v43 = vadd.f32 1e-05, %v1827_v63  ;;  %v1831_v50 = vmul.f32 0.125, %v1462_v28  ;;  %v1485_v40 = vadd.f32 %v1484_v32, %v1483_v55  ;;  %v1509_v22 = vrot.slane %v1508_v39, 2  ;;  %v8757_v51 = vpop.f32.mrb[18].mxu0  ;;  %v8825_v18 = vpop.f32.mrb[16].mxu1 }
 0x174   : > { %7610 = vrsqrt.f32 %v1890_v34  ;;  %v1894_v8 = vadd.f32 1e-05, %v1830_v37  ;;  %v1480_v52 = vrot.slane %v1479_v47, 1  ;;  %v1504_v49 = vadd.f32 %v1503_v48, %v1502_v9  ;;  %v8759_v23 = vpop.f32.mrb[19].mxu0  ;;  %11487 = vst [vmem:[#allocation17_spill] sm:$0xff] %v8825_v18 }
 0x175   : > { %7612 = vrsqrt.f32 %v1891_v43  ;;  %v1895_v53 = vadd.f32 1e-05, %v1831_v50  ;;  %v1486_v56 = vrot.slane %v1485_v40, 1  ;;  %v1510_v59 = vadd.f32 %v1509_v22, %v1508_v39 }
 0x176   : > { %7614 = vrsqrt.f32 %v1894_v8  ;;  %v1481_v1 = vadd.f32 %v1480_v52, %v1479_v47  ;;  %v1505_v3 = vrot.slane %v1504_v49, 1  ;;  %v846_v55 = vrot.slane %v8638_v35, 2 }
 0x177   : > { %7616 = vrsqrt.f32 %v1895_v53  ;;  %v1487_v63 = vadd.f32 %v1486_v56, %v1485_v40  ;;  %v1511_v28 = vrot.slane %v1510_v59, 1  ;;  %v853_v9 = vadd.f32 %v852_v41, %v8630_v29 }
 0x178   : > { %v1834_v32 = vmul.f32 0.125, %v1481_v1  ;;  %v1506_v34 = vadd.f32 %v1505_v3, %v1504_v49  ;;  %v847_v37 = vadd.f32 %v846_v55, %v8638_v35  ;;  %v933_v39 = vrot.slane %v8676_v12, 4 }
 0x179   : > { %v1835_v48 = vmul.f32 0.125, %v1487_v63  ;;  %v1512_v43 = vadd.f32 %v1511_v28, %v1510_v59  ;;  %v854_v50 = vrot.slane %v853_v9, 2  ;;  %v870_v47 = vrot.slane %v8632_v30, 4  ;;  %v8770_v22 = vpop.f32.mrb[20].mxu0  ;;  %v7482_v59 = vld [vmem:[%s11412_s4 + $0x68] ss:$12 sps:$4 sm:$0xff]  }
 0x17a   : > { %v1898_v8 = vadd.f32 1e-05, %v1834_v32  ;;  %v1838_v40 = vmul.f32 0.125, %v1506_v34  ;;  %v848_v52 = vrot.slane %v847_v37, 1  ;;  %v934_v53 = vadd.f32 %v933_v39, %v8676_v12  ;;  %v8773_v56 = vpop.f32.mrb[21].mxu0  ;;  %7045 = vmatpush3.bf16.msra.mxu1 %v7482_v59 }
 0x17b   : > { %v1899_v29 = vadd.f32 1e-05, %v1835_v48  ;;  %v1839_v41 = vmul.f32 0.125, %v1512_v43  ;;  %v855_v49 = vadd.f32 %v854_v50, %v853_v9  ;;  %v871_v35 = vadd.f32 %v870_v47, %v8632_v30  ;;  %v8780_v43 = vpop.f32.mrb[22].mxu0 }
 0x17c   : > { %7618 = vrsqrt.f32 %v1898_v8  ;;  %v1902_v1 = vadd.f32 1e-05, %v1838_v40  ;;  %v849_v3 = vadd.f32 %v848_v52, %v847_v37  ;;  %v935_v55 = vrot.slane %v934_v53, 2 }
 0x17d   : > { %7620 = vrsqrt.f32 %v1899_v29  ;;  %v1903_v63 = vadd.f32 1e-05, %v1839_v41  ;;  %v856_v28 = vrot.slane %v855_v49, 1  ;;  %v872_v32 = vrot.slane %v871_v35, 2 }
 0x17e   : > { %v7611_v34 = vpop.eup %7610  ;;  %v1236_v39 = vmul.f32 0.125, %v849_v3  ;;  %v936_v48 = vadd.f32 %v935_v55, %v934_v53  ;;  %v939_v9 = vrot.slane %v8685_v24, 4  ;;  %7622 = vrsqrt.f32 %v1902_v1 }
 0x17f   : > { %v7613_v50 = vpop.eup %7612  ;;  %v2018_v47 = vmul.f32 %v7611_v34, %v8669_v62  ;;  %v857_v19 = vadd.f32 %v856_v28, %v855_v49  ;;  %v873_v8 = vadd.f32 %v872_v32, %v871_v35  ;;  %7624 = vrsqrt.f32 %v1903_v63  ;;  %v8795_v34 = vpop.f32.mrb[23].mxu0 }
 0x180   : > { %v7615_v40 = vpop.eup %7614  ;;  %v8784_v37 = vsub.f32 %v8621_v15, %v1236_v39  ;;  %v937_v52 = vrot.slane %v936_v48, 1  ;;  %v940_v29 = vadd.f32 %v939_v9, %v8685_v24  ;;  %v876_v32 = vsel %vm850_vm1, %v8640_v36, 0.0  ;;  %11484 = vst [vmem:[#allocation14_spill] sm:$0xff] %v8795_v34 }
 0x181   : > { %v7617_v41 = vpop.eup %7616  ;;  %v2022_v53 = vmul.f32 %v7615_v40, %v8683_v14  ;;  %v1237_v59 = vmul.f32 0.125, %v857_v19  ;;  %v874_v3 = vrot.slane %v873_v8, 1  ;;  %v2082_v55 = vmax.f32 %v2018_v47, 0.0  ;;  %v7485_v19 = vld [vmem:[%s11412_s4 + $0x13c] ss:$12 sps:$4 sm:$0xff]  }
 0x182   : > { %v1364_v62 = vmul.f32 %v8784_v37, %v8784_v37  ;;  %v938_v49 = vadd.f32 %v937_v52, %v936_v48  ;;  %v941_v35 = vrot.slane %v940_v29, 2  ;;  %v877_v9 = vrot.slane %v876_v32, 4  ;;  %v7483_v48 = vld [vmem:[%s11412_s4 + $0x138] ss:$12 sps:$4 sm:$0xff]   ;;  %3164 = vmatprep.subr.bf16.mxu0 %v7485_v19  ;;  %v7486_v52 = vld [vmem:[%s11412_s4 + $0x140] ss:$12 sps:$4 sm:$0xff]  }
 0x183   : > { %v2086_v28 = vmax.f32 %v2022_v53, 0.0  ;;  %v8791_v1 = vsub.f32 %v8624_v25, %v1237_v59  ;;  %v875_v15 = vadd.f32 %v874_v3, %v873_v8  ;;  %v958_v40 = vrot.slane %v8694_v33, 4  ;;  %3165 = vmatpush1.bf16.msra.mxu0 %v7483_v48  ;;  %7046 = vmatprep.subr.bf16.mxu1 %v7486_v52 }
 0x184   : > { %v1438_v14 = vrot.slane %v1364_v62, 4  ;;  %v1250_v63 = vmul.f32 0.125, %v938_v49  ;;  %v942_v39 = vadd.f32 %v941_v35, %v940_v29  ;;  %v7487_v29 = vld [vmem:[%s11412_s4 + $0x80] ss:$12 sps:$4 sm:$0xff]   ;;  %v878_v49 = vadd.f32 %v877_v9, %v876_v32 }
 0x185   : > { %v8803_v25 = vpack.c.bf16 %v2086_v28, %v2082_v55  ;;  %v1365_v47 = vmul.f32 %v8791_v1, %v8791_v1  ;;  %v1240_v8 = vmul.f32 0.125, %v875_v15  ;;  %v8818_v28 = vmul.f32 %v7613_v50, %v8674_v7  ;;  %7047 = vmatpush3.bf16.msra.mxu1 %v7487_v29  ;;  %v8832_v7 = vpop.f32.mrb[17].mxu1 }
 0x186   : > { %v7619_v53 = vpop.eup %7618  ;;  %v1439_v59 = vadd.f32 %v1438_v14, %v1364_v62  ;;  %v8815_v3 = vsub.f32 %v8676_v12, %v1250_v63  ;;  %v943_v55 = vrot.slane %v942_v39, 1  ;;  %v959_v0 = vadd.f32 %v958_v40, %v8694_v33  ;;  %11489 = vst [vmem:[#allocation19_spill] sm:$0xff] %v8832_v7 }
 0x187   : > { %11485 = vst [vmem:[#allocation15_spill] sm:$0xff] %v8803_v25  ;;  %v7621_v35 = vpop.eup %7620  ;;  %11486 = vst [vmem:[#allocation16_spill] sm:$0xff] %v8818_v28  ;;  %v1444_v15 = vsel %vm850_vm1, %v1365_v47, 0.0  ;;  %v8822_v19 = vsub.f32 %v8632_v30, %v1240_v8  ;;  %v8828_v12 = vmul.f32 %v7617_v41, %v8692_v27  ;;  %v8835_v50 = vmul.f32 %v7619_v53, %v8711_v58 }
 0x188   : > { %v1440_v62 = vrot.slane %v1439_v59, 2  ;;  %v1445_v32 = vrot.slane %v1444_v15, 4  ;;  %v1378_v14 = vmul.f32 %v8815_v3, %v8815_v3  ;;  %v944_v63 = vadd.f32 %v943_v55, %v942_v39  ;;  %v8839_v48 = vpop.eup %7622 }
 0x189   : > { %11488 = vst [vmem:[#allocation18_spill] sm:$0xff] %v8828_v12  ;;  %11490 = vst [vmem:[#allocation20_spill] sm:$0xff] %v8835_v50  ;;  %v1368_v30 = vmul.f32 %v8822_v19, %v8822_v19  ;;  %v879_v9 = vrot.slane %v878_v49, 2  ;;  %v8842_v27 = vmul.f32 %v7621_v35, %v8716_v5  ;;  %v8844_v40 = vpop.eup %7624  ;;  %v960_v58 = vrot.slane %v959_v0, 2 }
 0x18a   : > { %v1441_v41 = vadd.f32 %v1440_v62, %v1439_v59  ;;  %v1446_v47 = vadd.f32 %v1445_v32, %v1444_v15  ;;  %v1526_v8 = vrot.slane %v1378_v14, 4  ;;  %v1251_v29 = vmul.f32 0.125, %v944_v63  ;;  %v7490_v59 = vld [vmem:[%s11412_s4 + $0x154] ss:$12 sps:$4 sm:$0xff]  }
 0x18b   : > { %11491 = vst [vmem:[#allocation21_spill] sm:$0xff] %v8842_v27  ;;  %v1463_v52 = vrot.slane %v1368_v30, 4  ;;  %v880_v25 = vadd.f32 %v879_v9, %v878_v49  ;;  %v964_v39 = vrot.slane %v8698_v42, 4  ;;  %v961_v35 = vadd.f32 %v960_v58, %v959_v0  ;;  %3166 = vmatprep.subr.bf16.mxu0 %v7490_v59  ;;  %v8859_v0 = vpop.f32.mrb[24].mxu0 }
 0x18c   : > { %v1442_v53 = vrot.slane %v1441_v41, 1  ;;  %v1447_v50 = vrot.slane %v1446_v47, 2  ;;  %v1527_v12 = vadd.f32 %v1526_v8, %v1378_v14  ;;  %v8848_v28 = vsub.f32 %v8685_v24, %v1251_v29  ;;  %v7488_v14 = vld [vmem:[%s11412_s4 + $0x150] ss:$12 sps:$4 sm:$0xff]  }
 0x18d   : > { %v1464_v55 = vadd.f32 %v1463_v52, %v1368_v30  ;;  %v881_v5 = vrot.slane %v880_v25, 1  ;;  %v965_v49 = vadd.f32 %v964_v39, %v8698_v42  ;;  %v962_v9 = vrot.slane %v961_v35, 1  ;;  %3167 = vmatpush1.bf16.msra.mxu0 %v7488_v14  ;;  %v8861_v39 = vpop.f32.mrb[18].mxu1 }
 0x18e   : > { %v1443_v15 = vadd.f32 %v1442_v53, %v1441_v41  ;;  %v1448_v62 = vadd.f32 %v1447_v50, %v1446_v47  ;;  %v1528_v32 = vrot.slane %v1527_v12, 2  ;;  %v1379_v24 = vmul.f32 %v8848_v28, %v8848_v28 }
 0x18f   : > { %v1465_v63 = vrot.slane %v1464_v55, 2  ;;  %v882_v30 = vadd.f32 %v881_v5, %v880_v25  ;;  %v966_v50 = vrot.slane %v965_v49, 2  ;;  %v963_v53 = vadd.f32 %v962_v9, %v961_v35 }
 0x190   : > { %v1828_v8 = vmul.f32 0.125, %v1443_v15  ;;  %v1449_v52 = vrot.slane %v1448_v62, 1  ;;  %v1529_v41 = vadd.f32 %v1528_v32, %v1527_v12  ;;  %v1532_v29 = vrot.slane %v1379_v24, 4 }
 0x191   : > { %v1466_v47 = vadd.f32 %v1465_v63, %v1464_v55  ;;  %v1241_v58 = vmul.f32 0.125, %v882_v30  ;;  %v967_v34 = vadd.f32 %v966_v50, %v965_v49  ;;  %v1254_v15 = vmul.f32 0.125, %v963_v53  ;;  %v7491_v55 = vld [vmem:[%s11412_s4 + $0x158] ss:$12 sps:$4 sm:$0xff]  }
 0x192   : > { %v1892_v27 = vadd.f32 1e-05, %v1828_v8  ;;  %v1450_v7 = vadd.f32 %v1449_v52, %v1448_v62  ;;  %v1530_v18 = vrot.slane %v1529_v41, 1  ;;  %v1533_v5 = vadd.f32 %v1532_v29, %v1379_v24  ;;  %7048 = vmatprep.subr.bf16.mxu1 %v7491_v55  ;;  %v8878_v52 = vpop.f32.mrb[25].mxu0 }
 0x193   : > { %v1467_v25 = vrot.slane %v1466_v47, 1  ;;  %v8864_v59 = vsub.f32 %v8640_v36, %v1241_v58  ;;  %v968_v14 = vrot.slane %v967_v34, 1  ;;  %v8872_v49 = vsub.f32 %v8694_v33, %v1254_v15 }
 0x194   : > { %7626 = vrsqrt.f32 %v1892_v27  ;;  %v1829_v12 = vmul.f32 0.125, %v1450_v7  ;;  %v1531_v32 = vadd.f32 %v1530_v18, %v1529_v41  ;;  %v1534_v63 = vrot.slane %v1533_v5, 2 }
 0x195   : > { %v1468_v35 = vadd.f32 %v1467_v25, %v1466_v47  ;;  %v1369_v62 = vmul.f32 %v8864_v59, %v8864_v59  ;;  %v969_v30 = vadd.f32 %v968_v14, %v967_v34  ;;  %v895_v27 = vrot.slane %v8666_v61, 4 }
 0x196   : > { %v1893_v24 = vadd.f32 1e-05, %v1829_v12  ;;  %v1842_v36 = vmul.f32 0.125, %v1531_v32  ;;  %v1535_v7 = vadd.f32 %v1534_v63, %v1533_v5  ;;  %v1382_v8 = vmul.f32 %v8872_v49, %v8872_v49 }
 0x197   : > { %v1832_v18 = vmul.f32 0.125, %v1468_v35  ;;  %v1469_v9 = vsel %vm850_vm1, %v1369_v62, 0.0  ;;  %v1255_v33 = vmul.f32 0.125, %v969_v30  ;;  %v896_v34 = vadd.f32 %v895_v27, %v8666_v61 }
 0x198   : > { %7628 = vrsqrt.f32 %v1893_v24  ;;  %v1906_v41 = vadd.f32 1e-05, %v1842_v36  ;;  %v1470_v50 = vrot.slane %v1469_v9, 4  ;;  %v1536_v29 = vrot.slane %v1535_v7, 1 }
 0x199   : > { %v1896_v47 = vadd.f32 1e-05, %v1832_v18  ;;  %v1551_v58 = vrot.slane %v1382_v8, 4  ;;  %v8883_v53 = vmul.f32 %v8839_v48, %v8725_v20  ;;  %v8886_v5 = vsub.f32 %v8698_v42, %v1255_v33  ;;  %v8895_v33 = vpop.f32.mrb[19].mxu1 }
 0x19a   : > { %v1471_v25 = vadd.f32 %v1470_v50, %v1469_v9  ;;  %v901_v15 = vsel %vm850_vm1, %v8671_v6, 0.0  ;;  %v1537_v12 = vadd.f32 %v1536_v29, %v1535_v7  ;;  %v897_v14 = vrot.slane %v896_v34, 2 }
 0x19b   : > { %11492 = vst [vmem:[#allocation22_spill] sm:$0xff] %v8883_v53  ;;  %7630 = vrsqrt.f32 %v1896_v47  ;;  %v1552_v32 = vadd.f32 %v1551_v58, %v1382_v8  ;;  %v1383_v35 = vmul.f32 %v8886_v5, %v8886_v5  ;;  %v902_v63 = vrot.slane %v901_v15, 4 }
 0x19c   : > { %v1472_v55 = vrot.slane %v1471_v25, 2  ;;  %v983_v62 = vrot.slane %v8718_v10, 4  ;;  %7632 = vrsqrt.f32 %v1906_v41  ;;  %v1843_v20 = vmul.f32 0.125, %v1537_v12 }
 0x19d   : > { %v1553_v48 = vrot.slane %v1552_v32, 2  ;;  %v898_v24 = vadd.f32 %v897_v14, %v896_v34  ;;  %v1557_v30 = vrot.slane %v1383_v35, 4  ;;  %v903_v27 = vadd.f32 %v902_v63, %v901_v15 }
 0x19e   : > { %v7627_v42 = vpop.eup %7626  ;;  %v1473_v36 = vadd.f32 %v1472_v55, %v1471_v25  ;;  %v984_v18 = vadd.f32 %v983_v62, %v8718_v10  ;;  %v1907_v7 = vadd.f32 1e-05, %v1843_v20  ;;  %v920_v50 = vrot.slane %v8678_v13, 4 }
 0x19f   : > { %v1554_v9 = vadd.f32 %v1553_v48, %v1552_v32  ;;  %v899_v8 = vrot.slane %v898_v24, 1  ;;  %v1558_v29 = vadd.f32 %v1557_v30, %v1383_v35  ;;  %v904_v58 = vrot.slane %v903_v27, 2 }
 0x1a0   : > { %v1474_v47 = vrot.slane %v1473_v36, 1  ;;  %v985_v41 = vrot.slane %v984_v18, 2  ;;  %v2020_v12 = vmul.f32 %v7627_v42, %v8784_v37  ;;  %7634 = vrsqrt.f32 %v1907_v7  ;;  %v7492_v37 = vld [vmem:[%s11412_s4 + $0x98] ss:$12 sps:$4 sm:$0xff]  }
 0x1a1   : > { %v1555_v34 = vrot.slane %v1554_v9, 1  ;;  %v900_v25 = vadd.f32 %v899_v8, %v898_v24  ;;  %v1559_v55 = vrot.slane %v1558_v29, 2  ;;  %v905_v63 = vadd.f32 %v904_v58, %v903_v27  ;;  %7049 = vmatpush3.bf16.msra.mxu1 %v7492_v37  ;;  %v8913_v58 = vpop.f32.mrb[26].mxu0 }
 0x1a2   : > { %v7629_v14 = vpop.eup %7628  ;;  %v1475_v15 = vadd.f32 %v1474_v47, %v1473_v36  ;;  %v986_v62 = vadd.f32 %v985_v41, %v984_v18  ;;  %v8900_v32 = vmul.f32 %v8844_v40, %v8734_v4  ;;  %v921_v35 = vadd.f32 %v920_v50, %v8678_v13 }
 0x1a3   : > { %v1556_v20 = vadd.f32 %v1555_v34, %v1554_v9  ;;  %v1244_v48 = vmul.f32 0.125, %v900_v25  ;;  %v1560_v30 = vadd.f32 %v1559_v55, %v1558_v29  ;;  %v906_v24 = vrot.slane %v905_v63, 1 }
 0x1a4   : > { %11493 = vst [vmem:[#allocation23_spill] sm:$0xff] %v8900_v32  ;;  %v1833_v42 = vmul.f32 0.125, %v1475_v15  ;;  %v987_v7 = vrot.slane %v986_v62, 1  ;;  %v2084_v8 = vmax.f32 %v2020_v12, 0.0  ;;  %v8907_v27 = vmul.f32 %v7629_v14, %v8791_v1 }
 0x1a5   : > { %v7631_v36 = vpop.eup %7630  ;;  %v1846_v18 = vmul.f32 0.125, %v1556_v20  ;;  %v8910_v4 = vsub.f32 %v8666_v61, %v1244_v48  ;;  %v1561_v50 = vrot.slane %v1560_v30, 1  ;;  %v907_v47 = vadd.f32 %v906_v24, %v905_v63  ;;  %v8918_v48 = vpop.f32.mrb[27].mxu0 }
 0x1a6   : > { %v2024_v40 = vmul.f32 %v7631_v36, %v8822_v19  ;;  %v1897_v9 = vadd.f32 1e-05, %v1833_v42  ;;  %v7633_v29 = vpop.eup %7632  ;;  %v988_v34 = vadd.f32 %v987_v7, %v986_v62  ;;  %v922_v1 = vrot.slane %v921_v35, 2 }
 0x1a7   : > { %v1910_v41 = vadd.f32 1e-05, %v1846_v18  ;;  %v1372_v12 = vmul.f32 %v8910_v4, %v8910_v4  ;;  %v1562_v14 = vadd.f32 %v1561_v50, %v1560_v30  ;;  %v1245_v61 = vmul.f32 0.125, %v907_v47  ;;  %v7496_v47 = vld [vmem:[%s11412_s4 + $0x170] ss:$12 sps:$4 sm:$0xff]  }
 0x1a8   : > { %v2088_v25 = vmax.f32 %v2024_v40, 0.0  ;;  %7636 = vrsqrt.f32 %v1897_v9  ;;  %v1258_v19 = vmul.f32 0.125, %v988_v34  ;;  %v923_v20 = vadd.f32 %v922_v1, %v921_v35  ;;  %v7493_v1 = vld [vmem:[%s11412_s4 + $0x168] ss:$12 sps:$4 sm:$0xff]   ;;  %7050 = vmatprep.subr.bf16.mxu1 %v7496_v47 }
 0x1a9   : > { %v1488_v55 = vrot.slane %v1372_v12, 4  ;;  %v8921_v63 = vmul.f32 %v7633_v29, %v8815_v3  ;;  %v8926_v42 = vsub.f32 %v8671_v6, %v1245_v61  ;;  %v989_v62 = vrot.slane %v8727_v2, 4 }
 0x1aa   : > { %v8923_v37 = vpack.c.bf16 %v2088_v25, %v2084_v8  ;;  %v7635_v24 = vpop.eup %7634  ;;  %v8930_v7 = vsub.f32 %v8718_v10, %v1258_v19  ;;  %v924_v36 = vrot.slane %v923_v20, 1  ;;  %v926_v35 = vsel %vm850_vm1, %v8687_v26, 0.0  ;;  %v7495_v10 = vld [vmem:[%s11412_s4 + $0x16c] ss:$12 sps:$4 sm:$0xff]  }
 0x1ab   : > { %11494 = vst [vmem:[#allocation24_spill] sm:$0xff] %v8921_v63  ;;  %v1489_v30 = vadd.f32 %v1488_v55, %v1372_v12  ;;  %7638 = vrsqrt.f32 %v1910_v41  ;;  %v1847_v18 = vmul.f32 0.125, %v1562_v14  ;;  %v1373_v3 = vmul.f32 %v8926_v42, %v8926_v42  ;;  %3168 = vmatprep.subr.bf16.mxu0 %v7495_v10 }
 0x1ac   : > { %11495 = vst [vmem:[#allocation25_spill] sm:$0xff] %v8923_v37  ;;  %v990_v8 = vadd.f32 %v989_v62, %v8727_v2  ;;  %v1386_v40 = vmul.f32 %v8930_v7, %v8930_v7  ;;  %v925_v9 = vadd.f32 %v924_v36, %v923_v20  ;;  %v927_v50 = vrot.slane %v926_v35, 4  ;;  %3169 = vmatpush1.bf16.msra.mxu0 %v7493_v1 }
 0x1ad   : > { %v1490_v6 = vrot.slane %v1489_v30, 2  ;;  %v8946_v29 = vmul.f32 %v7635_v24, %v8848_v28  ;;  %v1494_v41 = vsel %vm850_vm1, %v1373_v3, 0.0  ;;  %v1008_v34 = vrot.slane %v8736_v38, 4  ;;  %v7497_v28 = vld [vmem:[%s11412_s4 + $0xb0] ss:$12 sps:$4 sm:$0xff]  }
 0x1ae   : > { %v991_v12 = vrot.slane %v990_v8, 2  ;;  %v1495_v14 = vrot.slane %v1494_v41, 4  ;;  %v1576_v61 = vrot.slane %v1386_v40, 4  ;;  %v1248_v55 = vmul.f32 0.125, %v925_v9  ;;  %7051 = vmatpush3.bf16.msra.mxu1 %v7497_v28 }
 0x1af   : > { %11496 = vst [vmem:[#allocation26_spill] sm:$0xff] %v8946_v29  ;;  %v1491_v25 = vadd.f32 %v1490_v6, %v1489_v30  ;;  %v1911_v19 = vadd.f32 1e-05, %v1847_v18  ;;  %v928_v62 = vadd.f32 %v927_v50, %v926_v35  ;;  %v1009_v24 = vadd.f32 %v1008_v34, %v8736_v38  ;;  %v8960_v6 = vpop.f32.mrb[20].mxu1 }
 0x1b0   : > { %v992_v20 = vadd.f32 %v991_v12, %v990_v8  ;;  %v1496_v3 = vadd.f32 %v1495_v14, %v1494_v41  ;;  %v1577_v15 = vadd.f32 %v1576_v61, %v1386_v40  ;;  %v8958_v30 = vsub.f32 %v8678_v13, %v1248_v55  ;;  %v8963_v8 = vpop.f32.mrb[21].mxu1 }
 0x1b1   : > { %v1492_v36 = vrot.slane %v1491_v25, 1  ;;  %v929_v47 = vrot.slane %v928_v62, 2  ;;  %v1010_v37 = vrot.slane %v1009_v24, 2  ;;  %v1014_v18 = vrot.slane %v8740_v45, 4  ;;  %11497 = vst [vmem:[#allocation27_spill] sm:$0xff] %v8963_v8 }
 0x1b2   : > { %v7637_v9 = vpop.eup %7636  ;;  %v993_v10 = vrot.slane %v992_v20, 1  ;;  %v11498_v35 = vmov 0   ;;  %v1497_v40 = vrot.slane %v1496_v3, 2  ;;  %v1578_v12 = vrot.slane %v1577_v15, 2 }
 0x1b3   : > { %3461 = vmatprep.subr.bf16.mxu1 %v11498_v35  ;;  %v2025_v50 = vmul.f32 %v7637_v9, %v8864_v59  ;;  %v1493_v41 = vadd.f32 %v1492_v36, %v1491_v25  ;;  %7640 = vrsqrt.f32 %v1911_v19  ;;  %v1376_v13 = vmul.f32 %v8958_v30, %v8958_v30 }
 0x1b4   : > { %v994_v34 = vadd.f32 %v993_v10, %v992_v20  ;;  %v930_v1 = vadd.f32 %v929_v47, %v928_v62  ;;  %v1498_v55 = vadd.f32 %v1497_v40, %v1496_v3  ;;  %v1579_v28 = vadd.f32 %v1578_v12, %v1577_v15 }
 0x1b5   : > { %v2089_v14 = vmax.f32 %v2025_v50, 0.0  ;;  %v1836_v61 = vmul.f32 0.125, %v1493_v41  ;;  %v7639_v63 = vpop.eup %7638  ;;  %v1513_v29 = vrot.slane %v1376_v13, 4  ;;  %v1011_v35 = vadd.f32 %v1010_v37, %v1009_v24 }
 0x1b6   : > { %v1259_v53 = vmul.f32 0.125, %v994_v34  ;;  %v931_v32 = vrot.slane %v930_v1, 1  ;;  %v11499_v59 = vmax.f32 %v8907_v27, 0.0  ;;  %v1499_v36 = vrot.slane %v1498_v55, 1 }
 0x1b7   : > { %v1580_v19 = vrot.slane %v1579_v28, 1  ;;  %v1015_v9 = vadd.f32 %v1014_v18, %v8740_v45  ;;  %v1514_v8 = vadd.f32 %v1513_v29, %v1376_v13  ;;  %v1012_v3 = vrot.slane %v1011_v35, 1 }
 0x1b8   : > { %v8971_v25 = vpack.c.bf16 %v2089_v14, %v11499_v59  ;;  %v8975_v20 = vsub.f32 %v8727_v2, %v1259_v53  ;;  %v932_v62 = vadd.f32 %v931_v32, %v930_v1  ;;  %v8978_v15 = vmul.f32 %v7639_v63, %v8872_v49 }
 0x1b9   : > { %v1900_v10 = vadd.f32 1e-05, %v1836_v61  ;;  %v1500_v47 = vadd.f32 %v1499_v36, %v1498_v55  ;;  %v1581_v37 = vadd.f32 %v1580_v19, %v1579_v28  ;;  %v1515_v24 = vrot.slane %v1514_v8, 2 }
 0x1ba   : > { %11500 = vst [vmem:[#allocation28_spill] sm:$0xff] %v8971_v25  ;;  %11501 = vst [vmem:[#allocation29_spill] sm:$0xff] %v8978_v15  ;;  %v1387_v27 = vmul.f32 %v8975_v20, %v8975_v20  ;;  %v1249_v50 = vmul.f32 0.125, %v932_v62  ;;  %v1013_v41 = vadd.f32 %v1012_v3, %v1011_v35  ;;  %v1016_v29 = vrot.slane %v1015_v9, 2 }
 0x1bb   : > { %v1837_v40 = vmul.f32 0.125, %v1500_v47  ;;  %v1850_v18 = vmul.f32 0.125, %v1581_v37  ;;  %v945_v2 = vrot.slane %v8705_v54, 4  ;;  %v1516_v53 = vadd.f32 %v1515_v24, %v1514_v8  ;;  %v8997_v37 = vpop.f32.mrb[28].mxu0 }
 0x1bc   : > { %v1582_v32 = vrot.slane %v1387_v27, 4  ;;  %v8984_v12 = vsub.f32 %v8687_v26, %v1249_v50  ;;  %v1262_v49 = vmul.f32 0.125, %v1013_v41  ;;  %7642 = vrsqrt.f32 %v1900_v10 }
 0x1bd   : > { %v1901_v63 = vadd.f32 1e-05, %v1837_v40  ;;  %v1017_v13 = vadd.f32 %v1016_v29, %v1015_v9  ;;  %v946_v34 = vadd.f32 %v945_v2, %v8705_v54  ;;  %v7641_v1 = vpop.eup %7640  ;;  %v1517_v14 = vrot.slane %v1516_v53, 1  ;;  %v9002_v40 = vpop.f32.mrb[29].mxu0 }
 0x1be   : > { %v1583_v61 = vadd.f32 %v1582_v32, %v1387_v27  ;;  %v1377_v35 = vmul.f32 %v8984_v12, %v8984_v12  ;;  %v8990_v55 = vsub.f32 %v8736_v38, %v1262_v49  ;;  %v951_v26 = vsel %vm850_vm1, %v8713_v60, 0.0  ;;  %v8999_v38 = vpop.f32.mrb[22].mxu1 }
 0x1bf   : > { %7644 = vrsqrt.f32 %v1901_v63  ;;  %v1018_v8 = vrot.slane %v1017_v13, 1  ;;  %v947_v28 = vrot.slane %v946_v34, 2  ;;  %v1914_v59 = vadd.f32 1e-05, %v1850_v18 }
 0x1c0   : > { %v1518_v36 = vadd.f32 %v1517_v14, %v1516_v53  ;;  %v1584_v19 = vrot.slane %v1583_v61, 2  ;;  %v1519_v9 = vsel %vm850_vm1, %v1377_v35, 0.0  ;;  %v1390_v3 = vmul.f32 %v8990_v55, %v8990_v55 }
 0x1c1   : > { %v1520_v62 = vrot.slane %v1519_v9, 4  ;;  %v1019_v10 = vadd.f32 %v1018_v8, %v1017_v13  ;;  %v948_v47 = vadd.f32 %v947_v28, %v946_v34  ;;  %v952_v50 = vrot.slane %v951_v26, 4 }
 0x1c2   : > { %v1840_v24 = vmul.f32 0.125, %v1518_v36  ;;  %v1585_v27 = vadd.f32 %v1584_v19, %v1583_v61  ;;  %v1033_v41 = vrot.slane %v8751_v44, 4  ;;  %v1601_v29 = vrot.slane %v1390_v3, 4  ;;  %v9007_v61 = vpop.f32.mrb[23].mxu1 }
 0x1c3   : > { %v1521_v18 = vadd.f32 %v1520_v62, %v1519_v9  ;;  %v1263_v2 = vmul.f32 0.125, %v1019_v10  ;;  %v949_v53 = vrot.slane %v948_v47, 1  ;;  %7646 = vrsqrt.f32 %v1914_v59 }
 0x1c4   : > { %v1904_v32 = vadd.f32 1e-05, %v1840_v24  ;;  %v1586_v49 = vrot.slane %v1585_v27, 1  ;;  %v953_v63 = vadd.f32 %v952_v50, %v951_v26  ;;  %v1602_v34 = vadd.f32 %v1601_v29, %v1390_v3 }
 0x1c5   : > { %v1522_v13 = vrot.slane %v1521_v18, 2  ;;  %v9005_v14 = vsub.f32 %v8740_v45, %v1263_v2  ;;  %v950_v35 = vadd.f32 %v949_v53, %v948_v47  ;;  %v9010_v8 = vmul.f32 %v7641_v1, %v8886_v5 }
 0x1c6   : > { %v1587_v28 = vadd.f32 %v1586_v49, %v1585_v27  ;;  %v954_v36 = vrot.slane %v953_v63, 2  ;;  %v1034_v19 = vadd.f32 %v1033_v41, %v8751_v44  ;;  %v7643_v9 = vpop.eup %7642  ;;  %v1603_v62 = vrot.slane %v1602_v34, 2 }
 0x1c7   : > { %v1523_v59 = vadd.f32 %v1522_v13, %v1521_v18  ;;  %v1391_v26 = vmul.f32 %v9005_v14, %v9005_v14  ;;  %v1252_v3 = vmul.f32 0.125, %v950_v35  ;;  %7648 = vrsqrt.f32 %v1904_v32 }
 0x1c8   : > { %v1851_v45 = vmul.f32 0.125, %v1587_v28  ;;  %v955_v10 = vadd.f32 %v954_v36, %v953_v63  ;;  %v1035_v47 = vrot.slane %v1034_v19, 2  ;;  %v1604_v29 = vadd.f32 %v1603_v62, %v1602_v34 }
 0x1c9   : > { %v7645_v24 = vpop.eup %7644  ;;  %v1524_v50 = vrot.slane %v1523_v59, 1  ;;  %v1607_v5 = vrot.slane %v1391_v26, 4  ;;  %v9016_v1 = vsub.f32 %v8705_v54, %v1252_v3  ;;  %v970_v18 = vrot.slane %v8720_v11, 4 }
 0x1ca   : > { %v1915_v27 = vadd.f32 1e-05, %v1851_v45  ;;  %v956_v41 = vrot.slane %v955_v10, 1  ;;  %v1036_v2 = vadd.f32 %v1035_v47, %v1034_v19  ;;  %v9020_v53 = vmul.f32 %v7643_v9, %v8910_v4 }
 0x1cb   : > { %v1525_v49 = vadd.f32 %v1524_v50, %v1523_v59  ;;  %v1605_v32 = vrot.slane %v1604_v29, 1  ;;  %v1608_v13 = vadd.f32 %v1607_v5, %v1391_v26  ;;  %v9023_v63 = vmul.f32 %v7645_v24, %v8926_v42  ;;  %v9029_v24 = vpop.f32.mrb[30].mxu0 }
 0x1cc   : > { %11502 = vst [vmem:[#allocation30_spill] sm:$0xff] %v9020_v53  ;;  %7650 = vrsqrt.f32 %v1915_v27  ;;  %v1380_v34 = vmul.f32 %v9016_v1, %v9016_v1  ;;  %v957_v54 = vadd.f32 %v956_v41, %v955_v10  ;;  %v1037_v19 = vrot.slane %v1036_v2, 1 }
 0x1cd   : > { %v1841_v35 = vmul.f32 0.125, %v1525_v49  ;;  %v1606_v28 = vadd.f32 %v1605_v32, %v1604_v29  ;;  %v1609_v36 = vrot.slane %v1608_v13, 2  ;;  %v7647_v62 = vpop.eup %7646  ;;  %v971_v4 = vadd.f32 %v970_v18, %v8720_v11 }
 0x1ce   : > { %v1538_v3 = vrot.slane %v1380_v34, 4  ;;  %v1253_v45 = vmul.f32 0.125, %v957_v54  ;;  %v1039_v9 = vrot.slane %v8755_v21, 4  ;;  %v1038_v47 = vadd.f32 %v1037_v19, %v1036_v2  ;;  %v9041_v54 = vpop.f32.mrb[31].mxu0 }
 0x1cf   : > { %v1905_v59 = vadd.f32 1e-05, %v1841_v35  ;;  %v1854_v26 = vmul.f32 0.125, %v1606_v28  ;;  %v1610_v42 = vadd.f32 %v1609_v36, %v1608_v13  ;;  %v972_v29 = vrot.slane %v971_v4, 2 }
 0x1d0   : > { %v1539_v50 = vadd.f32 %v1538_v3, %v1380_v34  ;;  %v9032_v10 = vsub.f32 %v8713_v60, %v1253_v45  ;;  %v1040_v5 = vadd.f32 %v1039_v9, %v8755_v21  ;;  %v9037_v41 = vmul.f32 %v7647_v62, %v8930_v7 }
 0x1d1   : > { %7652 = vrsqrt.f32 %v1905_v59  ;;  %v1611_v18 = vrot.slane %v1610_v42, 1  ;;  %v7649_v49 = vpop.eup %7648  ;;  %v1266_v13 = vmul.f32 0.125, %v1038_v47  ;;  %v973_v34 = vadd.f32 %v972_v29, %v971_v4 }
 0x1d2   : > { %11503 = vst [vmem:[#allocation31_spill] sm:$0xff] %v9037_v41  ;;  %v1540_v32 = vrot.slane %v1539_v50, 2  ;;  %v1381_v2 = vmul.f32 %v9032_v10, %v9032_v10  ;;  %v1918_v60 = vadd.f32 1e-05, %v1854_v26  ;;  %v1041_v28 = vrot.slane %v1040_v5, 2  ;;  %v9056_v41 = vpop.f32.mrb[24].mxu1 }
 0x1d3   : > { %v1612_v35 = vadd.f32 %v1611_v18, %v1610_v42  ;;  %v976_v36 = vsel %vm850_vm1, %v8729_v31, 0.0  ;;  %v9047_v62 = vsub.f32 %v8751_v44, %v1266_v13  ;;  %v974_v3 = vrot.slane %v973_v34, 1 }
 0x1d4   : > { %v1541_v19 = vadd.f32 %v1540_v32, %v1539_v50  ;;  %v1544_v7 = vsel %vm850_vm1, %v1381_v2, 0.0  ;;  %v1042_v59 = vadd.f32 %v1041_v28, %v1040_v5  ;;  %v977_v47 = vrot.slane %v976_v36, 4 }
 0x1d5   : > { %v1855_v45 = vmul.f32 0.125, %v1612_v35  ;;  %v1545_v9 = vrot.slane %v1544_v7, 4  ;;  %v1394_v26 = vmul.f32 %v9047_v62, %v9047_v62  ;;  %v975_v42 = vadd.f32 %v974_v3, %v973_v34 }
 0x1d6   : > { %v7651_v4 = vpop.eup %7650  ;;  %v1542_v29 = vrot.slane %v1541_v19, 1  ;;  %v1058_v18 = vrot.slane %v8757_v51, 4  ;;  %v9053_v50 = vmul.f32 %v7649_v49, %v8958_v30  ;;  %7654 = vrsqrt.f32 %v1918_v60  ;;  %v9061_v49 = vpop.f32.mrb[25].mxu1 }
 0x1d7   : > { %v1546_v32 = vadd.f32 %v1545_v9, %v1544_v7  ;;  %v1043_v44 = vrot.slane %v1042_v59, 1  ;;  %v1626_v13 = vrot.slane %v1394_v26, 4  ;;  %v1256_v35 = vmul.f32 0.125, %v975_v42  ;;  %v7500_v9 = vld [vmem:[%s11412_s4 + $0x184] ss:$12 sps:$4 sm:$0xff]  }
 0x1d8   : > { %11504 = vst [vmem:[#allocation32_spill] sm:$0xff] %v9053_v50  ;;  %v1543_v2 = vadd.f32 %v1542_v29, %v1541_v19  ;;  %v978_v27 = vadd.f32 %v977_v47, %v976_v36  ;;  %v1919_v5 = vadd.f32 1e-05, %v1855_v45  ;;  %v1059_v53 = vadd.f32 %v1058_v18, %v8757_v51  ;;  %3251 = vmatprep.subr.bf16.mxu0 %v7500_v9 }
 0x1d9   : > { %v1547_v28 = vrot.slane %v1546_v32, 2  ;;  %v1044_v25 = vadd.f32 %v1043_v44, %v1042_v59  ;;  %v1627_v3 = vadd.f32 %v1626_v13, %v1394_v26  ;;  %v9059_v15 = vsub.f32 %v8720_v11, %v1256_v35 }
 0x1da   : > { %v1844_v34 = vmul.f32 0.125, %v1543_v2  ;;  %v979_v30 = vrot.slane %v978_v27, 2  ;;  %v9064_v19 = vmul.f32 %v7651_v4, %v8975_v20  ;;  %v1060_v45 = vrot.slane %v1059_v53, 2 }
 0x1db   : > { %v7653_v60 = vpop.eup %7652  ;;  %v1548_v36 = vadd.f32 %v1547_v28, %v1546_v32  ;;  %v1267_v7 = vmul.f32 0.125, %v1044_v25  ;;  %v1628_v47 = vrot.slane %v1627_v3, 2  ;;  %v1384_v11 = vmul.f32 %v9059_v15, %v9059_v15 }
 0x1dc   : > { %v2033_v59 = vmul.f32 %v7653_v60, %v8984_v12  ;;  %v1064_v29 = vrot.slane %v8759_v23, 4  ;;  %v980_v20 = vadd.f32 %v979_v30, %v978_v27  ;;  %v1061_v4 = vadd.f32 %v1060_v45, %v1059_v53 }
 0x1dd   : > { %v1549_v26 = vrot.slane %v1548_v36, 1  ;;  %v9074_v42 = vsub.f32 %v8755_v21, %v1267_v7  ;;  %7656 = vrsqrt.f32 %v1919_v5  ;;  %v1908_v18 = vadd.f32 1e-05, %v1844_v34 }
 0x1de   : > { %v2097_v25 = vmax.f32 %v2033_v59, 0.0  ;;  %v1629_v32 = vadd.f32 %v1628_v47, %v1627_v3  ;;  %v1563_v2 = vrot.slane %v1384_v11, 4  ;;  %v981_v13 = vrot.slane %v980_v20, 1 }
 0x1df   : > { %v1550_v44 = vadd.f32 %v1549_v26, %v1548_v36  ;;  %v1395_v12 = vmul.f32 %v9074_v42, %v9074_v42  ;;  %v11505_v35 = vmax.f32 %v9023_v63, 0.0  ;;  %v1062_v21 = vrot.slane %v1061_v4, 1 }
 0x1e0   : > { %v1630_v60 = vrot.slane %v1629_v32, 1  ;;  %v1065_v27 = vadd.f32 %v1064_v29, %v8759_v23  ;;  %v7655_v53 = vpop.eup %7654  ;;  %v1564_v7 = vadd.f32 %v1563_v2, %v1384_v11  ;;  %v982_v34 = vadd.f32 %v981_v13, %v980_v20 }
 0x1e1   : > { %v9080_v28 = vpack.c.bf16 %v2097_v25, %v11505_v35  ;;  %v1845_v30 = vmul.f32 0.125, %v1550_v44  ;;  %v1632_v5 = vrot.slane %v1395_v12, 4  ;;  %v1063_v36 = vadd.f32 %v1062_v21, %v1061_v4 }
 0x1e2   : > { %v1631_v3 = vadd.f32 %v1630_v60, %v1629_v32  ;;  %v1066_v45 = vrot.slane %v1065_v27, 2  ;;  %v995_v9 = vrot.slane %v8747_v57, 4  ;;  %v1565_v47 = vrot.slane %v1564_v7, 2 }
 0x1e3   : > { %11506 = vst [vmem:[#allocation33_spill] sm:$0xff] %v9080_v28  ;;  %v1909_v59 = vadd.f32 1e-05, %v1845_v30  ;;  %v1633_v26 = vadd.f32 %v1632_v5, %v1395_v12  ;;  %v1257_v63 = vmul.f32 0.125, %v982_v34  ;;  %7658 = vrsqrt.f32 %v1908_v18 }
 0x1e4   : > { %v1858_v25 = vmul.f32 0.125, %v1631_v3  ;;  %v1270_v35 = vmul.f32 0.125, %v1063_v36  ;;  %v1067_v28 = vadd.f32 %v1066_v45, %v1065_v27  ;;  %v1566_v29 = vadd.f32 %v1565_v47, %v1564_v7 }
 0x1e5   : > { %7660 = vrsqrt.f32 %v1909_v59  ;;  %v1634_v50 = vrot.slane %v1633_v26, 2  ;;  %v9085_v11 = vsub.f32 %v8729_v31, %v1257_v63  ;;  %v996_v44 = vadd.f32 %v995_v9, %v8747_v57 }
 0x1e6   : > { %v1922_v20 = vadd.f32 1e-05, %v1858_v25  ;;  %v9088_v4 = vsub.f32 %v8757_v51, %v1270_v35  ;;  %v1068_v32 = vrot.slane %v1067_v28, 1  ;;  %v9092_v2 = vmul.f32 %v7655_v53, %v8990_v55 }
 0x1e7   : > { %v1567_v18 = vrot.slane %v1566_v29, 1  ;;  %v1635_v12 = vadd.f32 %v1634_v50, %v1633_v26  ;;  %v1385_v13 = vmul.f32 %v9085_v11, %v9085_v11  ;;  %v7657_v60 = vpop.eup %7656  ;;  %v997_v27 = vrot.slane %v996_v44, 2 }
 0x1e8   : > { %11507 = vst [vmem:[#allocation34_spill] sm:$0xff] %v9092_v2  ;;  %v1398_v31 = vmul.f32 %v9088_v4, %v9088_v4  ;;  %v1069_v21 = vadd.f32 %v1068_v32, %v1067_v28  ;;  %v1001_v51 = vsel %vm850_vm1, %v8749_v16, 0.0  ;;  %7662 = vrsqrt.f32 %v1922_v20  ;;  %v9106_v20 = vpop.f32.mrb[26].mxu1 }
 0x1e9   : > { %v1568_v30 = vadd.f32 %v1567_v18, %v1566_v29  ;;  %v1636_v7 = vrot.slane %v1635_v12, 1  ;;  %v1569_v55 = vsel %vm850_vm1, %v1385_v13, 0.0  ;;  %v998_v34 = vadd.f32 %v997_v27, %v996_v44 }
 0x1ea   : > { %v1570_v53 = vrot.slane %v1569_v55, 4  ;;  %v1651_v5 = vrot.slane %v1398_v31, 4  ;;  %v1271_v50 = vmul.f32 0.125, %v1069_v21  ;;  %v1002_v45 = vrot.slane %v1001_v51, 4 }
 0x1eb   : > { %v1848_v3 = vmul.f32 0.125, %v1568_v30  ;;  %v1637_v36 = vadd.f32 %v1636_v7, %v1635_v12  ;;  %v1083_v9 = vrot.slane %v8770_v22, 4  ;;  %v999_v26 = vrot.slane %v998_v34, 1 }
 0x1ec   : > { %v1571_v59 = vadd.f32 %v1570_v53, %v1569_v55  ;;  %v1652_v28 = vadd.f32 %v1651_v5, %v1398_v31  ;;  %v9103_v47 = vsub.f32 %v8759_v23, %v1271_v50  ;;  %v1003_v35 = vadd.f32 %v1002_v45, %v1001_v51 }
 0x1ed   : > { %v1912_v63 = vadd.f32 1e-05, %v1848_v3  ;;  %v1859_v25 = vmul.f32 0.125, %v1637_v36  ;;  %v1084_v29 = vadd.f32 %v1083_v9, %v8770_v22  ;;  %v7659_v32 = vpop.eup %7658  ;;  %v1000_v13 = vadd.f32 %v999_v26, %v998_v34 }
 0x1ee   : > { %v1572_v44 = vrot.slane %v1571_v59, 2  ;;  %v1653_v18 = vrot.slane %v1652_v28, 2  ;;  %v1399_v12 = vmul.f32 %v9103_v47, %v9103_v47  ;;  %v1004_v23 = vrot.slane %v1003_v35, 2 }
 0x1ef   : > { %v7661_v21 = vpop.eup %7660  ;;  %7664 = vrsqrt.f32 %v1912_v63  ;;  %v1923_v31 = vadd.f32 1e-05, %v1859_v25  ;;  %v1085_v27 = vrot.slane %v1084_v29, 2  ;;  %v9111_v30 = vmul.f32 %v7657_v60, %v9005_v14 }
 0x1f0   : > { %v1573_v51 = vadd.f32 %v1572_v44, %v1571_v59  ;;  %v1654_v7 = vadd.f32 %v1653_v18, %v1652_v28  ;;  %v1657_v55 = vrot.slane %v1399_v12, 4  ;;  %v9114_v53 = vmul.f32 %v7659_v32, %v9016_v1  ;;  %v9122_v28 = vpop.f32.mrb[27].mxu1 }
 0x1f1   : > { %11508 = vst [vmem:[#allocation35_spill] sm:$0xff] %v9111_v30  ;;  %v1260_v5 = vmul.f32 0.125, %v1000_v13  ;;  %v1005_v50 = vadd.f32 %v1004_v23, %v1003_v35  ;;  %v1086_v3 = vadd.f32 %v1085_v27, %v1084_v29  ;;  %v9117_v36 = vmul.f32 %v7661_v21, %v9032_v10 }
 0x1f2   : > { %11509 = vst [vmem:[#allocation36_spill] sm:$0xff] %v9114_v53  ;;  %v1574_v34 = vrot.slane %v1573_v51, 1  ;;  %v1655_v45 = vrot.slane %v1654_v7, 1  ;;  %v1658_v9 = vadd.f32 %v1657_v55, %v1399_v12  ;;  %v7663_v26 = vpop.eup %7662  ;;  %7666 = vrsqrt.f32 %v1923_v31 }
 0x1f3   : > { %v9120_v14 = vsub.f32 %v8747_v57, %v1260_v5  ;;  %v1006_v60 = vrot.slane %v1005_v50, 1  ;;  %v1087_v59 = vrot.slane %v1086_v3, 1  ;;  %v1020_v35 = vrot.slane %v8753_v17, 4 }
 0x1f4   : > { %v1575_v1 = vadd.f32 %v1574_v34, %v1573_v51  ;;  %v1656_v63 = vadd.f32 %v1655_v45, %v1654_v7  ;;  %v1659_v25 = vrot.slane %v1658_v9, 2  ;;  %v1089_v44 = vrot.slane %v8773_v56, 4 }
 0x1f5   : > { %v1388_v10 = vmul.f32 %v9120_v14, %v9120_v14  ;;  %v1007_v29 = vadd.f32 %v1006_v60, %v1005_v50  ;;  %v1088_v32 = vadd.f32 %v1087_v59, %v1086_v3  ;;  %v1021_v13 = vadd.f32 %v1020_v35, %v8753_v17  ;;  %v9137_v60 = vpop.f32.mrb[28].mxu1 }
 0x1f6   : > { %v1849_v18 = vmul.f32 0.125, %v1575_v1  ;;  %v1862_v12 = vmul.f32 0.125, %v1656_v63  ;;  %v1660_v57 = vadd.f32 %v1659_v25, %v1658_v9  ;;  %v1090_v27 = vadd.f32 %v1089_v44, %v8773_v56  ;;  %v9139_v25 = vpop.f32.mrb[29].mxu1 }
 0x1f7   : > { %v1588_v21 = vrot.slane %v1388_v10, 4  ;;  %v1261_v31 = vmul.f32 0.125, %v1007_v29  ;;  %v1274_v23 = vmul.f32 0.125, %v1088_v32  ;;  %v1022_v5 = vrot.slane %v1021_v13, 2 }
 0x1f8   : > { %v1913_v7 = vadd.f32 1e-05, %v1849_v18  ;;  %v1661_v55 = vrot.slane %v1660_v57, 1  ;;  %v1091_v9 = vrot.slane %v1090_v27, 2  ;;  %v1926_v59 = vadd.f32 1e-05, %v1862_v12 }
 0x1f9   : > { %v7665_v34 = vpop.eup %7664  ;;  %v1589_v50 = vadd.f32 %v1588_v21, %v1388_v10  ;;  %v9132_v3 = vsub.f32 %v8749_v16, %v1261_v31  ;;  %v9135_v45 = vsub.f32 %v8770_v22, %v1274_v23  ;;  %v1023_v63 = vadd.f32 %v1022_v5, %v1021_v13 }
 0x1fa   : > { %7668 = vrsqrt.f32 %v1913_v7  ;;  %v1662_v1 = vadd.f32 %v1661_v55, %v1660_v57  ;;  %v9142_v35 = vmul.f32 %v7663_v26, %v9047_v62  ;;  %v9149_v10 = vmul.f32 %v7665_v34, %v9059_v15  ;;  %v9154_v26 = vpop.f32.mrb[30].mxu1 }
 0x1fb   : > { %v1590_v29 = vrot.slane %v1589_v50, 2  ;;  %v1389_v16 = vmul.f32 %v9132_v3, %v9132_v3  ;;  %v1402_v22 = vmul.f32 %v9135_v45, %v9135_v45  ;;  %v1024_v44 = vrot.slane %v1023_v63, 1 }
 0x1fc   : > { %11510 = vst [vmem:[#allocation37_spill] sm:$0xff] %v9142_v35  ;;  %11511 = vst [vmem:[#allocation38_spill] sm:$0xff] %v9149_v10  ;;  %v1863_v32 = vmul.f32 0.125, %v1662_v1  ;;  %v1092_v18 = vadd.f32 %v1091_v9, %v1090_v27  ;;  %v7667_v12 = vpop.eup %7666  ;;  %v1026_v62 = vsel %vm850_vm1, %v8761_v46, 0.0  ;;  %7670 = vrsqrt.f32 %v1926_v59 }
 0x1fd   : > { %v1591_v57 = vadd.f32 %v1590_v29, %v1589_v50  ;;  %v1594_v13 = vsel %vm850_vm1, %v1389_v16, 0.0  ;;  %v1676_v21 = vrot.slane %v1402_v22, 4  ;;  %v1025_v23 = vadd.f32 %v1024_v44, %v1023_v63  ;;  %v11512_v44 = vld [vmem:[#allocation14_spill] sm:$0xff] }
 0x1fe   : > { %v1595_v31 = vrot.slane %v1594_v13, 4  ;;  %v1093_v7 = vrot.slane %v1092_v18, 1  ;;  %v1027_v5 = vrot.slane %v1026_v62, 4  ;;  %v1108_v34 = vrot.slane %v8780_v43, 4 }
 0x1ff   : > { %v1592_v55 = vrot.slane %v1591_v57, 1  ;;  %v1677_v15 = vadd.f32 %v1676_v21, %v1402_v22  ;;  %v1927_v27 = vadd.f32 1e-05, %v1863_v32  ;;  %v1264_v50 = vmul.f32 0.125, %v1025_v23 }
 0x200   : > { %v1596_v9 = vadd.f32 %v1595_v31, %v1594_v13  ;;  %v1094_v1 = vadd.f32 %v1093_v7, %v1092_v18  ;;  %v1028_v51 = vadd.f32 %v1027_v5, %v1026_v62  ;;  %v1109_v10 = vadd.f32 %v1108_v34, %v8780_v43 }
 0x201   : > { %v1593_v29 = vadd.f32 %v1592_v55, %v1591_v57  ;;  %v1678_v16 = vrot.slane %v1677_v15, 2  ;;  %v9159_v59 = vsub.f32 %v8753_v17, %v1264_v50  ;;  %v1114_v35 = vrot.slane %v11512_v44, 4 }
 0x202   : > { %v1597_v53 = vrot.slane %v1596_v9, 2  ;;  %v1275_v63 = vmul.f32 0.125, %v1094_v1  ;;  %v1029_v2 = vrot.slane %v1028_v51, 2  ;;  %v1110_v30 = vrot.slane %v1109_v10, 2 }
 0x203   : > { %v1852_v22 = vmul.f32 0.125, %v1593_v29  ;;  %v1679_v21 = vadd.f32 %v1678_v16, %v1677_v15  ;;  %v1392_v18 = vmul.f32 %v9159_v59, %v9159_v59  ;;  %v1115_v62 = vadd.f32 %v1114_v35, %v11512_v44  ;;  %v9171_v16 = vpop.f32.mrb[31].mxu1 }
 0x204   : > { %v7669_v32 = vpop.eup %7668  ;;  %v1598_v13 = vadd.f32 %v1597_v53, %v1596_v9  ;;  %v9165_v57 = vsub.f32 %v8773_v56, %v1275_v63  ;;  %v1030_v7 = vadd.f32 %v1029_v2, %v1028_v51  ;;  %7672 = vrsqrt.f32 %v1927_v27 }
 0x205   : > { %v2041_v17 = vmul.f32 %v7669_v32, %v9085_v11  ;;  %v1916_v31 = vadd.f32 1e-05, %v1852_v22  ;;  %v1680_v23 = vrot.slane %v1679_v21, 1  ;;  %v1613_v15 = vrot.slane %v1392_v18, 4 }
 0x206   : > { %v1599_v55 = vrot.slane %v1598_v13, 1  ;;  %v1403_v5 = vmul.f32 %v9165_v57, %v9165_v57  ;;  %v1031_v9 = vrot.slane %v1030_v7, 1  ;;  %v7671_v50 = vpop.eup %7670  ;;  %v1111_v35 = vadd.f32 %v1110_v30, %v1109_v10 }
 0x207   : > { %v2105_v53 = vmax.f32 %v2041_v17, 0.0  ;;  %7674 = vrsqrt.f32 %v1916_v31  ;;  %v1681_v34 = vadd.f32 %v1680_v23, %v1679_v21  ;;  %v1614_v1 = vadd.f32 %v1613_v15, %v1392_v18 }
 0x208   : > { %v1600_v56 = vadd.f32 %v1599_v55, %v1598_v13  ;;  %v1682_v29 = vrot.slane %v1403_v5, 4  ;;  %v11513_v11 = vmax.f32 %v9117_v36, 0.0  ;;  %v1032_v27 = vadd.f32 %v1031_v9, %v1030_v7 }
 0x209   : > { %v1866_v51 = vmul.f32 0.125, %v1681_v34  ;;  %v1116_v63 = vrot.slane %v1115_v62, 2  ;;  %v1615_v32 = vrot.slane %v1614_v1, 2  ;;  %v1112_v31 = vrot.slane %v1111_v35, 1 }
 0x20a   : > { %v9175_v2 = vpack.c.bf16 %v2105_v53, %v11513_v11  ;;  %v1853_v22 = vmul.f32 0.125, %v1600_v56  ;;  %v1683_v17 = vadd.f32 %v1682_v29, %v1403_v5  ;;  %v9178_v21 = vmul.f32 %v7667_v12, %v9074_v42  ;;  %v11515_v53 = vld [vmem:[#allocation17_spill] sm:$0xff] }
 0x20b   : > { %v1930_v13 = vadd.f32 1e-05, %v1866_v51  ;;  %v1265_v18 = vmul.f32 0.125, %v1032_v27  ;;  %v1117_v23 = vadd.f32 %v1116_v63, %v1115_v62  ;;  %v1616_v10 = vadd.f32 %v1615_v32, %v1614_v1  ;;  %v11516_v1 = vld [vmem:[#allocation19_spill] sm:$0xff] }
 0x20c   : > { %11514 = vst [vmem:[#allocation14_spill] sm:$0xff] %v9175_v2  ;;  %v1917_v30 = vadd.f32 1e-05, %v1853_v22  ;;  %v1684_v55 = vrot.slane %v1683_v17, 2  ;;  %v1113_v15 = vadd.f32 %v1112_v31, %v1111_v35  ;;  %v1045_v34 = vrot.slane %v11515_v53, 4 }
 0x20d   : > { %7676 = vrsqrt.f32 %v1930_v13  ;;  %v9181_v36 = vsub.f32 %v8761_v46, %v1265_v18  ;;  %v1118_v7 = vrot.slane %v1117_v23, 1  ;;  %v1617_v5 = vrot.slane %v1616_v10, 1 }
 0x20e   : > { %7678 = vrsqrt.f32 %v1917_v30  ;;  %v1685_v9 = vadd.f32 %v1684_v55, %v1683_v17  ;;  %v1278_v56 = vmul.f32 0.125, %v1113_v15  ;;  %v1046_v62 = vadd.f32 %v1045_v34, %v11515_v53  ;;  %v7673_v35 = vpop.eup %7672 }
 0x20f   : > { %v1393_v42 = vmul.f32 %v9181_v36, %v9181_v36  ;;  %v1119_v12 = vadd.f32 %v1118_v7, %v1117_v23  ;;  %v1051_v29 = vsel %vm850_vm1, %v11516_v1, 0.0  ;;  %v1618_v11 = vadd.f32 %v1617_v5, %v1616_v10 }
 0x210   : > { %v1686_v46 = vrot.slane %v1685_v9, 1  ;;  %v9190_v51 = vsub.f32 %v8780_v43, %v1278_v56  ;;  %v1052_v27 = vrot.slane %v1051_v29, 4  ;;  %v1047_v17 = vrot.slane %v1046_v62, 2 }
 0x211   : > { %v7675_v63 = vpop.eup %7674  ;;  %v1619_v22 = vsel %vm850_vm1, %v1393_v42, 0.0  ;;  %v1279_v32 = vmul.f32 0.125, %v1119_v12  ;;  %v1133_v31 = vrot.slane %v8859_v0, 4  ;;  %v9195_v13 = vmul.f32 %v7671_v50, %v9088_v4 }
 0x212   : > { %v1856_v18 = vmul.f32 0.125, %v1618_v11  ;;  %v1687_v23 = vadd.f32 %v1686_v46, %v1685_v9  ;;  %v1620_v30 = vrot.slane %v1619_v22, 4  ;;  %v1406_v10 = vmul.f32 %v9190_v51, %v9190_v51 }
 0x213   : > { %11517 = vst [vmem:[#allocation17_spill] sm:$0xff] %v9195_v13  ;;  %v9200_v43 = vsub.f32 %v11512_v44, %v1279_v32  ;;  %v1048_v55 = vadd.f32 %v1047_v17, %v1046_v62  ;;  %v1053_v15 = vadd.f32 %v1052_v27, %v1051_v29  ;;  %v1134_v56 = vadd.f32 %v1133_v31, %v8859_v0 }
 0x214   : > { %v1920_v7 = vadd.f32 1e-05, %v1856_v18  ;;  %v1867_v34 = vmul.f32 0.125, %v1687_v23  ;;  %v1621_v5 = vadd.f32 %v1620_v30, %v1619_v22  ;;  %v1701_v42 = vrot.slane %v1406_v10, 4 }
 0x215   : > { %v1407_v4 = vmul.f32 %v9200_v43, %v9200_v43  ;;  %v1049_v50 = vrot.slane %v1048_v55, 1  ;;  %v1054_v9 = vrot.slane %v1053_v15, 2  ;;  %v9206_v12 = vmul.f32 %v7673_v35, %v9103_v47 }
 0x216   : > { %v9209_v11 = vmul.f32 %v7675_v63, %v9120_v14  ;;  %v1622_v44 = vrot.slane %v1621_v5, 2  ;;  %v1135_v62 = vrot.slane %v1134_v56, 2  ;;  %v1702_v46 = vadd.f32 %v1701_v42, %v1406_v10 }
 0x217   : > { %v7677_v29 = vpop.eup %7676  ;;  %v1707_v27 = vrot.slane %v1407_v4, 4  ;;  %v1050_v22 = vadd.f32 %v1049_v50, %v1048_v55  ;;  %v1055_v32 = vadd.f32 %v1054_v9, %v1053_v15  ;;  %7680 = vrsqrt.f32 %v1920_v7 }
 0x218   : > { %11518 = vst [vmem:[#allocation19_spill] sm:$0xff] %v9209_v11  ;;  %v7679_v17 = vpop.eup %7678  ;;  %v1931_v31 = vadd.f32 1e-05, %v1867_v34  ;;  %v1623_v18 = vadd.f32 %v1622_v44, %v1621_v5  ;;  %v1136_v23 = vadd.f32 %v1135_v62, %v1134_v56  ;;  %v9212_v30 = vmul.f32 %v7677_v29, %v9135_v45 }
 0x219   : > { %v1703_v47 = vrot.slane %v1702_v46, 2  ;;  %v1708_v35 = vadd.f32 %v1707_v27, %v1407_v4  ;;  %v1268_v2 = vmul.f32 0.125, %v1050_v22  ;;  %v1056_v63 = vrot.slane %v1055_v32, 1 }
 0x21a   : > { %v1624_v14 = vrot.slane %v1623_v18, 1  ;;  %v1137_v11 = vrot.slane %v1136_v23, 1  ;;  %v1070_v13 = vrot.slane %v8861_v39, 4  ;;  %v9216_v10 = vmul.f32 %v7679_v17, %v9132_v3 }
 0x21b   : > { %v1704_v55 = vadd.f32 %v1703_v47, %v1702_v46  ;;  %v1709_v15 = vrot.slane %v1708_v35, 2  ;;  %v9219_v7 = vsub.f32 %v11515_v53, %v1268_v2  ;;  %v1057_v5 = vadd.f32 %v1056_v63, %v1055_v32 }
 0x21c   : > { %v1625_v34 = vadd.f32 %v1624_v14, %v1623_v18  ;;  %v1138_v45 = vadd.f32 %v1137_v11, %v1136_v23  ;;  %v1071_v56 = vadd.f32 %v1070_v13, %v8861_v39  ;;  %v1139_v9 = vrot.slane %v8878_v52, 4 }
 0x21d   : > { %v1705_v42 = vrot.slane %v1704_v55, 1  ;;  %v1710_v4 = vadd.f32 %v1709_v15, %v1708_v35  ;;  %v1396_v50 = vmul.f32 %v9219_v7, %v9219_v7  ;;  %v1269_v3 = vmul.f32 0.125, %v1057_v5 }
 0x21e   : > { %v1857_v44 = vmul.f32 0.125, %v1625_v34  ;;  %v1282_v62 = vmul.f32 0.125, %v1138_v45  ;;  %v1072_v29 = vrot.slane %v1071_v56, 2  ;;  %v1140_v53 = vadd.f32 %v1139_v9, %v8878_v52 }
 0x21f   : > { %v1706_v46 = vadd.f32 %v1705_v42, %v1704_v55  ;;  %v1711_v27 = vrot.slane %v1710_v4, 1  ;;  %v1638_v2 = vrot.slane %v1396_v50, 4  ;;  %v9227_v11 = vsub.f32 %v11516_v1, %v1269_v3 }
 0x220   : > { %v1921_v22 = vadd.f32 1e-05, %v1857_v44  ;;  %v9230_v13 = vsub.f32 %v8859_v0, %v1282_v62  ;;  %v1073_v32 = vadd.f32 %v1072_v29, %v1071_v56  ;;  %7682 = vrsqrt.f32 %v1931_v31 }
 0x221   : > { %v1870_v17 = vmul.f32 0.125, %v1706_v46  ;;  %v1712_v18 = vadd.f32 %v1711_v27, %v1710_v4  ;;  %v1639_v23 = vadd.f32 %v1638_v2, %v1396_v50  ;;  %v7681_v47 = vpop.eup %7680  ;;  %v1397_v35 = vmul.f32 %v9227_v11, %v9227_v11 }
 0x222   : > { %7684 = vrsqrt.f32 %v1921_v22  ;;  %v1410_v14 = vmul.f32 %v9230_v13, %v9230_v13  ;;  %v1074_v63 = vrot.slane %v1073_v32, 1  ;;  %v2109_v1 = vmax.f32 %v9216_v10, 0.0 }
 0x223   : > { %v1934_v55 = vadd.f32 1e-05, %v1870_v17  ;;  %v1871_v15 = vmul.f32 0.125, %v1712_v18  ;;  %v1640_v0 = vrot.slane %v1639_v23, 2  ;;  %v1644_v34 = vsel %vm850_vm1, %v1397_v35, 0.0 }
 0x224   : > { %v1726_v31 = vrot.slane %v1410_v14, 4  ;;  %v1075_v5 = vadd.f32 %v1074_v63, %v1073_v32  ;;  %v1141_v45 = vrot.slane %v1140_v53, 2  ;;  %v9239_v56 = vmul.f32 %v7681_v47, %v9159_v59 }
 0x225   : > { %v1935_v42 = vadd.f32 1e-05, %v1871_v15  ;;  %v1641_v4 = vadd.f32 %v1640_v0, %v1639_v23  ;;  %v1645_v50 = vrot.slane %v1644_v34, 4  ;;  %v1076_v10 = vsel %vm850_vm1, %v8895_v33, 0.0 }
 0x226   : > { %v1727_v9 = vadd.f32 %v1726_v31, %v1410_v14  ;;  %v1272_v44 = vmul.f32 0.125, %v1075_v5  ;;  %v1142_v3 = vadd.f32 %v1141_v45, %v1140_v53  ;;  %7686 = vrsqrt.f32 %v1934_v55 }
 0x227   : > { %v1642_v62 = vrot.slane %v1641_v4, 1  ;;  %v1646_v29 = vadd.f32 %v1645_v50, %v1644_v34  ;;  %v1077_v46 = vrot.slane %v1076_v10, 4  ;;  %v1158_v59 = vrot.slane %v8913_v58, 4 }
 0x228   : > { %v1728_v27 = vrot.slane %v1727_v9, 2  ;;  %v9244_v2 = vsub.f32 %v8861_v39, %v1272_v44  ;;  %v1143_v22 = vrot.slane %v1142_v3, 1  ;;  %7688 = vrsqrt.f32 %v1935_v42 }
 0x229   : > { %v1643_v32 = vadd.f32 %v1642_v62, %v1641_v4  ;;  %v1647_v17 = vrot.slane %v1646_v29, 2  ;;  %v1078_v18 = vadd.f32 %v1077_v46, %v1076_v10  ;;  %v1159_v35 = vadd.f32 %v1158_v59, %v8913_v58 }
 0x22a   : > { %v1729_v23 = vadd.f32 %v1728_v27, %v1727_v9  ;;  %v1400_v53 = vmul.f32 %v9244_v2, %v9244_v2  ;;  %v1144_v47 = vadd.f32 %v1143_v22, %v1142_v3  ;;  %v7683_v14 = vpop.eup %7682  ;;  %v1164_v39 = vrot.slane %v8918_v48, 4 }
 0x22b   : > { %v1860_v63 = vmul.f32 0.125, %v1643_v32  ;;  %v1648_v55 = vadd.f32 %v1647_v17, %v1646_v29  ;;  %v1079_v15 = vrot.slane %v1078_v18, 2  ;;  %v1160_v45 = vrot.slane %v1159_v35, 2 }
 0x22c   : > { %v7685_v0 = vpop.eup %7684  ;;  %v1730_v34 = vrot.slane %v1729_v23, 1  ;;  %v1663_v31 = vrot.slane %v1400_v53, 4  ;;  %v1283_v5 = vmul.f32 0.125, %v1144_v47  ;;  %v1165_v22 = vadd.f32 %v1164_v39, %v8918_v48 }
 0x22d   : > { %v2049_v42 = vmul.f32 %v7685_v0, %v9181_v36  ;;  %v1924_v4 = vadd.f32 1e-05, %v1860_v63  ;;  %v1649_v50 = vrot.slane %v1648_v55, 1  ;;  %v1080_v9 = vadd.f32 %v1079_v15, %v1078_v18 }
 0x22e   : > { %v1731_v44 = vadd.f32 %v1730_v34, %v1729_v23  ;;  %v1664_v3 = vadd.f32 %v1663_v31, %v1400_v53  ;;  %v9253_v10 = vsub.f32 %v8878_v52, %v1283_v5  ;;  %v1161_v62 = vadd.f32 %v1160_v45, %v1159_v35 }
 0x22f   : > { %v2113_v29 = vmax.f32 %v2049_v42, 0.0  ;;  %v1650_v46 = vadd.f32 %v1649_v50, %v1648_v55  ;;  %v1081_v27 = vrot.slane %v1080_v9, 1  ;;  %v9257_v59 = vmul.f32 %v7683_v14, %v9165_v57 }
 0x230   : > { %v1874_v32 = vmul.f32 0.125, %v1731_v44  ;;  %v1665_v17 = vrot.slane %v1664_v3, 2  ;;  %v1411_v36 = vmul.f32 %v9253_v10, %v9253_v10  ;;  %v7687_v18 = vpop.eup %7686  ;;  %v1162_v47 = vrot.slane %v1161_v62, 1  ;;  %v11519_v44 = vld [vmem:[#allocation27_spill] sm:$0xff] }
 0x231   : > { %v9261_v23 = vpack.c.bf16 %v2113_v29, %v2109_v1  ;;  %v1861_v53 = vmul.f32 0.125, %v1650_v46  ;;  %v1082_v52 = vadd.f32 %v1081_v27, %v1080_v9  ;;  %7690 = vrsqrt.f32 %v1924_v4 }
 0x232   : > { %v1938_v35 = vadd.f32 1e-05, %v1874_v32  ;;  %v1666_v63 = vadd.f32 %v1665_v17, %v1664_v3  ;;  %v1732_v55 = vrot.slane %v1411_v36, 4  ;;  %v7689_v15 = vpop.eup %7688  ;;  %v1163_v57 = vadd.f32 %v1162_v47, %v1161_v62 }
 0x233   : > { %v1925_v39 = vadd.f32 1e-05, %v1861_v53  ;;  %v1273_v0 = vmul.f32 0.125, %v1082_v52  ;;  %v1166_v14 = vrot.slane %v1165_v22, 2  ;;  %v1095_v5 = vrot.slane %v8960_v6, 4 }
 0x234   : > { %7692 = vrsqrt.f32 %v1938_v35  ;;  %v1667_v34 = vrot.slane %v1666_v63, 1  ;;  %v1733_v31 = vadd.f32 %v1732_v55, %v1411_v36  ;;  %v1286_v45 = vmul.f32 0.125, %v1163_v57  ;;  %v11520_v55 = vld [vmem:[#allocation16_spill] sm:$0xff] }
 0x235   : > { %7694 = vrsqrt.f32 %v1925_v39  ;;  %v9265_v1 = vsub.f32 %v8895_v33, %v1273_v0  ;;  %v1167_v42 = vadd.f32 %v1166_v14, %v1165_v22  ;;  %v1096_v9 = vadd.f32 %v1095_v5, %v8960_v6 }
 0x236   : > { %v1668_v4 = vadd.f32 %v1667_v34, %v1666_v63  ;;  %v1734_v50 = vrot.slane %v1733_v31, 2  ;;  %v1101_v3 = vsel %vm850_vm1, %v11519_v44, 0.0  ;;  %v9273_v29 = vsub.f32 %v8913_v58, %v1286_v45  ;;  %v11521_v45 = vld [vmem:[#allocation18_spill] sm:$0xff] }
 0x237   : > { %v1401_v62 = vmul.f32 %v9265_v1, %v9265_v1  ;;  %v1168_v46 = vrot.slane %v1167_v42, 1  ;;  %v1102_v27 = vrot.slane %v1101_v3, 4  ;;  %v9276_v33 = vmul.f32 %v7687_v18, %v9190_v51 }
 0x238   : > { %v1864_v32 = vmul.f32 0.125, %v1668_v4  ;;  %v1735_v22 = vadd.f32 %v1734_v50, %v1733_v31  ;;  %v1097_v17 = vrot.slane %v1096_v9, 2  ;;  %v1414_v53 = vmul.f32 %v9273_v29, %v9273_v29 }
 0x239   : > { %v1669_v36 = vsel %vm850_vm1, %v1401_v62, 0.0  ;;  %v1169_v52 = vadd.f32 %v1168_v46, %v1167_v42  ;;  %v1103_v47 = vadd.f32 %v1102_v27, %v1101_v3  ;;  %v9282_v35 = vmul.f32 %v7689_v15, %v9200_v43  ;;  %v7498_v3 = vld [vmem:[%s11412_s4 + $0x180] ss:$12 sps:$4 sm:$0xff]  }
 0x23a   : > { %v1736_v58 = vrot.slane %v1735_v22, 1  ;;  %v1670_v63 = vrot.slane %v1669_v36, 4  ;;  %v2083_v39 = vmax.f32 %v11520_v55, 0.0  ;;  %v1751_v0 = vrot.slane %v1414_v53, 4 }
 0x23b   : > { %v1287_v51 = vmul.f32 0.125, %v1169_v52  ;;  %v1098_v18 = vadd.f32 %v1097_v17, %v1096_v9  ;;  %v1104_v57 = vrot.slane %v1103_v47, 2  ;;  %v7691_v14 = vpop.eup %7690  ;;  %v1928_v34 = vadd.f32 1e-05, %v1864_v32 }
 0x23c   : > { %v1737_v31 = vadd.f32 %v1736_v58, %v1735_v22  ;;  %v1671_v5 = vadd.f32 %v1670_v63, %v1669_v36  ;;  %v2087_v4 = vmax.f32 %v11521_v45, 0.0  ;;  %v1752_v50 = vadd.f32 %v1751_v0, %v1414_v53  ;;  %v7513_v22 = vld [vmem:[%s11412_s4 + $0x188] ss:$12 sps:$4 sm:$0xff]  }
 0x23d   : > { %v9287_v42 = vsub.f32 %v8918_v48, %v1287_v51  ;;  %v1099_v43 = vrot.slane %v1098_v18, 1  ;;  %v1105_v15 = vadd.f32 %v1104_v57, %v1103_v47  ;;  %v1183_v32 = vrot.slane %v8997_v37, 4  ;;  %v7503_v47 = vld [vmem:[%s11412_s4 + $0x19c] ss:$12 sps:$4 sm:$0xff]  }
 0x23e   : > { %v7693_v62 = vpop.eup %7692  ;;  %v1875_v46 = vmul.f32 0.125, %v1737_v31  ;;  %v1672_v9 = vrot.slane %v1671_v5, 2  ;;  %v2300_v27 = vpack.c.bf16 %v2087_v4, %v2083_v39  ;;  %v9297_v48 = vmul.f32 %v7691_v14, %v9219_v7  ;;  %v11522_v57 = vld [vmem:[#allocation15_spill] sm:$0xff] }
 0x23f   : > { %v7695_v17 = vpop.eup %7694  ;;  %v1753_v36 = vrot.slane %v1752_v50, 2  ;;  %v1415_v53 = vmul.f32 %v9287_v42, %v9287_v42  ;;  %v1100_v52 = vadd.f32 %v1099_v43, %v1098_v18  ;;  %v9305_v58 = vmul.f32 %v7693_v62, %v9230_v13  ;;  %v7501_v18 = vld [vmem:[%s11412_s4 + $0x198] ss:$12 sps:$4 sm:$0xff]  }
 0x240   : > { %7696 = vrsqrt.f32 %v1928_v34  ;;  %v1673_v63 = vadd.f32 %v1672_v9, %v1671_v5  ;;  %v1106_v55 = vrot.slane %v1105_v15, 1  ;;  %3170 = vmatprep.mubr.bf16.mxu0 %v2300_v27  ;;  %3396 = vmatprep.mubr.bf16.mxu1 %v2300_v27  ;;  %v1184_v51 = vadd.f32 %v1183_v32, %v8997_v37  ;;  %v7514_v5 = vld [vmem:[%s11412_s4 + $0x1a0] ss:$12 sps:$4 sm:$0xff]  }
 0x241   : > { %v1754_v39 = vadd.f32 %v1753_v36, %v1752_v50  ;;  %v1757_v7 = vrot.slane %v1415_v53, 4  ;;  %v1276_v0 = vmul.f32 0.125, %v1100_v52  ;;  %3171 = vmatmul.mubr.bf16.vlgmr.msra.gmra.mrb[32].mxu0 %v11522_v57  ;;  %3397 = vmatmul.mubr.bf16.vlgmr.msra.gmra.mrb[48].mxu1 %v11522_v57  ;;  %v9314_v13 = vmul.f32 %v7695_v17, %v9227_v11  ;;  %v7506_v11 = vld [vmem:[%s11412_s4 + $0x1b4] ss:$12 sps:$4 sm:$0xff]  }
 0x242   : > { %v1939_v14 = vadd.f32 1e-05, %v1875_v46  ;;  %v1674_v34 = vrot.slane %v1673_v63, 1  ;;  %v1107_v31 = vadd.f32 %v1106_v55, %v1105_v15  ;;  %3252 = vmatpush1.bf16.msra.mxu0 %v7498_v3  ;;  %3462 = vmatpush1.bf16.msra.mxu1 %v7513_v22  ;;  %v1185_v43 = vrot.slane %v1184_v51, 2 }
 0x243   : > { %v1755_v45 = vrot.slane %v1754_v39, 1  ;;  %v1758_v4 = vadd.f32 %v1757_v7, %v1415_v53  ;;  %v9320_v50 = vsub.f32 %v8960_v6, %v1276_v0  ;;  %3253 = vmatprep.subr.bf16.mxu0 %v7503_v47  ;;  %v11523_v62 = vmov 0   ;;  %v7504_v47 = vld [vmem:[%s11412_s4 + $0x1b0] ss:$12 sps:$4 sm:$0xff]   ;;  %v7509_v0 = vld [vmem:[%s11412_s4 + $0x1cc] ss:$12 sps:$4 sm:$0xff]  }
 0x244   : > { %3463 = vmatprep.subr.bf16.mxu1 %v11523_v62  ;;  %v1675_v15 = vadd.f32 %v1674_v34, %v1673_v63  ;;  %v1277_v3 = vmul.f32 0.125, %v1107_v31  ;;  %v1120_v46 = vrot.slane %v8999_v38, 4  ;;  %v1189_v9 = vrot.slane %v9002_v40, 4  ;;  %v7518_v63 = vld [vmem:[%s11412_s4 + $0x1b8] ss:$12 sps:$4 sm:$0xff]  }
 0x245   : > { %v1756_v27 = vadd.f32 %v1755_v45, %v1754_v39  ;;  %v1759_v32 = vrot.slane %v1758_v4, 2  ;;  %v1404_v6 = vmul.f32 %v9320_v50, %v9320_v50  ;;  %v1186_v22 = vadd.f32 %v1185_v43, %v1184_v51 }
 0x246   : > { %v1865_v17 = vmul.f32 0.125, %v1675_v15  ;;  %v9331_v36 = vsub.f32 %v11519_v44, %v1277_v3  ;;  %v1121_v53 = vadd.f32 %v1120_v46, %v8999_v38  ;;  %v1190_v52 = vadd.f32 %v1189_v9, %v9002_v40  ;;  %3254 = vmatpush1.bf16.msra.mxu0 %v7501_v18  ;;  %3464 = vmatpush1.bf16.msra.mxu1 %v7514_v5  ;;  %v7507_v46 = vld [vmem:[%s11412_s4 + $0x1c8] ss:$12 sps:$4 sm:$0xff]   ;;  %v7519_v9 = vld [vmem:[%s11412_s4 + $0x1d0] ss:$12 sps:$4 sm:$0xff]  }
 0x247   : > { %v2117_v55 = vmax.f32 %v9314_v13, 0.0  ;;  %v1878_v39 = vmul.f32 0.125, %v1756_v27  ;;  %v1760_v7 = vadd.f32 %v1759_v32, %v1758_v4  ;;  %v1688_v44 = vrot.slane %v1404_v6, 4  ;;  %3255 = vmatprep.subr.bf16.mxu0 %v7506_v11  ;;  %3465 = vmatprep.subr.bf16.mxu1 %v11523_v62  ;;  %v7532_v13 = vld [vmem:[%s11412_s4 + $0x230] ss:$12 sps:$4 sm:$0xff]  }
 0x248   : > { %v1929_v51 = vadd.f32 1e-05, %v1865_v17  ;;  %v1405_v57 = vmul.f32 %v9331_v36, %v9331_v36  ;;  %v1187_v18 = vrot.slane %v1186_v22, 1  ;;  %v1122_v34 = vrot.slane %v1121_v53, 2 }
 0x249   : > { %v1942_v31 = vadd.f32 1e-05, %v1878_v39  ;;  %v1761_v5 = vrot.slane %v1760_v7, 1  ;;  %v1689_v45 = vadd.f32 %v1688_v44, %v1404_v6  ;;  %v1191_v43 = vrot.slane %v1190_v52, 2 }
 0x24a   : > { %v9348_v15 = vpop.eup %7696  ;;  %7698 = vrsqrt.f32 %v1929_v51  ;;  %v1694_v4 = vsel %vm850_vm1, %v1405_v57, 0.0  ;;  %v1188_v11 = vadd.f32 %v1187_v18, %v1186_v22  ;;  %v1123_v3 = vadd.f32 %v1122_v34, %v1121_v53  ;;  %3256 = vmatpush1.bf16.msra.mxu0 %v7504_v47  ;;  %3466 = vmatpush1.bf16.msra.mxu1 %v7518_v63  ;;  %v7512_v22 = vld [vmem:[%s11412_s4 + $0x1e4] ss:$12 sps:$4 sm:$0xff]   ;;  %v7523_v34 = vld [vmem:[%s11412_s4 + $0x1e8] ss:$12 sps:$4 sm:$0xff]  }
 0x24b   : > { %7700 = vrsqrt.f32 %v1939_v14  ;;  %v1762_v27 = vadd.f32 %v1761_v5, %v1760_v7  ;;  %v1690_v32 = vrot.slane %v1689_v45, 2  ;;  %v1695_v6 = vrot.slane %v1694_v4, 4  ;;  %3257 = vmatprep.subr.bf16.mxu0 %v7509_v0  ;;  %3467 = vmatprep.subr.bf16.mxu1 %v11523_v62  ;;  %v7510_v7 = vld [vmem:[%s11412_s4 + $0x1e0] ss:$12 sps:$4 sm:$0xff]  }
 0x24c   : > { %v1290_v17 = vmul.f32 0.125, %v1188_v11  ;;  %v1124_v53 = vrot.slane %v1123_v3, 1  ;;  %v1192_v47 = vadd.f32 %v1191_v43, %v1190_v52  ;;  %v1126_v63 = vsel %vm850_vm1, %v9007_v61, 0.0  ;;  %v7517_v52 = vld [vmem:[%s11412_s4 + $0x1fc] ss:$12 sps:$4 sm:$0xff]  }
 0x24d   : > { %7702 = vrsqrt.f32 %v1942_v31  ;;  %v1879_v39 = vmul.f32 0.125, %v1762_v27  ;;  %v1691_v44 = vadd.f32 %v1690_v32, %v1689_v45  ;;  %v1696_v14 = vadd.f32 %v1695_v6, %v1694_v4  ;;  %v7515_v32 = vld [vmem:[%s11412_s4 + $0x1f8] ss:$12 sps:$4 sm:$0xff]  }
 0x24e   : > { %v9367_v0 = vsub.f32 %v8997_v37, %v1290_v17  ;;  %v1125_v51 = vadd.f32 %v1124_v53, %v1123_v3  ;;  %v1193_v57 = vrot.slane %v1192_v47, 1  ;;  %v1127_v18 = vrot.slane %v1126_v63, 4  ;;  %3258 = vmatpush1.bf16.msra.mxu0 %v7507_v46  ;;  %3468 = vmatpush1.bf16.msra.mxu1 %v7519_v9 }
 0x24f   : > { %v1943_v31 = vadd.f32 1e-05, %v1879_v39  ;;  %v1692_v5 = vrot.slane %v1691_v44, 1  ;;  %v1697_v45 = vrot.slane %v1696_v14, 2  ;;  %v1208_v43 = vrot.slane %v9029_v24, 4  ;;  %3259 = vmatprep.subr.bf16.mxu0 %v7512_v22  ;;  %3469 = vmatprep.subr.bf16.mxu1 %v11523_v62 }
 0x250   : > { %v1418_v37 = vmul.f32 %v9367_v0, %v9367_v0  ;;  %v1280_v4 = vmul.f32 0.125, %v1125_v51  ;;  %v1194_v11 = vadd.f32 %v1193_v57, %v1192_v47  ;;  %v1128_v3 = vadd.f32 %v1127_v18, %v1126_v63  ;;  %v7527_v47 = vld [vmem:[%s11412_s4 + $0x200] ss:$12 sps:$4 sm:$0xff]  }
 0x251   : > { %7704 = vrsqrt.f32 %v1943_v31  ;;  %v1693_v46 = vadd.f32 %v1692_v5, %v1691_v44  ;;  %v1698_v9 = vadd.f32 %v1697_v45, %v1696_v14  ;;  %v1209_v27 = vadd.f32 %v1208_v43, %v9029_v24  ;;  %v7522_v51 = vld [vmem:[%s11412_s4 + $0x214] ss:$12 sps:$4 sm:$0xff]  }
 0x252   : > { %v1776_v6 = vrot.slane %v1418_v37, 4  ;;  %v9384_v22 = vsub.f32 %v8999_v38, %v1280_v4  ;;  %v1291_v17 = vmul.f32 0.125, %v1194_v11  ;;  %v1129_v53 = vrot.slane %v1128_v3, 2  ;;  %3260 = vmatpush1.bf16.msra.mxu0 %v7510_v7  ;;  %3470 = vmatpush1.bf16.msra.mxu1 %v7523_v34 }
 0x253   : > { %v1868_v63 = vmul.f32 0.125, %v1693_v46  ;;  %v1699_v39 = vrot.slane %v1698_v9, 1  ;;  %v1210_v44 = vrot.slane %v1209_v27, 2  ;;  %v1214_v14 = vrot.slane %v9041_v54, 4  ;;  %3261 = vmatprep.subr.bf16.mxu0 %v7517_v52  ;;  %3471 = vmatprep.subr.bf16.mxu1 %v11523_v62 }
 0x254   : > { %v7699_v38 = vpop.eup %7698  ;;  %v1777_v57 = vadd.f32 %v1776_v6, %v1418_v37  ;;  %v1408_v7 = vmul.f32 %v9384_v22, %v9384_v22  ;;  %v9397_v18 = vsub.f32 %v9002_v40, %v1291_v17  ;;  %v1130_v34 = vadd.f32 %v1129_v53, %v1128_v3  ;;  %v7520_v40 = vld [vmem:[%s11412_s4 + $0x210] ss:$12 sps:$4 sm:$0xff]  }
 0x255   : > { %v7701_v31 = vpop.eup %7700  ;;  %v2057_v5 = vmul.f32 %v7699_v38, %v9265_v1  ;;  %v1932_v45 = vadd.f32 1e-05, %v1868_v63  ;;  %v1700_v52 = vadd.f32 %v1699_v39, %v1698_v9  ;;  %v1211_v43 = vadd.f32 %v1210_v44, %v1209_v27  ;;  %v7528_v1 = vld [vmem:[%s11412_s4 + $0x218] ss:$12 sps:$4 sm:$0xff]  }
 0x256   : > { %v9402_v4 = vmul.f32 %v9348_v15, %v9244_v2  ;;  %v1778_v11 = vrot.slane %v1777_v57, 2  ;;  %v1713_v46 = vrot.slane %v1408_v7, 4  ;;  %v1419_v37 = vmul.f32 %v9397_v18, %v9397_v18  ;;  %3262 = vmatpush1.bf16.msra.mxu0 %v7515_v32  ;;  %3472 = vmatpush1.bf16.msra.mxu1 %v7527_v47  ;;  %v7526_v27 = vld [vmem:[%s11412_s4 + $0x22c] ss:$12 sps:$4 sm:$0xff]  }
 0x257   : > { %v9412_v3 = vpop.eup %7702  ;;  %v2121_v9 = vmax.f32 %v2057_v5, 0.0  ;;  %7706 = vrsqrt.f32 %v1932_v45  ;;  %v1869_v2 = vmul.f32 0.125, %v1700_v52  ;;  %v1131_v15 = vrot.slane %v1130_v34, 1  ;;  %3263 = vmatprep.subr.bf16.mxu0 %v7522_v51  ;;  %3473 = vmatprep.subr.bf16.mxu1 %v11523_v62  ;;  %v7531_v52 = vld [vmem:[%s11412_s4 + $0x244] ss:$12 sps:$4 sm:$0xff]  }
 0x258   : > { %v1779_v32 = vadd.f32 %v1778_v11, %v1777_v57  ;;  %v1714_v6 = vadd.f32 %v1713_v46, %v1408_v7  ;;  %v1782_v17 = vrot.slane %v1419_v37, 4  ;;  %v1212_v53 = vrot.slane %v1211_v43, 1  ;;  %v7524_v57 = vld [vmem:[%s11412_s4 + $0x228] ss:$12 sps:$4 sm:$0xff]  }
 0x259   : > { %v9420_v47 = vpack.c.bf16 %v2121_v9, %v2117_v55  ;;  %v1933_v63 = vadd.f32 1e-05, %v1869_v2  ;;  %v1132_v39 = vadd.f32 %v1131_v15, %v1130_v34  ;;  %v1215_v44 = vadd.f32 %v1214_v14, %v9041_v54  ;;  %v7529_v15 = vld [vmem:[%s11412_s4 + $0x240] ss:$12 sps:$4 sm:$0xff]  }
 0x25a   : > { %v1780_v38 = vrot.slane %v1779_v32, 1  ;;  %v1715_v51 = vrot.slane %v1714_v6, 2  ;;  %v1783_v5 = vadd.f32 %v1782_v17, %v1419_v37  ;;  %v1213_v45 = vadd.f32 %v1212_v53, %v1211_v43  ;;  %3264 = vmatpush1.bf16.msra.mxu0 %v7520_v40  ;;  %3474 = vmatpush1.bf16.msra.mxu1 %v7528_v1 }
 0x25b   : > { %v7705_v55 = vpop.eup %7704  ;;  %7708 = vrsqrt.f32 %v1933_v63  ;;  %v1281_v7 = vmul.f32 0.125, %v1132_v39  ;;  %v1216_v34 = vrot.slane %v1215_v44, 2  ;;  %v1145_v14 = vrot.slane %v9056_v41, 4  ;;  %3265 = vmatprep.subr.bf16.mxu0 %v7526_v27  ;;  %3475 = vmatprep.subr.bf16.mxu1 %v11523_v62 }
 0x25c   : > { %v9435_v43 = vmul.f32 %v7701_v31, %v9253_v10  ;;  %v1781_v11 = vadd.f32 %v1780_v38, %v1779_v32  ;;  %v1716_v46 = vadd.f32 %v1715_v51, %v1714_v6  ;;  %v1784_v37 = vrot.slane %v1783_v5, 2 }
 0x25d   : > { %v9438_v40 = vsub.f32 %v9007_v61, %v1281_v7  ;;  %v1294_v1 = vmul.f32 0.125, %v1213_v45  ;;  %v1217_v9 = vadd.f32 %v1216_v34, %v1215_v44  ;;  %v1146_v2 = vadd.f32 %v1145_v14, %v9056_v41  ;;  %v7533_v61 = vld [vmem:[%s11412_s4 + $0x248] ss:$12 sps:$4 sm:$0xff]  }
 0x25e   : > { %v1882_v27 = vmul.f32 0.125, %v1781_v11  ;;  %v1717_v17 = vrot.slane %v1716_v46, 1  ;;  %v1785_v53 = vadd.f32 %v1784_v37, %v1783_v5  ;;  %v1151_v10 = vsel %vm850_vm1, %v9061_v49, 0.0  ;;  %3266 = vmatpush1.bf16.msra.mxu0 %v7524_v57  ;;  %3476 = vmatpush1.bf16.msra.mxu1 %v7532_v13 }
 0x25f   : > { %v1409_v31 = vmul.f32 %v9438_v40, %v9438_v40  ;;  %v9452_v32 = vsub.f32 %v9029_v24, %v1294_v1  ;;  %v1218_v6 = vrot.slane %v1217_v9, 1  ;;  %v1147_v63 = vrot.slane %v1146_v2, 2  ;;  %3267 = vmatprep.subr.bf16.mxu0 %v7531_v52  ;;  %3477 = vmatprep.subr.bf16.mxu1 %v11523_v62 }
 0x260   : > { %v1946_v39 = vadd.f32 1e-05, %v1882_v27  ;;  %v1718_v44 = vadd.f32 %v1717_v17, %v1716_v46  ;;  %v1786_v38 = vrot.slane %v1785_v53, 1  ;;  %v1152_v51 = vrot.slane %v1151_v10, 4 }
 0x261   : > { %v7707_v5 = vpop.eup %7706  ;;  %v1719_v45 = vsel %vm850_vm1, %v1409_v31, 0.0  ;;  %v1422_v57 = vmul.f32 %v9452_v32, %v9452_v32  ;;  %v1219_v13 = vadd.f32 %v1218_v6, %v1217_v9  ;;  %v1148_v7 = vadd.f32 %v1147_v63, %v1146_v2 }
 0x262   : > { %v9460_v24 = vmul.f32 %v9412_v3, %v9273_v29  ;;  %v9463_v34 = vmul.f32 %v7705_v55, %v9287_v42  ;;  %v1872_v14 = vmul.f32 0.125, %v1718_v44  ;;  %v1787_v52 = vadd.f32 %v1786_v38, %v1785_v53  ;;  %3268 = vmatpush1.bf16.msra.mxu0 %v7529_v15  ;;  %3478 = vmatpush1.bf16.msra.mxu1 %v7533_v61  ;;  %v11524_v15 = vld [vmem:[#allocation21_spill] sm:$0xff] }
 0x263   : > { %v1720_v11 = vrot.slane %v1719_v45, 4  ;;  %v1801_v46 = vrot.slane %v1422_v57, 4  ;;  %v1295_v37 = vmul.f32 0.125, %v1219_v13  ;;  %v1149_v1 = vrot.slane %v1148_v7, 1 }
 0x264   : > { %7710 = vrsqrt.f32 %v1946_v39  ;;  %v1936_v27 = vadd.f32 1e-05, %v1872_v14  ;;  %v1883_v17 = vmul.f32 0.125, %v1787_v52  ;;  %v1153_v9 = vadd.f32 %v1152_v51, %v1151_v10  ;;  %v11525_v51 = vld [vmem:[#allocation23_spill] sm:$0xff] }
 0x265   : > { %v7709_v2 = vpop.eup %7708  ;;  %v1721_v31 = vadd.f32 %v1720_v11, %v1719_v45  ;;  %v1802_v6 = vadd.f32 %v1801_v46, %v1422_v57  ;;  %v9466_v29 = vsub.f32 %v9041_v54, %v1295_v37  ;;  %v1150_v42 = vadd.f32 %v1149_v1, %v1148_v7  ;;  %v11526_v11 = vld [vmem:[#allocation20_spill] sm:$0xff] }
 0x266   : > { %v9469_v3 = vmul.f32 %v7707_v5, %v9320_v50  ;;  %7712 = vrsqrt.f32 %v1936_v27  ;;  %v1154_v55 = vrot.slane %v1153_v9, 2  ;;  %v2091_v53 = vmax.f32 %v11524_v15, 0.0 }
 0x267   : > { %v1722_v61 = vrot.slane %v1721_v31, 2  ;;  %v1803_v63 = vrot.slane %v1802_v6, 2  ;;  %v1423_v39 = vmul.f32 %v9466_v29, %v9466_v29  ;;  %v1284_v10 = vmul.f32 0.125, %v1150_v42 }
 0x268   : > { %v9475_v44 = vmul.f32 %v7709_v2, %v9331_v36  ;;  %v1947_v38 = vadd.f32 1e-05, %v1883_v17  ;;  %v1155_v54 = vadd.f32 %v1154_v55, %v1153_v9  ;;  %v2095_v45 = vmax.f32 %v11525_v51, 0.0  ;;  %v11527_v2 = vld [vmem:[#allocation22_spill] sm:$0xff] }
 0x269   : > { %v1723_v57 = vadd.f32 %v1722_v61, %v1721_v31  ;;  %v1804_v50 = vadd.f32 %v1803_v63, %v1802_v6  ;;  %v1807_v5 = vrot.slane %v1423_v39, 4  ;;  %v9479_v13 = vsub.f32 %v9056_v41, %v1284_v10 }
 0x26a   : > { %v1156_v7 = vrot.slane %v1155_v54, 1  ;;  %v2304_v14 = vpack.c.bf16 %v2095_v45, %v2091_v53  ;;  %v1170_v52 = vrot.slane %v9106_v20, 4  ;;  %v2090_v46 = vmax.f32 %v11526_v11, 0.0 }
 0x26b   : > { %v1724_v37 = vrot.slane %v1723_v57, 1  ;;  %v1805_v1 = vrot.slane %v1804_v50, 1  ;;  %v1808_v36 = vadd.f32 %v1807_v5, %v1423_v39  ;;  %v1412_v27 = vmul.f32 %v9479_v13, %v9479_v13 }
 0x26c   : > { %v1157_v17 = vadd.f32 %v1156_v7, %v1155_v54  ;;  %3180 = vmatprep.mubr.bf16.mxu0 %v2304_v14  ;;  %3404 = vmatprep.mubr.bf16.mxu1 %v2304_v14  ;;  %v1171_v9 = vadd.f32 %v1170_v52, %v9106_v20  ;;  %v2094_v41 = vmax.f32 %v11527_v2, 0.0  ;;  %v1176_v31 = vsel %vm850_vm1, %v9122_v28, 0.0 }
 0x26d   : > { %7714 = vrsqrt.f32 %v1947_v38  ;;  %v1725_v6 = vadd.f32 %v1724_v37, %v1723_v57  ;;  %v1806_v42 = vadd.f32 %v1805_v1, %v1804_v50  ;;  %v1809_v55 = vrot.slane %v1808_v36, 2  ;;  %v9493_v57 = vpop.f32.mrb[32].mxu1 }
 0x26e   : > { %v7711_v15 = vpop.eup %7710  ;;  %v1738_v53 = vrot.slane %v1412_v27, 4  ;;  %v1285_v61 = vmul.f32 0.125, %v1157_v17  ;;  %v1172_v63 = vrot.slane %v1171_v9, 2  ;;  %v2303_v39 = vpack.c.bf16 %v2094_v41, %v2090_v46  ;;  %v9499_v1 = vpop.f32.mrb[33].mxu1 }
 0x26f   : > { %v1873_v10 = vmul.f32 0.125, %v1725_v6  ;;  %v1886_v54 = vmul.f32 0.125, %v1806_v42  ;;  %v1810_v51 = vadd.f32 %v1809_v55, %v1808_v36  ;;  %v1177_v45 = vrot.slane %v1176_v31, 4 }
 0x270   : > { %v7713_v5 = vpop.eup %7712  ;;  %v1739_v7 = vadd.f32 %v1738_v53, %v1412_v27  ;;  %v9490_v14 = vsub.f32 %v9061_v49, %v1285_v61  ;;  %v1173_v52 = vadd.f32 %v1172_v63, %v1171_v9  ;;  %3181 = vmatmul.mubr.bf16.gmra.mrb[36].mxu0 %v2303_v39  ;;  %3405 = vmatmul.mubr.bf16.gmra.mrb[52].mxu1 %v2303_v39  ;;  %v1195_v38 = vrot.slane %v9137_v60, 4  ;;  %v9503_v9 = vpop.f32.mrb[34].mxu1 }
 0x271   : > { %v9497_v11 = vmul.f32 %v7711_v15, %v9367_v0  ;;  %v1937_v46 = vadd.f32 1e-05, %v1873_v10  ;;  %v1811_v37 = vrot.slane %v1810_v51, 1  ;;  %v1178_v17 = vadd.f32 %v1177_v45, %v1176_v31  ;;  %11528 = vst [vmem:[#allocation27_spill] sm:$0xff] %v9503_v9  ;;  %v9509_v6 = vpop.f32.mrb[35].mxu1 }
 0x272   : > { %v1740_v36 = vrot.slane %v1739_v7, 2  ;;  %v1413_v49 = vmul.f32 %v9490_v14, %v9490_v14  ;;  %v1174_v27 = vrot.slane %v1173_v52, 1  ;;  %v9506_v2 = vmul.f32 %v7713_v5, %v9384_v22  ;;  %v9512_v61 = vpop.f32.mrb[36].mxu1 }
 0x273   : > { %7716 = vrsqrt.f32 %v1937_v46  ;;  %v1812_v41 = vadd.f32 %v1811_v37, %v1810_v51  ;;  %v1196_v0 = vadd.f32 %v1195_v38, %v9137_v60  ;;  %v1950_v42 = vadd.f32 1e-05, %v1886_v54  ;;  %11529 = vst [vmem:[#allocation16_spill] sm:$0xff] %v9512_v61  ;;  %v9514_v45 = vpop.f32.mrb[37].mxu1  ;;  %v11531_v38 = vld [vmem:[#allocation26_spill] sm:$0xff] }
 0x274   : > { %v1741_v55 = vadd.f32 %v1740_v36, %v1739_v7  ;;  %v1744_v15 = vsel %vm850_vm1, %v1413_v49, 0.0  ;;  %v1175_v53 = vadd.f32 %v1174_v27, %v1173_v52  ;;  %v1179_v39 = vrot.slane %v1178_v17, 2  ;;  %11530 = vst [vmem:[#allocation18_spill] sm:$0xff] %v9514_v45  ;;  %v9519_v54 = vpop.f32.mrb[38].mxu1 }
 0x275   : > { %v1887_v63 = vmul.f32 0.125, %v1812_v41  ;;  %v1745_v31 = vrot.slane %v1744_v15, 4  ;;  %v1197_v10 = vrot.slane %v1196_v0, 2  ;;  %v1201_v51 = vsel %vm850_vm1, %v9139_v25, 0.0  ;;  %11532 = vst [vmem:[#allocation15_spill] sm:$0xff] %v9519_v54  ;;  %v9521_v27 = vpop.f32.mrb[39].mxu1 }
 0x276   : > { %v1742_v22 = vrot.slane %v1741_v55, 1  ;;  %v1288_v5 = vmul.f32 0.125, %v1175_v53  ;;  %v2099_v46 = vmax.f32 %v11531_v38, 0.0  ;;  %v1180_v36 = vadd.f32 %v1179_v39, %v1178_v17  ;;  %v9527_v61 = vpop.f32.mrb[40].mxu1 }
 0x277   : > { %v7715_v7 = vpop.eup %7714  ;;  %v1951_v37 = vadd.f32 1e-05, %v1887_v63  ;;  %v1746_v52 = vadd.f32 %v1745_v31, %v1744_v15  ;;  %v1198_v49 = vadd.f32 %v1197_v10, %v1196_v0  ;;  %v1202_v62 = vrot.slane %v1201_v51, 4  ;;  %11533 = vst [vmem:[#allocation21_spill] sm:$0xff] %v9527_v61  ;;  %v9529_v9 = vpop.f32.mrb[41].mxu1 }
 0x278   : > { %v1743_v41 = vadd.f32 %v1742_v22, %v1741_v55  ;;  %v9524_v50 = vsub.f32 %v9106_v20, %v1288_v5  ;;  %v2103_v53 = vmax.f32 %v9010_v8, 0.0  ;;  %7718 = vrsqrt.f32 %v1950_v42  ;;  %v9533_v63 = vpop.f32.mrb[42].mxu1 }
 0x279   : > { %v1747_v38 = vrot.slane %v1746_v52, 2  ;;  %v1181_v45 = vrot.slane %v1180_v36, 1  ;;  %v1199_v54 = vrot.slane %v1198_v49, 1  ;;  %v1203_v0 = vadd.f32 %v1202_v62, %v1201_v51  ;;  %11534 = vst [vmem:[#allocation23_spill] sm:$0xff] %v9533_v63  ;;  %v9536_v10 = vpop.f32.mrb[43].mxu1 }
 0x27a   : > { %v1876_v15 = vmul.f32 0.125, %v1743_v41  ;;  %v1416_v17 = vmul.f32 %v9524_v50, %v9524_v50  ;;  %v2308_v55 = vpack.c.bf16 %v2103_v53, %v2099_v46  ;;  %v1220_v8 = vrot.slane %v9154_v26, 4  ;;  %11535 = vst [vmem:[#allocation20_spill] sm:$0xff] %v9536_v10  ;;  %v9541_v41 = vpop.f32.mrb[44].mxu1 }
 0x27b   : > { %v1748_v20 = vadd.f32 %v1747_v38, %v1746_v52  ;;  %v1182_v31 = vadd.f32 %v1181_v45, %v1180_v36  ;;  %v1200_v39 = vadd.f32 %v1199_v54, %v1198_v49  ;;  %v9539_v42 = vmul.f32 %v7715_v7, %v9397_v18  ;;  %11536 = vst [vmem:[#allocation22_spill] sm:$0xff] %v9541_v41  ;;  %v9544_v54 = vpop.f32.mrb[45].mxu1 }
 0x27c   : > { %7720 = vrsqrt.f32 %v1951_v37  ;;  %v1763_v22 = vrot.slane %v1416_v17, 4  ;;  %v1204_v5 = vrot.slane %v1203_v0, 2  ;;  %3190 = vmatprep.mubr.bf16.mxu0 %v2308_v55  ;;  %3412 = vmatprep.mubr.bf16.mxu1 %v2308_v55  ;;  %v1221_v45 = vadd.f32 %v1220_v8, %v9154_v26  ;;  %11537 = vst [vmem:[#allocation26_spill] sm:$0xff] %v9544_v54  ;;  %v9547_v37 = vpop.f32.mrb[46].mxu1 }
 0x27d   : > { %v7717_v62 = vpop.eup %7716  ;;  %v1749_v51 = vrot.slane %v1748_v20, 1  ;;  %v1289_v46 = vmul.f32 0.125, %v1182_v31  ;;  %v1292_v52 = vmul.f32 0.125, %v1200_v39  ;;  %v1940_v49 = vadd.f32 1e-05, %v1876_v15  ;;  %11538 = vst [vmem:[#allocation39_spill] sm:$0xff] %v9547_v37 }
 0x27e   : > { %v2065_v36 = vmul.f32 %v7717_v62, %v9438_v40  ;;  %v1764_v18 = vadd.f32 %v1763_v22, %v1416_v17  ;;  %v1205_v7 = vadd.f32 %v1204_v5, %v1203_v0  ;;  %v11539_v31 = vld [vmem:[#allocation24_spill] sm:$0xff]  ;;  %v9556_v41 = vpop.f32.mrb[47].mxu1  ;;  %v1222_v40 = vrot.slane %v1221_v45, 2 }
 0x27f   : > { %v1750_v53 = vadd.f32 %v1749_v51, %v1748_v20  ;;  %v9550_v38 = vsub.f32 %v9122_v28, %v1289_v46  ;;  %v9553_v55 = vsub.f32 %v9137_v60, %v1292_v52  ;;  %v2098_v39 = vmax.f32 %v11539_v31, 0.0  ;;  %11540 = vst [vmem:[#allocation24_spill] sm:$0xff] %v9556_v41  ;;  %v11541_v28 = vld [vmem:[#allocation29_spill] sm:$0xff] }
 0x280   : > { %v2129_v8 = vmax.f32 %v2065_v36, 0.0  ;;  %v1765_v54 = vrot.slane %v1764_v18, 2  ;;  %v1206_v63 = vrot.slane %v1205_v7, 1  ;;  %v2102_v20 = vmax.f32 %v11541_v28, 0.0 }
 0x281   : > { %v1877_v15 = vmul.f32 0.125, %v1750_v53  ;;  %v1417_v17 = vmul.f32 %v9550_v38, %v9550_v38  ;;  %v1420_v0 = vmul.f32 %v9553_v55, %v9553_v55  ;;  %v11542_v60 = vmax.f32 %v9475_v44, 0.0 }
 0x282   : > { %v1766_v5 = vadd.f32 %v1765_v54, %v1764_v18  ;;  %v1207_v62 = vadd.f32 %v1206_v63, %v1205_v7  ;;  %v1223_v51 = vadd.f32 %v1222_v40, %v1221_v45  ;;  %v7719_v46 = vpop.eup %7718  ;;  %v2307_v31 = vpack.c.bf16 %v2102_v20, %v2098_v39  ;;  %v11543_v40 = vld [vmem:[#allocation35_spill] sm:$0xff] }
 0x283   : > { %v9565_v22 = vpack.c.bf16 %v2129_v8, %v11542_v60  ;;  %v1941_v52 = vadd.f32 1e-05, %v1877_v15  ;;  %v1769_v36 = vsel %vm850_vm1, %v1417_v17, 0.0  ;;  %v1788_v53 = vrot.slane %v1420_v0, 4 }
 0x284   : > { %7722 = vrsqrt.f32 %v1940_v49  ;;  %v1767_v37 = vrot.slane %v1766_v5, 1  ;;  %v1770_v41 = vrot.slane %v1769_v36, 4  ;;  %v1293_v61 = vmul.f32 0.125, %v1207_v62  ;;  %3191 = vmatmul.mubr.bf16.gmra.mrb[40].mxu0 %v2307_v31  ;;  %3413 = vmatmul.mubr.bf16.gmra.mrb[56].mxu1 %v2307_v31  ;;  %v11544_v31 = vld [vmem:[#allocation31_spill] sm:$0xff] }
 0x285   : > { %7724 = vrsqrt.f32 %v1941_v52  ;;  %v1789_v10 = vadd.f32 %v1788_v53, %v1420_v0  ;;  %v1224_v28 = vrot.slane %v1223_v51, 1  ;;  %v1226_v44 = vsel %vm850_vm1, %v9171_v16, 0.0 }
 0x286   : > { %v7721_v63 = vpop.eup %7720  ;;  %v1768_v45 = vadd.f32 %v1767_v37, %v1766_v5  ;;  %v1771_v54 = vadd.f32 %v1770_v41, %v1769_v36  ;;  %v9571_v18 = vsub.f32 %v9139_v25, %v1293_v61  ;;  %v1227_v7 = vrot.slane %v1226_v44, 4 }
 0x287   : > { %v1790_v39 = vrot.slane %v1789_v10, 2  ;;  %v1225_v49 = vadd.f32 %v1224_v28, %v1223_v51  ;;  %v2107_v8 = vmax.f32 %v9064_v19, 0.0  ;;  %v2111_v15 = vmax.f32 %v11543_v40, 0.0 }
 0x288   : > { %v1880_v17 = vmul.f32 0.125, %v1768_v45  ;;  %v1772_v0 = vrot.slane %v1771_v54, 2  ;;  %v1421_v20 = vmul.f32 %v9571_v18, %v9571_v18  ;;  %v1228_v60 = vadd.f32 %v1227_v7, %v1226_v44 }
 0x289   : > { %v9578_v62 = vmul.f32 %v7719_v46, %v9452_v32  ;;  %v1791_v41 = vadd.f32 %v1790_v39, %v1789_v10  ;;  %v1296_v37 = vmul.f32 0.125, %v1225_v49  ;;  %v2312_v25 = vpack.c.bf16 %v2111_v15, %v2107_v8  ;;  %v11545_v10 = vld [vmem:[#allocation34_spill] sm:$0xff] }
 0x28a   : > { %v1944_v61 = vadd.f32 1e-05, %v1880_v17  ;;  %v1773_v5 = vadd.f32 %v1772_v0, %v1771_v54  ;;  %v1794_v51 = vsel %vm850_vm1, %v1421_v20, 0.0  ;;  %v1229_v52 = vrot.slane %v1228_v60, 2 }
 0x28b   : > { %v1792_v19 = vrot.slane %v1791_v41, 1  ;;  %v1795_v36 = vrot.slane %v1794_v51, 4  ;;  %v9582_v53 = vsub.f32 %v9154_v26, %v1296_v37  ;;  %3200 = vmatprep.mubr.bf16.mxu0 %v2312_v25  ;;  %3420 = vmatprep.mubr.bf16.mxu1 %v2312_v25  ;;  %v2106_v28 = vmax.f32 %v11544_v31, 0.0 }
 0x28c   : > { %7726 = vrsqrt.f32 %v1944_v61  ;;  %v1774_v32 = vrot.slane %v1773_v5, 1  ;;  %v1230_v46 = vadd.f32 %v1229_v52, %v1228_v60  ;;  %v2110_v44 = vmax.f32 %v11545_v10, 0.0  ;;  %v11546_v52 = vld [vmem:[#allocation37_spill] sm:$0xff] }
 0x28d   : > { %v1793_v45 = vadd.f32 %v1792_v19, %v1791_v41  ;;  %v1796_v7 = vadd.f32 %v1795_v36, %v1794_v51  ;;  %v1424_v54 = vmul.f32 %v9582_v53, %v9582_v53  ;;  %v2115_v39 = vmax.f32 %v9178_v21, 0.0  ;;  %v11547_v36 = vld [vmem:[#allocation17_spill] sm:$0xff] }
 0x28e   : > { %v7723_v49 = vpop.eup %7722  ;;  %v1775_v8 = vadd.f32 %v1774_v32, %v1773_v5  ;;  %v1231_v26 = vrot.slane %v1230_v46, 1  ;;  %v2311_v40 = vpack.c.bf16 %v2110_v44, %v2106_v28  ;;  %v2119_v15 = vmax.f32 %v9206_v12, 0.0 }
 0x28f   : > { %v7725_v17 = vpop.eup %7724  ;;  %v2079_v0 = vmul.f32 %v7721_v63, %v9466_v29  ;;  %v1884_v20 = vmul.f32 0.125, %v1793_v45  ;;  %v1797_v60 = vrot.slane %v1796_v7, 2  ;;  %v1813_v37 = vrot.slane %v1424_v54, 4 }
 0x290   : > { %v9592_v41 = vmul.f32 %v7725_v17, %v9490_v14  ;;  %v1881_v25 = vmul.f32 0.125, %v1775_v8  ;;  %v1232_v61 = vadd.f32 %v1231_v26, %v1230_v46  ;;  %3201 = vmatmul.mubr.bf16.gmra.mrb[44].mxu0 %v2311_v40  ;;  %3421 = vmatmul.mubr.bf16.gmra.mrb[60].mxu1 %v2311_v40  ;;  %v2316_v21 = vpack.c.bf16 %v2119_v15, %v2115_v39 }
 0x291   : > { %v1798_v51 = vadd.f32 %v1797_v60, %v1796_v7  ;;  %v1814_v5 = vadd.f32 %v1813_v37, %v1424_v54  ;;  %v2114_v19 = vmax.f32 %v11546_v52, 0.0  ;;  %v2118_v12 = vmax.f32 %v11547_v36, 0.0 }
 0x292   : > { %v9597_v31 = vmul.f32 %v7723_v49, %v9479_v13  ;;  %v1945_v29 = vadd.f32 1e-05, %v1881_v25  ;;  %v1948_v63 = vadd.f32 1e-05, %v1884_v20  ;;  %v1297_v28 = vmul.f32 0.125, %v1232_v61  ;;  %3210 = vmatprep.mubr.bf16.mxu0 %v2316_v21  ;;  %3428 = vmatprep.mubr.bf16.mxu1 %v2316_v21 }
 0x293   : > { %v2133_v14 = vmax.f32 %v9592_v41, 0.0  ;;  %v1799_v32 = vrot.slane %v1798_v51, 1  ;;  %v1815_v46 = vrot.slane %v1814_v5, 2  ;;  %v2315_v10 = vpack.c.bf16 %v2118_v12, %v2114_v19 }
 0x294   : > { %7728 = vrsqrt.f32 %v1945_v29  ;;  %v9601_v44 = vsub.f32 %v9171_v16, %v1297_v28  ;;  %v2123_v45 = vmax.f32 %v9257_v59, 0.0  ;;  %v2127_v7 = vmax.f32 %v9282_v35, 0.0  ;;  %v11549_v29 = vld [vmem:[#allocation32_spill] sm:$0xff] }
 0x295   : > { %v1800_v13 = vadd.f32 %v1799_v32, %v1798_v51  ;;  %v1816_v54 = vadd.f32 %v1815_v46, %v1814_v5  ;;  %v2122_v39 = vmax.f32 %v9212_v30, 0.0  ;;  %v2126_v49 = vmax.f32 %v9276_v33, 0.0  ;;  %v11548_v51 = vld [vmem:[#allocation30_spill] sm:$0xff]  ;;  %v11550_v28 = vld [vmem:[#allocation36_spill] sm:$0xff] }
 0x296   : > { %v7727_v8 = vpop.eup %7726  ;;  %v1425_v26 = vmul.f32 %v9601_v44, %v9601_v44  ;;  %v2320_v40 = vpack.c.bf16 %v2127_v7, %v2123_v45  ;;  %v2131_v15 = vmax.f32 %v9435_v43, 0.0  ;;  %v2135_v16 = vmax.f32 %v9463_v34, 0.0  ;;  %v11551_v46 = vld [vmem:[#allocation38_spill] sm:$0xff]  ;;  %v11552_v45 = vld [vmem:[#allocation19_spill] sm:$0xff] }
 0x297   : > { %7730 = vrsqrt.f32 %v1948_v63  ;;  %v1817_v17 = vrot.slane %v1816_v54, 1  ;;  %v2319_v59 = vpack.c.bf16 %v2126_v49, %v2122_v39  ;;  %v2130_v35 = vmax.f32 %v9305_v58, 0.0 }
 0x298   : > { %v1885_v20 = vmul.f32 0.125, %v1800_v13  ;;  %v1819_v60 = vsel %vm850_vm1, %v1425_v26, 0.0  ;;  %3211 = vmatmul.mubr.bf16.gmra.mrb[48].mxu0 %v2315_v10  ;;  %3429 = vmatmul.mubr.bf16.gmra.mrb[64].mxu1 %v2315_v10  ;;  %v2324_v30 = vpack.c.bf16 %v2135_v16, %v2131_v15  ;;  %v2134_v33 = vmax.f32 %v9460_v24, 0.0 }
 0x299   : > { %v1818_v37 = vadd.f32 %v1817_v17, %v1816_v54  ;;  %v1820_v25 = vrot.slane %v1819_v60, 4  ;;  %3220 = vmatprep.mubr.bf16.mxu0 %v2320_v40  ;;  %3436 = vmatprep.mubr.bf16.mxu1 %v2320_v40  ;;  %v2139_v43 = vmax.f32 %v9539_v42, 0.0  ;;  %v2143_v34 = vmax.f32 %v2079_v0, 0.0 }
 0x29a   : > { %v2323_v61 = vpack.c.bf16 %v2134_v33, %v2130_v35  ;;  %v2138_v21 = vmax.f32 %v9497_v11, 0.0  ;;  %v2142_v58 = vmax.f32 %v9578_v62, 0.0  ;;  %v2092_v5 = vmax.f32 %v11548_v51, 0.0 }
 0x29b   : > { %v2072_v52 = vmul.f32 %v7727_v8, %v9524_v50  ;;  %v1888_v19 = vmul.f32 0.125, %v1818_v37  ;;  %v1821_v36 = vadd.f32 %v1820_v25, %v1819_v60  ;;  %v2328_v12 = vpack.c.bf16 %v2143_v34, %v2139_v43 }
 0x29c   : > { %v2327_v24 = vpack.c.bf16 %v2142_v58, %v2138_v21  ;;  %v2096_v63 = vmax.f32 %v11549_v29, 0.0  ;;  %v2100_v32 = vmax.f32 %v11550_v28, 0.0  ;;  %v2104_v42 = vmax.f32 %v11551_v46, 0.0  ;;  %v11553_v21 = vld [vmem:[#allocation28_spill] sm:$0xff] }
 0x29d   : > { %v1952_v0 = vadd.f32 1e-05, %v1888_v19  ;;  %v1822_v10 = vrot.slane %v1821_v36, 2  ;;  %v2108_v11 = vmax.f32 %v11552_v45, 0.0  ;;  %v2112_v62 = vmax.f32 %v9239_v56, 0.0 }
 0x29e   : > { %v7729_v7 = vpop.eup %7728  ;;  %v1949_v13 = vadd.f32 1e-05, %v1885_v20  ;;  %v2305_v54 = vpack.c.bf16 %v2096_v63, %v2092_v5  ;;  %v2309_v50 = vpack.c.bf16 %v2104_v42, %v2100_v32  ;;  %v2116_v39 = vmax.f32 %v9297_v48, 0.0  ;;  %v11554_v5 = vld [vmem:[#allocation25_spill] sm:$0xff]  ;;  %v7542_v19 = vld [vmem:[#allocation6 + $0x34] ss:$12 sps:$4 sm:$0xff]  }
 0x29f   : > { %v2073_v49 = vmul.f32 %v7729_v7, %v9550_v38  ;;  %7732 = vrsqrt.f32 %v1952_v0  ;;  %v1823_v8 = vadd.f32 %v1822_v10, %v1821_v36  ;;  %v2313_v26 = vpack.c.bf16 %v2112_v62, %v2108_v11  ;;  %v7540_v36 = vld [vmem:[#allocation6 + $0x30] ss:$12 sps:$4 sm:$0xff]   ;;  %v7545_v0 = vld [vmem:[#allocation6 + $0x4c] ss:$12 sps:$4 sm:$0xff]   ;;  %v7543_v10 = vld [vmem:[#allocation6 + $0x48] ss:$12 sps:$4 sm:$0xff]  }
 0x2a0   : > { %3221 = vmatmul.mubr.bf16.gmra.mrb[52].mxu0 %v2319_v59  ;;  %3437 = vmatmul.mubr.bf16.gmra.mrb[68].mxu1 %v2319_v59  ;;  %v2120_v40 = vmax.f32 %v9402_v4, 0.0  ;;  %v2124_v15 = vmax.f32 %v9469_v3, 0.0  ;;  %v2128_v16 = vmax.f32 %v9506_v2, 0.0  ;;  %v2132_v56 = vmax.f32 %v9597_v31, 0.0  ;;  %v7548_v45 = vld [vmem:[#allocation6 + $0x64] ss:$12 sps:$4 sm:$0xff]  }
 0x2a1   : > { %v7731_v17 = vpop.eup %7730  ;;  %v2137_v35 = vmax.f32 %v2073_v49, 0.0  ;;  %v1824_v20 = vrot.slane %v1823_v8, 1  ;;  %3230 = vmatprep.mubr.bf16.mxu0 %v2324_v30  ;;  %3444 = vmatprep.mubr.bf16.mxu1 %v2324_v30  ;;  %v2136_v48 = vmax.f32 %v2072_v52, 0.0  ;;  %7734 = vrsqrt.f32 %v1949_v13  ;;  %v11555_v52 = vld [vmem:[#allocation33_spill] sm:$0xff]  ;;  %v7549_v7 = vld [vmem:[#allocation6 + $0x78] ss:$12 sps:$4 sm:$0xff]  }
 0x2a2   : > { %v2317_v38 = vpack.c.bf16 %v2120_v40, %v2116_v39  ;;  %v2321_v60 = vpack.c.bf16 %v2128_v16, %v2124_v15  ;;  %v2076_v3 = vmul.f32 %v7731_v17, %v9553_v55  ;;  %v7546_v11 = vld [vmem:[#allocation6 + $0x60] ss:$12 sps:$4 sm:$0xff]   ;;  %v7551_v62 = vld [vmem:[#allocation6 + $0x7c] ss:$12 sps:$4 sm:$0xff]  }
 0x2a3   : > { %v2326_v33 = vpack.c.bf16 %v2137_v35, %v2133_v14  ;;  %v1825_v59 = vadd.f32 %v1824_v20, %v1823_v8  ;;  %v2325_v4 = vpack.c.bf16 %v2136_v48, %v2132_v56  ;;  %v7555_v13 = vld [vmem:[#allocation6 + $0x94] ss:$12 sps:$4 sm:$0xff]   ;;  %v7559_v17 = vld [vmem:[#allocation6 + $0xac] ss:$12 sps:$4 sm:$0xff]  }
 0x2a4   : > { %v2140_v25 = vmax.f32 %v2076_v3, 0.0  ;;  %v11557_v16 = vld [vmem:[#allocation27_spill] sm:$0xff]  ;;  %v7557_v35 = vld [vmem:[#allocation6 + $0xa8] ss:$12 sps:$4 sm:$0xff]  }
 0x2a5   : > { %v1889_v37 = vmul.f32 0.125, %v1825_v59  ;;  %v7561_v59 = vld [vmem:[#allocation6 + $0xc0] ss:$12 sps:$4 sm:$0xff]   ;;  %v11558_v3 = vld [vmem:[#allocation18_spill] sm:$0xff] }
 0x2a7   : > { %v1953_v2 = vadd.f32 1e-05, %v1889_v37 }
 0x2a8   : > { %3231 = vmatmul.mubr.bf16.gmra.mrb[56].mxu0 %v2323_v61  ;;  %3445 = vmatmul.mubr.bf16.gmra.mrb[72].mxu1 %v2323_v61 }
 0x2a9   : > { %v7733_v31 = vpop.eup %7732  ;;  %7736 = vrsqrt.f32 %v1953_v2  ;;  %3240 = vmatprep.mubr.bf16.mxu0 %v2328_v12  ;;  %3452 = vmatprep.mubr.bf16.mxu1 %v2328_v12 }
 0x2aa   : > { %v2080_v30 = vmul.f32 %v7733_v31, %v9582_v53 }
 0x2ab   : > { %v7735_v34 = vpop.eup %7734 }
 0x2ac   : > { %v2144_v43 = vmax.f32 %v2080_v30, 0.0  ;;  %v2077_v14 = vmul.f32 %v7735_v34, %v9571_v18  ;;  %v11556_v18 = vld [vmem:[#allocation14_spill] sm:$0xff]  ;;  %v7564_v30 = vld [vmem:[#allocation6 + $0x20] ss:$12 sps:$4 sm:$0xff]  }
 0x2ae   : > { %v2329_v41 = vpack.c.bf16 %v2144_v43, %v2140_v25  ;;  %v2141_v61 = vmax.f32 %v2077_v14, 0.0 }
 0x2b0   : > { %3241 = vmatmul.mubr.bf16.gmra.mrb[60].mxu0 %v2327_v24  ;;  %3453 = vmatmul.mubr.bf16.gmra.mrb[76].mxu1 %v2327_v24 }
 0x2b1   : > { %6932 = vmatprep.mubr.msk.bf16.mxu0 %vm850_vm1, %v11553_v21  ;;  %6940 = vmatprep.mubr.msk.bf16.mxu1 %vm850_vm1, %v11553_v21 }
 0x2b3   : > { %v7737_v55 = vpop.eup %7736 }
 0x2b4   : > { %v2081_v58 = vmul.f32 %v7737_v55, %v9601_v44  ;;  %v7537_v44 = vld [vmem:[#allocation6 + $0x18] ss:$12 sps:$4 sm:$0xff]  }
 0x2b5   : > { %v11559_v55 = vld [vmem:[#allocation16_spill] sm:$0xff] }
 0x2b6   : > { %v2145_v51 = vmax.f32 %v2081_v58, 0.0  ;;  %v11560_v58 = vld [vmem:[#allocation15_spill] sm:$0xff] }
 0x2b8   : > { %v2330_v53 = vpack.c.bf16 %v2145_v51, %v2141_v61  ;;  %3284 = vmatmul.mubr.bf16.vlgmr.msra.gmra.mrb[32].mxu0 %v11554_v5  ;;  %3494 = vmatmul.mubr.bf16.vlgmr.msra.gmra.mrb[80].mxu1 %v11554_v5 }
 0x2b9   : > { %6933 = vmatprep.mubr.msk.bf16.mxu0 %vm850_vm1, %v11555_v52  ;;  %6941 = vmatprep.mubr.msk.bf16.mxu1 %vm850_vm1, %v11555_v52 }
 0x2c0   : > { %3294 = vmatmul.mubr.bf16.gmra.mrb[36].mxu0 %v2305_v54  ;;  %3502 = vmatmul.mubr.bf16.gmra.mrb[84].mxu1 %v2305_v54  ;;  %v7553_v54 = vld [vmem:[#allocation6 + $0x90] ss:$12 sps:$4 sm:$0xff]  }
 0x2c1   : > { %6934 = vmatprep.mubr.msk.bf16.mxu0 %vm850_vm1, %v11556_v18  ;;  %6942 = vmatprep.mubr.msk.bf16.mxu1 %vm850_vm1, %v11556_v18 }
 0x2c8   : > { %3304 = vmatmul.mubr.bf16.gmra.mrb[40].mxu0 %v2309_v50  ;;  %3510 = vmatmul.mubr.bf16.gmra.mrb[88].mxu1 %v2309_v50  ;;  %v7556_v50 = vld [vmem:[#allocation6 + $0x8] ss:$12 sps:$4 sm:$0xff]  }
 0x2c9   : > { %6935 = vmatprep.mubr.msk.bf16.mxu0 %vm850_vm1, %v9261_v23  ;;  %6943 = vmatprep.mubr.msk.bf16.mxu1 %vm850_vm1, %v9261_v23  ;;  %v7534_v23 = vld [vmem:[#allocation6] ss:$12 sps:$4 sm:$0xff]  }
 0x2d0   : > { %3314 = vmatmul.mubr.bf16.gmra.mrb[44].mxu0 %v2313_v26  ;;  %3518 = vmatmul.mubr.bf16.gmra.mrb[92].mxu1 %v2313_v26 }
 0x2d1   : > { %6936 = vmatprep.mubr.msk.bf16.mxu0 %vm850_vm1, %v9420_v47  ;;  %6944 = vmatprep.mubr.msk.bf16.mxu1 %vm850_vm1, %v9420_v47  ;;  %v7536_v47 = vld [vmem:[#allocation6 + $0x4] ss:$12 sps:$4 sm:$0xff]  }
 0x2d2   : > { %4986 = vmatprep.subr.bf16.mxu1 %v7536_v47 }
 0x2d3   : > { %4987 = vmatpush1.bf16.msra.mxu1 %v7534_v23 }
 0x2d8   : > { %3324 = vmatmul.mubr.bf16.gmra.mrb[48].mxu0 %v2317_v38  ;;  %3526 = vmatmul.mubr.bf16.gmra.mrb[96].mxu1 %v2317_v38  ;;  %v7563_v38 = vld [vmem:[#allocation6 + $0xc4] ss:$12 sps:$4 sm:$0xff]  }
 0x2d9   : > { %6937 = vmatprep.mubr.msk.bf16.mxu0 %vm850_vm1, %v9565_v22  ;;  %6945 = vmatprep.mubr.msk.bf16.mxu1 %vm850_vm1, %v9565_v22  ;;  %v7539_v22 = vld [vmem:[#allocation6 + $0x1c] ss:$12 sps:$4 sm:$0xff]  }
 0x2da   : > { %4988 = vmatprep.subr.bf16.mxu1 %v7539_v22  ;;  %v11561_v22 = vld [vmem:[#allocation20_spill] sm:$0xff] }
 0x2db   : > { %4989 = vmatpush1.bf16.msra.mxu1 %v7537_v44  ;;  %v7567_v44 = vld [vmem:[#allocation6 + $0xdc] ss:$12 sps:$4 sm:$0xff]  }
 0x2dc   : > { %4990 = vmatprep.subr.bf16.mxu1 %v7542_v19 }
 0x2df   : > { %4991 = vmatpush1.bf16.msra.mxu1 %v7540_v36  ;;  %v7565_v36 = vld [vmem:[#allocation6 + $0xd8] ss:$12 sps:$4 sm:$0xff]  }
 0x2e0   : > { %3334 = vmatmul.mubr.bf16.gmra.mrb[52].mxu0 %v2321_v60  ;;  %3534 = vmatmul.mubr.bf16.gmra.mrb[100].mxu1 %v2321_v60 }
 0x2e1   : > { %6938 = vmatprep.mubr.msk.bf16.mxu0 %vm850_vm1, %v2326_v33  ;;  %6946 = vmatprep.mubr.msk.bf16.mxu1 %vm850_vm1, %v2326_v33 }
 0x2e2   : > { %4992 = vmatprep.subr.bf16.mxu1 %v7545_v0 }
 0x2e3   : > { %4993 = vmatpush1.bf16.msra.mxu1 %v7543_v10  ;;  %v7569_v10 = vld [vmem:[#allocation6 + $0xf0] ss:$12 sps:$4 sm:$0xff]  }
 0x2e4   : > { %4994 = vmatprep.subr.bf16.mxu1 %v7548_v45  ;;  %v7572_v45 = vld [vmem:[#allocation6 + $0x38] ss:$12 sps:$4 sm:$0xff]  }
 0x2e7   : > { %4995 = vmatpush1.bf16.msra.mxu1 %v7546_v11 }
 0x2e8   : > { %3344 = vmatmul.mubr.bf16.gmra.mrb[56].mxu0 %v2325_v4  ;;  %3542 = vmatmul.mubr.bf16.gmra.mrb[104].mxu1 %v2325_v4 }
 0x2e9   : > { %6939 = vmatprep.mubr.msk.bf16.mxu0 %vm850_vm1, %v2330_v53  ;;  %6947 = vmatprep.mubr.msk.bf16.mxu1 %vm850_vm1, %v2330_v53  ;;  %vm6679_vm1 = vcmask 982912  }
 0x2ea   : > { %4996 = vmatprep.subr.bf16.mxu1 %v7551_v62 }
 0x2eb   : > { %4997 = vmatpush1.bf16.msra.mxu1 %v7549_v7  ;;  %v11565_v7 = vld [vmem:[#allocation23_spill] sm:$0xff] }
 0x2ec   : > { %4998 = vmatprep.subr.bf16.mxu1 %v7555_v13 }
 0x2ef   : > { %4999 = vmatpush1.bf16.msra.mxu1 %v7553_v54 }
 0x2f0   : > { %3354 = vmatmul.mubr.bf16.gmra.mrb[60].mxu0 %v2329_v41  ;;  %3550 = vmatmul.mubr.bf16.gmra.mrb[108].mxu1 %v2329_v41 }
 0x2f1   : > { %5000 = vmatprep.subr.bf16.mxu1 %v7559_v17 }
 0x2f3   : > { %5001 = vmatpush1.bf16.msra.mxu1 %v7557_v35 }
 0x2f4   : > { %5002 = vmatprep.subr.bf16.mxu1 %v7563_v38 }
 0x2f7   : > { %5003 = vmatpush1.bf16.msra.mxu1 %v7561_v59 }
 0x2f8   : > { %5004 = vmatprep.subr.bf16.mxu1 %v7567_v44 }
 0x2fb   : > { %5005 = vmatpush1.bf16.msra.mxu1 %v7565_v36  ;;  %v7575_v36 = vld [vmem:[#allocation6 + $0x10c] ss:$12 sps:$4 sm:$0xff]  }
 0x314   : > { %v7052_v12 = vpop.f32.mrb[48].mxu1 }
 0x315   : > { %v7053_v24 = vpop.f32.mrb[49].mxu1 }
 0x316   : > { %v7054_v29 = vadd.f32 %v7053_v24, %v7052_v12  ;;  %v7055_v63 = vpop.f32.mrb[50].mxu1 }
 0x317   : > { %v7056_v28 = vpop.f32.mrb[51].mxu1 }
 0x318   : > { %v7057_v32 = vadd.f32 %v7056_v28, %v7055_v63  ;;  %v9667_v46 = vadd.f32 %v7054_v29, %v9499_v1  ;;  %v7552_v1 = vld [vmem:[#allocation6 + $0xc8] ss:$12 sps:$4 sm:$0xff]   ;;  %v7568_v28 = vld [vmem:[#allocation6 + $0xf8] ss:$12 sps:$4 sm:$0xff]  }
 0x319   : > { %7100 = vmatprep.subr.bf16.mxu0 %v7552_v1 }
 0x31a   : > { %v9670_v42 = vadd.f32 %v7057_v32, %v9509_v6  ;;  %7101 = vmatpush3.bf16.msra.mxu0 %v7556_v50  ;;  %v7571_v32 = vld [vmem:[#allocation6 + $0xf4] ss:$12 sps:$4 sm:$0xff]  }
 0x31b   : > { %5006 = vmatprep.subr.bf16.mxu1 %v7571_v32 }
 0x31c   : > { %5007 = vmatpush1.bf16.msra.mxu1 %v7569_v10 }
 0x31d   : > { %5008 = vmatprep.subr.bf16.mxu1 %v7575_v36 }
 0x343   : > { %v7058_v6 = vpop.f32.mrb[52].mxu1 }
 0x344   : > { %v7059_v39 = vpop.f32.mrb[53].mxu1 }
 0x345   : > { %v7060_v49 = vadd.f32 %v7059_v39, %v7058_v6  ;;  %v7061_v8 = vpop.f32.mrb[54].mxu1 }
 0x346   : > { %v7062_v26 = vpop.f32.mrb[55].mxu1 }
 0x347   : > { %v7063_v40 = vadd.f32 %v7062_v26, %v7061_v8  ;;  %v9673_v15 = vadd.f32 %v9493_v57, %v7060_v49  ;;  %v7560_v57 = vld [vmem:[#allocation6 + $0xe0] ss:$12 sps:$4 sm:$0xff]   ;;  %v11567_v8 = vld [vmem:[#allocation26_spill] sm:$0xff] }
 0x348   : > { %7102 = vmatprep.subr.bf16.mxu0 %v7560_v57 }
 0x349   : > { %v9676_v56 = vadd.f32 %v11557_v16, %v7063_v40  ;;  %7103 = vmatpush3.bf16.msra.mxu0 %v7564_v30 }
 0x34a   : > { %7104 = vmatprep.subr.bf16.mxu0 %v7568_v28  ;;  %v7577_v28 = vld [vmem:[#allocation6 + $0x50] ss:$12 sps:$4 sm:$0xff]  }
 0x34d   : > { %7105 = vmatpush3.bf16.msra.mxu0 %v7572_v45 }
 0x357   : > { %v7064_v20 = vpop.f32.mrb[56].mxu1 }
 0x358   : > { %v7065_v48 = vpop.f32.mrb[57].mxu1 }
 0x359   : > { %v7066_v60 = vadd.f32 %v7065_v48, %v7064_v20  ;;  %v7067_v33 = vpop.f32.mrb[58].mxu1 }
 0x35a   : > { %v7068_v4 = vpop.f32.mrb[59].mxu1 }
 0x35b   : > { %v7069_v37 = vadd.f32 %v7068_v4, %v7067_v33  ;;  %v9679_v2 = vadd.f32 %v7066_v60, %v11558_v3  ;;  %v11571_v33 = vld [vmem:[#allocation24_spill] sm:$0xff] }
 0x35d   : > { %v9682_v31 = vadd.f32 %v7069_v37, %v9521_v27 }
 0x363   : > { %v7070_v25 = vpop.f32.mrb[60].mxu1 }
 0x364   : > { %v7071_v43 = vpop.f32.mrb[61].mxu1 }
 0x365   : > { %v7072_v34 = vadd.f32 %v7071_v43, %v7070_v25  ;;  %v7073_v41 = vpop.f32.mrb[62].mxu1 }
 0x366   : > { %v7074_v14 = vpop.f32.mrb[63].mxu1 }
 0x367   : > { %v7075_v21 = vadd.f32 %v7074_v14, %v7073_v41  ;;  %v9685_v61 = vadd.f32 %v11559_v55, %v7072_v34 }
 0x369   : > { %v9688_v51 = vadd.f32 %v11560_v58, %v7075_v21 }
 0x36b   : > { %v7076_v53 = vpop.f32.mrb[64].mxu1 }
 0x36c   : > { %v7077_v5 = vpop.f32.mrb[65].mxu1 }
 0x36d   : > { %v7078_v52 = vadd.f32 %v7077_v5, %v7076_v53  ;;  %v7079_v27 = vpop.f32.mrb[66].mxu1 }
 0x36e   : > { %v7080_v18 = vpop.f32.mrb[67].mxu1 }
 0x36f   : > { %v7081_v23 = vadd.f32 %v7080_v18, %v7079_v27  ;;  %v9691_v47 = vadd.f32 %v7078_v52, %v9529_v9  ;;  %v11563_v9 = vld [vmem:[#allocation21_spill] sm:$0xff] }
 0x371   : > { %v9694_v19 = vadd.f32 %v7081_v23, %v11561_v22 }
 0x373   : > { %11562 = vst [vmem:[#allocation29_spill] sm:$0xff] %v9694_v19  ;;  %v7082_v12 = vpop.f32.mrb[68].mxu1 }
 0x374   : > { %v7083_v24 = vpop.f32.mrb[69].mxu1 }
 0x375   : > { %v7084_v29 = vadd.f32 %v7083_v24, %v7082_v12  ;;  %v7085_v63 = vpop.f32.mrb[70].mxu1  ;;  %v7576_v12 = vld [vmem:[#allocation6 + $0x110] ss:$12 sps:$4 sm:$0xff]  }
 0x376   : > { %v7086_v0 = vpop.f32.mrb[71].mxu1  ;;  %7106 = vmatprep.subr.bf16.mxu0 %v7576_v12 }
 0x377   : > { %v7087_v11 = vadd.f32 %v7086_v0, %v7085_v63  ;;  %v9697_v62 = vadd.f32 %v11563_v9, %v7084_v29  ;;  %v7573_v63 = vld [vmem:[#allocation6 + $0x108] ss:$12 sps:$4 sm:$0xff]   ;;  %7107 = vmatpush3.bf16.msra.mxu0 %v7577_v28 }
 0x378   : > { %5009 = vmatpush1.bf16.msra.mxu1 %v7573_v63 }
 0x379   : > { %11564 = vst [vmem:[#allocation35_spill] sm:$0xff] %v9697_v62  ;;  %v9700_v13 = vadd.f32 %v11565_v7, %v7087_v11 }
 0x37b   : > { %11566 = vst [vmem:[#allocation31_spill] sm:$0xff] %v9700_v13  ;;  %v7088_v54 = vpop.f32.mrb[72].mxu1 }
 0x37c   : > { %v7089_v1 = vpop.f32.mrb[73].mxu1 }
 0x37d   : > { %v7090_v50 = vadd.f32 %v7089_v1, %v7088_v54  ;;  %v7091_v6 = vpop.f32.mrb[74].mxu1 }
 0x37e   : > { %v7092_v39 = vpop.f32.mrb[75].mxu1 }
 0x37f   : > { %v7093_v49 = vadd.f32 %v7092_v39, %v7091_v6  ;;  %v9703_v26 = vadd.f32 %v7090_v50, %v11567_v8 }
 0x381   : > { %11568 = vst [vmem:[#allocation34_spill] sm:$0xff] %v9703_v26  ;;  %v9712_v59 = vadd.f32 %v7093_v49, %v11571_v33 }
 0x383   : > { %v7094_v40 = vpop.f32.mrb[76].mxu1  ;;  %11572 = vst [vmem:[#allocation30_spill] sm:$0xff] %v9712_v59 }
 0x384   : > { %v7095_v16 = vpop.f32.mrb[77].mxu1 }
 0x385   : > { %v9705_v17 = vadd.f32 %v7095_v16, %v7094_v40  ;;  %v7097_v35 = vpop.f32.mrb[78].mxu1 }
 0x386   : > { %v7098_v20 = vpop.f32.mrb[79].mxu1 }
 0x387   : > { %11569 = vst [vmem:[#allocation37_spill] sm:$0xff] %v9705_v17  ;;  %v9707_v48 = vadd.f32 %v7098_v20, %v7097_v35 }
 0x389   : > { %11570 = vst [vmem:[#allocation17_spill] sm:$0xff] %v9707_v48 }
 0x38b   : > { %v9709_v38 = vpop.f32.mrb[32].mxu0  ;;  %v3495_v60 = vpop.f32.mrb[80].mxu1 }
 0x38c   : > { %v3558_v4 = vrot.slane %v9709_v38, 4  ;;  %v9716_v37 = vadd.f32 %v3495_v60, %v9667_v46  ;;  %v9718_v3 = vpop.f32.mrb[33].mxu0  ;;  %v3497_v57 = vpop.f32.mrb[81].mxu1  ;;  %v7580_v60 = vld [vmem:[#allocation6 + $0x124] ss:$12 sps:$4 sm:$0xff]  }
 0x38d   : > { %v3564_v30 = vrot.slane %v9718_v3, 4  ;;  %v9721_v25 = vpop.f32.mrb[34].mxu0  ;;  %v3498_v43 = vpop.f32.mrb[82].mxu1  ;;  %5010 = vmatprep.subr.bf16.mxu1 %v7580_v60 }
 0x38e   : > { %v3559_v34 = vadd.f32 %v3558_v4, %v9709_v38  ;;  %v3571_v41 = vsel %vm3570_vm2, %v9716_v37, 0.0  ;;  %v3578_v14 = vrot.slane %v9721_v25, 4  ;;  %v9728_v21 = vadd.f32 %v3498_v43, %v9670_v42  ;;  %v9730_v46 = vpop.f32.mrb[35].mxu0  ;;  %v3500_v55 = vpop.f32.mrb[83].mxu1 }
 0x38f   : > { %v3572_v58 = vrot.slane %v3571_v41, 4  ;;  %v3565_v53 = vadd.f32 %v3564_v30, %v9718_v3  ;;  %v3584_v5 = vrot.slane %v9730_v46, 4 }
 0x390   : > { %v3560_v52 = vrot.slane %v3559_v34, 2  ;;  %v3579_v27 = vadd.f32 %v3578_v14, %v9721_v25  ;;  %v3590_v18 = vsel %vm3570_vm2, %v9728_v21, 0.0 }
 0x391   : > { %v3573_v23 = vadd.f32 %v3572_v58, %v3571_v41  ;;  %v3566_v44 = vrot.slane %v3565_v53, 2  ;;  %v3591_v22 = vrot.slane %v3590_v18, 4  ;;  %v3585_v42 = vadd.f32 %v3584_v5, %v9730_v46 }
 0x392   : > { %v3561_v24 = vadd.f32 %v3560_v52, %v3559_v34  ;;  %v3580_v29 = vrot.slane %v3579_v27, 2  ;;  %v7578_v34 = vld [vmem:[#allocation6 + $0x120] ss:$12 sps:$4 sm:$0xff]  }
 0x393   : > { %v3574_v32 = vrot.slane %v3573_v23, 2  ;;  %v3567_v0 = vadd.f32 %v3566_v44, %v3565_v53  ;;  %v3592_v10 = vadd.f32 %v3591_v22, %v3590_v18  ;;  %v3586_v45 = vrot.slane %v3585_v42, 2  ;;  %v9738_v11 = vpop.f32.mrb[36].mxu0  ;;  %v3503_v9 = vpop.f32.mrb[84].mxu1  ;;  %v7581_v53 = vld [vmem:[#allocation6 + $0x128] ss:$12 sps:$4 sm:$0xff]   ;;  %5011 = vmatpush1.bf16.msra.mxu1 %v7578_v34 }
 0x394   : > { %v3562_v7 = vrot.slane %v3561_v24, 1  ;;  %v3581_v54 = vadd.f32 %v3580_v29, %v3579_v27  ;;  %v3597_v1 = vrot.slane %v9738_v11, 4  ;;  %v9742_v50 = vadd.f32 %v3503_v9, %v9673_v15  ;;  %v9744_v6 = vpop.f32.mrb[37].mxu0  ;;  %v3505_v39 = vpop.f32.mrb[85].mxu1  ;;  %7108 = vmatprep.subr.bf16.mxu0 %v7581_v53 }
 0x395   : > { %v3575_v49 = vadd.f32 %v3574_v32, %v3573_v23  ;;  %v3568_v8 = vrot.slane %v3567_v0, 1  ;;  %v3593_v40 = vrot.slane %v3592_v10, 2  ;;  %v3587_v16 = vadd.f32 %v3586_v45, %v3585_v42  ;;  %v9746_v35 = vpop.f32.mrb[38].mxu0  ;;  %v9748_v20 = vpop.f32.mrb[86].mxu1 }
 0x396   : > { %v3563_v33 = vadd.f32 %v3562_v7, %v3561_v24  ;;  %v3582_v4 = vrot.slane %v3581_v54, 1  ;;  %v3598_v57 = vadd.f32 %v3597_v1, %v9738_v11  ;;  %v3609_v15 = vsel %vm3570_vm2, %v9742_v50, 0.0  ;;  %v9753_v30 = vpop.f32.mrb[39].mxu0  ;;  %v3508_v43 = vpop.f32.mrb[87].mxu1 }
 0x397   : > { %v3576_v41 = vrot.slane %v3575_v49, 1  ;;  %v3569_v14 = vadd.f32 %v3568_v8, %v3567_v0  ;;  %v3594_v55 = vadd.f32 %v3593_v40, %v3592_v10  ;;  %v3588_v58 = vrot.slane %v3587_v16, 1 }
 0x398   : > { %v3863_v5 = vmul.f32 0.125, %v3563_v33  ;;  %v3583_v52 = vadd.f32 %v3582_v4, %v3581_v54  ;;  %v3599_v27 = vrot.slane %v3598_v57, 2  ;;  %v3610_v18 = vrot.slane %v3609_v15, 4 }
 0x399   : > { %v3577_v23 = vadd.f32 %v3576_v41, %v3575_v49  ;;  %v3864_v44 = vmul.f32 0.125, %v3569_v14  ;;  %v3595_v22 = vrot.slane %v3594_v55, 1  ;;  %v3589_v42 = vadd.f32 %v3588_v58, %v3587_v16 }
 0x39a   : > { %v9756_v36 = vsub.f32 %v9709_v38, %v3863_v5  ;;  %v3866_v12 = vmul.f32 0.125, %v3583_v52  ;;  %v3600_v24 = vadd.f32 %v3599_v27, %v3598_v57  ;;  %v3611_v29 = vadd.f32 %v3610_v18, %v3609_v15 }
 0x39b   : > { %v3865_v63 = vmul.f32 0.125, %v3577_v23  ;;  %v9759_v28 = vsub.f32 %v9718_v3, %v3864_v44  ;;  %v3596_v32 = vadd.f32 %v3595_v22, %v3594_v55  ;;  %v3867_v0 = vmul.f32 0.125, %v3589_v42  ;;  %v9761_v10 = vpop.f32.mrb[40].mxu0  ;;  %v9763_v45 = vpop.f32.mrb[88].mxu1  ;;  %v7582_v23 = vld [vmem:[#allocation6 + $0x68] ss:$12 sps:$4 sm:$0xff]  }
 0x39c   : > { %v3959_v9 = vmul.f32 %v9756_v36, %v9756_v36  ;;  %v9768_v7 = vsub.f32 %v9721_v25, %v3866_v12  ;;  %v3601_v38 = vrot.slane %v3600_v24, 1  ;;  %v3612_v54 = vrot.slane %v3611_v29, 2  ;;  %v9770_v1 = vpop.f32.mrb[41].mxu0  ;;  %v3513_v39 = vpop.f32.mrb[89].mxu1  ;;  %7109 = vmatpush3.bf16.msra.mxu0 %v7582_v23 }
 0x39d   : > { %v9773_v3 = vsub.f32 %v9716_v37, %v3865_v63  ;;  %v3960_v49 = vmul.f32 %v9759_v28, %v9759_v28  ;;  %v3868_v8 = vmul.f32 0.125, %v3596_v32  ;;  %v9778_v40 = vsub.f32 %v9730_v46, %v3867_v0  ;;  %v9780_v16 = vpop.f32.mrb[42].mxu0  ;;  %v9782_v60 = vpop.f32.mrb[90].mxu1 }
 0x39e   : > { %v4007_v25 = vrot.slane %v3959_v9, 4  ;;  %v3962_v33 = vmul.f32 %v9768_v7, %v9768_v7  ;;  %v3602_v4 = vadd.f32 %v3601_v38, %v3600_v24  ;;  %v3613_v57 = vadd.f32 %v3612_v54, %v3611_v29  ;;  %v9786_v15 = vpop.f32.mrb[43].mxu0  ;;  %v3516_v37 = vpop.f32.mrb[91].mxu1 }
 0x39f   : > { %v3961_v43 = vmul.f32 %v9773_v3, %v9773_v3  ;;  %v4013_v34 = vrot.slane %v3960_v49, 4  ;;  %v9791_v46 = vsub.f32 %v9728_v21, %v3868_v8  ;;  %v3963_v41 = vmul.f32 %v9778_v40, %v9778_v40 }
 0x3a0   : > { %v4008_v14 = vadd.f32 %v4007_v25, %v3959_v9  ;;  %v4026_v55 = vrot.slane %v3962_v33, 4  ;;  %v3869_v58 = vmul.f32 0.125, %v3602_v4  ;;  %v3614_v53 = vrot.slane %v3613_v57, 1 }
 0x3a1   : > { %v4019_v5 = vsel %vm3570_vm2, %v3961_v43, 0.0  ;;  %v4014_v52 = vadd.f32 %v4013_v34, %v3960_v49  ;;  %v3964_v27 = vmul.f32 %v9791_v46, %v9791_v46  ;;  %v4032_v18 = vrot.slane %v3963_v41, 4 }
 0x3a2   : > { %v4009_v44 = vrot.slane %v4008_v14, 2  ;;  %v4020_v22 = vrot.slane %v4019_v5, 4  ;;  %v4027_v42 = vadd.f32 %v4026_v55, %v3962_v33  ;;  %v9799_v21 = vsub.f32 %v9738_v11, %v3869_v58 }
 0x3a3   : > { %v4015_v12 = vrot.slane %v4014_v52, 2  ;;  %v4038_v24 = vsel %vm3570_vm2, %v3964_v27, 0.0  ;;  %v4033_v29 = vadd.f32 %v4032_v18, %v3963_v41  ;;  %v3615_v63 = vadd.f32 %v3614_v53, %v3613_v57  ;;  %v9802_v32 = vpop.f32.mrb[44].mxu0  ;;  %v9804_v0 = vpop.f32.mrb[92].mxu1 }
 0x3a4   : > { %v4010_v9 = vadd.f32 %v4009_v44, %v4008_v14  ;;  %v4021_v38 = vadd.f32 %v4020_v22, %v4019_v5  ;;  %v4028_v54 = vrot.slane %v4027_v42, 2  ;;  %v4039_v39 = vrot.slane %v4038_v24, 4  ;;  %v9806_v49 = vpop.f32.mrb[45].mxu0  ;;  %v3521_v8 = vpop.f32.mrb[93].mxu1 }
 0x3a5   : > { %v4016_v25 = vadd.f32 %v4015_v12, %v4014_v52  ;;  %v4034_v11 = vrot.slane %v4033_v29, 2  ;;  %v3965_v33 = vmul.f32 %v9799_v21, %v9799_v21  ;;  %v3871_v4 = vmul.f32 0.125, %v3615_v63  ;;  %v9810_v37 = vpop.f32.mrb[46].mxu0  ;;  %v9812_v57 = vpop.f32.mrb[94].mxu1 }
 0x3a6   : > { %v4011_v43 = vrot.slane %v4010_v9, 1  ;;  %v4022_v34 = vrot.slane %v4021_v38, 2  ;;  %v4029_v41 = vadd.f32 %v4028_v54, %v4027_v42  ;;  %v4040_v14 = vadd.f32 %v4039_v39, %v4038_v24  ;;  %v9814_v55 = vpop.f32.mrb[47].mxu0  ;;  %v3524_v58 = vpop.f32.mrb[95].mxu1 }
 0x3a7   : > { %v4017_v53 = vrot.slane %v4016_v25, 1  ;;  %v4035_v5 = vadd.f32 %v4034_v11, %v4033_v29  ;;  %v4045_v27 = vrot.slane %v3965_v33, 4  ;;  %v9817_v52 = vsub.f32 %v9742_v50, %v3871_v4 }
 0x3a8   : > { %v4012_v18 = vadd.f32 %v4011_v43, %v4010_v9  ;;  %v4023_v23 = vadd.f32 %v4022_v34, %v4021_v38  ;;  %v4030_v44 = vrot.slane %v4029_v41, 1  ;;  %v4041_v22 = vrot.slane %v4040_v14, 2 }
 0x3a9   : > { %v4018_v12 = vadd.f32 %v4017_v53, %v4016_v25  ;;  %v4036_v63 = vrot.slane %v4035_v5, 1  ;;  %v4046_v8 = vadd.f32 %v4045_v27, %v3965_v33  ;;  %v3967_v42 = vmul.f32 %v9817_v52, %v9817_v52 }
 0x3aa   : > { %v4311_v24 = vmul.f32 0.125, %v4012_v18  ;;  %v4024_v54 = vrot.slane %v4023_v23, 1  ;;  %v4031_v39 = vadd.f32 %v4030_v44, %v4029_v41  ;;  %v4042_v58 = vadd.f32 %v4041_v22, %v4040_v14 }
 0x3ab   : > { %v4312_v48 = vmul.f32 0.125, %v4018_v12  ;;  %v4037_v29 = vadd.f32 %v4036_v63, %v4035_v5  ;;  %v4047_v11 = vrot.slane %v4046_v8, 2  ;;  %v4057_v50 = vsel %vm3570_vm2, %v3967_v42, 0.0  ;;  %v9822_v4 = vpop.f32.mrb[48].mxu0  ;;  %v9824_v9 = vpop.f32.mrb[96].mxu1 }
 0x3ac   : > { %v4359_v38 = vadd.f32 1e-05, %v4311_v24  ;;  %v4025_v25 = vadd.f32 %v4024_v54, %v4023_v23  ;;  %v4314_v43 = vmul.f32 0.125, %v4031_v39  ;;  %v4043_v33 = vrot.slane %v4042_v58, 1  ;;  %v9826_v34 = vpop.f32.mrb[49].mxu0  ;;  %v3529_v53 = vpop.f32.mrb[97].mxu1 }
 0x3ad   : > { %v4048_v27 = vadd.f32 %v4047_v11, %v4046_v8  ;;  %v4058_v18 = vrot.slane %v4057_v50, 4  ;;  %v9828_v41 = vpop.f32.mrb[50].mxu0  ;;  %v9830_v14 = vpop.f32.mrb[98].mxu1  ;;  %v4360_v42 = vadd.f32 1e-05, %v4312_v48  ;;  %v4315_v23 = vmul.f32 0.125, %v4037_v29 }
 0x3ae   : > { %11573 = vst [vmem:[#allocation32_spill] sm:$0xff] %v9830_v14  ;;  %7738 = vrsqrt.f32 %v4359_v38  ;;  %v4313_v5 = vmul.f32 0.125, %v4025_v25  ;;  %v4362_v44 = vadd.f32 1e-05, %v4314_v43  ;;  %v4044_v22 = vadd.f32 %v4043_v33, %v4042_v58  ;;  %v9832_v12 = vpop.f32.mrb[51].mxu0  ;;  %v3532_v63 = vpop.f32.mrb[99].mxu1 }
 0x3af   : > { %11574 = vst [vmem:[#allocation36_spill] sm:$0xff] %v9832_v12  ;;  %v4049_v24 = vrot.slane %v4048_v27, 1  ;;  %v4059_v54 = vadd.f32 %v4058_v18, %v4057_v50  ;;  %v7583_v39 = vld [vmem:[#allocation6 + $0x138] ss:$12 sps:$4 sm:$0xff]   ;;  %v3603_v11 = vrot.slane %v9744_v6, 4  ;;  %v3616_v38 = vrot.slane %v9746_v35, 4 }
 0x3b0   : > { %v4361_v17 = vadd.f32 1e-05, %v4313_v5  ;;  %7740 = vrsqrt.f32 %v4362_v44  ;;  %v4316_v8 = vmul.f32 0.125, %v4044_v22  ;;  %v7585_v53 = vld [vmem:[#allocation6 + $0x13c] ss:$12 sps:$4 sm:$0xff]   ;;  %v9839_v29 = vadd.f32 %v9748_v20, %v9676_v56 }
 0x3b1   : > { %v4050_v59 = vadd.f32 %v4049_v24, %v4048_v27  ;;  %v4060_v26 = vrot.slane %v4059_v54, 2  ;;  %v7586_v25 = vld [vmem:[#allocation6 + $0x140] ss:$12 sps:$4 sm:$0xff]   ;;  %v3604_v48 = vadd.f32 %v3603_v11, %v9744_v6  ;;  %5012 = vmatprep.subr.bf16.mxu1 %v7585_v53  ;;  %v3617_v5 = vadd.f32 %v3616_v38, %v9746_v35 }
 0x3b2   : > { %v7587_v58 = vld [vmem:[#allocation6 + $0x80] ss:$12 sps:$4 sm:$0xff]   ;;  %7742 = vrsqrt.f32 %v4361_v17  ;;  %v4364_v43 = vadd.f32 1e-05, %v4316_v8  ;;  %v3622_v27 = vrot.slane %v9753_v30, 4  ;;  %5013 = vmatpush1.bf16.msra.mxu1 %v7583_v39  ;;  %7110 = vmatprep.subr.bf16.mxu0 %v7586_v25  ;;  %v3628_v56 = vsel %vm3570_vm2, %v9839_v29, 0.0 }
 0x3b3   : > { %v7590_v50 = vld [vmem:[#allocation6 + $0x154] ss:$12 sps:$4 sm:$0xff]   ;;  %v4317_v33 = vmul.f32 0.125, %v4050_v59  ;;  %v4061_v18 = vadd.f32 %v4060_v26, %v4059_v54  ;;  %v9843_v44 = vpop.f32.mrb[52].mxu0  ;;  %v9845_v22 = vpop.f32.mrb[100].mxu1  ;;  %v3605_v63 = vrot.slane %v3604_v48, 2  ;;  %7111 = vmatpush3.bf16.msra.mxu0 %v7587_v58 }
 0x3b4   : > { %11575 = vst [vmem:[#allocation38_spill] sm:$0xff] %v9843_v44  ;;  %11576 = vst [vmem:[#allocation19_spill] sm:$0xff] %v9845_v22  ;;  %v7588_v17 = vld [vmem:[#allocation6 + $0x150] ss:$12 sps:$4 sm:$0xff]   ;;  %7744 = vrsqrt.f32 %v4364_v43  ;;  %v3635_v20 = vrot.slane %v9761_v10, 4  ;;  %v9850_v59 = vpop.f32.mrb[53].mxu0  ;;  %5014 = vmatprep.subr.bf16.mxu1 %v7590_v50  ;;  %v3623_v38 = vadd.f32 %v3622_v27, %v9753_v30  ;;  %v9858_v43 = vadd.f32 %v9763_v45, %v9679_v2 }
 0x3b5   : > { %11577 = vst [vmem:[#allocation28_spill] sm:$0xff] %v9850_v59  ;;  %v3537_v26 = vpop.f32.mrb[101].mxu1  ;;  %v4363_v24 = vadd.f32 1e-05, %v4315_v23  ;;  %v4062_v54 = vrot.slane %v4061_v18, 1  ;;  %v3618_v8 = vrot.slane %v3617_v5, 2  ;;  %v3606_v39 = vadd.f32 %v3605_v63, %v3604_v48 }
 0x3b6   : > { %v3629_v11 = vrot.slane %v3628_v56, 4  ;;  %v9852_v53 = vpop.f32.mrb[54].mxu0  ;;  %v3636_v25 = vadd.f32 %v3635_v20, %v9761_v10  ;;  %v9860_v13 = vpop.f32.mrb[102].mxu1  ;;  %v7591_v58 = vld [vmem:[#allocation6 + $0x158] ss:$12 sps:$4 sm:$0xff]   ;;  %5015 = vmatpush1.bf16.msra.mxu1 %v7588_v17  ;;  %7746 = vrsqrt.f32 %v4360_v42  ;;  %v3624_v63 = vrot.slane %v3623_v38, 2 }
 0x3b7   : > { %11578 = vst [vmem:[#allocation25_spill] sm:$0xff] %v9852_v53  ;;  %11579 = vst [vmem:[#allocation33_spill] sm:$0xff] %v9860_v13  ;;  %v9862_v26 = vpop.f32.mrb[55].mxu0  ;;  %v4365_v23 = vadd.f32 1e-05, %v4317_v33  ;;  %v4063_v50 = vadd.f32 %v4062_v54, %v4061_v18  ;;  %v3619_v59 = vadd.f32 %v3618_v8, %v3617_v5  ;;  %v3540_v62 = vpop.f32.mrb[103].mxu1  ;;  %7112 = vmatprep.subr.bf16.mxu0 %v7591_v58  ;;  %7748 = vrsqrt.f32 %v4363_v24 }
 0x3b8   : > { %11580 = vst [vmem:[#allocation14_spill] sm:$0xff] %v9862_v26  ;;  %v3630_v22 = vadd.f32 %v3629_v11, %v3628_v56  ;;  %v7739_v48 = vpop.eup %7738  ;;  %v3607_v27 = vrot.slane %v3606_v39, 1  ;;  %v3637_v20 = vrot.slane %v3636_v25, 2  ;;  %v3625_v33 = vadd.f32 %v3624_v63, %v3623_v38 }
 0x3b9   : > { %v4455_v2 = vmul.f32 %v7739_v48, %v9756_v36  ;;  %v4319_v45 = vmul.f32 0.125, %v4063_v50  ;;  %v3620_v53 = vrot.slane %v3619_v59, 1  ;;  %7750 = vrsqrt.f32 %v4365_v23 }
 0x3ba   : > { %v3631_v13 = vrot.slane %v3630_v22, 2  ;;  %v7741_v44 = vpop.eup %7740  ;;  %v3608_v26 = vadd.f32 %v3607_v27, %v3606_v39  ;;  %v3638_v18 = vadd.f32 %v3637_v20, %v3636_v25  ;;  %v3647_v42 = vsel %vm3570_vm2, %v9858_v43, 0.0 }
 0x3bb   : > { %v4458_v5 = vmul.f32 %v7741_v44, %v9768_v7  ;;  %v3621_v62 = vadd.f32 %v3620_v53, %v3619_v59  ;;  %v9868_v17 = vpop.f32.mrb[56].mxu0  ;;  %v9870_v56 = vpop.f32.mrb[104].mxu1  ;;  %v4503_v54 = vmax.f32 %v4455_v2, 0.0  ;;  %v3626_v58 = vrot.slane %v3625_v33, 1  ;;  %v7592_v53 = vld [vmem:[#allocation6 + $0x98] ss:$12 sps:$4 sm:$0xff]  }
 0x3bc   : > { %11581 = vst [vmem:[#allocation27_spill] sm:$0xff] %v9868_v17  ;;  %11582 = vst [vmem:[#allocation18_spill] sm:$0xff] %v9870_v56  ;;  %v7743_v36 = vpop.eup %7742  ;;  %v3870_v8 = vmul.f32 0.125, %v3608_v26  ;;  %v3632_v11 = vadd.f32 %v3631_v13, %v3630_v22  ;;  %v9872_v24 = vpop.f32.mrb[57].mxu0  ;;  %v4367_v44 = vadd.f32 1e-05, %v4319_v45  ;;  %7113 = vmatpush3.bf16.msra.mxu0 %v7592_v53 }
 0x3bd   : > { %11583 = vst [vmem:[#allocation16_spill] sm:$0xff] %v9872_v24  ;;  %v3545_v39 = vpop.f32.mrb[105].mxu1  ;;  %v4457_v38 = vmul.f32 %v7743_v36, %v9773_v3  ;;  %v4506_v7 = vmax.f32 %v4458_v5, 0.0  ;;  %v3872_v59 = vmul.f32 0.125, %v3621_v62  ;;  %v3627_v48 = vadd.f32 %v3626_v58, %v3625_v33 }
 0x3be   : > { %v7745_v25 = vpop.eup %7744  ;;  %v9876_v23 = vsub.f32 %v9744_v6, %v3870_v8  ;;  %v3633_v50 = vrot.slane %v3632_v11, 1  ;;  %v3639_v27 = vrot.slane %v3638_v18, 1  ;;  %v9886_v6 = vpop.f32.mrb[58].mxu0  ;;  %v3648_v62 = vrot.slane %v3647_v42, 4 }
 0x3bf   : > { %v4505_v63 = vmax.f32 %v4457_v38, 0.0  ;;  %v9878_v26 = vpack.c.bf16 %v4506_v7, %v4503_v54  ;;  %v4460_v13 = vmul.f32 %v7745_v25, %v9791_v46  ;;  %v9882_v22 = vsub.f32 %v9746_v35, %v3872_v59  ;;  %11585 = vst [vmem:[#allocation20_spill] sm:$0xff] %v9886_v6 }
 0x3c0   : > { %v3966_v3 = vmul.f32 %v9876_v23, %v9876_v23  ;;  %v3634_v20 = vadd.f32 %v3633_v50, %v3632_v11  ;;  %v3873_v2 = vmul.f32 0.125, %v3627_v48  ;;  %v3640_v45 = vadd.f32 %v3639_v27, %v3638_v18  ;;  %v9891_v46 = vpop.eup %7746 }
 0x3c1   : > { %11584 = vst [vmem:[#allocation15_spill] sm:$0xff] %v9878_v26  ;;  %v4508_v5 = vmax.f32 %v4460_v13, 0.0  ;;  %v3968_v33 = vmul.f32 %v9882_v22, %v9882_v22  ;;  %v3641_v36 = vrot.slane %v9770_v1, 4  ;;  %7752 = vrsqrt.f32 %v4367_v44  ;;  %v7749_v38 = vpop.eup %7748 }
 0x3c2   : > { %v4051_v35 = vrot.slane %v3966_v3, 4  ;;  %v3874_v54 = vmul.f32 0.125, %v3634_v20  ;;  %v9894_v8 = vsub.f32 %v9753_v30, %v3873_v2  ;;  %v3875_v58 = vmul.f32 0.125, %v3640_v45  ;;  %v9914_v45 = vpop.f32.mrb[106].mxu1 }
 0x3c3   : > { %v9896_v11 = vpack.c.bf16 %v4508_v5, %v4505_v63  ;;  %v4064_v18 = vrot.slane %v3968_v33, 4  ;;  %v3649_v39 = vadd.f32 %v3648_v62, %v3647_v42  ;;  %v3642_v44 = vadd.f32 %v3641_v36, %v9770_v1  ;;  %v9904_v25 = vpop.eup %7750  ;;  %11587 = vst [vmem:[#allocation23_spill] sm:$0xff] %v9914_v45  ;;  %v3548_v36 = vpop.f32.mrb[107].mxu1 }
 0x3c4   : > { %v4052_v7 = vadd.f32 %v4051_v35, %v3966_v3  ;;  %v9899_v59 = vsub.f32 %v9839_v29, %v3874_v54  ;;  %v3969_v53 = vmul.f32 %v9894_v8, %v9894_v8  ;;  %v9907_v30 = vsub.f32 %v9761_v10, %v3875_v58 }
 0x3c5   : > { %11586 = vst [vmem:[#allocation21_spill] sm:$0xff] %v9896_v11  ;;  %v4065_v50 = vadd.f32 %v4064_v18, %v3968_v33  ;;  %v3650_v48 = vrot.slane %v3649_v39, 2  ;;  %v3654_v27 = vrot.slane %v9780_v16, 4  ;;  %v3643_v13 = vrot.slane %v3642_v44, 2 }
 0x3c6   : > { %v4053_v42 = vrot.slane %v4052_v7, 2  ;;  %v3970_v63 = vmul.f32 %v9899_v59, %v9899_v59  ;;  %v4070_v29 = vrot.slane %v3969_v53, 4  ;;  %v3971_v20 = vmul.f32 %v9907_v30, %v9907_v30 }
 0x3c7   : > { %v4066_v3 = vrot.slane %v4065_v50, 2  ;;  %v3651_v2 = vadd.f32 %v3650_v48, %v3649_v39  ;;  %v3655_v62 = vadd.f32 %v3654_v27, %v9780_v16  ;;  %v3644_v6 = vadd.f32 %v3643_v13, %v3642_v44  ;;  %v9918_v48 = vpop.f32.mrb[59].mxu0  ;;  %v7595_v44 = vld [vmem:[#allocation6 + $0x16c] ss:$12 sps:$4 sm:$0xff]   ;;  %v7596_v13 = vld [vmem:[#allocation6 + $0x170] ss:$12 sps:$4 sm:$0xff]  }
 0x3c8   : > { %v4054_v5 = vadd.f32 %v4053_v42, %v4052_v7  ;;  %v4076_v10 = vsel %vm3570_vm2, %v3970_v63, 0.0  ;;  %v4071_v33 = vadd.f32 %v4070_v29, %v3969_v53  ;;  %v4083_v18 = vrot.slane %v3971_v20, 4  ;;  %5016 = vmatprep.subr.bf16.mxu1 %v7595_v44  ;;  %7114 = vmatprep.subr.bf16.mxu0 %v7596_v13 }
 0x3c9   : > { %v4067_v35 = vadd.f32 %v4066_v3, %v4065_v50  ;;  %v4077_v54 = vrot.slane %v4076_v10, 4  ;;  %v3652_v58 = vrot.slane %v3651_v2, 1  ;;  %v3645_v53 = vrot.slane %v3644_v6, 1 }
 0x3ca   : > { %v4055_v11 = vrot.slane %v4054_v5, 1  ;;  %v4072_v26 = vrot.slane %v4071_v33, 2  ;;  %v4084_v17 = vadd.f32 %v4083_v18, %v3971_v20  ;;  %v3656_v29 = vrot.slane %v3655_v62, 2 }
 0x3cb   : > { %v4068_v24 = vrot.slane %v4067_v35, 1  ;;  %v4078_v56 = vadd.f32 %v4077_v54, %v4076_v10  ;;  %v3653_v39 = vadd.f32 %v3652_v58, %v3651_v2  ;;  %v7753_v7 = vpop.eup %7752  ;;  %v3646_v14 = vadd.f32 %v3645_v53, %v3644_v6 }
 0x3cc   : > { %v4056_v42 = vadd.f32 %v4055_v11, %v4054_v5  ;;  %v4073_v63 = vadd.f32 %v4072_v26, %v4071_v33  ;;  %v4085_v50 = vrot.slane %v4084_v17, 2  ;;  %v3657_v19 = vadd.f32 %v3656_v29, %v3655_v62  ;;  %v7593_v11 = vld [vmem:[#allocation6 + $0x168] ss:$12 sps:$4 sm:$0xff]   ;;  %v7597_v26 = vld [vmem:[#allocation6 + $0xb0] ss:$12 sps:$4 sm:$0xff]  }
 0x3cd   : > { %v4069_v27 = vadd.f32 %v4068_v24, %v4067_v35  ;;  %v4079_v36 = vrot.slane %v4078_v56, 2  ;;  %v3877_v3 = vmul.f32 0.125, %v3653_v39  ;;  %v9925_v24 = vmul.f32 %v9891_v46, %v9759_v28  ;;  %5017 = vmatpush1.bf16.msra.mxu1 %v7593_v11  ;;  %7115 = vmatpush3.bf16.msra.mxu0 %v7597_v26  ;;  %v9963_v11 = vpop.f32.mrb[60].mxu0 }
 0x3ce   : > { %v4318_v45 = vmul.f32 0.125, %v4056_v42  ;;  %v4074_v12 = vrot.slane %v4073_v63, 1  ;;  %v4086_v2 = vadd.f32 %v4085_v50, %v4084_v17  ;;  %v3876_v33 = vmul.f32 0.125, %v3646_v14 }
 0x3cf   : > { %v4320_v10 = vmul.f32 0.125, %v4069_v27  ;;  %v4080_v20 = vadd.f32 %v4079_v36, %v4078_v56  ;;  %v9921_v54 = vsub.f32 %v9858_v43, %v3877_v3  ;;  %v3658_v35 = vrot.slane %v3657_v19, 1 }
 0x3d0   : > { %v4366_v5 = vadd.f32 1e-05, %v4318_v45  ;;  %v9928_v6 = vmul.f32 %v7749_v38, %v9778_v40  ;;  %v4075_v56 = vadd.f32 %v4074_v12, %v4073_v63  ;;  %v9934_v17 = vmul.f32 %v9904_v25, %v9799_v21 }
 0x3d1   : > { %v4081_v62 = vrot.slane %v4080_v20, 1  ;;  %v3973_v43 = vmul.f32 %v9921_v54, %v9921_v54  ;;  %v4087_v28 = vrot.slane %v4086_v2, 1  ;;  %v9937_v14 = vsub.f32 %v9770_v1, %v3876_v33 }
 0x3d2   : > { %v3659_v46 = vadd.f32 %v3658_v35, %v3657_v19  ;;  %v9940_v45 = vmul.f32 %v7753_v7, %v9817_v52  ;;  %v4368_v40 = vadd.f32 1e-05, %v4320_v10  ;;  %7754 = vrsqrt.f32 %v4366_v5 }
 0x3d3   : > { %v4082_v38 = vadd.f32 %v4081_v62, %v4080_v20  ;;  %v4095_v12 = vsel %vm3570_vm2, %v3973_v43, 0.0  ;;  %v3972_v58 = vmul.f32 %v9937_v14, %v9937_v14  ;;  %v4321_v25 = vmul.f32 0.125, %v4075_v56 }
 0x3d4   : > { %v4096_v18 = vrot.slane %v4095_v12, 4  ;;  %v3878_v39 = vmul.f32 0.125, %v3659_v46  ;;  %v9947_v1 = vadd.f32 %v9782_v60, %v9682_v31  ;;  %v3660_v19 = vrot.slane %v9786_v15, 4 }
 0x3d5   : > { %v4322_v21 = vmul.f32 0.125, %v4082_v38  ;;  %v4088_v52 = vadd.f32 %v4087_v28, %v4086_v2  ;;  %v4089_v42 = vrot.slane %v3972_v58, 4  ;;  %7756 = vrsqrt.f32 %v4368_v40 }
 0x3d6   : > { %v4097_v7 = vadd.f32 %v4096_v18, %v4095_v12  ;;  %v9951_v63 = vsub.f32 %v9780_v16, %v3878_v39  ;;  %v3666_v29 = vsel %vm3570_vm2, %v9947_v1, 0.0  ;;  %v3661_v27 = vadd.f32 %v3660_v19, %v9786_v15 }
 0x3d7   : > { %v4370_v53 = vadd.f32 1e-05, %v4322_v21  ;;  %v4090_v50 = vadd.f32 %v4089_v42, %v3972_v58  ;;  %v3667_v60 = vrot.slane %v3666_v29, 4  ;;  %v3673_v44 = vrot.slane %v9802_v32, 4 }
 0x3d8   : > { %v4098_v36 = vrot.slane %v4097_v7, 2  ;;  %v3974_v31 = vmul.f32 %v9951_v63, %v9951_v63  ;;  %v3662_v3 = vrot.slane %v3661_v27, 2  ;;  %v9961_v16 = vadd.f32 %v9804_v0, %v9685_v61 }
 0x3d9   : > { %7758 = vrsqrt.f32 %v4370_v53  ;;  %v4323_v13 = vmul.f32 0.125, %v4088_v52  ;;  %v4091_v20 = vrot.slane %v4090_v50, 2  ;;  %v3668_v26 = vadd.f32 %v3667_v60, %v3666_v29 }
 0x3da   : > { %v4099_v10 = vadd.f32 %v4098_v36, %v4097_v7  ;;  %v4102_v2 = vrot.slane %v3974_v31, 4  ;;  %v3663_v5 = vadd.f32 %v3662_v3, %v3661_v27  ;;  %v3674_v33 = vadd.f32 %v3673_v44, %v9802_v32 }
 0x3db   : > { %v3685_v35 = vsel %vm3570_vm2, %v9961_v16, 0.0  ;;  %v4092_v56 = vadd.f32 %v4091_v20, %v4090_v50  ;;  %v4369_v46 = vadd.f32 1e-05, %v4321_v25  ;;  %v3669_v61 = vrot.slane %v3668_v26, 2 }
 0x3dc   : > { %v4100_v62 = vrot.slane %v4099_v10, 1  ;;  %v4103_v43 = vadd.f32 %v4102_v2, %v3974_v31  ;;  %v3686_v28 = vrot.slane %v3685_v35, 4  ;;  %v3664_v0 = vrot.slane %v3663_v5, 1  ;;  %v7755_v38 = vpop.eup %7754 }
 0x3dd   : > { %v3675_v40 = vrot.slane %v3674_v33, 2  ;;  %v4371_v12 = vadd.f32 1e-05, %v4323_v13  ;;  %v4093_v58 = vrot.slane %v4092_v56, 1  ;;  %v3670_v21 = vadd.f32 %v3669_v61, %v3668_v26 }
 0x3de   : > { %v4101_v18 = vadd.f32 %v4100_v62, %v4099_v10  ;;  %v4104_v39 = vrot.slane %v4103_v43, 2  ;;  %v3665_v19 = vadd.f32 %v3664_v0, %v3663_v5  ;;  %v3687_v7 = vadd.f32 %v3686_v28, %v3685_v35 }
 0x3df   : > { %v3676_v52 = vadd.f32 %v3675_v40, %v3674_v33  ;;  %v4094_v53 = vadd.f32 %v4093_v58, %v4092_v56  ;;  %v3679_v27 = vrot.slane %v9806_v49, 4  ;;  %v7757_v36 = vpop.eup %7756  ;;  %7760 = vrsqrt.f32 %v4369_v46 }
 0x3e0   : > { %v4325_v42 = vmul.f32 0.125, %v4101_v18  ;;  %v4105_v29 = vadd.f32 %v4104_v39, %v4103_v43  ;;  %v3671_v25 = vrot.slane %v3670_v21, 1  ;;  %v3879_v50 = vmul.f32 0.125, %v3665_v19 }
 0x3e1   : > { %v3677_v31 = vrot.slane %v3676_v52, 1  ;;  %v4511_v60 = vmax.f32 %v9940_v45, 0.0  ;;  %v3688_v13 = vrot.slane %v3687_v7, 2  ;;  %v3680_v5 = vadd.f32 %v3679_v27, %v9806_v49 }
 0x3e2   : > { %v4373_v3 = vadd.f32 1e-05, %v4325_v42  ;;  %v4106_v44 = vrot.slane %v4105_v29, 1  ;;  %v3672_v20 = vadd.f32 %v3671_v25, %v3670_v21  ;;  %v9971_v2 = vsub.f32 %v9786_v15, %v3879_v50 }
 0x3e3   : > { %v7759_v10 = vpop.eup %7758  ;;  %v3678_v26 = vadd.f32 %v3677_v31, %v3676_v52  ;;  %v9975_v33 = vmul.f32 %v7755_v38, %v9876_v23  ;;  %7762 = vrsqrt.f32 %v4371_v12  ;;  %v4324_v62 = vmul.f32 0.125, %v4094_v53 }
 0x3e4   : > { %v4466_v35 = vmul.f32 %v7759_v10, %v9899_v59  ;;  %v9979_v45 = vmul.f32 %v7757_v36, %v9882_v22  ;;  %v3880_v56 = vmul.f32 0.125, %v3672_v20  ;;  %v3975_v43 = vmul.f32 %v9971_v2, %v9971_v2 }
 0x3e5   : > { %v3881_v28 = vmul.f32 0.125, %v3678_v26  ;;  %7764 = vrsqrt.f32 %v4373_v3  ;;  %v4107_v46 = vadd.f32 %v4106_v44, %v4105_v29  ;;  %v3689_v61 = vadd.f32 %v3688_v13, %v3687_v7 }
 0x3e6   : > { %v4514_v15 = vmax.f32 %v4466_v35, 0.0  ;;  %v9984_v0 = vsub.f32 %v9947_v1, %v3880_v56  ;;  %v4108_v23 = vrot.slane %v3975_v43, 4  ;;  %v3681_v40 = vrot.slane %v3680_v5, 2 }
 0x3e7   : > { %v9987_v59 = vsub.f32 %v9802_v32, %v3881_v28  ;;  %v4372_v22 = vadd.f32 1e-05, %v4324_v62  ;;  %v3690_v12 = vrot.slane %v3689_v61, 1  ;;  %v3692_v18 = vrot.slane %v9810_v37, 4 }
 0x3e8   : > { %v9989_v38 = vpack.c.bf16 %v4514_v15, %v4511_v60  ;;  %v3976_v58 = vmul.f32 %v9984_v0, %v9984_v0  ;;  %v4109_v39 = vadd.f32 %v4108_v23, %v3975_v43  ;;  %v3682_v1 = vadd.f32 %v3681_v40, %v3680_v5 }
 0x3e9   : > { %v3977_v21 = vmul.f32 %v9987_v59, %v9987_v59  ;;  %v4326_v19 = vmul.f32 0.125, %v4107_v46  ;;  %v3691_v52 = vadd.f32 %v3690_v12, %v3689_v61  ;;  %v3693_v32 = vadd.f32 %v3692_v18, %v9810_v37  ;;  %v7761_v42 = vpop.eup %7760 }
 0x3ea   : > { %11588 = vst [vmem:[#allocation26_spill] sm:$0xff] %v9989_v38  ;;  %v9999_v7 = vadd.f32 %v9812_v57, %v9688_v51  ;;  %v4114_v53 = vsel %vm3570_vm2, %v3976_v58, 0.0  ;;  %v4110_v29 = vrot.slane %v4109_v39, 2  ;;  %v3683_v36 = vrot.slane %v3682_v1, 1 }
 0x3eb   : > { %v4121_v27 = vrot.slane %v3977_v21, 4  ;;  %v4115_v25 = vrot.slane %v4114_v53, 4  ;;  %v3883_v50 = vmul.f32 0.125, %v3691_v52  ;;  %v3694_v31 = vrot.slane %v3693_v32, 2 }
 0x3ec   : > { %v3704_v60 = vsel %vm3570_vm2, %v9999_v7, 0.0  ;;  %v4111_v3 = vadd.f32 %v4110_v29, %v4109_v39  ;;  %v3684_v13 = vadd.f32 %v3683_v36, %v3682_v1  ;;  %v10005_v51 = vmul.f32 %v7761_v42, %v9894_v8 }
 0x3ed   : > { %v4122_v44 = vadd.f32 %v4121_v27, %v3977_v21  ;;  %v3705_v10 = vrot.slane %v3704_v60, 4  ;;  %v7763_v20 = vpop.eup %7762  ;;  %v4116_v57 = vadd.f32 %v4115_v25, %v4114_v53  ;;  %v10008_v26 = vsub.f32 %v9961_v16, %v3883_v50 }
 0x3ee   : > { %v3695_v5 = vadd.f32 %v3694_v31, %v3693_v32  ;;  %v4112_v35 = vrot.slane %v4111_v3, 1  ;;  %v3882_v56 = vmul.f32 0.125, %v3684_v13  ;;  %v3698_v43 = vrot.slane %v9814_v55, 4 }
 0x3ef   : > { %v4123_v62 = vrot.slane %v4122_v44, 2  ;;  %v7765_v28 = vpop.eup %7764  ;;  %v4117_v15 = vrot.slane %v4116_v57, 2  ;;  %v3979_v46 = vmul.f32 %v10008_v26, %v10008_v26  ;;  %v3706_v23 = vadd.f32 %v3705_v10, %v3704_v60 }
 0x3f0   : > { %v3696_v61 = vrot.slane %v3695_v5, 1  ;;  %7766 = vrsqrt.f32 %v4372_v22  ;;  %v4374_v8 = vadd.f32 1e-05, %v4326_v19  ;;  %v4113_v40 = vadd.f32 %v4112_v35, %v4111_v3 }
 0x3f1   : > { %v4124_v12 = vadd.f32 %v4123_v62, %v4122_v44  ;;  %v4118_v18 = vadd.f32 %v4117_v15, %v4116_v57  ;;  %v4133_v16 = vsel %vm3570_vm2, %v3979_v46, 0.0  ;;  %v10015_v58 = vsub.f32 %v9806_v49, %v3882_v56 }
 0x3f2   : > { %v3697_v39 = vadd.f32 %v3696_v61, %v3695_v5  ;;  %v4327_v21 = vmul.f32 0.125, %v4113_v40  ;;  %v4134_v52 = vrot.slane %v4133_v16, 4  ;;  %v3707_v32 = vrot.slane %v3706_v23, 2 }
 0x3f3   : > { %v4125_v1 = vrot.slane %v4124_v12, 1  ;;  %v4119_v42 = vrot.slane %v4118_v18, 1  ;;  %v3978_v53 = vmul.f32 %v10015_v58, %v10015_v58  ;;  %v3699_v22 = vadd.f32 %v3698_v43, %v9814_v55 }
 0x3f4   : > { %v3884_v29 = vmul.f32 0.125, %v3697_v39  ;;  %v10021_v19 = vmul.f32 %v7763_v20, %v9907_v30  ;;  %7768 = vrsqrt.f32 %v4374_v8  ;;  %v4375_v27 = vadd.f32 1e-05, %v4327_v21 }
 0x3f5   : > { %v4135_v36 = vadd.f32 %v4134_v52, %v4133_v16  ;;  %v4120_v49 = vadd.f32 %v4119_v42, %v4118_v18  ;;  %v4127_v25 = vrot.slane %v3978_v53, 4  ;;  %v3708_v31 = vadd.f32 %v3707_v32, %v3706_v23 }
 0x3f6   : > { %11589 = vst [vmem:[#allocation24_spill] sm:$0xff] %v10021_v19  ;;  %v10024_v50 = vsub.f32 %v9810_v37, %v3884_v29  ;;  %v10027_v60 = vmul.f32 %v7765_v28, %v9921_v54  ;;  %v4126_v3 = vadd.f32 %v4125_v1, %v4124_v12  ;;  %v3700_v13 = vrot.slane %v3699_v22, 2 }
 0x3f7   : > { %v4136_v44 = vrot.slane %v4135_v36, 2  ;;  %v4328_v10 = vmul.f32 0.125, %v4120_v49  ;;  %v4128_v57 = vadd.f32 %v4127_v25, %v3978_v53  ;;  %v3709_v20 = vrot.slane %v3708_v31, 1 }
 0x3f8   : > { %v3980_v30 = vmul.f32 %v10024_v50, %v10024_v50  ;;  %7770 = vrsqrt.f32 %v4375_v27  ;;  %v3701_v35 = vadd.f32 %v3700_v13, %v3699_v22  ;;  %v3711_v62 = vrot.slane %v9822_v4, 4 }
 0x3f9   : > { %v4137_v5 = vadd.f32 %v4136_v44, %v4135_v36  ;;  %v4376_v37 = vadd.f32 1e-05, %v4328_v10  ;;  %v4129_v56 = vrot.slane %v4128_v57, 2  ;;  %v3710_v15 = vadd.f32 %v3709_v20, %v3708_v31  ;;  %v7600_v31 = vld [vmem:[#allocation6 + $0x184] ss:$12 sps:$4 sm:$0xff]  }
 0x3fa   : > { %v4140_v43 = vrot.slane %v3980_v30, 4  ;;  %v7767_v54 = vpop.eup %7766  ;;  %v4329_v28 = vmul.f32 0.125, %v4126_v3  ;;  %v3702_v61 = vrot.slane %v3701_v35, 1  ;;  %v3712_v23 = vadd.f32 %v3711_v62, %v9822_v4  ;;  %5099 = vmatprep.subr.bf16.mxu1 %v7600_v31 }
 0x3fb   : > { %v4138_v46 = vrot.slane %v4137_v5, 1  ;;  %7772 = vrsqrt.f32 %v4376_v37  ;;  %v4130_v8 = vadd.f32 %v4129_v56, %v4128_v57  ;;  %v3886_v12 = vmul.f32 0.125, %v3710_v15 }
 0x3fc   : > { %v4141_v40 = vadd.f32 %v4140_v43, %v3980_v30  ;;  %v3703_v16 = vadd.f32 %v3702_v61, %v3701_v35  ;;  %v3713_v39 = vrot.slane %v3712_v23, 2  ;;  %v10035_v21 = vadd.f32 %v9824_v9, %v9691_v47 }
 0x3fd   : > { %v4139_v18 = vadd.f32 %v4138_v46, %v4137_v5  ;;  %v4131_v1 = vrot.slane %v4130_v8, 1  ;;  %v10038_v32 = vsub.f32 %v9999_v7, %v3886_v12  ;;  %v3717_v42 = vrot.slane %v9826_v34, 4 }
 0x3fe   : > { %v4142_v52 = vrot.slane %v4141_v40, 2  ;;  %v7769_v53 = vpop.eup %7768  ;;  %v3885_v22 = vmul.f32 0.125, %v3703_v16  ;;  %v3714_v27 = vadd.f32 %v3713_v39, %v3712_v23  ;;  %v3723_v36 = vsel %vm3570_vm2, %v10035_v21, 0.0 }
 0x3ff   : > { %v4331_v29 = vmul.f32 0.125, %v4139_v18  ;;  %v4377_v49 = vadd.f32 1e-05, %v4329_v28  ;;  %v3982_v47 = vmul.f32 %v10038_v32, %v10038_v32  ;;  %v3724_v9 = vrot.slane %v3723_v36, 4 }
 0x400   : > { %v4143_v25 = vadd.f32 %v4142_v52, %v4141_v40  ;;  %v4517_v3 = vmax.f32 %v10027_v60, 0.0  ;;  %v10047_v7 = vsub.f32 %v9814_v55, %v3885_v22  ;;  %v3715_v44 = vrot.slane %v3714_v27, 1 }
 0x401   : > { %v3718_v13 = vadd.f32 %v3717_v42, %v9826_v34  ;;  %v10051_v10 = vmul.f32 %v7767_v54, %v9937_v14  ;;  %v4379_v57 = vadd.f32 1e-05, %v4331_v29  ;;  %v4132_v30 = vadd.f32 %v4131_v1, %v4130_v8  ;;  %v10059_v14 = vpop.f32.mrb[108].mxu1 }
 0x402   : > { %v4152_v20 = vsel %vm3570_vm2, %v3982_v47, 0.0  ;;  %v7771_v5 = vpop.eup %7770  ;;  %v10055_v35 = vmul.f32 %v7769_v53, %v9951_v63  ;;  %v3981_v55 = vmul.f32 %v10047_v7, %v10047_v7  ;;  %v3716_v60 = vadd.f32 %v3715_v44, %v3714_v27  ;;  %v3553_v61 = vpop.f32.mrb[109].mxu1 }
 0x403   : > { %v4153_v62 = vrot.slane %v4152_v20, 4  ;;  %7774 = vrsqrt.f32 %v4377_v49  ;;  %v4144_v37 = vrot.slane %v4143_v25, 1  ;;  %v3725_v56 = vadd.f32 %v3724_v9, %v3723_v36 }
 0x404   : > { %11590 = vst [vmem:[#allocation40_spill] sm:$0xff] %v10055_v35  ;;  %v3719_v43 = vrot.slane %v3718_v13, 2  ;;  %v4146_v54 = vrot.slane %v3981_v55, 4  ;;  %v3887_v28 = vmul.f32 0.125, %v3716_v60  ;;  %v3730_v46 = vrot.slane %v9828_v41, 4 }
 0x405   : > { %v4154_v15 = vadd.f32 %v4153_v62, %v4152_v20  ;;  %v7773_v23 = vpop.eup %7772  ;;  %v10063_v63 = vmul.f32 %v7771_v5, %v9971_v2  ;;  %7776 = vrsqrt.f32 %v4379_v57  ;;  %v4330_v8 = vmul.f32 0.125, %v4132_v30  ;;  %v11592_v30 = vld [vmem:[#allocation29_spill] sm:$0xff]  ;;  %v11593_v20 = vld [vmem:[#allocation32_spill] sm:$0xff] }
 0x406   : > { %v3726_v40 = vrot.slane %v3725_v56, 2  ;;  %v4472_v12 = vmul.f32 %v7773_v23, %v9984_v0  ;;  %v4147_v16 = vadd.f32 %v4146_v54, %v3981_v55  ;;  %v10067_v39 = vsub.f32 %v9822_v4, %v3887_v28 }
 0x407   : > { %v4155_v18 = vrot.slane %v4154_v15, 2  ;;  %v4145_v1 = vadd.f32 %v4144_v37, %v4143_v25  ;;  %v3720_v42 = vadd.f32 %v3719_v43, %v3718_v13  ;;  %v3731_v53 = vadd.f32 %v3730_v46, %v9828_v41 }
 0x408   : > { %v3727_v52 = vadd.f32 %v3726_v40, %v3725_v56  ;;  %v4520_v29 = vmax.f32 %v4472_v12, 0.0  ;;  %v4148_v27 = vrot.slane %v4147_v16, 2  ;;  %v3983_v2 = vmul.f32 %v10067_v39, %v10067_v39 }
 0x409   : > { %v4156_v22 = vadd.f32 %v4155_v18, %v4154_v15  ;;  %v4378_v36 = vadd.f32 1e-05, %v4330_v8  ;;  %v3721_v47 = vrot.slane %v3720_v42, 1  ;;  %v3732_v0 = vrot.slane %v3731_v53, 2 }
 0x40a   : > { %v3728_v49 = vrot.slane %v3727_v52, 1  ;;  %v10072_v9 = vpack.c.bf16 %v4520_v29, %v4517_v3  ;;  %v4149_v4 = vadd.f32 %v4148_v27, %v4147_v16  ;;  %v4159_v44 = vrot.slane %v3983_v2, 4  ;;  %v11594_v3 = vld [vmem:[#allocation36_spill] sm:$0xff] }
 0x40b   : > { %v4157_v31 = vrot.slane %v4156_v22, 1  ;;  %v3722_v57 = vadd.f32 %v3721_v47, %v3720_v42  ;;  %v3733_v13 = vadd.f32 %v3732_v0, %v3731_v53  ;;  %v10076_v5 = vadd.f32 %v11593_v20, %v11592_v30 }
 0x40c   : > { %11591 = vst [vmem:[#allocation41_spill] sm:$0xff] %v10072_v9  ;;  %v3729_v25 = vadd.f32 %v3728_v49, %v3727_v52  ;;  %v4332_v62 = vmul.f32 0.125, %v4145_v1  ;;  %v4150_v60 = vrot.slane %v4149_v4, 1  ;;  %v4160_v37 = vadd.f32 %v4159_v44, %v3983_v2 }
 0x40d   : > { %v4158_v55 = vadd.f32 %v4157_v31, %v4156_v22  ;;  %v7775_v56 = vpop.eup %7774  ;;  %v3888_v15 = vmul.f32 0.125, %v3722_v57  ;;  %v3734_v54 = vrot.slane %v3733_v13, 1  ;;  %v3736_v28 = vrot.slane %v11594_v3, 4 }
 0x40e   : > { %v3889_v43 = vmul.f32 0.125, %v3729_v25  ;;  %v4151_v61 = vadd.f32 %v4150_v60, %v4149_v4  ;;  %v4161_v23 = vrot.slane %v4160_v37, 2  ;;  %v3742_v8 = vsel %vm3570_vm2, %v10076_v5, 0.0 }
 0x40f   : > { %v4334_v46 = vmul.f32 0.125, %v4158_v55  ;;  %v7777_v40 = vpop.eup %7776  ;;  %7778 = vrsqrt.f32 %v4378_v36  ;;  %v10085_v18 = vsub.f32 %v9826_v34, %v3888_v15  ;;  %v3735_v16 = vadd.f32 %v3734_v54, %v3733_v13  ;;  %v10091_v36 = vpop.f32.mrb[61].mxu0  ;;  %v11597_v54 = vld [vmem:[#allocation35_spill] sm:$0xff] }
 0x410   : > { %v10082_v12 = vsub.f32 %v10035_v21, %v3889_v43  ;;  %v4380_v1 = vadd.f32 1e-05, %v4332_v62  ;;  %v4333_v42 = vmul.f32 0.125, %v4151_v61  ;;  %v4162_v53 = vadd.f32 %v4161_v23, %v4160_v37  ;;  %v10093_v21 = vpop.f32.mrb[110].mxu1  ;;  %v10099_v0 = vpop.f32.mrb[62].mxu0  ;;  %v11596_v43 = vld [vmem:[#allocation38_spill] sm:$0xff] }
 0x411   : > { %v4382_v52 = vadd.f32 1e-05, %v4334_v46  ;;  %v3984_v22 = vmul.f32 %v10085_v18, %v10085_v18  ;;  %v3890_v27 = vmul.f32 0.125, %v3735_v16  ;;  %v3743_v2 = vrot.slane %v3742_v8, 4  ;;  %v3556_v31 = vpop.f32.mrb[111].mxu1 }
 0x412   : > { %v3985_v29 = vmul.f32 %v10082_v12, %v10082_v12  ;;  %v10096_v34 = vmul.f32 %v7775_v56, %v9987_v59  ;;  %v4163_v49 = vrot.slane %v4162_v53, 1  ;;  %v3737_v47 = vadd.f32 %v3736_v28, %v11594_v3  ;;  %v11598_v28 = vld [vmem:[#allocation19_spill] sm:$0xff] }
 0x413   : > { %7780 = vrsqrt.f32 %v4382_v52  ;;  %v4165_v44 = vrot.slane %v3984_v22, 4  ;;  %v10103_v25 = vsub.f32 %v9828_v41, %v3890_v27  ;;  %v3744_v57 = vadd.f32 %v3743_v2, %v3742_v8 }
 0x414   : > { %11595 = vst [vmem:[#allocation29_spill] sm:$0xff] %v10096_v34  ;;  %v4171_v4 = vsel %vm3570_vm2, %v3985_v29, 0.0  ;;  %v4475_v13 = vmul.f32 %v7777_v40, %v10008_v26  ;;  %7782 = vrsqrt.f32 %v4380_v1  ;;  %v4381_v30 = vadd.f32 1e-05, %v4333_v42 }
 0x415   : > { %v4172_v59 = vrot.slane %v4171_v4, 4  ;;  %v4166_v20 = vadd.f32 %v4165_v44, %v3984_v22  ;;  %v3986_v62 = vmul.f32 %v10103_v25, %v10103_v25  ;;  %v3745_v55 = vrot.slane %v3744_v57, 2 }
 0x416   : > { %v3738_v60 = vrot.slane %v3737_v47, 2  ;;  %v4164_v37 = vadd.f32 %v4163_v49, %v4162_v53  ;;  %v3749_v15 = vrot.slane %v11596_v43, 4  ;;  %v10111_v41 = vadd.f32 %v11598_v28, %v11597_v54 }
 0x417   : > { %v4173_v56 = vadd.f32 %v4172_v59, %v4171_v4  ;;  %v4167_v46 = vrot.slane %v4166_v20, 2  ;;  %v4178_v61 = vrot.slane %v3986_v62, 4  ;;  %v3746_v26 = vadd.f32 %v3745_v55, %v3744_v57 }
 0x418   : > { %v3739_v23 = vadd.f32 %v3738_v60, %v3737_v47  ;;  %7784 = vrsqrt.f32 %v4381_v30  ;;  %v3750_v40 = vadd.f32 %v3749_v15, %v11596_v43  ;;  %v3761_v16 = vsel %vm3570_vm2, %v10111_v41, 0.0 }
 0x419   : > { %v4174_v8 = vrot.slane %v4173_v56, 2  ;;  %v7779_v1 = vpop.eup %7778  ;;  %v4168_v52 = vadd.f32 %v4167_v46, %v4166_v20  ;;  %v4179_v42 = vadd.f32 %v4178_v61, %v3986_v62  ;;  %v3747_v53 = vrot.slane %v3746_v26, 1 }
 0x41a   : > { %v3740_v29 = vrot.slane %v3739_v23, 1  ;;  %v4523_v22 = vmax.f32 %v4475_v13, 0.0  ;;  %v3751_v2 = vrot.slane %v3750_v40, 2  ;;  %v3762_v49 = vrot.slane %v3761_v16, 4 }
 0x41b   : > { %v4175_v27 = vadd.f32 %v4174_v8, %v4173_v56  ;;  %v4335_v31 = vmul.f32 0.125, %v4164_v37  ;;  %v4180_v4 = vrot.slane %v4179_v42, 2  ;;  %v3748_v44 = vadd.f32 %v3747_v53, %v3746_v26  ;;  %v11600_v8 = vld [vmem:[#allocation28_spill] sm:$0xff] }
 0x41c   : > { %v3741_v47 = vadd.f32 %v3740_v29, %v3739_v23  ;;  %v10117_v30 = vmul.f32 %v7779_v1, %v10015_v58  ;;  %v3752_v55 = vadd.f32 %v3751_v2, %v3750_v40  ;;  %v3763_v60 = vadd.f32 %v3762_v49, %v3761_v16  ;;  %v10127_v16 = vpop.f32.mrb[63].mxu0  ;;  %v10134_v49 = vld [vmem:[#allocation6 + $0x188] ss:$12 sps:$4 sm:$0xff]  }
 0x41d   : > { %v7781_v57 = vpop.eup %7780  ;;  %v4176_v59 = vrot.slane %v4175_v27, 1  ;;  %v4169_v62 = vrot.slane %v4168_v52, 1  ;;  %v4181_v15 = vadd.f32 %v4180_v4, %v4179_v42  ;;  %v3892_v54 = vmul.f32 0.125, %v3748_v44  ;;  %7195 = vmatprep.subr.bf16.mxu0 %v10134_v49 }
 0x41e   : > { %11599 = vst [vmem:[#allocation32_spill] sm:$0xff] %v10117_v30  ;;  %v4478_v20 = vmul.f32 %v7781_v57, %v10038_v32  ;;  %v7783_v13 = vpop.eup %7782  ;;  %v3891_v28 = vmul.f32 0.125, %v3741_v47  ;;  %v3753_v46 = vrot.slane %v3752_v55, 1  ;;  %v3764_v37 = vrot.slane %v3763_v60, 2 }
 0x41f   : > { %v4177_v56 = vadd.f32 %v4176_v59, %v4175_v27  ;;  %v4383_v26 = vadd.f32 1e-05, %v4335_v31  ;;  %v4182_v23 = vrot.slane %v4181_v15, 1  ;;  %v3755_v53 = vrot.slane %v11600_v8, 4 }
 0x420   : > { %v4526_v61 = vmax.f32 %v4478_v20, 0.0  ;;  %v10122_v1 = vsub.f32 %v10076_v5, %v3892_v54  ;;  %v10125_v40 = vsub.f32 %v11594_v3, %v3891_v28  ;;  %v3754_v32 = vadd.f32 %v3753_v46, %v3752_v55 }
 0x421   : > { %v4337_v58 = vmul.f32 0.125, %v4177_v56  ;;  %v10130_v42 = vmul.f32 %v7783_v13, %v10024_v50  ;;  %v4170_v27 = vadd.f32 %v4169_v62, %v4168_v52  ;;  %v3765_v2 = vadd.f32 %v3764_v37, %v3763_v60  ;;  %v11604_v56 = vld [vmem:[#allocation25_spill] sm:$0xff] }
 0x422   : > { %v10132_v29 = vpack.c.bf16 %v4526_v61, %v4523_v22  ;;  %v7785_v31 = vpop.eup %7784  ;;  %v3988_v5 = vmul.f32 %v10122_v1, %v10122_v1  ;;  %v3987_v3 = vmul.f32 %v10125_v40, %v10125_v40  ;;  %v3893_v44 = vmul.f32 0.125, %v3754_v32 }
 0x423   : > { %11601 = vst [vmem:[#allocation36_spill] sm:$0xff] %v10130_v42  ;;  %v4385_v4 = vadd.f32 1e-05, %v4337_v58  ;;  %7786 = vrsqrt.f32 %v4383_v26  ;;  %v4183_v47 = vadd.f32 %v4182_v23, %v4181_v15  ;;  %v3766_v57 = vrot.slane %v3765_v2, 1  ;;  %v11605_v26 = vld [vmem:[#allocation31_spill] sm:$0xff]  ;;  %v11606_v23 = vld [vmem:[#allocation33_spill] sm:$0xff] }
 0x424   : > { %11602 = vst [vmem:[#allocation38_spill] sm:$0xff] %v10132_v29  ;;  %v3756_v50 = vadd.f32 %v3755_v53, %v11600_v8  ;;  %v4190_v52 = vsel %vm3570_vm2, %v3988_v5, 0.0  ;;  %v4184_v22 = vrot.slane %v3987_v3, 4  ;;  %v10144_v59 = vsub.f32 %v11596_v43, %v3893_v44 }
 0x425   : > { %7788 = vrsqrt.f32 %v4385_v4  ;;  %v10147_v55 = vmul.f32 %v7785_v31, %v10047_v7  ;;  %v4336_v60 = vmul.f32 0.125, %v4170_v27  ;;  %v4191_v20 = vrot.slane %v4190_v52, 4  ;;  %v11607_v4 = vld [vmem:[#allocation14_spill] sm:$0xff] }
 0x426   : > { %v3767_v62 = vadd.f32 %v3766_v57, %v3765_v2  ;;  %v4185_v54 = vadd.f32 %v4184_v22, %v3987_v3  ;;  %v3989_v15 = vmul.f32 %v10144_v59, %v10144_v59  ;;  %v3757_v13 = vrot.slane %v3756_v50, 2 }
 0x427   : > { %11603 = vst [vmem:[#allocation35_spill] sm:$0xff] %v10147_v55  ;;  %v3768_v28 = vrot.slane %v11604_v56, 4  ;;  %v4338_v46 = vmul.f32 0.125, %v4183_v47  ;;  %v4192_v37 = vadd.f32 %v4191_v20, %v4190_v52  ;;  %v10154_v43 = vadd.f32 %v11606_v23, %v11605_v26 }
 0x428   : > { %v3895_v61 = vmul.f32 0.125, %v3767_v62  ;;  %v4186_v53 = vrot.slane %v4185_v54, 2  ;;  %v4197_v7 = vrot.slane %v3989_v15, 4  ;;  %v3758_v58 = vadd.f32 %v3757_v13, %v3756_v50 }
 0x429   : > { %v3769_v32 = vadd.f32 %v3768_v28, %v11604_v56  ;;  %v4193_v27 = vrot.slane %v4192_v37, 2  ;;  %v3780_v31 = vsel %vm3570_vm2, %v10154_v43, 0.0  ;;  %v3774_v5 = vrot.slane %v11607_v4, 4 }
 0x42a   : > { %v10158_v2 = vsub.f32 %v10111_v41, %v3895_v61  ;;  %v4187_v3 = vadd.f32 %v4186_v53, %v4185_v54  ;;  %v4198_v44 = vadd.f32 %v4197_v7, %v3989_v15  ;;  %v3759_v47 = vrot.slane %v3758_v58, 1 }
 0x42b   : > { %v3770_v57 = vrot.slane %v3769_v32, 2  ;;  %v4194_v52 = vadd.f32 %v4193_v27, %v4192_v37  ;;  %v3781_v50 = vrot.slane %v3780_v31, 4  ;;  %v3775_v20 = vadd.f32 %v3774_v5, %v11607_v4 }
 0x42c   : > { %v3991_v22 = vmul.f32 %v10158_v2, %v10158_v2  ;;  %v4188_v62 = vrot.slane %v4187_v3, 1  ;;  %v4199_v13 = vrot.slane %v4198_v44, 2  ;;  %v3760_v41 = vadd.f32 %v3759_v47, %v3758_v58 }
 0x42d   : > { %v3771_v28 = vadd.f32 %v3770_v57, %v3769_v32  ;;  %v10166_v61 = vpop.eup %7786  ;;  %v4384_v26 = vadd.f32 1e-05, %v4336_v60  ;;  %v4195_v23 = vrot.slane %v4194_v52, 1  ;;  %v3782_v15 = vadd.f32 %v3781_v50, %v3780_v31 }
 0x42e   : > { %v4209_v54 = vsel %vm3570_vm2, %v3991_v22, 0.0  ;;  %v4386_v7 = vadd.f32 1e-05, %v4338_v46  ;;  %v4189_v37 = vadd.f32 %v4188_v62, %v4187_v3  ;;  %v4200_v27 = vadd.f32 %v4199_v13, %v4198_v44 }
 0x42f   : > { %v7789_v53 = vpop.eup %7788  ;;  %v4210_v29 = vrot.slane %v4209_v54, 4  ;;  %v4196_v9 = vadd.f32 %v4195_v23, %v4194_v52  ;;  %v3894_v38 = vmul.f32 0.125, %v3760_v41  ;;  %v3772_v34 = vrot.slane %v3771_v28, 1  ;;  %v11608_v23 = vld [vmem:[#allocation27_spill] sm:$0xff] }
 0x430   : > { %v3776_v5 = vrot.slane %v3775_v20, 2  ;;  %v10170_v42 = vmul.f32 %v7789_v53, %v10082_v12  ;;  %v4201_v58 = vrot.slane %v4200_v27, 1  ;;  %v3783_v47 = vrot.slane %v3782_v15, 2 }
 0x431   : > { %v4211_v32 = vadd.f32 %v4210_v29, %v4209_v54  ;;  %7790 = vrsqrt.f32 %v4384_v26  ;;  %v4340_v60 = vmul.f32 0.125, %v4196_v9  ;;  %v10173_v57 = vsub.f32 %v11600_v8, %v3894_v38 }
 0x432   : > { %v3773_v31 = vadd.f32 %v3772_v34, %v3771_v28  ;;  %7792 = vrsqrt.f32 %v4386_v7  ;;  %v4339_v46 = vmul.f32 0.125, %v4189_v37  ;;  %v4202_v3 = vadd.f32 %v4201_v58, %v4200_v27  ;;  %v11609_v37 = vld [vmem:[#allocation34_spill] sm:$0xff] }
 0x433   : > { %v4212_v44 = vrot.slane %v4211_v32, 2  ;;  %v4388_v52 = vadd.f32 1e-05, %v4340_v60  ;;  %v3990_v22 = vmul.f32 %v10173_v57, %v10173_v57  ;;  %v3784_v12 = vadd.f32 %v3783_v47, %v3782_v15  ;;  %v11610_v27 = vld [vmem:[#allocation18_spill] sm:$0xff] }
 0x434   : > { %v3896_v50 = vmul.f32 0.125, %v3773_v31  ;;  %v4341_v29 = vmul.f32 0.125, %v4202_v3  ;;  %v3777_v41 = vadd.f32 %v3776_v5, %v3775_v20  ;;  %v4387_v8 = vadd.f32 1e-05, %v4339_v46 }
 0x435   : > { %v4213_v13 = vadd.f32 %v4212_v44, %v4211_v32  ;;  %7794 = vrsqrt.f32 %v4388_v52  ;;  %v4203_v9 = vrot.slane %v3990_v22, 4  ;;  %v3785_v34 = vrot.slane %v3784_v12, 1 }
 0x436   : > { %v10179_v38 = vsub.f32 %v11604_v56, %v3896_v50  ;;  %v3778_v26 = vrot.slane %v3777_v41, 1  ;;  %v3787_v54 = vrot.slane %v11608_v23, 4  ;;  %v10186_v58 = vadd.f32 %v11610_v27, %v11609_v37 }
 0x437   : > { %v4214_v28 = vrot.slane %v4213_v13, 1  ;;  %v4204_v53 = vadd.f32 %v4203_v9, %v3990_v22  ;;  %v3786_v7 = vadd.f32 %v3785_v34, %v3784_v12  ;;  %v4389_v20 = vadd.f32 1e-05, %v4341_v29  ;;  %v11611_v29 = vld [vmem:[#allocation16_spill] sm:$0xff] }
 0x438   : > { %v3992_v15 = vmul.f32 %v10179_v38, %v10179_v38  ;;  %v3779_v32 = vadd.f32 %v3778_v26, %v3777_v41  ;;  %v3788_v56 = vadd.f32 %v3787_v54, %v11608_v23  ;;  %v3799_v46 = vsel %vm3570_vm2, %v10186_v58, 0.0 }
 0x439   : > { %v4215_v5 = vadd.f32 %v4214_v28, %v4213_v13  ;;  %v4205_v47 = vrot.slane %v4204_v53, 2  ;;  %v3898_v31 = vmul.f32 0.125, %v3786_v7  ;;  %v3800_v22 = vrot.slane %v3799_v46, 4 }
 0x43a   : > { %v4216_v60 = vrot.slane %v3992_v15, 4  ;;  %v3897_v44 = vmul.f32 0.125, %v3779_v32  ;;  %v3789_v52 = vrot.slane %v3788_v56, 2  ;;  %v3793_v13 = vrot.slane %v11611_v29, 4 }
 0x43b   : > { %v4343_v3 = vmul.f32 0.125, %v4215_v5  ;;  %v7791_v50 = vpop.eup %7790  ;;  %v4206_v12 = vadd.f32 %v4205_v47, %v4204_v53  ;;  %v10192_v34 = vsub.f32 %v10154_v43, %v3898_v31  ;;  %7796 = vrsqrt.f32 %v4387_v8 }
 0x43c   : > { %v4217_v9 = vadd.f32 %v4216_v60, %v3992_v15  ;;  %v10195_v41 = vpop.eup %7792  ;;  %v10198_v28 = vsub.f32 %v11607_v4, %v3897_v44  ;;  %v3790_v26 = vadd.f32 %v3789_v52, %v3788_v56  ;;  %v3801_v54 = vadd.f32 %v3800_v22, %v3799_v46 }
 0x43d   : > { %v4207_v7 = vrot.slane %v4206_v12, 1  ;;  %v3994_v27 = vmul.f32 %v10192_v34, %v10192_v34  ;;  %v3794_v53 = vadd.f32 %v3793_v13, %v11611_v29  ;;  %7798 = vrsqrt.f32 %v4389_v20 }
 0x43e   : > { %v4218_v37 = vrot.slane %v4217_v9, 2  ;;  %v3993_v43 = vmul.f32 %v10198_v28, %v10198_v28  ;;  %v3791_v15 = vrot.slane %v3790_v26, 1  ;;  %v3802_v5 = vrot.slane %v3801_v54, 2 }
 0x43f   : > { %v7795_v32 = vpop.eup %7794  ;;  %v4391_v8 = vadd.f32 1e-05, %v4343_v3  ;;  %v4208_v47 = vadd.f32 %v4207_v7, %v4206_v12  ;;  %v4228_v56 = vsel %vm3570_vm2, %v3994_v27, 0.0  ;;  %v3795_v20 = vrot.slane %v3794_v53, 2 }
 0x440   : > { %v4219_v4 = vadd.f32 %v4218_v37, %v4217_v9  ;;  %v4484_v60 = vmul.f32 %v7795_v32, %v10122_v1  ;;  %v4229_v31 = vrot.slane %v4228_v56, 4  ;;  %v4222_v46 = vrot.slane %v3993_v43, 4 }
 0x441   : > { %v3792_v44 = vadd.f32 %v3791_v15, %v3790_v26  ;;  %v4342_v52 = vmul.f32 0.125, %v4208_v47  ;;  %v3803_v13 = vadd.f32 %v3802_v5, %v3801_v54  ;;  %7800 = vrsqrt.f32 %v4391_v8 }
 0x442   : > { %v4220_v22 = vrot.slane %v4219_v4, 1  ;;  %v4532_v62 = vmax.f32 %v4484_v60, 0.0  ;;  %v4230_v55 = vadd.f32 %v4229_v31, %v4228_v56  ;;  %v4223_v30 = vadd.f32 %v4222_v46, %v3993_v43 }
 0x443   : > { %v3899_v19 = vmul.f32 0.125, %v3792_v44  ;;  %v4390_v35 = vadd.f32 1e-05, %v4342_v52  ;;  %v3804_v12 = vrot.slane %v3803_v13, 1  ;;  %v11612_v9 = vmax.f32 %v10170_v42, 0.0 }
 0x444   : > { %v4221_v3 = vadd.f32 %v4220_v22, %v4219_v4  ;;  %v4231_v1 = vrot.slane %v4230_v55, 2  ;;  %v4224_v37 = vrot.slane %v4223_v30, 2  ;;  %v10216_v54 = vmul.f32 %v10166_v61, %v10067_v39 }
 0x445   : > { %v10209_v7 = vpack.c.bf16 %v4532_v62, %v11612_v9  ;;  %v10212_v26 = vsub.f32 %v11608_v23, %v3899_v19  ;;  %v3805_v43 = vadd.f32 %v3804_v12, %v3803_v13  ;;  %v3796_v15 = vadd.f32 %v3795_v20, %v3794_v53  ;;  %v7797_v5 = vpop.eup %7796  ;;  %v11613_v62 = vld [vmem:[#allocation20_spill] sm:$0xff]  ;;  %v11614_v19 = vld [vmem:[#allocation30_spill] sm:$0xff]  ;;  %v11615_v23 = vld [vmem:[#allocation23_spill] sm:$0xff] }
 0x446   : > { %v4344_v27 = vmul.f32 0.125, %v4221_v3  ;;  %v4232_v32 = vadd.f32 %v4231_v1, %v4230_v55  ;;  %v4225_v8 = vadd.f32 %v4224_v37, %v4223_v30  ;;  %v3806_v47 = vrot.slane %v11613_v62, 4 }
 0x447   : > { %v3995_v42 = vmul.f32 %v10212_v26, %v10212_v26  ;;  %7802 = vrsqrt.f32 %v4390_v35  ;;  %v3901_v4 = vmul.f32 0.125, %v3805_v43  ;;  %v3797_v56 = vrot.slane %v3796_v15, 1  ;;  %v7799_v39 = vpop.eup %7798 }
 0x448   : > { %v10223_v60 = vadd.f32 %v11615_v23, %v11614_v19  ;;  %v4233_v61 = vrot.slane %v4232_v32, 1  ;;  %v4226_v31 = vrot.slane %v4225_v8, 1  ;;  %v3807_v53 = vadd.f32 %v3806_v47, %v11613_v62 }
 0x449   : > { %v4235_v46 = vrot.slane %v3995_v42, 4  ;;  %v10227_v30 = vmul.f32 %v7791_v50, %v10085_v18  ;;  %v4392_v55 = vadd.f32 1e-05, %v4344_v27  ;;  %v10230_v44 = vsub.f32 %v10186_v58, %v3901_v4 }
 0x44a   : > { %v3798_v35 = vadd.f32 %v3797_v56, %v3796_v15  ;;  %v4234_v52 = vadd.f32 %v4233_v61, %v4232_v32  ;;  %v4227_v22 = vadd.f32 %v4226_v31, %v4225_v8  ;;  %v3808_v20 = vrot.slane %v3807_v53, 2 }
 0x44b   : > { %v4236_v13 = vadd.f32 %v4235_v46, %v3995_v42  ;;  %v10234_v3 = vmul.f32 %v10195_v41, %v10103_v25  ;;  %v3997_v12 = vmul.f32 %v10230_v44, %v10230_v44  ;;  %v3818_v18 = vsel %vm3570_vm2, %v10223_v60, 0.0  ;;  %v7801_v27 = vpop.eup %7800 }
 0x44c   : > { %v3900_v9 = vmul.f32 0.125, %v3798_v35  ;;  %v10241_v50 = vmul.f32 %v7797_v5, %v10125_v40  ;;  %v4346_v58 = vmul.f32 0.125, %v4234_v52  ;;  %v4345_v1 = vmul.f32 0.125, %v4227_v22 }
 0x44d   : > { %v3809_v37 = vadd.f32 %v3808_v20, %v3807_v53  ;;  %v4247_v43 = vsel %vm3570_vm2, %v3997_v12, 0.0  ;;  %v3819_v25 = vrot.slane %v3818_v18, 4  ;;  %v3812_v41 = vrot.slane %v9918_v48, 4 }
 0x44e   : > { %v10245_v15 = vsub.f32 %v11611_v29, %v3900_v9  ;;  %7804 = vrsqrt.f32 %v4392_v55  ;;  %v4394_v32 = vadd.f32 1e-05, %v4346_v58  ;;  %v4237_v8 = vrot.slane %v4236_v13, 2 }
 0x44f   : > { %v4248_v42 = vrot.slane %v4247_v43, 4  ;;  %v3810_v5 = vrot.slane %v3809_v37, 1  ;;  %v3820_v47 = vadd.f32 %v3819_v25, %v3818_v18  ;;  %v3813_v4 = vadd.f32 %v3812_v41, %v9918_v48 }
 0x450   : > { %v3996_v40 = vmul.f32 %v10245_v15, %v10245_v15  ;;  %v10252_v56 = vmul.f32 %v7799_v39, %v10144_v59  ;;  %v10255_v29 = vmul.f32 %v7801_v27, %v10158_v2  ;;  %7806 = vrsqrt.f32 %v4394_v32 }
 0x451   : > { %v4249_v19 = vadd.f32 %v4248_v42, %v4247_v43  ;;  %v7803_v23 = vpop.eup %7802  ;;  %v4393_v61 = vadd.f32 1e-05, %v4345_v1  ;;  %v3811_v46 = vadd.f32 %v3810_v5, %v3809_v37  ;;  %v3821_v53 = vrot.slane %v3820_v47, 2  ;;  %v7598_v43 = vld [vmem:[#allocation6 + $0x180] ss:$12 sps:$4 sm:$0xff]  }
 0x452   : > { %v4241_v31 = vrot.slane %v3996_v40, 4  ;;  %v4238_v55 = vadd.f32 %v4237_v8, %v4236_v13  ;;  %v3814_v52 = vrot.slane %v3813_v4, 2  ;;  %v4504_v22 = vmax.f32 %v9925_v24, 0.0  ;;  %v7603_v24 = vld [vmem:[#allocation6 + $0x19c] ss:$12 sps:$4 sm:$0xff]  }
 0x453   : > { %v4250_v35 = vrot.slane %v4249_v19, 2  ;;  %v3902_v12 = vmul.f32 0.125, %v3811_v46  ;;  %v3822_v9 = vadd.f32 %v3821_v53, %v3820_v47  ;;  %v4507_v59 = vmax.f32 %v9928_v6, 0.0  ;;  %v7608_v8 = vld [vmem:[#allocation6 + $0x1a0] ss:$12 sps:$4 sm:$0xff]   ;;  %v11618_v53 = vld [vmem:[#allocation22_spill] sm:$0xff] }
 0x454   : > { %v4242_v20 = vadd.f32 %v4241_v31, %v3996_v40  ;;  %v4535_v2 = vmax.f32 %v10255_v29, 0.0  ;;  %v10261_v39 = vmul.f32 %v7803_v23, %v10173_v57  ;;  %v3815_v58 = vadd.f32 %v3814_v52, %v3813_v4  ;;  %v11616_v29 = vld [vmem:[#allocation15_spill] sm:$0xff]  ;;  %v11617_v46 = vld [vmem:[#allocation37_spill] sm:$0xff] }
 0x455   : > { %v4251_v18 = vadd.f32 %v4250_v35, %v4249_v19  ;;  %v10264_v37 = vsub.f32 %v11613_v62, %v3902_v12  ;;  %v3823_v13 = vrot.slane %v3822_v9, 1  ;;  %v4552_v27 = vpack.c.bf16 %v4507_v59, %v4504_v22  ;;  %v7601_v52 = vld [vmem:[#allocation6 + $0x198] ss:$12 sps:$4 sm:$0xff]  }
 0x456   : > { %v4243_v1 = vrot.slane %v4242_v20, 2  ;;  %v4239_v25 = vrot.slane %v4238_v55, 1  ;;  %v3816_v32 = vrot.slane %v3815_v58, 1  ;;  %v3825_v6 = vrot.slane %v9963_v11, 4 }
 0x457   : > { %v4252_v41 = vrot.slane %v4251_v18, 1  ;;  %7808 = vrsqrt.f32 %v4393_v61  ;;  %v3998_v57 = vmul.f32 %v10264_v37, %v10264_v37  ;;  %v3824_v40 = vadd.f32 %v3823_v13, %v3822_v9  ;;  %5018 = vmatprep.mubr.bf16.mxu1 %v4552_v27  ;;  %5244 = vmatprep.mubr.bf16.mxu0 %v4552_v27 }
 0x458   : > { %v4244_v42 = vadd.f32 %v4243_v1, %v4242_v20  ;;  %v7805_v62 = vpop.eup %7804  ;;  %v3817_v47 = vadd.f32 %v3816_v32, %v3815_v58  ;;  %v3826_v4 = vadd.f32 %v3825_v6, %v9963_v11  ;;  %5019 = vmatmul.mubr.bf16.vlgmr.msra.gmra.mrb[112].mxu1 %v11616_v29  ;;  %5245 = vmatmul.mubr.bf16.vlgmr.msra.gmra.mrb[64].mxu0 %v11616_v29  ;;  %v3831_v19 = vrot.slane %v10091_v36, 4 }
 0x459   : > { %v4253_v5 = vadd.f32 %v4252_v41, %v4251_v18  ;;  %v4254_v61 = vrot.slane %v3998_v57, 4  ;;  %v3904_v31 = vmul.f32 0.125, %v3824_v40  ;;  %v3455_v35 = vadd.f32 %v11618_v53, %v11617_v46  ;;  %5100 = vmatpush1.bf16.msra.mxu1 %v7598_v43  ;;  %7196 = vmatpush3.bf16.msra.mxu0 %v10134_v49 }
 0x45a   : > { %v4245_v23 = vrot.slane %v4244_v42, 1  ;;  %v7807_v22 = vpop.eup %7806  ;;  %v4240_v20 = vadd.f32 %v4239_v25, %v4238_v55  ;;  %v3903_v9 = vmul.f32 0.125, %v3817_v47  ;;  %v3827_v59 = vrot.slane %v3826_v4, 2  ;;  %5101 = vmatprep.subr.bf16.mxu1 %v7603_v24  ;;  %7197 = vmatprep.subr.bf16.mxu0 %v7608_v8 }
 0x45b   : > { %v4349_v12 = vmul.f32 0.125, %v4253_v5  ;;  %v4490_v18 = vmul.f32 %v7807_v22, %v10192_v34  ;;  %v4255_v1 = vadd.f32 %v4254_v61, %v3998_v57  ;;  %v10278_v13 = vsub.f32 %v10223_v60, %v3904_v31 }
 0x45c   : > { %v4246_v58 = vadd.f32 %v4245_v23, %v4244_v42  ;;  %v10281_v27 = vmul.f32 %v7805_v62, %v10179_v38  ;;  %v10284_v43 = vsub.f32 %v9918_v48, %v3903_v9  ;;  %v3828_v49 = vadd.f32 %v3827_v59, %v3826_v4 }
 0x45d   : > { %v3832_v55 = vadd.f32 %v3831_v19, %v10091_v36  ;;  %v4538_v25 = vmax.f32 %v4490_v18, 0.0  ;;  %v4397_v41 = vadd.f32 1e-05, %v4349_v12  ;;  %v4256_v24 = vrot.slane %v4255_v1, 2  ;;  %5102 = vmatpush1.bf16.msra.mxu1 %v7601_v52  ;;  %7198 = vmatpush3.bf16.msra.mxu0 %v7608_v8 }
 0x45e   : > { %v4000_v34 = vmul.f32 %v10278_v13, %v10278_v13  ;;  %v4347_v32 = vmul.f32 0.125, %v4240_v20  ;;  %v3999_v60 = vmul.f32 %v10284_v43, %v10284_v43  ;;  %v3829_v38 = vrot.slane %v3828_v49, 1 }
 0x45f   : > { %v10292_v6 = vadd.f32 %v10059_v14, %v3455_v35  ;;  %v10294_v48 = vpack.c.bf16 %v4538_v25, %v4535_v2  ;;  %v4348_v42 = vmul.f32 0.125, %v4246_v58  ;;  %v4257_v57 = vadd.f32 %v4256_v24, %v4255_v1  ;;  %v11619_v1 = vld [vmem:[#allocation17_spill] sm:$0xff] }
 0x460   : > { %v4266_v40 = vsel %vm3570_vm2, %v4000_v34, 0.0  ;;  %v4260_v5 = vrot.slane %v3999_v60, 4  ;;  %v3830_v47 = vadd.f32 %v3829_v38, %v3828_v49  ;;  %7810 = vrsqrt.f32 %v4397_v41  ;;  %v11620_v49 = vld [vmem:[#allocation39_spill] sm:$0xff] }
 0x461   : > { %v4267_v62 = vrot.slane %v4266_v40, 4  ;;  %v3837_v8 = vsel %vm3570_vm2, %v10292_v6, 0.0  ;;  %v7809_v4 = vpop.eup %7808  ;;  %v4258_v29 = vrot.slane %v4257_v57, 1  ;;  %v3833_v23 = vrot.slane %v3832_v55, 2 }
 0x462   : > { %v3838_v19 = vrot.slane %v3837_v8, 4  ;;  %v4261_v14 = vadd.f32 %v4260_v5, %v3999_v60  ;;  %v3905_v31 = vmul.f32 0.125, %v3830_v47  ;;  %v3844_v2 = vrot.slane %v10099_v0, 4 }
 0x463   : > { %v4268_v61 = vadd.f32 %v4267_v62, %v4266_v40  ;;  %v4395_v46 = vadd.f32 1e-05, %v4347_v32  ;;  %v4259_v53 = vadd.f32 %v4258_v29, %v4257_v57  ;;  %v3834_v52 = vadd.f32 %v3833_v23, %v3832_v55 }
 0x464   : > { %v3839_v35 = vadd.f32 %v3838_v19, %v3837_v8  ;;  %v4262_v20 = vrot.slane %v4261_v14, 2  ;;  %v10301_v12 = vsub.f32 %v9963_v11, %v3905_v31  ;;  %v3845_v9 = vadd.f32 %v3844_v2, %v10099_v0 }
 0x465   : > { %v4269_v22 = vrot.slane %v4268_v61, 2  ;;  %v4396_v59 = vadd.f32 1e-05, %v4348_v42  ;;  %v3835_v58 = vrot.slane %v3834_v52, 1  ;;  %v3458_v25 = vadd.f32 %v11620_v49, %v11619_v1 }
 0x466   : > { %v3840_v18 = vrot.slane %v3839_v35, 2  ;;  %v4263_v24 = vadd.f32 %v4262_v20, %v4261_v14  ;;  %v4001_v34 = vmul.f32 %v10301_v12, %v10301_v12  ;;  %v3846_v32 = vrot.slane %v3845_v9, 2 }
 0x467   : > { %v4270_v41 = vadd.f32 %v4269_v22, %v4268_v61  ;;  %v4350_v55 = vmul.f32 0.125, %v4259_v53  ;;  %v3836_v38 = vadd.f32 %v3835_v58, %v3834_v52  ;;  %v10309_v11 = vadd.f32 %v10093_v21, %v3458_v25 }
 0x468   : > { %v3841_v60 = vadd.f32 %v3840_v18, %v3839_v35  ;;  %v4264_v40 = vrot.slane %v4263_v24, 1  ;;  %v4273_v42 = vrot.slane %v4001_v34, 4  ;;  %v3847_v62 = vadd.f32 %v3846_v32, %v3845_v9 }
 0x469   : > { %v4271_v57 = vrot.slane %v4270_v41, 1  ;;  %v10312_v5 = vmul.f32 %v7809_v4, %v10198_v28  ;;  %7812 = vrsqrt.f32 %v4395_v46  ;;  %v3906_v8 = vmul.f32 0.125, %v3836_v38 }
 0x46a   : > { %v3842_v47 = vrot.slane %v3841_v60, 1  ;;  %v4265_v19 = vadd.f32 %v4264_v40, %v4263_v24  ;;  %v4274_v23 = vadd.f32 %v4273_v42, %v4001_v34  ;;  %v3848_v61 = vrot.slane %v3847_v62, 1  ;;  %v7811_v14 = vpop.eup %7810 }
 0x46b   : > { %v4272_v29 = vadd.f32 %v4271_v57, %v4270_v41  ;;  %7814 = vrsqrt.f32 %v4396_v59  ;;  %v10315_v21 = vsub.f32 %v10091_v36, %v3906_v8  ;;  %v3856_v2 = vsel %vm3570_vm2, %v10309_v11, 0.0 }
 0x46c   : > { %v3843_v31 = vadd.f32 %v3842_v47, %v3841_v60  ;;  %v4398_v53 = vadd.f32 1e-05, %v4350_v55  ;;  %v4351_v28 = vmul.f32 0.125, %v4265_v19  ;;  %v4275_v4 = vrot.slane %v4274_v23, 2 }
 0x46d   : > { %v4352_v35 = vmul.f32 0.125, %v4272_v29  ;;  %v4002_v52 = vmul.f32 %v10315_v21, %v10315_v21  ;;  %v3849_v22 = vadd.f32 %v3848_v61, %v3847_v62  ;;  %v3857_v20 = vrot.slane %v3856_v2, 4 }
 0x46e   : > { %v3907_v46 = vmul.f32 0.125, %v3843_v31  ;;  %v10322_v9 = vmul.f32 %v7811_v14, %v10230_v44  ;;  %v4276_v18 = vadd.f32 %v4275_v4, %v4274_v23  ;;  %v3850_v36 = vrot.slane %v10127_v16, 4 }
 0x46f   : > { %v4400_v59 = vadd.f32 1e-05, %v4352_v35  ;;  %v4279_v1 = vrot.slane %v4002_v52, 4  ;;  %v3908_v49 = vmul.f32 0.125, %v3849_v22  ;;  %v3858_v25 = vadd.f32 %v3857_v20, %v3856_v2 }
 0x470   : > { %v10326_v58 = vsub.f32 %v10292_v6, %v3907_v46  ;;  %v4399_v41 = vadd.f32 1e-05, %v4351_v28  ;;  %v4277_v24 = vrot.slane %v4276_v18, 1  ;;  %v3851_v34 = vadd.f32 %v3850_v36, %v10127_v16 }
 0x471   : > { %7816 = vrsqrt.f32 %v4400_v59  ;;  %v4280_v32 = vadd.f32 %v4279_v1, %v4002_v52  ;;  %v10332_v55 = vsub.f32 %v10099_v0, %v3908_v49  ;;  %v3859_v38 = vrot.slane %v3858_v25, 2 }
 0x472   : > { %7818 = vrsqrt.f32 %v4398_v53  ;;  %v4003_v44 = vmul.f32 %v10326_v58, %v10326_v58  ;;  %v4278_v60 = vadd.f32 %v4277_v24, %v4276_v18  ;;  %v3852_v6 = vrot.slane %v3851_v34, 2  ;;  %v11621_v24 = vld [vmem:[#allocation40_spill] sm:$0xff] }
 0x473   : > { %v4513_v57 = vmax.f32 %v10005_v51, 0.0  ;;  %v7813_v40 = vpop.eup %7812  ;;  %v4281_v62 = vrot.slane %v4280_v32, 2  ;;  %v4004_v47 = vmul.f32 %v10332_v55, %v10332_v55  ;;  %v4510_v8 = vmax.f32 %v9975_v33, 0.0 }
 0x474   : > { %v4285_v42 = vsel %vm3570_vm2, %v4003_v44, 0.0  ;;  %7820 = vrsqrt.f32 %v4399_v41  ;;  %v4353_v29 = vmul.f32 0.125, %v4278_v60  ;;  %v3860_v23 = vadd.f32 %v3859_v38, %v3858_v25 }
 0x475   : > { %v4286_v19 = vrot.slane %v4285_v42, 4  ;;  %v7815_v0 = vpop.eup %7814  ;;  %v4282_v61 = vadd.f32 %v4281_v62, %v4280_v32  ;;  %v4292_v14 = vrot.slane %v4004_v47, 4  ;;  %v3853_v31 = vadd.f32 %v3852_v6, %v3851_v34 }
 0x476   : > { %v4555_v2 = vpack.c.bf16 %v4513_v57, %v4510_v8  ;;  %v3861_v51 = vrot.slane %v3860_v23, 1  ;;  %v4509_v35 = vmax.f32 %v9934_v17, 0.0  ;;  %v4512_v28 = vmax.f32 %v9979_v45, 0.0 }
 0x477   : > { %v4287_v53 = vadd.f32 %v4286_v19, %v4285_v42  ;;  %v10342_v4 = vmul.f32 %v7813_v40, %v10212_v26  ;;  %v4283_v46 = vrot.slane %v4282_v61, 1  ;;  %v4293_v33 = vadd.f32 %v4292_v14, %v4004_v47  ;;  %v11622_v40 = vld [vmem:[#allocation24_spill] sm:$0xff] }
 0x478   : > { %v3854_v52 = vrot.slane %v3853_v31, 1  ;;  %5028 = vmatprep.mubr.bf16.mxu1 %v4555_v2  ;;  %5252 = vmatprep.mubr.bf16.mxu0 %v4555_v2  ;;  %v4541_v22 = vmax.f32 %v10322_v9, 0.0  ;;  %v3862_v59 = vadd.f32 %v3861_v51, %v3860_v23  ;;  %v4554_v18 = vpack.c.bf16 %v4512_v28, %v4509_v35  ;;  %v11624_v2 = vld [vmem:[#allocation35_spill] sm:$0xff] }
 0x479   : > { %v4288_v20 = vrot.slane %v4287_v53, 2  ;;  %v4401_v36 = vadd.f32 1e-05, %v4353_v29  ;;  %v4294_v1 = vrot.slane %v4293_v33, 2  ;;  %v4519_v17 = vmax.f32 %v10063_v63, 0.0 }
 0x47a   : > { %v3855_v49 = vadd.f32 %v3854_v52, %v3853_v31  ;;  %v3910_v41 = vmul.f32 0.125, %v3862_v59  ;;  %5029 = vmatmul.mubr.bf16.gmra.mrb[116].mxu1 %v4554_v18  ;;  %5253 = vmatmul.mubr.bf16.gmra.mrb[68].mxu0 %v4554_v18  ;;  %v4516_v26 = vmax.f32 %v10051_v10, 0.0  ;;  %v4518_v34 = vmax.f32 %v11621_v24, 0.0  ;;  %v11623_v31 = vld [vmem:[#allocation32_spill] sm:$0xff] }
 0x47b   : > { %v7817_v25 = vpop.eup %7816  ;;  %v4289_v45 = vadd.f32 %v4288_v20, %v4287_v53  ;;  %v4284_v32 = vadd.f32 %v4283_v46, %v4282_v61  ;;  %v4295_v60 = vadd.f32 %v4294_v1, %v4293_v33  ;;  %v4515_v42 = vmax.f32 %v11622_v40, 0.0  ;;  %v11625_v46 = vld [vmem:[#allocation36_spill] sm:$0xff] }
 0x47c   : > { %v7819_v44 = vpop.eup %7818  ;;  %v4496_v9 = vmul.f32 %v7817_v25, %v10278_v13  ;;  %v3909_v38 = vmul.f32 0.125, %v3855_v49  ;;  %v10350_v57 = vsub.f32 %v10309_v11, %v3910_v41  ;;  %v4558_v63 = vpack.c.bf16 %v4519_v17, %v4516_v26 }
 0x47d   : > { %v4290_v6 = vrot.slane %v4289_v45, 1  ;;  %v10354_v62 = vmul.f32 %v7815_v0, %v10245_v15  ;;  %v4296_v10 = vrot.slane %v4295_v60, 1  ;;  %v10360_v13 = vmul.f32 %v7819_v44, %v10264_v37  ;;  %v7609_v44 = vld [vmem:[#allocation6 + $0x1b8] ss:$12 sps:$4 sm:$0x3f]  }
 0x47e   : > { %v4544_v47 = vmax.f32 %v4496_v9, 0.0  ;;  %v10357_v8 = vsub.f32 %v10127_v16, %v3909_v38  ;;  %v7821_v29 = vpop.eup %7820  ;;  %7822 = vrsqrt.f32 %v4401_v36  ;;  %v4006_v11 = vmul.f32 %v10350_v57, %v10350_v57  ;;  %5038 = vmatprep.mubr.bf16.mxu1 %v4558_v63  ;;  %5260 = vmatprep.mubr.bf16.mxu0 %v4558_v63  ;;  %v7605_v36 = vld [vmem:[#allocation6 + $0x1b4] ss:$12 sps:$4 sm:$0x3f]  }
 0x47f   : > { %v4557_v19 = vpack.c.bf16 %v4518_v34, %v4515_v42  ;;  %v4354_v15 = vmul.f32 0.125, %v4284_v32  ;;  %v4297_v0 = vadd.f32 %v4296_v10, %v4295_v60  ;;  %v4291_v16 = vadd.f32 %v4290_v6, %v4289_v45  ;;  %v7607_v45 = vld [vmem:[#allocation6 + $0x1b0] ss:$12 sps:$4 sm:$0x3f]   ;;  %7005 = vmatprep.subr.msk.bf16.mxu1 %vm4976_vm3, %v7605_v36  ;;  %7313 = vmatprep.subr.msk.bf16.mxu0 %vm4976_vm3, %v7609_v44 }
 0x480   : > { %v10364_v23 = vpack.c.bf16 %v4544_v47, %v4541_v22  ;;  %v4005_v61 = vmul.f32 %v10357_v8, %v10357_v8  ;;  %v4304_v14 = vsel %vm3570_vm2, %v4006_v11, 0.0  ;;  %v4522_v37 = vmax.f32 %v11623_v31, 0.0  ;;  %v11626_v22 = vld [vmem:[#allocation29_spill] sm:$0xff] }
 0x481   : > { %v4525_v53 = vmax.f32 %v11624_v2, 0.0  ;;  %v4356_v51 = vmul.f32 0.125, %v4297_v0  ;;  %v4305_v35 = vrot.slane %v4304_v14, 4  ;;  %v4524_v33 = vmax.f32 %v11625_v46, 0.0 }
 0x482   : > { %v4298_v28 = vrot.slane %v4005_v61, 4  ;;  %5039 = vmatmul.mubr.bf16.gmra.mrb[120].mxu1 %v4557_v19  ;;  %5261 = vmatmul.mubr.bf16.gmra.mrb[72].mxu0 %v4557_v19  ;;  %v4521_v20 = vmax.f32 %v11626_v22, 0.0  ;;  %v4528_v59 = vmax.f32 %v10227_v30, 0.0  ;;  %v4531_v18 = vmax.f32 %v10241_v50, 0.0 }
 0x483   : > { %v4561_v52 = vpack.c.bf16 %v4525_v53, %v4522_v37  ;;  %v4495_v1 = vmul.f32 %v7821_v29, %v10284_v43  ;;  %v4404_v49 = vadd.f32 1e-05, %v4356_v51  ;;  %v4306_v17 = vadd.f32 %v4305_v35, %v4304_v14 }
 0x484   : > { %v4299_v25 = vadd.f32 %v4298_v28, %v4005_v61  ;;  %v4355_v41 = vmul.f32 0.125, %v4291_v16  ;;  %v4560_v26 = vpack.c.bf16 %v4524_v33, %v4521_v20  ;;  %v4564_v24 = vpack.c.bf16 %v4531_v18, %v4528_v59 }
 0x485   : > { %5048 = vmatprep.mubr.bf16.mxu1 %v4561_v52  ;;  %5268 = vmatprep.mubr.bf16.mxu0 %v4561_v52  ;;  %v4527_v34 = vmax.f32 %v10216_v54, 0.0  ;;  %7824 = vrsqrt.f32 %v4404_v49  ;;  %v4307_v9 = vrot.slane %v4306_v17, 2  ;;  %v4530_v50 = vmax.f32 %v10234_v3, 0.0 }
 0x486   : > { %v4300_v30 = vrot.slane %v4299_v25, 2  ;;  %v4534_v32 = vmax.f32 %v10261_v39, 0.0  ;;  %v4537_v43 = vmax.f32 %v10312_v5, 0.0  ;;  %v4533_v60 = vmax.f32 %v10252_v56, 0.0 }
 0x487   : > { %v4536_v38 = vmax.f32 %v10281_v27, 0.0  ;;  %v4308_v6 = vadd.f32 %v4307_v9, %v4306_v17  ;;  %v4563_v40 = vpack.c.bf16 %v4530_v50, %v4527_v34  ;;  %v4403_v54 = vadd.f32 1e-05, %v4355_v41 }
 0x488   : > { %v4301_v63 = vadd.f32 %v4300_v30, %v4299_v25  ;;  %v7823_v42 = vpop.eup %7822  ;;  %v4567_v47 = vpack.c.bf16 %v4537_v43, %v4534_v32  ;;  %v4978_v3 = vsel %vm4976_vm3, %v7607_v45, 0  ;;  %v4540_v56 = vmax.f32 %v10354_v62, 0.0  ;;  %v11631_v45 = vld [vmem:[#allocation38_spill] sm:$0xff] }
 0x489   : > { %v4566_v10 = vpack.c.bf16 %v4536_v38, %v4533_v60  ;;  %v4309_v39 = vrot.slane %v4308_v6, 1  ;;  %5104 = vmatpush1.bf16.msra.mxu1 %v4978_v3  ;;  %v4543_v27 = vmax.f32 %v4495_v1, 0.0  ;;  %v4402_v29 = vadd.f32 1e-05, %v4354_v15 }
 0x48a   : > { %v4302_v5 = vrot.slane %v4301_v63, 1  ;;  %5049 = vmatmul.mubr.bf16.gmra.mrb[124].mxu1 %v4560_v26  ;;  %5269 = vmatmul.mubr.bf16.gmra.mrb[76].mxu0 %v4560_v26  ;;  %v4539_v11 = vmax.f32 %v10342_v4, 0.0  ;;  %v4542_v19 = vmax.f32 %v10360_v13, 0.0  ;;  %v4984_v0 = vsel %vm4976_vm3, %v7609_v44, 0 }
 0x48b   : > { %v4310_v61 = vadd.f32 %v4309_v39, %v4308_v6  ;;  %5058 = vmatprep.mubr.bf16.mxu1 %v4564_v24  ;;  %5276 = vmatprep.mubr.bf16.mxu0 %v4564_v24  ;;  %v4570_v14 = vpack.c.bf16 %v4543_v27, %v4540_v56  ;;  %7826 = vrsqrt.f32 %v4403_v54  ;;  %v4497_v15 = vmul.f32 %v7823_v42, %v10301_v12 }
 0x48c   : > { %v4303_v16 = vadd.f32 %v4302_v5, %v4301_v63  ;;  %v4569_v31 = vpack.c.bf16 %v4542_v19, %v4539_v11  ;;  %7200 = vmatpush3.bf16.msra.mxu0 %v4984_v0  ;;  %7828 = vrsqrt.f32 %v4402_v29 }
 0x48d   : > { %v4358_v37 = vmul.f32 0.125, %v4310_v61  ;;  %v4545_v51 = vmax.f32 %v4497_v15, 0.0 }
 0x48e   : > { %v4357_v62 = vmul.f32 0.125, %v4303_v16 }
 0x48f   : > { %v7825_v2 = vpop.eup %7824  ;;  %v4406_v53 = vadd.f32 1e-05, %v4358_v37 }
 0x490   : > { %v4405_v4 = vadd.f32 1e-05, %v4357_v62  ;;  %v4500_v13 = vmul.f32 %v7825_v2, %v10332_v55 }
 0x491   : > { %7830 = vrsqrt.f32 %v4406_v53 }
 0x492   : > { %7832 = vrsqrt.f32 %v4405_v4  ;;  %5059 = vmatmul.mubr.bf16.gmra.mrb[128].mxu1 %v4563_v40  ;;  %5277 = vmatmul.mubr.bf16.gmra.mrb[80].mxu0 %v4563_v40  ;;  %v4548_v35 = vmax.f32 %v4500_v13, 0.0 }
 0x493   : > { %5068 = vmatprep.mubr.bf16.mxu1 %v4567_v47  ;;  %5284 = vmatprep.mubr.bf16.mxu0 %v4567_v47 }
 0x494   : > { %v4572_v28 = vpack.c.bf16 %v4548_v35, %v4545_v51 }
 0x495   : > { %v7827_v46 = vpop.eup %7826 }
 0x496   : > { %v7829_v33 = vpop.eup %7828  ;;  %v4499_v52 = vmul.f32 %v7827_v46, %v10326_v58  ;;  %v11628_v58 = vmov 0  }
 0x497   : > { %v4498_v22 = vmul.f32 %v7829_v33, %v10315_v21  ;;  %v11627_v21 = vld [vmem:[#allocation21_spill] sm:$0xff] }
 0x498   : > { %v4547_v18 = vmax.f32 %v4499_v52, 0.0 }
 0x499   : > { %v4546_v1 = vmax.f32 %v4498_v22, 0.0 }
 0x49a   : > { %5069 = vmatmul.mubr.bf16.gmra.mrb[132].mxu1 %v4566_v10  ;;  %5285 = vmatmul.mubr.bf16.gmra.mrb[84].mxu0 %v4566_v10 }
 0x49b   : > { %v7831_v12 = vpop.eup %7830  ;;  %5078 = vmatprep.mubr.bf16.mxu1 %v4570_v14  ;;  %5292 = vmatprep.mubr.bf16.mxu0 %v4570_v14 }
 0x49c   : > { %v7833_v55 = vpop.eup %7832  ;;  %v4502_v20 = vmul.f32 %v7831_v12, %v10350_v57  ;;  %v11629_v57 = vld [vmem:[#allocation26_spill] sm:$0xff] }
 0x49d   : > { %v4501_v59 = vmul.f32 %v7833_v55, %v10357_v8  ;;  %v11630_v8 = vld [vmem:[#allocation41_spill] sm:$0xff] }
 0x49e   : > { %v4550_v36 = vmax.f32 %v4502_v20, 0.0 }
 0x49f   : > { %v4549_v49 = vmax.f32 %v4501_v59, 0.0 }
 0x4a0   : > { %v4574_v17 = vpack.c.bf16 %v4550_v36, %v4547_v18 }
 0x4a1   : > { %v4573_v25 = vpack.c.bf16 %v4549_v49, %v4546_v1 }
 0x4a2   : > { %5079 = vmatmul.mubr.bf16.gmra.mrb[136].mxu1 %v4569_v31  ;;  %5293 = vmatmul.mubr.bf16.gmra.mrb[88].mxu0 %v4569_v31 }
 0x4a3   : > { %5088 = vmatprep.mubr.bf16.mxu1 %v4573_v25  ;;  %5300 = vmatprep.mubr.bf16.mxu0 %v4573_v25 }
 0x4aa   : > { %5089 = vmatmul.mubr.bf16.gmra.mrb[140].mxu1 %v4572_v28  ;;  %5301 = vmatmul.mubr.bf16.gmra.mrb[92].mxu0 %v4572_v28 }
 0x4ab   : > { %7201 = vmatprep.mubr.msk.bf16.mxu0 %vm3570_vm2, %v11627_v21  ;;  %5131 = vmatprep.mubr.bf16.mxu1 %v11628_v58 }
 0x4b2   : > { %7006 = vmatmul.mubr.msk.bf16.vlgmr.msra.gmra.mrb[112].mxu1 %vm3570_vm2, %v11627_v21  ;;  %7202 = vmatmul.mubr.msk.bf16.vlgmr.msra.gmra.mrb[96].mxu0 %vm3570_vm2, %v11629_v57 }
 0x4b3   : > { %7205 = vmatprep.mubr.msk.bf16.mxu0 %vm3570_vm2, %v11630_v8  ;;  %5141 = vmatprep.mubr.bf16.mxu1 %v11628_v58 }
 0x4ba   : > { %7007 = vmatmul.mubr.msk.bf16.gmra.mrb[116].mxu1 %vm3570_vm2, %v11629_v57  ;;  %7206 = vmatmul.mubr.msk.bf16.gmra.mrb[100].mxu0 %vm3570_vm2, %v11631_v45 }
 0x4bb   : > { %7209 = vmatprep.mubr.msk.bf16.mxu0 %vm3570_vm2, %v10209_v7  ;;  %5151 = vmatprep.mubr.bf16.mxu1 %v11628_v58 }
 0x4c2   : > { %7008 = vmatmul.mubr.msk.bf16.gmra.mrb[120].mxu1 %vm3570_vm2, %v11630_v8  ;;  %7210 = vmatmul.mubr.msk.bf16.gmra.mrb[104].mxu0 %vm3570_vm2, %v10294_v48 }
 0x4c3   : > { %7213 = vmatprep.mubr.msk.bf16.mxu0 %vm3570_vm2, %v10364_v23  ;;  %5161 = vmatprep.mubr.bf16.mxu1 %v11628_v58 }
 0x4ca   : > { %7009 = vmatmul.mubr.msk.bf16.gmra.mrb[124].mxu1 %vm3570_vm2, %v11631_v45  ;;  %7214 = vmatmul.mubr.msk.bf16.gmra.mrb[108].mxu0 %vm3570_vm2, %v4574_v17 }
 0x4cb   : > { %5171 = vmatprep.mubr.bf16.mxu1 %v11628_v58 }
 0x4d2   : > { %7010 = vmatmul.mubr.msk.bf16.gmra.mrb[128].mxu1 %vm3570_vm2, %v10209_v7 }
 0x4d3   : > { %5181 = vmatprep.mubr.bf16.mxu1 %v11628_v58 }
 0x4da   : > { %7011 = vmatmul.mubr.msk.bf16.gmra.mrb[132].mxu1 %vm3570_vm2, %v10294_v48 }
 0x4db   : > { %5191 = vmatprep.mubr.bf16.mxu1 %v11628_v58 }
 0x4e2   : > { %7012 = vmatmul.mubr.msk.bf16.gmra.mrb[136].mxu1 %vm3570_vm2, %v10364_v23 }
 0x4e3   : > { %5201 = vmatprep.mubr.bf16.mxu1 %v11628_v58 }
 0x4ea   : > { %7013 = vmatmul.mubr.msk.bf16.gmra.mrb[140].mxu1 %vm3570_vm2, %v4574_v17 }
 0x52b   : > { %v7116_v41 = vpop.f32.mrb[64].mxu0 }
 0x52c   : > { %v7117_v26 = vpop.f32.mrb[65].mxu0 }
 0x52d   : > { %v7118_v24 = vadd.f32 %v7117_v26, %v7116_v41  ;;  %v7119_v34 = vpop.f32.mrb[66].mxu0 }
 0x52e   : > { %v7120_v44 = vpop.f32.mrb[67].mxu0 }
 0x52f   : > { %v10433_v7 = vadd.f32 %v7120_v44, %v7119_v34 }
 0x54d   : > { %v7122_v9 = vpop.f32.mrb[68].mxu0 }
 0x54e   : > { %v7123_v30 = vpop.f32.mrb[69].mxu0 }
 0x54f   : > { %v7124_v50 = vadd.f32 %v7123_v30, %v7122_v9  ;;  %v7125_v48 = vpop.f32.mrb[70].mxu0 }
 0x550   : > { %v7126_v32 = vpop.f32.mrb[71].mxu0 }
 0x551   : > { %v7127_v43 = vadd.f32 %v7126_v32, %v7125_v48 }
 0x555   : > { %v7128_v60 = vpop.f32.mrb[72].mxu0 }
 0x556   : > { %v7129_v38 = vpop.f32.mrb[73].mxu0 }
 0x557   : > { %v10435_v23 = vadd.f32 %v7129_v38, %v7128_v60  ;;  %v7131_v6 = vpop.f32.mrb[74].mxu0 }
 0x558   : > { %v7132_v63 = vpop.f32.mrb[75].mxu0 }
 0x559   : > { %v10437_v40 = vadd.f32 %v7132_v63, %v7131_v6 }
 0x55d   : > { %v7134_v42 = vpop.f32.mrb[76].mxu0 }
 0x55e   : > { %v7135_v54 = vpop.f32.mrb[77].mxu0 }
 0x55f   : > { %v10439_v47 = vadd.f32 %v7135_v54, %v7134_v42  ;;  %v7137_v10 = vpop.f32.mrb[78].mxu0 }
 0x560   : > { %v7138_v3 = vpop.f32.mrb[79].mxu0 }
 0x561   : > { %v10441_v39 = vadd.f32 %v7138_v3, %v7137_v10 }
 0x565   : > { %v7140_v5 = vpop.f32.mrb[80].mxu0 }
 0x566   : > { %v7141_v56 = vpop.f32.mrb[81].mxu0 }
 0x567   : > { %v10443_v27 = vadd.f32 %v7141_v56, %v7140_v5  ;;  %v7143_v29 = vpop.f32.mrb[82].mxu0 }
 0x568   : > { %v7144_v11 = vpop.f32.mrb[83].mxu0 }
 0x569   : > { %v10445_v19 = vadd.f32 %v7144_v11, %v7143_v29 }
 0x56d   : > { %v7146_v0 = vpop.f32.mrb[84].mxu0 }
 0x56e   : > { %v7147_v61 = vpop.f32.mrb[85].mxu0 }
 0x56f   : > { %v10447_v16 = vadd.f32 %v7147_v61, %v7146_v0  ;;  %v7149_v14 = vpop.f32.mrb[86].mxu0 }
 0x570   : > { %v7150_v31 = vpop.f32.mrb[87].mxu0 }
 0x571   : > { %v10449_v37 = vadd.f32 %v7150_v31, %v7149_v14 }
 0x575   : > { %v7152_v62 = vpop.f32.mrb[88].mxu0 }
 0x576   : > { %v7153_v15 = vpop.f32.mrb[89].mxu0 }
 0x577   : > { %v10451_v2 = vadd.f32 %v7153_v15, %v7152_v62  ;;  %v7155_v53 = vpop.f32.mrb[90].mxu0 }
 0x578   : > { %v7156_v4 = vpop.f32.mrb[91].mxu0 }
 0x579   : > { %11632 = vst [vmem:[#allocation19_spill] sm:$0xff] %v10451_v2  ;;  %v10453_v13 = vadd.f32 %v7156_v4, %v7155_v53 }
 0x57b   : > { %11633 = vst [vmem:[#allocation28_spill] sm:$0xff] %v10453_v13 }
 0x57d   : > { %v7158_v51 = vpop.f32.mrb[92].mxu0 }
 0x57e   : > { %v7159_v35 = vpop.f32.mrb[93].mxu0 }
 0x57f   : > { %v10455_v28 = vadd.f32 %v7159_v35, %v7158_v51  ;;  %v7161_v46 = vpop.f32.mrb[94].mxu0 }
 0x580   : > { %v7162_v33 = vpop.f32.mrb[95].mxu0 }
 0x581   : > { %v10457_v52 = vadd.f32 %v7162_v33, %v7161_v46 }
 0x583   : > { %11634 = vst [vmem:[#allocation25_spill] sm:$0xff] %v10457_v52 }
 0x585   : > { %v10459_v12 = vpop.f32.mrb[112].mxu1  ;;  %v7203_v22 = vpop.f32.mrb[96].mxu0 }
 0x586   : > { %v5406_v55 = vrot.slane %v10459_v12, 4  ;;  %v10462_v20 = vadd.f32 %v7203_v22, %v7124_v50  ;;  %v10464_v59 = vpop.f32.mrb[113].mxu1  ;;  %v5343_v18 = vpop.f32.mrb[97].mxu0 }
 0x587   : > { %v5412_v36 = vrot.slane %v10464_v59, 4  ;;  %v10467_v1 = vadd.f32 %v7118_v24, %v5343_v18  ;;  %v10469_v49 = vpop.f32.mrb[114].mxu1  ;;  %v7204_v17 = vpop.f32.mrb[98].mxu0 }
 0x588   : > { %v5407_v25 = vadd.f32 %v5406_v55, %v10459_v12  ;;  %v5456_v21 = vsel %vm3570_vm2, %v10462_v20, 0.0  ;;  %v5425_v58 = vrot.slane %v10469_v49, 4  ;;  %v10475_v57 = vadd.f32 %v7204_v17, %v7127_v43  ;;  %v10477_v8 = vpop.f32.mrb[115].mxu1  ;;  %v5346_v45 = vpop.f32.mrb[99].mxu0 }
 0x589   : > { %v5457_v41 = vrot.slane %v5456_v21, 4  ;;  %v5413_v26 = vadd.f32 %v5412_v36, %v10464_v59  ;;  %v5418_v24 = vsel %vm3570_vm2, %v10467_v1, 0.0  ;;  %v5431_v34 = vrot.slane %v10477_v8, 4 }
 0x58a   : > { %v5408_v44 = vrot.slane %v5407_v25, 2  ;;  %v5419_v9 = vrot.slane %v5418_v24, 4  ;;  %v5426_v30 = vadd.f32 %v5425_v58, %v10469_v49  ;;  %v5475_v50 = vsel %vm3570_vm2, %v10475_v57, 0.0 }
 0x58b   : > { %v5458_v48 = vadd.f32 %v5457_v41, %v5456_v21  ;;  %v5414_v32 = vrot.slane %v5413_v26, 2  ;;  %v5476_v43 = vrot.slane %v5475_v50, 4  ;;  %v5432_v60 = vadd.f32 %v5431_v34, %v10477_v8 }
 0x58c   : > { %v5409_v38 = vadd.f32 %v5408_v44, %v5407_v25  ;;  %v5420_v6 = vadd.f32 %v5419_v9, %v5418_v24  ;;  %v5427_v63 = vrot.slane %v5426_v30, 2  ;;  %v10488_v42 = vadd.f32 %v10433_v7, %v5346_v45 }
 0x58d   : > { %v5459_v54 = vrot.slane %v5458_v48, 2  ;;  %v5415_v10 = vadd.f32 %v5414_v32, %v5413_v26  ;;  %v5477_v3 = vadd.f32 %v5476_v43, %v5475_v50  ;;  %v5433_v5 = vrot.slane %v5432_v60, 2  ;;  %v10490_v56 = vpop.f32.mrb[116].mxu1  ;;  %v10492_v29 = vpop.f32.mrb[100].mxu0 }
 0x58e   : > { %v5410_v11 = vrot.slane %v5409_v38, 1  ;;  %v5421_v0 = vrot.slane %v5420_v6, 2  ;;  %v5428_v61 = vadd.f32 %v5427_v63, %v5426_v30  ;;  %v5437_v14 = vsel %vm3570_vm2, %v10488_v42, 0.0  ;;  %v10496_v31 = vpop.f32.mrb[117].mxu1  ;;  %v10498_v62 = vpop.f32.mrb[101].mxu0 }
 0x58f   : > { %v5460_v7 = vadd.f32 %v5459_v54, %v5458_v48  ;;  %v5416_v15 = vrot.slane %v5415_v10, 1  ;;  %v5478_v53 = vrot.slane %v5477_v3, 2  ;;  %v5434_v4 = vadd.f32 %v5433_v5, %v5432_v60  ;;  %v10500_v51 = vpop.f32.mrb[118].mxu1  ;;  %v10502_v35 = vpop.f32.mrb[102].mxu0 }
 0x590   : > { %v5411_v46 = vadd.f32 %v5410_v11, %v5409_v38  ;;  %v5422_v33 = vadd.f32 %v5421_v0, %v5420_v6  ;;  %v5429_v22 = vrot.slane %v5428_v61, 1  ;;  %v5438_v55 = vrot.slane %v5437_v14, 4  ;;  %v10504_v18 = vpop.f32.mrb[119].mxu1  ;;  %v10506_v36 = vpop.f32.mrb[103].mxu0 }
 0x591   : > { %v5461_v17 = vrot.slane %v5460_v7, 1  ;;  %v5417_v25 = vadd.f32 %v5416_v15, %v5415_v10  ;;  %v5479_v21 = vadd.f32 %v5478_v53, %v5477_v3  ;;  %v5435_v58 = vrot.slane %v5434_v4, 1 }
 0x592   : > { %v5710_v45 = vmul.f32 0.125, %v5411_v46  ;;  %v5423_v41 = vrot.slane %v5422_v33, 1  ;;  %v5430_v26 = vadd.f32 %v5429_v22, %v5428_v61  ;;  %v5439_v24 = vadd.f32 %v5438_v55, %v5437_v14 }
 0x593   : > { %v5462_v34 = vadd.f32 %v5461_v17, %v5460_v7  ;;  %v5711_v44 = vmul.f32 0.125, %v5417_v25  ;;  %v5480_v9 = vrot.slane %v5479_v21, 1  ;;  %v5436_v30 = vadd.f32 %v5435_v58, %v5434_v4 }
 0x594   : > { %v10509_v50 = vsub.f32 %v10459_v12, %v5710_v45  ;;  %v5424_v48 = vadd.f32 %v5423_v41, %v5422_v33  ;;  %v5713_v32 = vmul.f32 0.125, %v5430_v26  ;;  %v5440_v43 = vrot.slane %v5439_v24, 2 }
 0x595   : > { %v5718_v60 = vmul.f32 0.125, %v5462_v34  ;;  %v10512_v38 = vsub.f32 %v10464_v59, %v5711_v44  ;;  %v5481_v6 = vadd.f32 %v5480_v9, %v5479_v21  ;;  %v5714_v63 = vmul.f32 0.125, %v5436_v30  ;;  %v10514_v54 = vpop.f32.mrb[120].mxu1  ;;  %v10516_v10 = vpop.f32.mrb[104].mxu0 }
 0x596   : > { %v5806_v3 = vmul.f32 %v10509_v50, %v10509_v50  ;;  %v5712_v5 = vmul.f32 0.125, %v5424_v48  ;;  %v10521_v12 = vsub.f32 %v10469_v49, %v5713_v32  ;;  %v5441_v11 = vadd.f32 %v5440_v43, %v5439_v24  ;;  %v10523_v0 = vpop.f32.mrb[121].mxu1  ;;  %v10525_v61 = vpop.f32.mrb[105].mxu0 }
 0x597   : > { %v10528_v59 = vsub.f32 %v10462_v20, %v5718_v60  ;;  %v5807_v14 = vmul.f32 %v10512_v38, %v10512_v38  ;;  %v5721_v7 = vmul.f32 0.125, %v5481_v6  ;;  %v10533_v15 = vsub.f32 %v10477_v8, %v5714_v63  ;;  %v10535_v53 = vpop.f32.mrb[122].mxu1  ;;  %v10537_v4 = vpop.f32.mrb[106].mxu0 }
 0x598   : > { %v5854_v49 = vrot.slane %v5806_v3, 4  ;;  %v10540_v46 = vsub.f32 %v10467_v1, %v5712_v5  ;;  %v5809_v33 = vmul.f32 %v10521_v12, %v10521_v12  ;;  %v5442_v20 = vrot.slane %v5441_v11, 1  ;;  %v10544_v22 = vpop.f32.mrb[123].mxu1  ;;  %v10546_v55 = vpop.f32.mrb[107].mxu0 }
 0x599   : > { %v5814_v8 = vmul.f32 %v10528_v59, %v10528_v59  ;;  %v5860_v17 = vrot.slane %v5807_v14, 4  ;;  %v10551_v25 = vsub.f32 %v10475_v57, %v5721_v7  ;;  %v5810_v21 = vmul.f32 %v10533_v15, %v10533_v15 }
 0x59a   : > { %v5855_v1 = vadd.f32 %v5854_v49, %v5806_v3  ;;  %v5808_v58 = vmul.f32 %v10540_v46, %v10540_v46  ;;  %v5873_v45 = vrot.slane %v5809_v33, 4  ;;  %v5443_v41 = vadd.f32 %v5442_v20, %v5441_v11 }
 0x59b   : > { %v5904_v26 = vsel %vm3570_vm2, %v5814_v8, 0.0  ;;  %v5861_v24 = vadd.f32 %v5860_v17, %v5807_v14  ;;  %v5817_v34 = vmul.f32 %v10551_v25, %v10551_v25  ;;  %v5879_v44 = vrot.slane %v5810_v21, 4 }
 0x59c   : > { %v5856_v9 = vrot.slane %v5855_v1, 2  ;;  %v5905_v30 = vrot.slane %v5904_v26, 4  ;;  %v5866_v57 = vsel %vm3570_vm2, %v5808_v58, 0.0  ;;  %v5874_v48 = vadd.f32 %v5873_v45, %v5809_v33 }
 0x59d   : > { %v5862_v32 = vrot.slane %v5861_v24, 2  ;;  %v5867_v43 = vrot.slane %v5866_v57, 4  ;;  %v5923_v60 = vsel %vm3570_vm2, %v5817_v34, 0.0  ;;  %v5880_v6 = vadd.f32 %v5879_v44, %v5810_v21  ;;  %v10562_v63 = vpop.f32.mrb[124].mxu1  ;;  %v10564_v3 = vpop.f32.mrb[108].mxu0 }
 0x59e   : > { %v5857_v5 = vadd.f32 %v5856_v9, %v5855_v1  ;;  %v5906_v11 = vadd.f32 %v5905_v30, %v5904_v26  ;;  %v5875_v14 = vrot.slane %v5874_v48, 2  ;;  %v5924_v7 = vrot.slane %v5923_v60, 4  ;;  %v10566_v49 = vpop.f32.mrb[125].mxu1  ;;  %v10568_v20 = vpop.f32.mrb[109].mxu0 }
 0x59f   : > { %11635 = vst [vmem:[#allocation31_spill] sm:$0xff] %v10566_v49  ;;  %11636 = vst [vmem:[#allocation33_spill] sm:$0xff] %v10568_v20  ;;  %v5863_v8 = vadd.f32 %v5862_v32, %v5861_v24  ;;  %v5868_v17 = vadd.f32 %v5867_v43, %v5866_v57  ;;  %v5881_v33 = vrot.slane %v5880_v6, 2  ;;  %v5715_v58 = vmul.f32 0.125, %v5443_v41  ;;  %v10570_v45 = vpop.f32.mrb[126].mxu1  ;;  %v10572_v34 = vpop.f32.mrb[110].mxu0 }
 0x5a0   : > { %11637 = vst [vmem:[#allocation14_spill] sm:$0xff] %v10570_v45  ;;  %11638 = vst [vmem:[#allocation27_spill] sm:$0xff] %v10572_v34  ;;  %v5858_v21 = vrot.slane %v5857_v5, 1  ;;  %v5907_v44 = vrot.slane %v5906_v11, 2  ;;  %v5876_v13 = vadd.f32 %v5875_v14, %v5874_v48  ;;  %v5925_v52 = vadd.f32 %v5924_v7, %v5923_v60  ;;  %v10574_v1 = vpop.f32.mrb[127].mxu1  ;;  %v10576_v26 = vpop.f32.mrb[111].mxu0 }
 0x5a1   : > { %11639 = vst [vmem:[#allocation34_spill] sm:$0xff] %v10574_v1  ;;  %11640 = vst [vmem:[#allocation18_spill] sm:$0xff] %v10576_v26  ;;  %v5864_v9 = vrot.slane %v5863_v8, 1  ;;  %v5869_v30 = vrot.slane %v5868_v17, 2  ;;  %v5882_v2 = vadd.f32 %v5881_v33, %v5880_v6  ;;  %v10579_v24 = vsub.f32 %v10488_v42, %v5715_v58 }
 0x5a2   : > { %v5859_v57 = vadd.f32 %v5858_v21, %v5857_v5  ;;  %v5908_v41 = vadd.f32 %v5907_v44, %v5906_v11  ;;  %v5877_v32 = vrot.slane %v5876_v13, 1  ;;  %v5926_v43 = vrot.slane %v5925_v52, 2 }
 0x5a3   : > { %v5865_v45 = vadd.f32 %v5864_v9, %v5863_v8  ;;  %v5870_v34 = vadd.f32 %v5869_v30, %v5868_v17  ;;  %v5883_v20 = vrot.slane %v5882_v2, 1  ;;  %v5811_v48 = vmul.f32 %v10579_v24, %v10579_v24 }
 0x5a4   : > { %v6158_v60 = vmul.f32 0.125, %v5859_v57  ;;  %v5909_v14 = vrot.slane %v5908_v41, 1  ;;  %v5878_v7 = vadd.f32 %v5877_v32, %v5876_v13  ;;  %v5927_v26 = vadd.f32 %v5926_v43, %v5925_v52 }
 0x5a5   : > { %v6159_v1 = vmul.f32 0.125, %v5865_v45  ;;  %v5871_v49 = vrot.slane %v5870_v34, 1  ;;  %v5884_v6 = vadd.f32 %v5883_v20, %v5882_v2  ;;  %v5885_v42 = vsel %vm3570_vm2, %v5811_v48, 0.0  ;;  %v10584_v33 = vpop.f32.mrb[128].mxu1 }
 0x5a6   : > { %v6206_v5 = vadd.f32 1e-05, %v6158_v60  ;;  %v5910_v11 = vadd.f32 %v5909_v14, %v5908_v41  ;;  %v6161_v58 = vmul.f32 0.125, %v5878_v7  ;;  %v5928_v8 = vrot.slane %v5927_v26, 1  ;;  %v10586_v17 = vpop.f32.mrb[129].mxu1 }
 0x5a7   : > { %v6207_v21 = vadd.f32 1e-05, %v6159_v1  ;;  %v5872_v44 = vadd.f32 %v5871_v49, %v5870_v34  ;;  %v6162_v9 = vmul.f32 0.125, %v5884_v6  ;;  %v5886_v30 = vrot.slane %v5885_v42, 4  ;;  %v10588_v57 = vpop.f32.mrb[130].mxu1 }
 0x5a8   : > { %7834 = vrsqrt.f32 %v6206_v5  ;;  %v6166_v13 = vmul.f32 0.125, %v5910_v11  ;;  %v6209_v52 = vadd.f32 1e-05, %v6161_v58  ;;  %v5929_v2 = vadd.f32 %v5928_v8, %v5927_v26  ;;  %v10591_v60 = vpop.f32.mrb[131].mxu1 }
 0x5a9   : > { %7836 = vrsqrt.f32 %v6207_v21  ;;  %v6160_v20 = vmul.f32 0.125, %v5872_v44  ;;  %v6210_v45 = vadd.f32 1e-05, %v6162_v9  ;;  %v5887_v32 = vadd.f32 %v5886_v30, %v5885_v42 }
 0x5aa   : > { %v6214_v43 = vadd.f32 1e-05, %v6166_v13  ;;  %7838 = vrsqrt.f32 %v6209_v52  ;;  %v6169_v41 = vmul.f32 0.125, %v5929_v2  ;;  %v5444_v48 = vrot.slane %v10490_v56, 4  ;;  %v11641_v52 = vld [vmem:[#allocation13_spill] sm:$0xff] }
 0x5ab   : > { %v6208_v49 = vadd.f32 1e-05, %v6160_v20  ;;  %7840 = vrsqrt.f32 %v6210_v45  ;;  %v5888_v34 = vrot.slane %v5887_v32, 2  ;;  %v10595_v1 = vadd.f32 %v10492_v29, %v10439_v47  ;;  %v6398_v47 = vld [vmem:[%s11415_s7] sm:$0x7] }
 0x5ac   : > { %7842 = vrsqrt.f32 %v6214_v43  ;;  %v6217_v26 = vadd.f32 1e-05, %v6169_v41  ;;  %v5445_v14 = vadd.f32 %v5444_v48, %v10490_v56  ;;  %v5450_v7 = vrot.slane %v10496_v31, 4 }
 0x5ad   : > { %7844 = vrsqrt.f32 %v6208_v49  ;;  %v5889_v6 = vadd.f32 %v5888_v34, %v5887_v32  ;;  %v5532_v42 = vsel %vm3570_vm2, %v10595_v1, 0.0  ;;  %v10603_v5 = vadd.f32 %v10435_v23, %v10498_v62 }
 0x5ae   : > { %7846 = vrsqrt.f32 %v6217_v26  ;;  %v5446_v29 = vrot.slane %v5445_v14, 2  ;;  %v5533_v11 = vrot.slane %v5532_v42, 4  ;;  %v5451_v58 = vadd.f32 %v5450_v7, %v10496_v31 }
 0x5af   : > { %v5890_v8 = vrot.slane %v5889_v6, 1  ;;  %v5494_v21 = vsel %vm3570_vm2, %v10603_v5, 0.0  ;;  %v5463_v44 = vrot.slane %v10500_v51, 4  ;;  %v10614_v9 = vadd.f32 %v10502_v35, %v10441_v39 }
 0x5b0   : > { %v5447_v23 = vadd.f32 %v5446_v29, %v5445_v14  ;;  %v5534_v62 = vadd.f32 %v5533_v11, %v5532_v42  ;;  %v5452_v30 = vrot.slane %v5451_v58, 2  ;;  %v5495_v13 = vrot.slane %v5494_v21, 4 }
 0x5b1   : > { %v11642_v2 = vsub.s32 0, %v11641_v52  ;;  %v5891_v45 = vadd.f32 %v5890_v8, %v5889_v6  ;;  %v5464_v32 = vadd.f32 %v5463_v44, %v10500_v51  ;;  %v5551_v43 = vsel %vm3570_vm2, %v10614_v9, 0.0 }
 0x5b2   : > { %v7835_v41 = vpop.eup %7834  ;;  %v5448_v48 = vrot.slane %v5447_v23, 1  ;;  %v5535_v49 = vrot.slane %v5534_v62, 2  ;;  %v5453_v34 = vadd.f32 %v5452_v30, %v5451_v58  ;;  %v5496_v39 = vadd.f32 %v5495_v13, %v5494_v21 }
 0x5b3   : > { %v10618_v20 = vrot.slane %v6398_v47, %v11642_v2  ;;  %v7837_v35 = vpop.eup %7836  ;;  %v10624_v26 = vmul.f32 %v7835_v41, %v10509_v50  ;;  %v6163_v14 = vmul.f32 0.125, %v5891_v45  ;;  %v5465_v7 = vrot.slane %v5464_v32, 2  ;;  %v10633_v50 = vpop.f32.mrb[132].mxu1 }
 0x5b4   : > { %v5469_v42 = vrot.slane %v10504_v18, 4  ;;  %v7839_v47 = vpop.eup %7838  ;;  %v10628_v6 = vmul.f32 %v7837_v35, %v10512_v38  ;;  %v5449_v29 = vadd.f32 %v5448_v48, %v5447_v23  ;;  %v5536_v11 = vadd.f32 %v5535_v49, %v5534_v62  ;;  %v10639_v23 = vpop.f32.mrb[133].mxu1 }
 0x5b5   : > { %11643 = vst [vmem:[#allocation16_spill] sm:$0xff] %v10618_v20  ;;  %v5454_v8 = vrot.slane %v5453_v34, 1  ;;  %v7841_v44 = vpop.eup %7840  ;;  %v10631_v2 = vmul.f32 %v7839_v47, %v10521_v12  ;;  %v6211_v58 = vadd.f32 1e-05, %v6163_v14  ;;  %v5497_v21 = vrot.slane %v5496_v39, 2 }
 0x5b6   : > { %v5552_v30 = vrot.slane %v5551_v43, 4  ;;  %v7843_v13 = vpop.eup %7842  ;;  %v10637_v41 = vmul.f32 %v7841_v44, %v10533_v15  ;;  %v5716_v38 = vmul.f32 0.125, %v5449_v29  ;;  %v5537_v35 = vrot.slane %v5536_v11, 1 }
 0x5b7   : > { %11644 = vst [vmem:[#allocation20_spill] sm:$0xff] %v10631_v2  ;;  %v7845_v62 = vpop.eup %7844  ;;  %v10642_v48 = vmul.f32 %v7843_v13, %v10528_v59  ;;  %7848 = vrsqrt.f32 %v6211_v58  ;;  %v5455_v49 = vadd.f32 %v5454_v8, %v5453_v34  ;;  %v5498_v13 = vadd.f32 %v5497_v21, %v5496_v39 }
 0x5b8   : > { %11645 = vst [vmem:[#allocation30_spill] sm:$0xff] %v10637_v41  ;;  %v7847_v14 = vpop.eup %7846  ;;  %v10646_v47 = vmul.f32 %v7845_v62, %v10540_v46  ;;  %v10650_v15 = vsub.f32 %v10490_v56, %v5716_v38  ;;  %v5538_v29 = vadd.f32 %v5537_v35, %v5536_v11  ;;  %v5466_v8 = vadd.f32 %v5465_v7, %v5464_v32  ;;  %v10663_v35 = vpop.f32.mrb[134].mxu1 }
 0x5b9   : > { %11646 = vst [vmem:[#allocation23_spill] sm:$0xff] %v10642_v48  ;;  %v5717_v59 = vmul.f32 0.125, %v5455_v49  ;;  %v10655_v12 = vmul.f32 %v7847_v14, %v10551_v25  ;;  %v5499_v11 = vrot.slane %v5498_v13, 1  ;;  %v5553_v38 = vadd.f32 %v5552_v30, %v5551_v43  ;;  %v10679_v45 = vpop.f32.mrb[135].mxu1 }
 0x5ba   : > { %11647 = vst [vmem:[#allocation15_spill] sm:$0xff] %v10646_v47  ;;  %v5812_v34 = vmul.f32 %v10650_v15, %v10650_v15  ;;  %v5730_v46 = vmul.f32 0.125, %v5538_v29  ;;  %v5467_v25 = vrot.slane %v5466_v8, 1  ;;  %v5470_v21 = vadd.f32 %v5469_v42, %v10504_v18 }
 0x5bb   : > { %11648 = vst [vmem:[#allocation37_spill] sm:$0xff] %v10655_v12  ;;  %v10661_v56 = vsub.f32 %v10496_v31, %v5717_v59  ;;  %v5500_v32 = vadd.f32 %v5499_v11, %v5498_v13  ;;  %v5554_v7 = vrot.slane %v5553_v38, 2  ;;  %v10673_v31 = vadd.f32 %v10437_v40, %v10506_v36 }
 0x5bc   : > { %v5892_v62 = vrot.slane %v5812_v34, 4  ;;  %v10666_v39 = vsub.f32 %v10595_v1, %v5730_v46  ;;  %v5468_v30 = vadd.f32 %v5467_v25, %v5466_v8  ;;  %v5471_v29 = vrot.slane %v5470_v21, 2 }
 0x5bd   : > { %v5813_v49 = vmul.f32 %v10661_v56, %v10661_v56  ;;  %v5724_v46 = vmul.f32 0.125, %v5500_v32  ;;  %v5555_v42 = vadd.f32 %v5554_v7, %v5553_v38  ;;  %v5513_v38 = vsel %vm3570_vm2, %v10673_v31, 0.0 }
 0x5be   : > { %v5893_v14 = vadd.f32 %v5892_v62, %v5812_v34  ;;  %v5826_v43 = vmul.f32 %v10666_v39, %v10666_v39  ;;  %v5719_v13 = vmul.f32 0.125, %v5468_v30  ;;  %v5472_v11 = vadd.f32 %v5471_v29, %v5470_v21 }
 0x5bf   : > { %v5898_v59 = vrot.slane %v5813_v49, 4  ;;  %v10682_v62 = vsub.f32 %v10603_v5, %v5724_v46  ;;  %v5556_v8 = vrot.slane %v5555_v42, 1  ;;  %v5482_v2 = vrot.slane %v10514_v54, 4 }
 0x5c0   : > { %v5894_v44 = vrot.slane %v5893_v14, 2  ;;  %v5980_v20 = vsel %vm3570_vm2, %v5826_v43, 0.0  ;;  %v10685_v1 = vsub.f32 %v10500_v51, %v5719_v13  ;;  %v5473_v32 = vrot.slane %v5472_v11, 1 }
 0x5c1   : > { %v7849_v40 = vpop.eup %7848  ;;  %v5981_v36 = vrot.slane %v5980_v20, 4  ;;  %v5899_v34 = vadd.f32 %v5898_v59, %v5813_v49  ;;  %v5820_v21 = vmul.f32 %v10682_v62, %v10682_v62  ;;  %v5557_v30 = vadd.f32 %v5556_v8, %v5555_v42 }
 0x5c2   : > { %v5895_v25 = vadd.f32 %v5894_v44, %v5893_v14  ;;  %v10692_v49 = vmul.f32 %v7849_v40, %v10579_v24  ;;  %v5815_v44 = vmul.f32 %v10685_v1, %v10685_v1  ;;  %v5474_v14 = vadd.f32 %v5473_v32, %v5472_v11 }
 0x5c3   : > { %v5982_v7 = vadd.f32 %v5981_v36, %v5980_v20  ;;  %v5900_v43 = vrot.slane %v5899_v34, 2  ;;  %v5942_v59 = vsel %vm3570_vm2, %v5820_v21, 0.0  ;;  %v5733_v46 = vmul.f32 0.125, %v5557_v30 }
 0x5c4   : > { %v5896_v5 = vrot.slane %v5895_v25, 1  ;;  %v5943_v20 = vrot.slane %v5942_v59, 4  ;;  %v5911_v36 = vrot.slane %v5815_v44, 4  ;;  %v5720_v58 = vmul.f32 0.125, %v5474_v14 }
 0x5c5   : > { %v5983_v51 = vrot.slane %v5982_v7, 2  ;;  %v5901_v29 = vadd.f32 %v5900_v43, %v5899_v34  ;;  %v10698_v42 = vsub.f32 %v10614_v9, %v5733_v46  ;;  %v5514_v24 = vrot.slane %v5513_v38, 4 }
 0x5c6   : > { %v5897_v13 = vadd.f32 %v5896_v5, %v5895_v25  ;;  %v5944_v8 = vadd.f32 %v5943_v20, %v5942_v59  ;;  %v5912_v41 = vadd.f32 %v5911_v36, %v5815_v44  ;;  %v10701_v11 = vsub.f32 %v10504_v18, %v5720_v58  ;;  %v10707_v5 = vpop.f32.mrb[136].mxu1 }
 0x5c7   : > { %v5984_v12 = vadd.f32 %v5983_v51, %v5982_v7  ;;  %v5902_v48 = vrot.slane %v5901_v29, 1  ;;  %v5829_v25 = vmul.f32 %v10698_v42, %v10698_v42  ;;  %v5515_v43 = vadd.f32 %v5514_v24, %v5513_v38  ;;  %v10710_v58 = vpop.f32.mrb[137].mxu1 }
 0x5c8   : > { %v6164_v40 = vmul.f32 0.125, %v5897_v13  ;;  %v5945_v30 = vrot.slane %v5944_v8, 2  ;;  %v5913_v7 = vrot.slane %v5912_v41, 2  ;;  %v5816_v9 = vmul.f32 %v10701_v11, %v10701_v11 }
 0x5c9   : > { %v5985_v34 = vrot.slane %v5984_v12, 1  ;;  %v5903_v32 = vadd.f32 %v5902_v48, %v5901_v29  ;;  %v5999_v44 = vsel %vm3570_vm2, %v5829_v25, 0.0  ;;  %v5516_v18 = vrot.slane %v5515_v43, 2  ;;  %v10713_v25 = vpop.f32.mrb[138].mxu1 }
 0x5ca   : > { %v6212_v21 = vadd.f32 1e-05, %v6164_v40  ;;  %v5946_v48 = vadd.f32 %v5945_v30, %v5944_v8  ;;  %v5914_v29 = vadd.f32 %v5913_v7, %v5912_v41  ;;  %v6000_v59 = vrot.slane %v5999_v44, 4 }
 0x5cb   : > { %v5986_v14 = vadd.f32 %v5985_v34, %v5984_v12  ;;  %v6165_v51 = vmul.f32 0.125, %v5903_v32  ;;  %v5917_v13 = vrot.slane %v5816_v9, 4  ;;  %v5517_v20 = vadd.f32 %v5516_v18, %v5515_v43 }
 0x5cc   : > { %7850 = vrsqrt.f32 %v6212_v21  ;;  %v5947_v36 = vrot.slane %v5946_v48, 1  ;;  %v5915_v24 = vrot.slane %v5914_v29, 1  ;;  %v6001_v40 = vadd.f32 %v6000_v59, %v5999_v44 }
 0x5cd   : > { %v6178_v38 = vmul.f32 0.125, %v5986_v14  ;;  %v6213_v46 = vadd.f32 1e-05, %v6165_v51  ;;  %v5918_v34 = vadd.f32 %v5917_v13, %v5816_v9  ;;  %v5518_v32 = vrot.slane %v5517_v20, 1 }
 0x5ce   : > { %v5948_v47 = vadd.f32 %v5947_v36, %v5946_v48  ;;  %v5916_v21 = vadd.f32 %v5915_v24, %v5914_v29  ;;  %v6002_v8 = vrot.slane %v6001_v40, 2  ;;  %v5483_v41 = vadd.f32 %v5482_v2, %v10514_v54 }
 0x5cf   : > { %v6226_v12 = vadd.f32 1e-05, %v6178_v38  ;;  %7852 = vrsqrt.f32 %v6213_v46  ;;  %v5919_v30 = vrot.slane %v5918_v34, 2  ;;  %v5519_v7 = vadd.f32 %v5518_v32, %v5517_v20  ;;  %v10723_v38 = vpop.f32.mrb[139].mxu1 }
 0x5d0   : > { %v10718_v43 = vadd.f32 %v10516_v10, %v10447_v16  ;;  %v6172_v14 = vmul.f32 0.125, %v5948_v47  ;;  %v6167_v51 = vmul.f32 0.125, %v5916_v21  ;;  %v6003_v44 = vadd.f32 %v6002_v8, %v6001_v40 }
 0x5d1   : > { %7854 = vrsqrt.f32 %v6226_v12  ;;  %v5484_v18 = vrot.slane %v5483_v41, 2  ;;  %v5920_v9 = vadd.f32 %v5919_v30, %v5918_v34  ;;  %v5727_v59 = vmul.f32 0.125, %v5519_v7 }
 0x5d2   : > { %v5608_v48 = vsel %vm3570_vm2, %v10718_v43, 0.0  ;;  %v5488_v29 = vrot.slane %v10523_v0, 4  ;;  %v6220_v2 = vadd.f32 1e-05, %v6172_v14  ;;  %v6215_v46 = vadd.f32 1e-05, %v6167_v51 }
 0x5d3   : > { %v6004_v13 = vrot.slane %v6003_v44, 1  ;;  %v5485_v20 = vadd.f32 %v5484_v18, %v5483_v41  ;;  %v5921_v36 = vrot.slane %v5920_v9, 1  ;;  %v10726_v16 = vsub.f32 %v10673_v31, %v5727_v59 }
 0x5d4   : > { %v5609_v10 = vrot.slane %v5608_v48, 4  ;;  %v5489_v47 = vadd.f32 %v5488_v29, %v10523_v0  ;;  %7856 = vrsqrt.f32 %v6220_v2  ;;  %v10731_v34 = vadd.f32 %v10443_v27, %v10525_v61 }
 0x5d5   : > { %v6005_v40 = vadd.f32 %v6004_v13, %v6003_v44  ;;  %v5486_v12 = vrot.slane %v5485_v20, 1  ;;  %7858 = vrsqrt.f32 %v6215_v46  ;;  %v5922_v21 = vadd.f32 %v5921_v36, %v5920_v9 }
 0x5d6   : > { %v7851_v24 = vpop.eup %7850  ;;  %v5823_v31 = vmul.f32 %v10726_v16, %v10726_v16  ;;  %v5610_v30 = vadd.f32 %v5609_v10, %v5608_v48  ;;  %v5490_v7 = vrot.slane %v5489_v47, 2  ;;  %v5570_v27 = vsel %vm3570_vm2, %v10731_v34, 0.0 }
 0x5d7   : > { %v10734_v32 = vmul.f32 %v7851_v24, %v10650_v15  ;;  %v6181_v8 = vmul.f32 0.125, %v6005_v40  ;;  %v5487_v41 = vadd.f32 %v5486_v12, %v5485_v20  ;;  %v6168_v44 = vmul.f32 0.125, %v5922_v21  ;;  %v10752_v12 = vpop.f32.mrb[140].mxu1 }
 0x5d8   : > { %v5961_v18 = vsel %vm3570_vm2, %v5823_v31, 0.0  ;;  %v5611_v46 = vrot.slane %v5610_v30, 2  ;;  %v5491_v48 = vadd.f32 %v5490_v7, %v5489_v47  ;;  %v5571_v13 = vrot.slane %v5570_v27, 4 }
 0x5d9   : > { %11649 = vst [vmem:[#allocation22_spill] sm:$0xff] %v10734_v32  ;;  %v7853_v14 = vpop.eup %7852  ;;  %v6229_v15 = vadd.f32 1e-05, %v6181_v8  ;;  %v5962_v9 = vrot.slane %v5961_v18, 4  ;;  %v5722_v59 = vmul.f32 0.125, %v5487_v41  ;;  %v5501_v8 = vrot.slane %v10535_v53, 4 }
 0x5da   : > { %v10743_v61 = vmul.f32 %v7853_v14, %v10661_v56  ;;  %v6216_v2 = vadd.f32 1e-05, %v6168_v44  ;;  %v5612_v56 = vadd.f32 %v5611_v46, %v5610_v30  ;;  %v5492_v40 = vrot.slane %v5491_v48, 1  ;;  %v10756_v41 = vpop.f32.mrb[141].mxu1 }
 0x5db   : > { %v7855_v29 = vpop.eup %7854  ;;  %7860 = vrsqrt.f32 %v6229_v15  ;;  %v5963_v10 = vadd.f32 %v5962_v9, %v5961_v18  ;;  %v10750_v24 = vsub.f32 %v10514_v54, %v5722_v59  ;;  %v5572_v47 = vadd.f32 %v5571_v13, %v5570_v27 }
 0x5dc   : > { %11650 = vst [vmem:[#allocation17_spill] sm:$0xff] %v10743_v61  ;;  %v10747_v36 = vmul.f32 %v7855_v29, %v10666_v39  ;;  %7862 = vrsqrt.f32 %v6216_v2  ;;  %v5613_v7 = vrot.slane %v5612_v56, 1  ;;  %v5493_v14 = vadd.f32 %v5492_v40, %v5491_v48 }
 0x5dd   : > { %v5964_v31 = vrot.slane %v5963_v10, 2  ;;  %v5818_v39 = vmul.f32 %v10750_v24, %v10750_v24  ;;  %v10762_v54 = vadd.f32 %v10537_v4, %v10449_v37  ;;  %v5573_v15 = vrot.slane %v5572_v47, 2 }
 0x5de   : > { %11651 = vst [vmem:[#allocation39_spill] sm:$0xff] %v10747_v36  ;;  %v7857_v30 = vpop.eup %7856  ;;  %v5502_v27 = vadd.f32 %v5501_v8, %v10535_v53  ;;  %v5614_v2 = vadd.f32 %v5613_v7, %v5612_v56  ;;  %v5723_v46 = vmul.f32 0.125, %v5493_v14  ;;  %v5507_v37 = vrot.slane %v10544_v22, 4  ;;  %v10777_v56 = vpop.f32.mrb[142].mxu1 }
 0x5df   : > { %v5965_v18 = vadd.f32 %v5964_v31, %v5963_v10  ;;  %v7859_v9 = vpop.eup %7858  ;;  %v10767_v59 = vmul.f32 %v7857_v30, %v10682_v62  ;;  %v5930_v29 = vrot.slane %v5818_v39, 4  ;;  %v5574_v48 = vadd.f32 %v5573_v15, %v5572_v47 }
 0x5e0   : > { %v5503_v40 = vrot.slane %v5502_v27, 2  ;;  %v10771_v4 = vmul.f32 %v7859_v9, %v10685_v1  ;;  %v5742_v10 = vmul.f32 0.125, %v5614_v2  ;;  %v10774_v31 = vsub.f32 %v10523_v0, %v5723_v46 }
 0x5e1   : > { %11652 = vst [vmem:[#allocation40_spill] sm:$0xff] %v10767_v59  ;;  %v5966_v13 = vrot.slane %v5965_v18, 1  ;;  %v5931_v44 = vadd.f32 %v5930_v29, %v5818_v39  ;;  %v5575_v30 = vrot.slane %v5574_v48, 1  ;;  %v5627_v39 = vsel %vm3570_vm2, %v10762_v54, 0.0 }
 0x5e2   : > { %11653 = vst [vmem:[#allocation24_spill] sm:$0xff] %v10771_v4  ;;  %v5504_v21 = vadd.f32 %v5503_v40, %v5502_v27  ;;  %v10780_v47 = vsub.f32 %v10718_v43, %v5742_v10  ;;  %v5819_v1 = vmul.f32 %v10774_v31, %v10774_v31  ;;  %v5628_v29 = vrot.slane %v5627_v39, 4 }
 0x5e3   : > { %v5967_v62 = vadd.f32 %v5966_v13, %v5965_v18  ;;  %v5932_v7 = vrot.slane %v5931_v44, 2  ;;  %v5576_v15 = vadd.f32 %v5575_v30, %v5574_v48  ;;  %v10786_v18 = vpop.f32.mrb[143].mxu1 }
 0x5e4   : > { %v5505_v9 = vrot.slane %v5504_v21, 1  ;;  %v5838_v43 = vmul.f32 %v10780_v47, %v10780_v47  ;;  %v5936_v13 = vrot.slane %v5819_v1, 4 }
 0x5e5   : > { %v7861_v14 = vpop.eup %7860  ;;  %v6175_v0 = vmul.f32 0.125, %v5967_v62  ;;  %v5933_v46 = vadd.f32 %v5932_v7, %v5931_v44  ;;  %v5736_v8 = vmul.f32 0.125, %v5576_v15 }
 0x5e6   : > { %v7863_v27 = vpop.eup %7862  ;;  %v10789_v2 = vmul.f32 %v7861_v14, %v10698_v42  ;;  %v5506_v20 = vadd.f32 %v5505_v9, %v5504_v21  ;;  %v6056_v30 = vsel %vm3570_vm2, %v5838_v43, 0.0  ;;  %v5937_v51 = vadd.f32 %v5936_v13, %v5819_v1 }
 0x5e7   : > { %v6223_v10 = vadd.f32 1e-05, %v6175_v0  ;;  %v10795_v48 = vmul.f32 %v7863_v27, %v10701_v11  ;;  %v5934_v62 = vrot.slane %v5933_v46, 1  ;;  %v6057_v44 = vrot.slane %v6056_v30, 4 }
 0x5e8   : > { %11654 = vst [vmem:[#allocation32_spill] sm:$0xff] %v10789_v2  ;;  %v10800_v7 = vsub.f32 %v10731_v34, %v5736_v8  ;;  %v5938_v36 = vrot.slane %v5937_v51, 2  ;;  %v5725_v40 = vmul.f32 0.125, %v5506_v20  ;;  %v5629_v0 = vadd.f32 %v5628_v29, %v5627_v39 }
 0x5e9   : > { %7864 = vrsqrt.f32 %v6223_v10  ;;  %v5935_v14 = vadd.f32 %v5934_v62, %v5933_v46  ;;  %v6058_v15 = vadd.f32 %v6057_v44, %v6056_v30  ;;  %v5508_v21 = vadd.f32 %v5507_v37, %v10544_v22 }
 0x5ea   : > { %v5832_v11 = vmul.f32 %v10800_v7, %v10800_v7  ;;  %v10807_v1 = vadd.f32 %v10445_v19, %v10546_v55  ;;  %v5939_v27 = vadd.f32 %v5938_v36, %v5937_v51  ;;  %v10810_v43 = vsub.f32 %v10535_v53, %v5725_v40 }
 0x5eb   : > { %v6170_v9 = vmul.f32 0.125, %v5935_v14  ;;  %v5630_v34 = vrot.slane %v5629_v0, 2  ;;  %v6059_v8 = vrot.slane %v6058_v15, 2  ;;  %v5509_v39 = vrot.slane %v5508_v21, 2 }
 0x5ec   : > { %v6018_v20 = vsel %vm3570_vm2, %v5832_v11, 0.0  ;;  %v5589_v29 = vsel %vm3570_vm2, %v10807_v1, 0.0  ;;  %v5940_v13 = vrot.slane %v5939_v27, 1  ;;  %v5821_v19 = vmul.f32 %v10810_v43, %v10810_v43 }
 0x5ed   : > { %v6218_v46 = vadd.f32 1e-05, %v6170_v9  ;;  %v6019_v37 = vrot.slane %v6018_v20, 4  ;;  %v6060_v55 = vadd.f32 %v6059_v8, %v6058_v15  ;;  %v5631_v10 = vadd.f32 %v5630_v34, %v5629_v0 }
 0x5ee   : > { %v5510_v51 = vadd.f32 %v5509_v39, %v5508_v21  ;;  %v5590_v36 = vrot.slane %v5589_v29, 4  ;;  %v5941_v53 = vadd.f32 %v5940_v13, %v5939_v27  ;;  %v5949_v62 = vrot.slane %v5821_v19, 4 }
 0x5ef   : > { %7866 = vrsqrt.f32 %v6218_v46  ;;  %v6020_v40 = vadd.f32 %v6019_v37, %v6018_v20  ;;  %v6061_v30 = vrot.slane %v6060_v55, 1  ;;  %v5632_v44 = vrot.slane %v5631_v10, 1 }
 0x5f0   : > { %v5511_v14 = vrot.slane %v5510_v51, 1  ;;  %v5591_v11 = vadd.f32 %v5590_v36, %v5589_v29  ;;  %v6171_v9 = vmul.f32 0.125, %v5941_v53  ;;  %v5950_v59 = vadd.f32 %v5949_v62, %v5821_v19 }
 0x5f1   : > { %v6021_v2 = vrot.slane %v6020_v40, 2  ;;  %v6062_v61 = vadd.f32 %v6061_v30, %v6060_v55  ;;  %v5633_v32 = vadd.f32 %v5632_v44, %v5631_v10  ;;  %v5520_v27 = vrot.slane %v10562_v63, 4 }
 0x5f2   : > { %v5512_v15 = vadd.f32 %v5511_v14, %v5510_v51  ;;  %v5592_v0 = vrot.slane %v5591_v11, 2  ;;  %v6219_v21 = vadd.f32 1e-05, %v6171_v9  ;;  %v5951_v8 = vrot.slane %v5950_v59, 2 }
 0x5f3   : > { %v7865_v4 = vpop.eup %7864  ;;  %v6022_v34 = vadd.f32 %v6021_v2, %v6020_v40  ;;  %v6190_v20 = vmul.f32 0.125, %v6062_v61  ;;  %v5745_v39 = vmul.f32 0.125, %v5633_v32  ;;  %v5521_v32 = vadd.f32 %v5520_v27, %v10562_v63 }
 0x5f4   : > { %v5726_v46 = vmul.f32 0.125, %v5512_v15  ;;  %v5593_v13 = vadd.f32 %v5592_v0, %v5591_v11  ;;  %v10820_v29 = vmul.f32 %v7865_v4, %v10726_v16  ;;  %7868 = vrsqrt.f32 %v6219_v21 }
 0x5f5   : > { %v6023_v37 = vrot.slane %v6022_v34, 1  ;;  %v5952_v19 = vadd.f32 %v5951_v8, %v5950_v59  ;;  %v6238_v36 = vadd.f32 1e-05, %v6190_v20  ;;  %v10823_v55 = vsub.f32 %v10762_v54, %v5745_v39 }
 0x5f6   : > { %11655 = vst [vmem:[#allocation35_spill] sm:$0xff] %v10820_v29  ;;  %v10826_v10 = vsub.f32 %v10544_v22, %v5726_v46  ;;  %v5594_v2 = vrot.slane %v5593_v13, 1  ;;  %v10831_v61 = vadd.f32 %v10564_v3, %v10455_v28  ;;  %v5522_v62 = vrot.slane %v5521_v32, 2 }
 0x5f7   : > { %v6024_v51 = vadd.f32 %v6023_v37, %v6022_v34  ;;  %v5953_v53 = vrot.slane %v5952_v19, 1  ;;  %7870 = vrsqrt.f32 %v6238_v36  ;;  %v5841_v16 = vmul.f32 %v10823_v55, %v10823_v55  ;;  %v11656_v36 = vld [vmem:[#allocation31_spill] sm:$0xff] }
 0x5f8   : > { %v5822_v54 = vmul.f32 %v10826_v10, %v10826_v10  ;;  %v5595_v59 = vadd.f32 %v5594_v2, %v5593_v13  ;;  %v5684_v30 = vsel %vm3570_vm2, %v10831_v61, 0.0  ;;  %v5523_v0 = vadd.f32 %v5522_v62, %v5521_v32  ;;  %v11657_v32 = vld [vmem:[#allocation33_spill] sm:$0xff] }
 0x5f9   : > { %v7867_v4 = vpop.eup %7866  ;;  %v6184_v22 = vmul.f32 0.125, %v6024_v51  ;;  %v5954_v40 = vadd.f32 %v5953_v53, %v5952_v19  ;;  %v6075_v28 = vsel %vm3570_vm2, %v5841_v16, 0.0  ;;  %v5685_v27 = vrot.slane %v5684_v30, 4  ;;  %v11658_v16 = vld [vmem:[#allocation19_spill] sm:$0xff] }
 0x5fa   : > { %v5955_v3 = vrot.slane %v5822_v54, 4  ;;  %v5739_v14 = vmul.f32 0.125, %v5595_v59  ;;  %v6076_v15 = vrot.slane %v6075_v28, 4  ;;  %v10842_v21 = vmul.f32 %v7867_v4, %v10750_v24 }
 0x5fb   : > { %v6232_v11 = vadd.f32 1e-05, %v6184_v22  ;;  %v6173_v9 = vmul.f32 0.125, %v5954_v40  ;;  %v5524_v46 = vrot.slane %v5523_v0, 1  ;;  %v5686_v19 = vadd.f32 %v5685_v27, %v5684_v30 }
 0x5fc   : > { %v5956_v34 = vadd.f32 %v5955_v3, %v5822_v54  ;;  %v10845_v8 = vsub.f32 %v10807_v1, %v5739_v14  ;;  %v6077_v39 = vadd.f32 %v6076_v15, %v6075_v28  ;;  %v5526_v2 = vrot.slane %v11656_v36, 4 }
 0x5fd   : > { %7872 = vrsqrt.f32 %v6232_v11  ;;  %v6221_v20 = vadd.f32 1e-05, %v6173_v9  ;;  %v5525_v53 = vadd.f32 %v5524_v46, %v5523_v0  ;;  %v10852_v1 = vadd.f32 %v11658_v16, %v11657_v32 }
 0x5fe   : > { %v5957_v13 = vrot.slane %v5956_v34, 2  ;;  %v5835_v37 = vmul.f32 %v10845_v8, %v10845_v8  ;;  %v7869_v51 = vpop.eup %7868  ;;  %v6078_v24 = vrot.slane %v6077_v39, 2  ;;  %v5687_v22 = vrot.slane %v5686_v19, 2 }
 0x5ff   : > { %7874 = vrsqrt.f32 %v6221_v20  ;;  %v10855_v54 = vmul.f32 %v7869_v51, %v10774_v31  ;;  %v5728_v30 = vmul.f32 0.125, %v5525_v53  ;;  %v5527_v28 = vadd.f32 %v5526_v2, %v11656_v36 }
 0x600   : > { %v5958_v59 = vadd.f32 %v5957_v13, %v5956_v34  ;;  %v6037_v4 = vsel %vm3570_vm2, %v5835_v37, 0.0  ;;  %v6079_v40 = vadd.f32 %v6078_v24, %v6077_v39  ;;  %v5688_v9 = vadd.f32 %v5687_v22, %v5686_v19 }
 0x601   : > { %v6038_v62 = vrot.slane %v6037_v4, 4  ;;  %v7871_v3 = vpop.eup %7870  ;;  %v5646_v15 = vsel %vm3570_vm2, %v10852_v1, 0.0  ;;  %v10864_v27 = vsub.f32 %v10562_v63, %v5728_v30  ;;  %v5528_v46 = vrot.slane %v5527_v28, 2 }
 0x602   : > { %v5959_v11 = vrot.slane %v5958_v59, 1  ;;  %v6080_v0 = vrot.slane %v6079_v40, 1  ;;  %v5689_v39 = vrot.slane %v5688_v9, 1  ;;  %v5647_v13 = vrot.slane %v5646_v15, 4 }
 0x603   : > { %v6039_v34 = vadd.f32 %v6038_v62, %v6037_v4  ;;  %v10867_v37 = vmul.f32 %v7871_v3, %v10780_v47  ;;  %v5824_v19 = vmul.f32 %v10864_v27, %v10864_v27  ;;  %v5529_v32 = vadd.f32 %v5528_v46, %v5527_v28 }
 0x604   : > { %v5960_v20 = vadd.f32 %v5959_v11, %v5958_v59  ;;  %v6081_v2 = vadd.f32 %v6080_v0, %v6079_v40  ;;  %v5690_v53 = vadd.f32 %v5689_v39, %v5688_v9  ;;  %v5648_v16 = vadd.f32 %v5647_v13, %v5646_v15  ;;  %v11660_v59 = vld [vmem:[#allocation14_spill] sm:$0xff] }
 0x605   : > { %11659 = vst [vmem:[#allocation36_spill] sm:$0xff] %v10867_v37  ;;  %v6040_v51 = vrot.slane %v6039_v34, 2  ;;  %v5968_v62 = vrot.slane %v5824_v19, 4  ;;  %v5539_v30 = vrot.slane %v11660_v59, 4  ;;  %v5530_v40 = vrot.slane %v5529_v32, 1 }
 0x606   : > { %v6174_v24 = vmul.f32 0.125, %v5960_v20  ;;  %v6193_v22 = vmul.f32 0.125, %v6081_v2  ;;  %v5754_v3 = vmul.f32 0.125, %v5690_v53  ;;  %v5649_v20 = vrot.slane %v5648_v16, 2 }
 0x607   : > { %v7873_v4 = vpop.eup %7872  ;;  %v6041_v63 = vadd.f32 %v6040_v51, %v6039_v34  ;;  %v5969_v14 = vadd.f32 %v5968_v62, %v5824_v19  ;;  %v5531_v39 = vadd.f32 %v5530_v40, %v5529_v32  ;;  %v5540_v51 = vadd.f32 %v5539_v30, %v11660_v59 }
 0x608   : > { %v10873_v11 = vmul.f32 %v7873_v4, %v10800_v7  ;;  %v6222_v47 = vadd.f32 1e-05, %v6174_v24  ;;  %v6241_v44 = vadd.f32 1e-05, %v6193_v22  ;;  %v10878_v15 = vsub.f32 %v10831_v61, %v5754_v3  ;;  %v11662_v4 = vld [vmem:[#allocation25_spill] sm:$0xff]  ;;  %v11663_v22 = vld [vmem:[#allocation27_spill] sm:$0xff] }
 0x609   : > { %v7875_v0 = vpop.eup %7874  ;;  %v6042_v31 = vrot.slane %v6041_v63, 1  ;;  %v5970_v7 = vrot.slane %v5969_v14, 2  ;;  %v5650_v2 = vadd.f32 %v5649_v20, %v5648_v16  ;;  %v5729_v53 = vmul.f32 0.125, %v5531_v39 }
 0x60a   : > { %11661 = vst [vmem:[#allocation29_spill] sm:$0xff] %v10873_v11  ;;  %7876 = vrsqrt.f32 %v6222_v47  ;;  %v10881_v46 = vmul.f32 %v7875_v0, %v10810_v43  ;;  %v5850_v13 = vmul.f32 %v10878_v15, %v10878_v15  ;;  %v10888_v61 = vadd.f32 %v11663_v22, %v11662_v4 }
 0x60b   : > { %7878 = vrsqrt.f32 %v6241_v44  ;;  %v6043_v34 = vadd.f32 %v6042_v31, %v6041_v63  ;;  %v5971_v24 = vadd.f32 %v5970_v7, %v5969_v14  ;;  %v5651_v31 = vrot.slane %v5650_v2, 1  ;;  %v11664_v63 = vld [vmem:[#allocation34_spill] sm:$0xff] }
 0x60c   : > { %v6132_v44 = vsel %vm3570_vm2, %v5850_v13, 0.0  ;;  %v5541_v32 = vrot.slane %v5540_v51, 2  ;;  %v5545_v43 = vrot.slane %v11664_v63, 4  ;;  %v10893_v16 = vsub.f32 %v11656_v36, %v5729_v53 }
 0x60d   : > { %v6187_v19 = vmul.f32 0.125, %v6043_v34  ;;  %v5972_v47 = vrot.slane %v5971_v24, 1  ;;  %v6133_v3 = vrot.slane %v6132_v44, 4  ;;  %v5652_v30 = vadd.f32 %v5651_v31, %v5650_v2  ;;  %v11665_v2 = vld [vmem:[#allocation18_spill] sm:$0xff] }
 0x60e   : > { %v5542_v40 = vadd.f32 %v5541_v32, %v5540_v51  ;;  %v5703_v14 = vsel %vm3570_vm2, %v10888_v61, 0.0  ;;  %v5546_v0 = vadd.f32 %v5545_v43, %v11664_v63  ;;  %v5825_v7 = vmul.f32 %v10893_v16, %v10893_v16  ;;  %v11666_v51 = vld [vmem:[#allocation28_spill] sm:$0xff] }
 0x60f   : > { %v6235_v62 = vadd.f32 1e-05, %v6187_v19  ;;  %v5973_v20 = vadd.f32 %v5972_v47, %v5971_v24  ;;  %v6134_v34 = vadd.f32 %v6133_v3, %v6132_v44  ;;  %v5748_v39 = vmul.f32 0.125, %v5652_v30 }
 0x610   : > { %v5543_v13 = vrot.slane %v5542_v40, 1  ;;  %v5704_v19 = vrot.slane %v5703_v14, 4  ;;  %v5547_v4 = vrot.slane %v5546_v0, 2  ;;  %v5974_v53 = vrot.slane %v5825_v7, 4 }
 0x611   : > { %7880 = vrsqrt.f32 %v6235_v62  ;;  %v6176_v22 = vmul.f32 0.125, %v5973_v20  ;;  %v6135_v36 = vrot.slane %v6134_v34, 2  ;;  %v10902_v31 = vadd.f32 %v11666_v51, %v11665_v2 }
 0x612   : > { %v10905_v43 = vsub.f32 %v10852_v1, %v5748_v39  ;;  %v5544_v24 = vadd.f32 %v5543_v13, %v5542_v40  ;;  %v5705_v44 = vadd.f32 %v5704_v19, %v5703_v14  ;;  %v5548_v62 = vadd.f32 %v5547_v4, %v5546_v0 }
 0x613   : > { %v6224_v30 = vadd.f32 1e-05, %v6176_v22  ;;  %v6136_v28 = vadd.f32 %v6135_v36, %v6134_v34  ;;  %v5975_v20 = vadd.f32 %v5974_v53, %v5825_v7  ;;  %v5665_v36 = vsel %vm3570_vm2, %v10902_v31, 0.0 }
 0x614   : > { %v7877_v32 = vpop.eup %7876  ;;  %v5844_v2 = vmul.f32 %v10905_v43, %v10905_v43  ;;  %v5731_v51 = vmul.f32 0.125, %v5544_v24  ;;  %v5706_v42 = vrot.slane %v5705_v44, 2  ;;  %v5549_v4 = vrot.slane %v5548_v62, 1 }
 0x615   : > { %v7879_v47 = vpop.eup %7878  ;;  %v10908_v3 = vmul.f32 %v7877_v32, %v10826_v10  ;;  %7882 = vrsqrt.f32 %v6224_v30  ;;  %v6137_v40 = vrot.slane %v6136_v28, 1  ;;  %v5976_v14 = vrot.slane %v5975_v20, 2 }
 0x616   : > { %v10914_v1 = vmul.f32 %v7879_v47, %v10823_v55  ;;  %v6094_v10 = vsel %vm3570_vm2, %v5844_v2, 0.0  ;;  %v10919_v34 = vsub.f32 %v11660_v59, %v5731_v51  ;;  %v5707_v7 = vadd.f32 %v5706_v42, %v5705_v44 }
 0x617   : > { %v6138_v39 = vadd.f32 %v6137_v40, %v6136_v28  ;;  %v5977_v13 = vadd.f32 %v5976_v14, %v5975_v20  ;;  %v6095_v19 = vrot.slane %v6094_v10, 4  ;;  %v5558_v53 = vrot.slane %v10584_v33, 4 }
 0x618   : > { %v5827_v22 = vmul.f32 %v10919_v34, %v10919_v34  ;;  %v5708_v55 = vrot.slane %v5707_v7, 1  ;;  %v5550_v59 = vadd.f32 %v5549_v4, %v5548_v62  ;;  %v5666_v20 = vrot.slane %v5665_v36, 4 }
 0x619   : > { %v6202_v24 = vmul.f32 0.125, %v6138_v39  ;;  %v5978_v47 = vrot.slane %v5977_v13, 1  ;;  %v6096_v30 = vadd.f32 %v6095_v19, %v6094_v10 }
 0x61a   : > { %v5987_v28 = vrot.slane %v5827_v22, 4  ;;  %v5709_v44 = vadd.f32 %v5708_v55, %v5707_v7  ;;  %v5732_v14 = vmul.f32 0.125, %v5550_v59  ;;  %v5667_v11 = vadd.f32 %v5666_v20, %v5665_v36 }
 0x61b   : > { %v7881_v32 = vpop.eup %7880  ;;  %v6250_v2 = vadd.f32 1e-05, %v6202_v24  ;;  %v5979_v51 = vadd.f32 %v5978_v47, %v5977_v13  ;;  %v6097_v40 = vrot.slane %v6096_v30, 2  ;;  %v5559_v13 = vadd.f32 %v5558_v53, %v10584_v33 }
 0x61c   : > { %v10927_v42 = vmul.f32 %v7881_v32, %v10845_v8  ;;  %v5988_v9 = vadd.f32 %v5987_v28, %v5827_v22  ;;  %v5757_v37 = vmul.f32 0.125, %v5709_v44  ;;  %v10931_v62 = vsub.f32 %v11664_v63, %v5732_v14 }
 0x61d   : > { %7884 = vrsqrt.f32 %v6250_v2  ;;  %v6177_v39 = vmul.f32 0.125, %v5979_v51  ;;  %v6098_v29 = vadd.f32 %v6097_v40, %v6096_v30  ;;  %v5668_v7 = vrot.slane %v5667_v11, 2 }
 0x61e   : > { %v5989_v8 = vrot.slane %v5988_v9, 2  ;;  %v10934_v10 = vsub.f32 %v10888_v61, %v5757_v37  ;;  %v5828_v36 = vmul.f32 %v10931_v62, %v10931_v62  ;;  %v5564_v47 = vrot.slane %v10586_v17, 4 }
 0x61f   : > { %v7883_v19 = vpop.eup %7882  ;;  %v6225_v55 = vadd.f32 1e-05, %v6177_v39  ;;  %v6099_v22 = vrot.slane %v6098_v29, 1  ;;  %v5669_v24 = vadd.f32 %v5668_v7, %v5667_v11  ;;  %v5560_v30 = vrot.slane %v5559_v13, 2 }
 0x620   : > { %v5990_v32 = vadd.f32 %v5989_v8, %v5988_v9  ;;  %v5853_v63 = vmul.f32 %v10934_v10, %v10934_v10  ;;  %v5993_v61 = vrot.slane %v5828_v36, 4  ;;  %v10944_v53 = vmul.f32 %v7883_v19, %v10864_v27 }
 0x621   : > { %7886 = vrsqrt.f32 %v6225_v55  ;;  %v6100_v37 = vadd.f32 %v6099_v22, %v6098_v29  ;;  %v5670_v44 = vrot.slane %v5669_v24, 1  ;;  %v5561_v51 = vadd.f32 %v5560_v30, %v5559_v13 }
 0x622   : > { %v5991_v59 = vrot.slane %v5990_v32, 1  ;;  %v6151_v28 = vsel %vm3570_vm2, %v5853_v63, 0.0  ;;  %v5994_v9 = vadd.f32 %v5993_v61, %v5828_v36  ;;  %v5565_v11 = vadd.f32 %v5564_v47, %v10586_v17 }
 0x623   : > { %v6196_v20 = vmul.f32 0.125, %v6100_v37  ;;  %v6152_v2 = vrot.slane %v6151_v28, 4  ;;  %v5671_v14 = vadd.f32 %v5670_v44, %v5669_v24  ;;  %v5577_v39 = vrot.slane %v10588_v57, 4 }
 0x624   : > { %v5992_v40 = vadd.f32 %v5991_v59, %v5990_v32  ;;  %v5995_v7 = vrot.slane %v5994_v9, 2  ;;  %v5562_v55 = vrot.slane %v5561_v51, 1  ;;  %v5566_v22 = vrot.slane %v5565_v11, 2 }
 0x625   : > { %v6244_v29 = vadd.f32 1e-05, %v6196_v20  ;;  %v6153_v8 = vadd.f32 %v6152_v2, %v6151_v28  ;;  %v5751_v19 = vmul.f32 0.125, %v5671_v14  ;;  %v5578_v63 = vadd.f32 %v5577_v39, %v10588_v57 }
 0x626   : > { %v6179_v27 = vmul.f32 0.125, %v5992_v40  ;;  %v5996_v36 = vadd.f32 %v5995_v7, %v5994_v9  ;;  %v5563_v13 = vadd.f32 %v5562_v55, %v5561_v51  ;;  %v5567_v61 = vadd.f32 %v5566_v22, %v5565_v11 }
 0x627   : > { %v7885_v0 = vpop.eup %7884  ;;  %7888 = vrsqrt.f32 %v6244_v29  ;;  %v6154_v37 = vrot.slane %v6153_v8, 2  ;;  %v10954_v47 = vsub.f32 %v10902_v31, %v5751_v19  ;;  %v5579_v44 = vrot.slane %v5578_v63, 2 }
 0x628   : > { %v10951_v32 = vmul.f32 %v7885_v0, %v10878_v15  ;;  %v6227_v24 = vadd.f32 1e-05, %v6179_v27  ;;  %v5997_v59 = vrot.slane %v5996_v36, 1  ;;  %v5734_v28 = vmul.f32 0.125, %v5563_v13 }
 0x629   : > { %v6155_v30 = vadd.f32 %v6154_v37, %v6153_v8  ;;  %v6368_v20 = vmax.f32 %v10944_v53, 0.0  ;;  %v5847_v2 = vmul.f32 %v10954_v47, %v10954_v47  ;;  %v5568_v9 = vrot.slane %v5567_v61, 1 }
 0x62a   : > { %7890 = vrsqrt.f32 %v6227_v24  ;;  %v5998_v15 = vadd.f32 %v5997_v59, %v5996_v36  ;;  %v10960_v0 = vsub.f32 %v10584_v33, %v5734_v28  ;;  %v5580_v31 = vadd.f32 %v5579_v44, %v5578_v63 }
 0x62b   : > { %v7887_v51 = vpop.eup %7886  ;;  %v6156_v40 = vrot.slane %v6155_v30, 1  ;;  %v6113_v11 = vsel %vm3570_vm2, %v5847_v2, 0.0  ;;  %v5569_v39 = vadd.f32 %v5568_v9, %v5567_v61  ;;  %v5583_v29 = vrot.slane %v10591_v60, 4 }
 0x62c   : > { %v6180_v7 = vmul.f32 0.125, %v5998_v15  ;;  %v6114_v55 = vrot.slane %v6113_v11, 4  ;;  %v5830_v27 = vmul.f32 %v10960_v0, %v10960_v0  ;;  %v10968_v19 = vmul.f32 %v7887_v51, %v10893_v16 }
 0x62d   : > { %v6157_v8 = vadd.f32 %v6156_v40, %v6155_v30  ;;  %v5735_v22 = vmul.f32 0.125, %v5569_v39  ;;  %v5581_v33 = vrot.slane %v5580_v31, 1  ;;  %v5584_v63 = vadd.f32 %v5583_v29, %v10591_v60 }
 0x62e   : > { %v6228_v36 = vadd.f32 1e-05, %v6180_v7  ;;  %v6115_v13 = vadd.f32 %v6114_v55, %v6113_v11  ;;  %v6006_v24 = vrot.slane %v5830_v27, 4  ;;  %v5596_v28 = vrot.slane %v10633_v50, 4 }
 0x62f   : > { %v6205_v37 = vmul.f32 0.125, %v6157_v8  ;;  %v10972_v61 = vsub.f32 %v10586_v17, %v5735_v22  ;;  %v5582_v30 = vadd.f32 %v5581_v33, %v5580_v31  ;;  %v5585_v59 = vrot.slane %v5584_v63, 2 }
 0x630   : > { %7892 = vrsqrt.f32 %v6228_v36  ;;  %v6116_v16 = vrot.slane %v6115_v13, 2  ;;  %v6007_v9 = vadd.f32 %v6006_v24, %v5830_v27  ;;  %v5597_v31 = vadd.f32 %v5596_v28, %v10633_v50 }
 0x631   : > { %v7889_v44 = vpop.eup %7888  ;;  %v6253_v2 = vadd.f32 1e-05, %v6205_v37  ;;  %v5831_v40 = vmul.f32 %v10972_v61, %v10972_v61  ;;  %v5737_v15 = vmul.f32 0.125, %v5582_v30  ;;  %v5586_v11 = vadd.f32 %v5585_v59, %v5584_v63 }
 0x632   : > { %v10976_v51 = vmul.f32 %v7889_v44, %v10905_v43  ;;  %v6117_v17 = vadd.f32 %v6116_v16, %v6115_v13  ;;  %v6008_v39 = vrot.slane %v6007_v9, 2  ;;  %v5598_v37 = vrot.slane %v5597_v31, 2 }
 0x633   : > { %7894 = vrsqrt.f32 %v6253_v2  ;;  %v6012_v7 = vrot.slane %v5831_v40, 4  ;;  %v10983_v55 = vsub.f32 %v10588_v57, %v5737_v15  ;;  %v5587_v27 = vrot.slane %v5586_v11, 1 }
 0x634   : > { %v7891_v29 = vpop.eup %7890  ;;  %v6118_v22 = vrot.slane %v6117_v17, 1  ;;  %v6009_v33 = vadd.f32 %v6008_v39, %v6007_v9  ;;  %v5602_v24 = vrot.slane %v10639_v23, 4  ;;  %v5599_v57 = vadd.f32 %v5598_v37, %v5597_v31 }
 0x635   : > { %v6013_v36 = vadd.f32 %v6012_v7, %v5831_v40  ;;  %v5833_v63 = vmul.f32 %v10983_v55, %v10983_v55  ;;  %v5588_v13 = vadd.f32 %v5587_v27, %v5586_v11  ;;  %v10990_v30 = vmul.f32 %v7891_v29, %v10919_v34 }
 0x636   : > { %v6119_v59 = vadd.f32 %v6118_v22, %v6117_v17  ;;  %v6010_v28 = vrot.slane %v6009_v33, 1  ;;  %v5603_v15 = vadd.f32 %v5602_v24, %v10639_v23  ;;  %v5600_v40 = vrot.slane %v5599_v57, 1 }
 0x637   : > { %v6014_v44 = vrot.slane %v6013_v36, 2  ;;  %v6025_v2 = vrot.slane %v5833_v63, 4  ;;  %v5738_v16 = vmul.f32 0.125, %v5588_v13  ;;  %v5615_v7 = vrot.slane %v10663_v35, 4 }
 0x638   : > { %v6199_v9 = vmul.f32 0.125, %v6119_v59  ;;  %v6011_v39 = vadd.f32 %v6010_v28, %v6009_v33  ;;  %v5604_v34 = vrot.slane %v5603_v15, 2  ;;  %v5601_v31 = vadd.f32 %v5600_v40, %v5599_v57 }
 0x639   : > { %v6015_v14 = vadd.f32 %v6014_v44, %v6013_v36  ;;  %v6026_v11 = vadd.f32 %v6025_v2, %v5833_v63  ;;  %v10995_v27 = vsub.f32 %v10591_v60, %v5738_v16  ;;  %v5616_v37 = vadd.f32 %v5615_v7, %v10663_v35 }
 0x63a   : > { %v7893_v29 = vpop.eup %7892  ;;  %v6247_v17 = vadd.f32 1e-05, %v6199_v9  ;;  %v6182_v22 = vmul.f32 0.125, %v6011_v39  ;;  %v5740_v60 = vmul.f32 0.125, %v5601_v31  ;;  %v5605_v28 = vadd.f32 %v5604_v34, %v5603_v15 }
 0x63b   : > { %v10999_v13 = vmul.f32 %v7893_v29, %v10931_v62  ;;  %v6016_v24 = vrot.slane %v6015_v14, 1  ;;  %v6027_v33 = vrot.slane %v6026_v11, 2  ;;  %v5834_v59 = vmul.f32 %v10995_v27, %v10995_v27 }
 0x63c   : > { %7896 = vrsqrt.f32 %v6247_v17  ;;  %v6230_v63 = vadd.f32 1e-05, %v6182_v22  ;;  %v11008_v9 = vsub.f32 %v10633_v50, %v5740_v60  ;;  %v5606_v39 = vrot.slane %v5605_v28, 1 }
 0x63d   : > { %v7895_v36 = vpop.eup %7894  ;;  %v6017_v57 = vadd.f32 %v6016_v24, %v6015_v14  ;;  %v6028_v16 = vadd.f32 %v6027_v33, %v6026_v11  ;;  %v6031_v62 = vrot.slane %v5834_v59, 4  ;;  %v5617_v17 = vrot.slane %v5616_v37, 2 }
 0x63e   : > { %v11005_v2 = vmul.f32 %v7895_v36, %v10934_v10  ;;  %7898 = vrsqrt.f32 %v6230_v63  ;;  %v5836_v15 = vmul.f32 %v11008_v9, %v11008_v9  ;;  %v5607_v34 = vadd.f32 %v5606_v39, %v5605_v28 }
 0x63f   : > { %v6183_v7 = vmul.f32 0.125, %v6017_v57  ;;  %v6029_v29 = vrot.slane %v6028_v16, 1  ;;  %v6032_v22 = vadd.f32 %v6031_v62, %v5834_v59  ;;  %v5621_v10 = vrot.slane %v10679_v45, 4 }
 0x640   : > { %v5618_v31 = vadd.f32 %v5617_v17, %v5616_v37  ;;  %v5634_v24 = vrot.slane %v10707_v5, 4  ;;  %v6044_v33 = vrot.slane %v5836_v15, 4  ;;  %v5741_v36 = vmul.f32 0.125, %v5607_v34 }
 0x641   : > { %v6231_v14 = vadd.f32 1e-05, %v6183_v7  ;;  %v6030_v11 = vadd.f32 %v6029_v29, %v6028_v16  ;;  %v6033_v50 = vrot.slane %v6032_v22, 2  ;;  %v5622_v63 = vadd.f32 %v5621_v10, %v10679_v45 }
 0x642   : > { %v5619_v57 = vrot.slane %v5618_v31, 1  ;;  %v5635_v59 = vadd.f32 %v5634_v24, %v10707_v5  ;;  %v6045_v43 = vadd.f32 %v6044_v33, %v5836_v15  ;;  %v11018_v28 = vsub.f32 %v10639_v23, %v5741_v36 }
 0x643   : > { %7900 = vrsqrt.f32 %v6231_v14  ;;  %v6185_v60 = vmul.f32 0.125, %v6030_v11  ;;  %v6034_v62 = vadd.f32 %v6033_v50, %v6032_v22  ;;  %v5623_v39 = vrot.slane %v5622_v63, 2 }
 0x644   : > { %v5620_v37 = vadd.f32 %v5619_v57, %v5618_v31  ;;  %v5636_v7 = vrot.slane %v5635_v59, 2  ;;  %v5640_v29 = vrot.slane %v10710_v58, 4  ;;  %v6046_v4 = vrot.slane %v6045_v43, 2 }
 0x645   : > { %v6233_v16 = vadd.f32 1e-05, %v6185_v60  ;;  %v6035_v34 = vrot.slane %v6034_v62, 1  ;;  %v5837_v10 = vmul.f32 %v11018_v28, %v11018_v28  ;;  %v5624_v14 = vadd.f32 %v5623_v39, %v5622_v63 }
 0x646   : > { %v7897_v17 = vpop.eup %7896  ;;  %v5743_v22 = vmul.f32 0.125, %v5620_v37  ;;  %v5637_v23 = vadd.f32 %v5636_v7, %v5635_v59  ;;  %v6047_v50 = vadd.f32 %v6046_v4, %v6045_v43  ;;  %v11700_v53 = vmax.f32 %v10990_v30, 0.0 }
 0x647   : > { %v11024_v11 = vmul.f32 %v7897_v17, %v10954_v47  ;;  %7902 = vrsqrt.f32 %v6233_v16  ;;  %v6036_v24 = vadd.f32 %v6035_v34, %v6034_v62  ;;  %v6050_v31 = vrot.slane %v5837_v10, 4 }
 0x648   : > { %v7899_v15 = vpop.eup %7898  ;;  %v5625_v33 = vrot.slane %v5624_v14, 1  ;;  %v11031_v57 = vsub.f32 %v10663_v35, %v5743_v22  ;;  %v5638_v63 = vrot.slane %v5637_v23, 1  ;;  %v6048_v47 = vrot.slane %v6047_v50, 1 }
 0x649   : > { %v11028_v60 = vmul.f32 %v7899_v15, %v10960_v0  ;;  %v6186_v39 = vmul.f32 0.125, %v6036_v24  ;;  %v6051_v17 = vadd.f32 %v6050_v31, %v5837_v10  ;;  %v5641_v62 = vadd.f32 %v5640_v29, %v10710_v58 }
 0x64a   : > { %v5626_v16 = vadd.f32 %v5625_v33, %v5624_v14  ;;  %v5839_v4 = vmul.f32 %v11031_v57, %v11031_v57  ;;  %v5639_v43 = vadd.f32 %v5638_v63, %v5637_v23  ;;  %v6049_v7 = vadd.f32 %v6048_v47, %v6047_v50 }
 0x64b   : > { %v6234_v37 = vadd.f32 1e-05, %v6186_v39  ;;  %v6052_v0 = vrot.slane %v6051_v17, 2  ;;  %v5642_v36 = vrot.slane %v5641_v62, 2  ;;  %v5653_v24 = vrot.slane %v10713_v25, 4 }
 0x64c   : > { %v5744_v34 = vmul.f32 0.125, %v5626_v16  ;;  %v6063_v35 = vrot.slane %v5839_v4, 4  ;;  %v5746_v22 = vmul.f32 0.125, %v5639_v43  ;;  %v6188_v14 = vmul.f32 0.125, %v6049_v7 }
 0x64d   : > { %v7901_v15 = vpop.eup %7900  ;;  %7904 = vrsqrt.f32 %v6234_v37  ;;  %v6053_v31 = vadd.f32 %v6052_v0, %v6051_v17  ;;  %v5643_v50 = vadd.f32 %v5642_v36, %v5641_v62  ;;  %v5654_v16 = vadd.f32 %v5653_v24, %v10713_v25 }
 0x64e   : > { %v11039_v10 = vmul.f32 %v7901_v15, %v10972_v61  ;;  %v6064_v33 = vadd.f32 %v6063_v35, %v5839_v4  ;;  %v11042_v23 = vsub.f32 %v10679_v45, %v5744_v34  ;;  %v11045_v29 = vsub.f32 %v10707_v5, %v5746_v22 }
 0x64f   : > { %v6236_v39 = vadd.f32 1e-05, %v6188_v14  ;;  %v6054_v47 = vrot.slane %v6053_v31, 1  ;;  %v5644_v45 = vrot.slane %v5643_v50, 1  ;;  %v5655_v36 = vrot.slane %v5654_v16, 2 }
 0x650   : > { %v6065_v61 = vrot.slane %v6064_v33, 2  ;;  %v5840_v37 = vmul.f32 %v11042_v23, %v11042_v23  ;;  %v5842_v17 = vmul.f32 %v11045_v29, %v11045_v29  ;;  %v5659_v24 = vrot.slane %v10723_v38, 4 }
 0x651   : > { %v7903_v43 = vpop.eup %7902  ;;  %7906 = vrsqrt.f32 %v6236_v39  ;;  %v6055_v5 = vadd.f32 %v6054_v47, %v6053_v31  ;;  %v5645_v34 = vadd.f32 %v5644_v45, %v5643_v50  ;;  %v5656_v22 = vadd.f32 %v5655_v36, %v5654_v16 }
 0x652   : > { %v11054_v4 = vmul.f32 %v7903_v43, %v10983_v55  ;;  %v6066_v62 = vadd.f32 %v6065_v61, %v6064_v33  ;;  %v6069_v7 = vrot.slane %v5840_v37, 4  ;;  %v6082_v0 = vrot.slane %v5842_v17, 4 }
 0x653   : > { %v6189_v35 = vmul.f32 0.125, %v6055_v5  ;;  %v5747_v40 = vmul.f32 0.125, %v5645_v34  ;;  %v5657_v55 = vrot.slane %v5656_v22, 1  ;;  %v5660_v39 = vadd.f32 %v5659_v24, %v10723_v38 }
 0x654   : > { %v6067_v14 = vrot.slane %v6066_v62, 1  ;;  %v6070_v63 = vadd.f32 %v6069_v7, %v5840_v37  ;;  %v6083_v59 = vadd.f32 %v6082_v0, %v5842_v17  ;;  %v5672_v31 = vrot.slane %v10752_v12, 4 }
 0x655   : > { %v6237_v44 = vadd.f32 1e-05, %v6189_v35  ;;  %v11061_v50 = vsub.f32 %v10710_v58, %v5747_v40  ;;  %v5658_v16 = vadd.f32 %v5657_v55, %v5656_v22  ;;  %v5661_v45 = vrot.slane %v5660_v39, 2 }
 0x656   : > { %v6068_v33 = vadd.f32 %v6067_v14, %v6066_v62  ;;  %v6071_v47 = vrot.slane %v6070_v63, 2  ;;  %v6084_v43 = vrot.slane %v6083_v59, 2  ;;  %v5673_v37 = vadd.f32 %v5672_v31, %v10752_v12 }
 0x657   : > { %v7905_v61 = vpop.eup %7904  ;;  %7908 = vrsqrt.f32 %v6237_v44  ;;  %v5843_v62 = vmul.f32 %v11061_v50, %v11061_v50  ;;  %v5749_v0 = vmul.f32 0.125, %v5658_v16  ;;  %v5662_v34 = vadd.f32 %v5661_v45, %v5660_v39 }
 0x658   : > { %v11065_v17 = vmul.f32 %v7905_v61, %v10995_v27  ;;  %v6191_v5 = vmul.f32 0.125, %v6068_v33  ;;  %v6072_v36 = vadd.f32 %v6071_v47, %v6070_v63  ;;  %v6085_v7 = vadd.f32 %v6084_v43, %v6083_v59 }
 0x659   : > { %v5674_v35 = vrot.slane %v5673_v37, 2  ;;  %v6088_v14 = vrot.slane %v5843_v62, 4  ;;  %v11071_v55 = vsub.f32 %v10713_v25, %v5749_v0  ;;  %v5663_v27 = vrot.slane %v5662_v34, 1 }
 0x65a   : > { %v6239_v40 = vadd.f32 1e-05, %v6191_v5  ;;  %v6073_v44 = vrot.slane %v6072_v36, 1  ;;  %v6086_v22 = vrot.slane %v6085_v7, 1  ;;  %v5678_v25 = vrot.slane %v10756_v41, 4 }
 0x65b   : > { %v7907_v24 = vpop.eup %7906  ;;  %v5675_v31 = vadd.f32 %v5674_v35, %v5673_v37  ;;  %v6089_v39 = vadd.f32 %v6088_v14, %v5843_v62  ;;  %v5845_v47 = vmul.f32 %v11071_v55, %v11071_v55  ;;  %v5664_v43 = vadd.f32 %v5663_v27, %v5662_v34 }
 0x65c   : > { %v11074_v59 = vmul.f32 %v7907_v24, %v11008_v9  ;;  %7910 = vrsqrt.f32 %v6239_v40  ;;  %v6074_v63 = vadd.f32 %v6073_v44, %v6072_v36  ;;  %v6087_v33 = vadd.f32 %v6086_v22, %v6085_v7 }
 0x65d   : > { %v5676_v61 = vrot.slane %v5675_v31, 1  ;;  %v6090_v0 = vrot.slane %v6089_v39, 2  ;;  %v6101_v37 = vrot.slane %v5845_v47, 4  ;;  %v5750_v35 = vmul.f32 0.125, %v5664_v43 }
 0x65e   : > { %v6192_v45 = vmul.f32 0.125, %v6074_v63  ;;  %v6194_v5 = vmul.f32 0.125, %v6087_v33  ;;  %v5679_v36 = vadd.f32 %v5678_v25, %v10756_v41  ;;  %v5691_v7 = vrot.slane %v10777_v56, 4 }
 0x65f   : > { %v5677_v9 = vadd.f32 %v5676_v61, %v5675_v31  ;;  %v6091_v44 = vadd.f32 %v6090_v0, %v6089_v39  ;;  %v6102_v34 = vadd.f32 %v6101_v37, %v5845_v47  ;;  %v11083_v22 = vsub.f32 %v10723_v38, %v5750_v35 }
 0x660   : > { %v6240_v24 = vadd.f32 1e-05, %v6192_v45  ;;  %v6242_v40 = vadd.f32 1e-05, %v6194_v5  ;;  %v5680_v63 = vrot.slane %v5679_v36, 2  ;;  %v5692_v31 = vadd.f32 %v5691_v7, %v10777_v56 }
 0x661   : > { %v7909_v62 = vpop.eup %7908  ;;  %v5752_v14 = vmul.f32 0.125, %v5677_v9  ;;  %v6092_v33 = vrot.slane %v6091_v44, 1  ;;  %v6103_v43 = vrot.slane %v6102_v34, 2  ;;  %v5846_v61 = vmul.f32 %v11083_v22, %v11083_v22 }
 0x662   : > { %v11086_v27 = vmul.f32 %v7909_v62, %v11018_v28  ;;  %7912 = vrsqrt.f32 %v6240_v24  ;;  %v5681_v38 = vadd.f32 %v5680_v63, %v5679_v36  ;;  %v5693_v45 = vrot.slane %v5692_v31, 2 }
 0x663   : > { %7914 = vrsqrt.f32 %v6242_v40  ;;  %v11093_v47 = vsub.f32 %v10752_v12, %v5752_v14  ;;  %v6093_v5 = vadd.f32 %v6092_v33, %v6091_v44  ;;  %v6104_v28 = vadd.f32 %v6103_v43, %v6102_v34  ;;  %v7930_v40 = vld [vmem:[%s11415_s7] sm:$0x7] }
 0x664   : > { %v6107_v25 = vrot.slane %v5846_v61, 4  ;;  %v5697_v0 = vrot.slane %v10786_v18, 4  ;;  %v5682_v9 = vrot.slane %v5681_v38, 1  ;;  %v5694_v24 = vadd.f32 %v5693_v45, %v5692_v31 }
 0x665   : > { %v5848_v35 = vmul.f32 %v11093_v47, %v11093_v47  ;;  %v11667_v12 = vsub.s32 1, %v11641_v52  ;;  %v6195_v62 = vmul.f32 0.125, %v6093_v5  ;;  %v6105_v44 = vrot.slane %v6104_v28, 1 }
 0x666   : > { %v7911_v37 = vpop.eup %7910  ;;  %v6108_v34 = vadd.f32 %v6107_v25, %v5846_v61  ;;  %v5683_v63 = vadd.f32 %v5682_v9, %v5681_v38  ;;  %v5695_v33 = vrot.slane %v5694_v24, 1  ;;  %v5698_v43 = vadd.f32 %v5697_v0, %v10786_v18 }
 0x667   : > { %v11103_v7 = vrot.slane %v7930_v40, %v11667_v12  ;;  %v11106_v36 = vmul.f32 %v7911_v37, %v11031_v57  ;;  %v6120_v14 = vrot.slane %v5848_v35, 4  ;;  %v6243_v45 = vadd.f32 1e-05, %v6195_v62 }
 0x668   : > { %v6106_v39 = vadd.f32 %v6105_v44, %v6104_v28  ;;  %v6109_v16 = vrot.slane %v6108_v34, 2  ;;  %v5753_v15 = vmul.f32 0.125, %v5683_v63  ;;  %v5696_v12 = vadd.f32 %v5695_v33, %v5694_v24 }
 0x669   : > { %v6121_v58 = vadd.f32 %v6120_v14, %v5848_v35  ;;  %v5699_v8 = vrot.slane %v5698_v43, 2  ;;  %7916 = vrsqrt.f32 %v6243_v45  ;;  %v6410_v5 = vsub.s32 2, %v11641_v52 }
 0x66a   : > { %v6197_v57 = vmul.f32 0.125, %v6106_v39  ;;  %v6110_v37 = vadd.f32 %v6109_v16, %v6108_v34  ;;  %v11112_v38 = vsub.f32 %v10756_v41, %v5753_v15  ;;  %v5755_v0 = vmul.f32 0.125, %v5696_v12 }
 0x66b   : > { %v6122_v25 = vrot.slane %v6121_v58, 2  ;;  %v5700_v9 = vadd.f32 %v5699_v8, %v5698_v43  ;;  %v11117_v24 = vrot.slane %v7930_v40, %v6410_v5  ;;  %v11668_v33 = vmax.f32 %v10624_v26, 0.0  ;;  %v11669_v43 = vld [vmem:[#allocation16_spill] sm:$0xff]  ;;  %v11671_v5 = vld [vmem:[#allocation15_spill] sm:$0xff] }
 0x66c   : > { %v7913_v61 = vpop.eup %7912  ;;  %v6245_v35 = vadd.f32 1e-05, %v6197_v57  ;;  %v6111_v62 = vrot.slane %v6110_v37, 1  ;;  %v5849_v44 = vmul.f32 %v11112_v38, %v11112_v38  ;;  %v11125_v41 = vsub.f32 %v10777_v56, %v5755_v0 }
 0x66d   : > { %v7915_v31 = vpop.eup %7914  ;;  %v11115_v28 = vmul.f32 %v7913_v61, %v11042_v23  ;;  %v6123_v16 = vadd.f32 %v6122_v25, %v6121_v58  ;;  %v5701_v23 = vrot.slane %v5700_v9, 1  ;;  %v11670_v56 = vmax.f32 %v10628_v6, 0.0 }
 0x66e   : > { %v11120_v39 = vmul.f32 %v7915_v31, %v11045_v29  ;;  %7918 = vrsqrt.f32 %v6245_v35  ;;  %v6112_v15 = vadd.f32 %v6111_v62, %v6110_v37  ;;  %v6126_v40 = vrot.slane %v5849_v44, 4 }
 0x66f   : > { %v6384_v8 = vmax.f32 %v11115_v28, 0.0  ;;  %v6124_v14 = vrot.slane %v6123_v16, 1  ;;  %v5851_v29 = vmul.f32 %v11125_v41, %v11125_v41  ;;  %v5702_v58 = vadd.f32 %v5701_v23, %v5700_v9 }
 0x670   : > { %v6198_v63 = vmul.f32 0.125, %v6112_v15  ;;  %v6415_v31 = vmul.f32 %v11669_v43, %v11668_v33  ;;  %v6416_v45 = vmul.f32 %v11103_v7, %v11670_v56  ;;  %v6127_v57 = vadd.f32 %v6126_v40, %v5849_v44  ;;  %v11673_v15 = vld [vmem:[#allocation20_spill] sm:$0xff] }
 0x671   : > { %v6125_v12 = vadd.f32 %v6124_v14, %v6123_v16  ;;  %v6139_v37 = vrot.slane %v5851_v29, 4  ;;  %v11672_v61 = vmax.f32 %v11671_v5, 0.0  ;;  %v5756_v35 = vmul.f32 0.125, %v5702_v58  ;;  %v11675_v14 = vld [vmem:[#allocation30_spill] sm:$0xff] }
 0x672   : > { %v6246_v0 = vadd.f32 1e-05, %v6198_v63  ;;  %v6463_v62 = vadd.f32 %v6416_v45, %v6415_v31  ;;  %v11674_v9 = vmax.f32 %v11673_v15, 0.0  ;;  %v6128_v33 = vrot.slane %v6127_v57, 2 }
 0x673   : > { %v6417_v25 = vmul.f32 %v11117_v24, %v11672_v61  ;;  %v6200_v23 = vmul.f32 0.125, %v6125_v12  ;;  %v6140_v34 = vadd.f32 %v6139_v37, %v5851_v29  ;;  %v7917_v56 = vpop.eup %7916  ;;  %v11145_v16 = vsub.f32 %v10786_v18, %v5756_v35  ;;  %v11678_v61 = vld [vmem:[#allocation22_spill] sm:$0xff] }
 0x674   : > { %v6418_v26 = vmul.f32 %v11669_v43, %v11674_v9  ;;  %7920 = vrsqrt.f32 %v6246_v0  ;;  %v11676_v40 = vmax.f32 %v11675_v14, 0.0  ;;  %v11151_v58 = vmul.f32 %v7917_v56, %v11061_v50 }
 0x675   : > { %v6464_v6 = vsel %vm3570_vm2, %v6417_v25, 0.0  ;;  %v6248_v31 = vadd.f32 1e-05, %v6200_v23  ;;  %v6129_v45 = vadd.f32 %v6128_v33, %v6127_v57  ;;  %v6141_v12 = vrot.slane %v6140_v34, 2  ;;  %v11680_v23 = vld [vmem:[#allocation17_spill] sm:$0xff] }
 0x676   : > { %v6465_v44 = vadd.f32 %v6464_v6, %v6463_v62  ;;  %v6419_v63 = vmul.f32 %v11103_v7, %v11676_v40  ;;  %v5852_v29 = vmul.f32 %v11145_v16, %v11145_v16  ;;  %v11677_v37 = vmax.f32 %v10692_v49, 0.0  ;;  %v11682_v6 = vld [vmem:[#allocation23_spill] sm:$0xff] }
 0x677   : > { %v11679_v25 = vmax.f32 %v11678_v61, 0.0  ;;  %v6387_v35 = vmax.f32 %v11151_v58, 0.0  ;;  %7922 = vrsqrt.f32 %v6248_v31  ;;  %v6130_v50 = vrot.slane %v6129_v45, 1 }
 0x678   : > { %6466 = vadd.xlane.f32.xlu0 %v6465_v44  ;;  %v6420_v18 = vmul.f32 %v11117_v24, %v11677_v37  ;;  %v6468_v5 = vadd.f32 %v6419_v63, %v6418_v26  ;;  %v6142_v62 = vadd.f32 %v6141_v12, %v6140_v34  ;;  %v7919_v57 = vpop.eup %7918  ;;  %v6145_v15 = vrot.slane %v5852_v29, 4  ;;  %v11684_v37 = vld [vmem:[#allocation24_spill] sm:$0xff] }
 0x679   : > { %v6421_v0 = vmul.f32 %v11669_v43, %v11679_v25  ;;  %v11681_v33 = vmax.f32 %v11680_v23, 0.0  ;;  %v11683_v56 = vmax.f32 %v11682_v6, 0.0  ;;  %v11170_v44 = vmul.f32 %v7919_v57, %v11071_v55 }
 0x67a   : > { %v6469_v9 = vsel %vm3570_vm2, %v6420_v18, 0.0  ;;  %v6131_v14 = vadd.f32 %v6130_v50, %v6129_v45  ;;  %v6143_v40 = vrot.slane %v6142_v62, 1  ;;  %v6146_v31 = vadd.f32 %v6145_v15, %v5852_v29 }
 0x67b   : > { %v6422_v49 = vmul.f32 %v11103_v7, %v11681_v33  ;;  %v6423_v26 = vmul.f32 %v11117_v24, %v11683_v56  ;;  %v6470_v63 = vadd.f32 %v6469_v9, %v6468_v5  ;;  %v11685_v18 = vmax.f32 %v11684_v37, 0.0  ;;  %v11687_v5 = vld [vmem:[#allocation37_spill] sm:$0xff] }
 0x67c   : > { %v6389_v25 = vmax.f32 %v11170_v44, 0.0  ;;  %v6201_v23 = vmul.f32 0.125, %v6131_v14  ;;  %v6144_v33 = vadd.f32 %v6143_v40, %v6142_v62  ;;  %v11686_v6 = vmax.f32 %v10795_v48, 0.0 }
 0x67d   : > { %v6473_v34 = vadd.f32 %v6422_v49, %v6421_v0  ;;  %v6474_v12 = vsel %vm3570_vm2, %v6423_v26, 0.0  ;;  %v6424_v61 = vmul.f32 %v11669_v43, %v11685_v18  ;;  %6471 = vadd.xlane.f32.xlu1 %v6470_v63  ;;  %v6147_v45 = vrot.slane %v6146_v31, 2  ;;  %v11691_v63 = vld [vmem:[#allocation40_spill] sm:$0xff] }
 0x67e   : > { %v6425_v55 = vmul.f32 %v11103_v7, %v11686_v6  ;;  %v11688_v29 = vmax.f32 %v11687_v5, 0.0  ;;  %v11689_v57 = vmax.f32 %v10842_v21, 0.0  ;;  %v6249_v9 = vadd.f32 1e-05, %v6201_v23  ;;  %v7921_v48 = vpop.eup %7920 }
 0x67f   : > { %v6475_v50 = vadd.f32 %v6474_v12, %v6473_v34  ;;  %v6203_v49 = vmul.f32 0.125, %v6144_v33  ;;  %v11690_v62 = vmax.f32 %v10855_v54, 0.0  ;;  %v6148_v14 = vadd.f32 %v6147_v45, %v6146_v31 }
 0x680   : > { %v6426_v0 = vmul.f32 %v11117_v24, %v11688_v29  ;;  %v6427_v15 = vmul.f32 %v11669_v43, %v11689_v57  ;;  %v6478_v56 = vadd.f32 %v6425_v55, %v6424_v61  ;;  %v11692_v34 = vmax.f32 %v11691_v63, 0.0 }
 0x681   : > { %v6428_v26 = vmul.f32 %v11103_v7, %v11690_v62  ;;  %6476 = vadd.xlane.f32.xlu0 %v6475_v50  ;;  %v11693_v21 = vmax.f32 %v10881_v46, 0.0  ;;  %v11197_v18 = vmul.f32 %v7921_v48, %v11083_v22  ;;  %7924 = vrsqrt.f32 %v6249_v9  ;;  %v7923_v45 = vpop.eup %7922  ;;  %v11695_v46 = vld [vmem:[#allocation35_spill] sm:$0xff] }
 0x682   : > { %v6479_v40 = vsel %vm3570_vm2, %v6426_v0, 0.0  ;;  %v6429_v12 = vmul.f32 %v11117_v24, %v11692_v34  ;;  %v6251_v54 = vadd.f32 1e-05, %v6203_v49  ;;  %v6149_v23 = vrot.slane %v6148_v14, 1  ;;  %v11698_v62 = vld [vmem:[#allocation39_spill] sm:$0xff] }
 0x683   : > { %v6430_v37 = vmul.f32 %v11669_v43, %v11693_v21  ;;  %v6480_v61 = vadd.f32 %v6479_v40, %v6478_v56  ;;  %v6483_v33 = vadd.f32 %v6428_v26, %v6427_v15  ;;  %v11694_v6 = vmax.f32 %v10908_v3, 0.0  ;;  %v11702_v21 = vld [vmem:[#allocation32_spill] sm:$0xff] }
 0x684   : > { %v6484_v31 = vsel %vm3570_vm2, %v6429_v12, 0.0  ;;  %v6390_v50 = vmax.f32 %v11197_v18, 0.0  ;;  %7926 = vrsqrt.f32 %v6251_v54  ;;  %v11696_v5 = vmax.f32 %v11695_v46, 0.0 }
 0x685   : > { %v6431_v55 = vmul.f32 %v11103_v7, %v11694_v6  ;;  %v6433_v29 = vmul.f32 %v11669_v43, %v6368_v20  ;;  %v11211_v0 = vmul.f32 %v7923_v45, %v11093_v47  ;;  %v6150_v57 = vadd.f32 %v6149_v23, %v6148_v14  ;;  %6481 = vadd.xlane.f32.xlu0 %v6480_v61  ;;  %v11706_v6 = vld [vmem:[#allocation29_spill] sm:$0xff] }
 0x686   : > { %v6432_v22 = vmul.f32 %v11117_v24, %v11696_v5  ;;  %v6485_v3 = vadd.f32 %v6484_v31, %v6483_v33  ;;  %v11697_v49 = vmax.f32 %v10968_v19, 0.0  ;;  %v11699_v26 = vmax.f32 %v11698_v62, 0.0 }
 0x687   : > { %v6488_v15 = vadd.f32 %v6431_v55, %v6430_v37  ;;  %v6436_v20 = vmul.f32 %v11669_v43, %v11700_v53  ;;  %v6392_v47 = vmax.f32 %v11211_v0, 0.0  ;;  %v6204_v14 = vmul.f32 0.125, %v6150_v57 }
 0x688   : > { %v6489_v9 = vsel %vm3570_vm2, %v6432_v22, 0.0  ;;  %v6434_v56 = vmul.f32 %v11103_v7, %v11697_v49  ;;  %v6435_v48 = vmul.f32 %v11117_v24, %v11699_v26  ;;  %6486 = vadd.xlane.f32.xlu1 %v6485_v3  ;;  %v11701_v63 = vmax.f32 %v10999_v13, 0.0 }
 0x689   : > { %v6490_v40 = vadd.f32 %v6489_v9, %v6488_v15  ;;  %v11703_v37 = vmax.f32 %v11702_v21, 0.0  ;;  %v11704_v30 = vmax.f32 %v11028_v60, 0.0  ;;  %v6252_v23 = vadd.f32 1e-05, %v6204_v14 }
 0x68a   : > { %v6437_v34 = vmul.f32 %v11103_v7, %v11701_v63  ;;  %v6493_v19 = vadd.f32 %v6434_v56, %v6433_v29  ;;  %v6494_v12 = vsel %vm3570_vm2, %v6435_v48, 0.0  ;;  %v11705_v31 = vmax.f32 %v11039_v10, 0.0 }
 0x68b   : > { %v6438_v54 = vmul.f32 %v11117_v24, %v11703_v37  ;;  %v6439_v61 = vmul.f32 %v11669_v43, %v11704_v30  ;;  %6491 = vadd.xlane.f32.xlu0 %v6490_v40  ;;  %v11707_v55 = vmax.f32 %v11706_v6, 0.0  ;;  %v11708_v22 = vmax.f32 %v11054_v4, 0.0  ;;  %v7925_v15 = vpop.eup %7924 }
 0x68c   : > { %v6498_v33 = vadd.f32 %v6437_v34, %v6436_v20  ;;  %v6440_v13 = vmul.f32 %v11103_v7, %v11705_v31  ;;  %v6495_v46 = vadd.f32 %v6494_v12, %v6493_v19  ;;  %v11709_v29 = vmax.f32 %v11065_v17, 0.0  ;;  %v11713_v20 = vld [vmem:[#allocation36_spill] sm:$0xff] }
 0x68d   : > { %v6441_v45 = vmul.f32 %v11117_v24, %v11707_v55  ;;  %v6499_v5 = vsel %vm3570_vm2, %v6438_v54, 0.0  ;;  %v6442_v60 = vmul.f32 %v11669_v43, %v11708_v22  ;;  %7928 = vrsqrt.f32 %v6252_v23 }
 0x68e   : > { %v6443_v0 = vmul.f32 %v11103_v7, %v11709_v29  ;;  %v6500_v57 = vadd.f32 %v6499_v5, %v6498_v33  ;;  %v6503_v10 = vadd.f32 %v6440_v13, %v6439_v61  ;;  %6496 = vadd.xlane.f32.xlu1 %v6495_v46  ;;  %v11710_v9 = vmax.f32 %v10927_v42, 0.0  ;;  %v7927_v34 = vpop.eup %7926 }
 0x68f   : > { %v6504_v3 = vsel %vm3570_vm2, %v6441_v45, 0.0  ;;  %v11711_v4 = vmax.f32 %v11074_v59, 0.0  ;;  %v11712_v17 = vmax.f32 %v11086_v27, 0.0  ;;  %v6345_v48 = vmul.f32 %v7925_v15, %v11112_v38 }
 0x690   : > { %v6444_v49 = vmul.f32 %v11117_v24, %v11710_v9  ;;  %v6508_v56 = vadd.f32 %v6443_v0, %v6442_v60  ;;  %6501 = vadd.xlane.f32.xlu0 %v6500_v57  ;;  %v6505_v53 = vadd.f32 %v6504_v3, %v6503_v10  ;;  %v11714_v14 = vmax.f32 %v11713_v20, 0.0 }
 0x691   : > { %v6445_v62 = vmul.f32 %v11669_v43, %v11711_v4  ;;  %v6446_v26 = vmul.f32 %v11103_v7, %v11712_v17  ;;  %v11715_v42 = vmax.f32 %v11106_v36, 0.0  ;;  %v6449_v27 = vmul.f32 %v11103_v7, %v6384_v8 }
 0x692   : > { %v6447_v40 = vmul.f32 %v11117_v24, %v11714_v14  ;;  %v6509_v59 = vsel %vm3570_vm2, %v6444_v49, 0.0  ;;  %v11716_v38 = vmax.f32 %v10914_v1, 0.0  ;;  %v6393_v21 = vmax.f32 %v6345_v48, 0.0  ;;  %6506 = vadd.xlane.f32.xlu1 %v6505_v53 }
 0x693   : > { %v6448_v63 = vmul.f32 %v11669_v43, %v11715_v42  ;;  %v6513_v19 = vadd.f32 %v6446_v26, %v6445_v62  ;;  %v6347_v37 = vmul.f32 %v7927_v34, %v11125_v41  ;;  %v6510_v54 = vadd.f32 %v6509_v59, %v6508_v56 }
 0x694   : > { %v6450_v12 = vmul.f32 %v11117_v24, %v11716_v38  ;;  %v6514_v36 = vsel %vm3570_vm2, %v6447_v40, 0.0  ;;  %v11717_v33 = vmax.f32 %v11120_v39, 0.0  ;;  %v6452_v1 = vmul.f32 %v11103_v7, %v6387_v35 }
 0x695   : > { %v6515_v30 = vadd.f32 %v6514_v36, %v6513_v19  ;;  %v6518_v61 = vadd.f32 %v6449_v27, %v6448_v63  ;;  %v6395_v8 = vmax.f32 %v6347_v37, 0.0  ;;  %6511 = vadd.xlane.f32.xlu0 %v6510_v54  ;;  %v11718_v41 = vmax.f32 %v10976_v51, 0.0 }
 0x696   : > { %v6519_v23 = vsel %vm3570_vm2, %v6450_v12, 0.0  ;;  %v6451_v28 = vmul.f32 %v11669_v43, %v11717_v33  ;;  %v6454_v13 = vmul.f32 %v11669_v43, %v6389_v25  ;;  %v6455_v39 = vmul.f32 %v11103_v7, %v6390_v50 }
 0x697   : > { %v6453_v31 = vmul.f32 %v11117_v24, %v11718_v41  ;;  %v6520_v6 = vadd.f32 %v6519_v23, %v6518_v61  ;;  %v11719_v55 = vmax.f32 %v11024_v11, 0.0  ;;  %v6457_v58 = vmul.f32 %v11669_v43, %v6392_v47  ;;  %6516 = vadd.xlane.f32.xlu1 %v6515_v30  ;;  %v7929_v50 = vpop.eup %7928 }
 0x698   : > { %v6523_v35 = vadd.f32 %v6452_v1, %v6451_v28  ;;  %v6458_v51 = vmul.f32 %v11103_v7, %v6393_v21  ;;  %v11720_v46 = vmax.f32 %v10951_v32, 0.0  ;;  %v6528_v5 = vadd.f32 %v6455_v39, %v6454_v13 }
 0x699   : > { %v6456_v45 = vmul.f32 %v11117_v24, %v11719_v55  ;;  %v6524_v25 = vsel %vm3570_vm2, %v6453_v31, 0.0  ;;  %v6460_v18 = vmul.f32 %v11669_v43, %v6395_v8  ;;  %v6397_v11 = vmax.f32 %v11005_v2, 0.0  ;;  %6521 = vadd.xlane.f32.xlu0 %v6520_v6 }
 0x69a   : > { %v6459_v44 = vmul.f32 %v11117_v24, %v11720_v46  ;;  %v6525_v22 = vadd.f32 %v6524_v25, %v6523_v35  ;;  %v6533_v60 = vadd.f32 %v6458_v51, %v6457_v58  ;;  %v6348_v29 = vmul.f32 %v7929_v50, %v11145_v16 }
 0x69b   : > { %v6529_v47 = vsel %vm3570_vm2, %v6456_v45, 0.0  ;;  %v6462_v3 = vmul.f32 %v11117_v24, %v6397_v11  ;;  %v11721_v49 = vlaneseq }
 0x69c   : > { %v6530_v0 = vadd.f32 %v6529_v47, %v6528_v5  ;;  %v6534_v32 = vsel %vm3570_vm2, %v6459_v44, 0.0  ;;  %v6396_v10 = vmax.f32 %v6348_v29, 0.0  ;;  %6526 = vadd.xlane.f32.xlu1 %v6525_v22 }
 0x69d   : > { %v6535_v57 = vadd.f32 %v6534_v32, %v6533_v60  ;;  %v6539_v15 = vsel %vm3570_vm2, %v6462_v3, 0.0  ;;  %v11307_v16 = vand.u32 127, %v11721_v49  ;;  %vm6686_vm2 = vcmask 1048512  }
 0x69e   : > { %6531 = vadd.xlane.f32.xlu0 %v6530_v0  ;;  %v6461_v43 = vmul.f32 %v11103_v7, %v6396_v10  ;;  %v11312_v7 = vstv %s6543_s25 }
 0x69f   : > { %v6583_v4 = vadd.s32 4294967288, %v11307_v16  ;;  %v6590_v17 = vadd.s32 4294967280, %v11307_v16  ;;  %v6597_v24 = vadd.s32 4294967272, %v11307_v16  ;;  %v6604_v48 = vadd.s32 4294967264, %v11307_v16 }
 0x6a0   : > { %6536 = vadd.xlane.f32.xlu1 %v6535_v57  ;;  %v6538_v2 = vadd.f32 %v6461_v43, %v6460_v18  ;;  %v6581_v42 = vsub.s32 %v11307_v16, %v11641_v52  ;;  %v6611_v19 = vadd.s32 4294967256, %v11307_v16  ;;  %v6618_v37 = vadd.s32 4294967248, %v11307_v16 }
 0x6a1   : > { %v6586_v53 = vsub.s32 %v6583_v4, %v11641_v52  ;;  %v6593_v14 = vsub.s32 %v6590_v17, %v11641_v52  ;;  %v6600_v34 = vsub.s32 %v6597_v24, %v11641_v52  ;;  %v6607_v38 = vsub.s32 %v6604_v48, %v11641_v52 }
 0x6a2   : > { %v6540_v9 = vadd.f32 %v6539_v15, %v6538_v2  ;;  %v6625_v30 = vadd.s32 4294967240, %v11307_v16  ;;  %v6614_v33 = vsub.s32 %v6611_v19, %v11641_v52  ;;  %v6621_v31 = vsub.s32 %v6618_v37, %v11641_v52 }
 0x6a3   : > { %v6632_v13 = vadd.s32 4294967232, %v11307_v16  ;;  %v6639_v46 = vadd.s32 4294967224, %v11307_v16  ;;  %v6646_v50 = vadd.s32 4294967216, %v11307_v16  ;;  %v6653_v22 = vadd.s32 4294967208, %v11307_v16 }
 0x6a4   : > { %6541 = vadd.xlane.f32.xlu0 %v6540_v9  ;;  %v6628_v55 = vsub.s32 %v6625_v30, %v11641_v52  ;;  %v6660_v2 = vadd.s32 4294967200, %v11307_v16  ;;  %v6667_v17 = vadd.s32 4294967192, %v11307_v16 }
 0x6a5   : > { %v6635_v18 = vsub.s32 %v6632_v13, %v11641_v52  ;;  %v6642_v0 = vsub.s32 %v6639_v46, %v11641_v52  ;;  %v6649_v43 = vsub.s32 %v6646_v50, %v11641_v52  ;;  %v6656_v9 = vsub.s32 %v6653_v22, %v11641_v52 }
 0x705   : > { %v6467_v56 = vpop.xlane.xlu0 %6466 }
 0x706   : > { %v6545_v63 = vadd.f32 %v11312_v7, %v6467_v56 }
 0x708   : > { %v6582_v61 = vrot.slane %v6545_v63, %v6581_v42 }
 0x70a   : > { %v6472_v62 = vpop.xlane.xlu1 %6471 }
 0x70b   : > { %v6546_v20 = vadd.f32 %v11312_v7, %v6472_v62 }
 0x70d   : > { %v6587_v12 = vrot.slane %v6546_v20, %v6586_v53  ;;  %v6663_v53 = vsub.s32 %v6660_v2, %v11641_v52  ;;  %v6674_v20 = vadd.s32 4294967184, %v11307_v16 }
 0x70e   : > { %v6477_v26 = vpop.xlane.xlu0 %6476 }
 0x70f   : > { %v6547_v40 = vadd.f32 %v11312_v7, %v6477_v26  ;;  %v6589_v41 = vsel %vm6588_vm4, %v6587_v12, %v6582_v61  ;;  %v6677_v12 = vsub.s32 %v6674_v20, %v11641_v52 }
 0x711   : > { %v6594_v54 = vrot.slane %v6547_v40, %v6593_v14 }
 0x712   : > { %v6482_v59 = vpop.xlane.xlu0 %6481 }
 0x713   : > { %v6548_v27 = vadd.f32 %v11312_v7, %v6482_v59  ;;  %v6596_v6 = vsel %vm6595_vm5, %v6594_v54, %v6589_v41 }
 0x715   : > { %v6487_v21 = vpop.xlane.xlu1 %6486  ;;  %v6601_v23 = vrot.slane %v6548_v27, %v6600_v34  ;;  %v6670_v34 = vsub.s32 %v6667_v17, %v11641_v52 }
 0x716   : > { %v6549_v36 = vadd.f32 %v11312_v7, %v6487_v21  ;;  %v6681_v21 = vadd.s32 4294967176, %v11307_v16 }
 0x717   : > { %v6603_v45 = vsel %vm6602_vm6, %v6601_v23, %v6596_v6 }
 0x718   : > { %v6492_v28 = vpop.xlane.xlu0 %6491  ;;  %v6608_v8 = vrot.slane %v6549_v36, %v6607_v38 }
 0x719   : > { %v6550_v1 = vadd.f32 %v11312_v7, %v6492_v28 }
 0x71a   : > { %v6610_v44 = vsel %vm6609_vm7, %v6608_v8, %v6603_v45 }
 0x71b   : > { %v6497_v39 = vpop.xlane.xlu1 %6496  ;;  %v6615_v58 = vrot.slane %v6550_v1, %v6614_v33  ;;  %v6684_v33 = vsub.s32 %v6681_v21, %v11641_v52 }
 0x71c   : > { %v6551_v35 = vadd.f32 %v11312_v7, %v6497_v39 }
 0x71d   : > { %v6502_v51 = vpop.xlane.xlu0 %6501  ;;  %v6617_v47 = vsel %vm6616_vm8, %v6615_v58, %v6610_v44 }
 0x71e   : > { %v6552_v25 = vadd.f32 %v11312_v7, %v6502_v51  ;;  %v6622_v5 = vrot.slane %v6551_v35, %v6621_v31 }
 0x71f   : > { %v6507_v11 = vpop.xlane.xlu1 %6506 }
 0x720   : > { %v6629_v60 = vrot.slane %v6552_v25, %v6628_v55  ;;  %v6553_v29 = vadd.f32 %v11312_v7, %v6507_v11  ;;  %v6624_v57 = vsel %vm6623_vm9, %v6622_v5, %v6617_v47 }
 0x722   : > { %v6512_v32 = vpop.xlane.xlu0 %6511  ;;  %v6636_v3 = vrot.slane %v6553_v29, %v6635_v18  ;;  %v6631_v49 = vsel %vm6630_vm10, %v6629_v60, %v6624_v57 }
 0x723   : > { %v6554_v10 = vadd.f32 %v11312_v7, %v6512_v32 }
 0x724   : > { %v6517_v15 = vpop.xlane.xlu1 %6516  ;;  %v6638_v26 = vsel %vm6637_vm11, %v6636_v3, %v6631_v49 }
 0x725   : > { %v6643_v56 = vrot.slane %v6554_v10, %v6642_v0  ;;  %v6555_v4 = vadd.f32 %v11312_v7, %v6517_v15 }
 0x726   : > { %v6522_v62 = vpop.xlane.xlu0 %6521 }
 0x727   : > { %v6556_v24 = vadd.f32 %v11312_v7, %v6522_v62  ;;  %v6650_v48 = vrot.slane %v6555_v4, %v6649_v43  ;;  %v6645_v40 = vsel %vm6644_vm12, %v6643_v56, %v6638_v26 }
 0x729   : > { %v6527_v14 = vpop.xlane.xlu1 %6526  ;;  %v6657_v42 = vrot.slane %v6556_v24, %v6656_v9  ;;  %v6652_v19 = vsel %vm6651_vm13, %v6650_v48, %v6645_v40 }
 0x72a   : > { %v6557_v63 = vadd.f32 %v11312_v7, %v6527_v14 }
 0x72b   : > { %v6532_v59 = vpop.xlane.xlu0 %6531  ;;  %v6659_v54 = vsel %vm6658_vm14, %v6657_v42, %v6652_v19 }
 0x72c   : > { %v6558_v27 = vadd.f32 %v11312_v7, %v6532_v59  ;;  %v6664_v38 = vrot.slane %v6557_v63, %v6663_v53 }
 0x72d   : > { %v6537_v37 = vpop.xlane.xlu1 %6536 }
 0x72e   : > { %v6671_v36 = vrot.slane %v6558_v27, %v6670_v34  ;;  %v6559_v30 = vadd.f32 %v11312_v7, %v6537_v37  ;;  %v6666_v61 = vsel %vm6665_vm15, %v6664_v38, %v6659_v54 }
 0x730   : > { %v6678_v23 = vrot.slane %v6559_v30, %v6677_v12  ;;  %v6673_v8 = vsel %vm6672_vm0, %v6671_v36, %v6666_v61 }
 0x731   : > { %v6542_v28 = vpop.xlane.xlu0 %6541 }
 0x732   : > { %v6560_v1 = vadd.f32 %v11312_v7, %v6542_v28  ;;  %v6680_v16 = vsel %vm6679_vm1, %v6678_v23, %v6673_v8 }
 0x734   : > { %v6685_v41 = vrot.slane %v6560_v1, %v6684_v33 }
 0x736   : > { %v6687_v52 = vsel %vm6686_vm2, %v6685_v41, %v6680_v16 }
 0x737   : > { %6689 = vst [vmem:[%s381_s8] sm:$0x1] %v6687_v52 }
 0x738   : > { %8002 = shalt.err (!%p7999_p9)
}
 0x739   : > { %s8003_s15 = scalar_lea.hbm %s11364_s24, 16  ;;  %s8007_s26 = scalar_lea.hbm %s11417_s9, 32 }
 0x73a   : > { %p8004_p2 = scmp.ne.s32.totalorder %s11364_s24, %s8003_s15  ;;  %p8008_p11 = scmp.lt.u32.totalorder %s11364_s24, %s11417_s9 }
 0x73b   : > { %p8009_p1 = scmp.lt.u32.totalorder %s8007_s26, %s8003_s15  ;;  %p8011_p6 = scmp.lt.u32.totalorder %s8003_s15, %s11364_s24 }
 0x73c   : > { %p8005_p0 = pnand %p8004_p2, %p8213_p12 }
 0x73d   : > { %p8010_p4 = por %p8009_p1, %p8008_p11 }
 0x73e   : > { %p8006_p5 = pneg %p8005_p0 }
 0x73f   : > { %p8012_p8 = por %p8011_p6, %p8010_p4 }
 0x741   : > { %p8013_p10 = pnand %p8012_p8, %p8006_p5 }
 0x743   : > { %8016 = shalt.err (!%p8013_p10)
}
 0x744   : > { %7320 = dma.vmem_to_hbm [thread:$0]  (%p8213_p12), %s11366_s20, 16, %s11364_s24, %s6691_s30  }
 0x745 PF: > { %s6715_s16 = sand.u32 1, %s8047_s11   ;;  %p11722_p13 = scmp.ne.s32.totalorder %s11472_s17, 0 }
 0x746   : > { %p11723_p3 = scmp.ge.s32.totalorder %s8059_s14, 2  ;;  %s6716_s23 = scalar_lea.sflag [#allocation5], %s6715_s16 }
 0x748   : > { %p7331_p7 = pnand %p11723_p3, %p11722_p13 }
 0x74a   : > { %8042 = dma.done.wait (!%p7331_p7), %s6716_s23, 16  }
 0x74b   : > { %8044 = vsyncadd (!%p7331_p7), %s6716_s23, 4294967280  ;;  %s11724_s14 = sld [smem:[#allocation12_spill]]  ;;  %s11725_s11 = smov %s8051_s12 }
 0x74c   : > { %s11726_s12 = smov %s8055_s13  ;;  %s11727_s13 = smov %s8209_s28 }
 0x751   : > { %p24_p9 = scmp.ge.s32.totalorder %s11724_s14, 4  }
 0x753   :  { %26 = sbr.rel (!%p24_p9) target bundleno = 8 (0x8), region = 108 }
 0x75a   :  { %6720 = vsyncpa [#allocation4], 1 }
 0x75b   :  { %6722 = vsyncpa [#allocation4 + $0x1], 1 }
 0x75c   :  { %6723 = vsyncpa [#allocation7], 1 }
 0x75d   :  { %6724 = vsyncpa [#allocation5], 1 }
 0x75e   :  { %6726 = vsyncpa [#allocation5 + $0x1], 1 }

</bundles_post_ra>
